<compile_context>
chip_gen: v6e
topology: v6e:2x2x1
jax: 0.10.0
libtpu: 0.0.40
codegen_flags: <defaults>
</compile_context>

<pallas_src>
import math

import numpy as np
import jax
import jax.numpy as jnp
from jax.experimental import pallas as pl
from jax.experimental.pallas import tpu as pltpu


# -----------------------------------------------------------------------------
# Fused per-view kernel: fcn_1 (synthetic 1x1-conv stem) + ReLU
#                        + GroupSchema score (OneConvFc + sigmoid(log(abs)))
#                        + fcn_2 (6x6 avg-pool as matmul + 1x1 conv 192->1536 + ReLU)
#                        + the 5x5 window sum that the final AvgPool2d(5,5) needs.
# Grid = (N*V,), one view per step; every big intermediate stays in VMEM.
# -----------------------------------------------------------------------------
def _gvcnn_view_kernel(bias_ref, w1_ref, b1_ref, wc_ref, wf_ref, pool_ref,
                       w2_ref, b2_ref, x_ref, score_ref, wsum_ref, y_scr):
    # ---- fcn_1: [HW, 3] @ [3, C1] + bias, ReLU fused, kept in VMEM scratch ----
    x = x_ref[0]                                                      # [HW, 3]
    y_scr[...] = jnp.maximum(
        jnp.dot(x, w1_ref[...], preferred_element_type=jnp.float32) + b1_ref[...],
        0.0)                                                          # [HW, C1]

    # ---- GroupSchema / OneConvFc score ----
    # raw = (wf^T @ y) @ wc + (bc * sum(wf) + bf); contracting over HW first
    # keeps the MXU output lane-dense ([1, C1]) instead of a [HW, 1] column.
    t = jnp.dot(wf_ref[...], y_scr[...], preferred_element_type=jnp.float32)  # [1, C1]
    raw = jnp.sum(t * wc_ref[...]) + bias_ref[0, 0]
    score_ref[...] = jnp.reshape(jax.nn.sigmoid(jnp.log(jnp.abs(raw))), (1, 1, 1))

    # ---- fcn_2 (synthetic): 6x6/stride-6 avg-pool expressed as a pooling
    # matmul restricted to the 25 spatial positions the final AvgPool2d(5,5)
    # actually reads, then 1x1 conv C1->C2 + ReLU, then the window sum. ----
    ds = jnp.dot(pool_ref[...], y_scr[...], preferred_element_type=jnp.float32)   # [25, C1]
    fv = jnp.dot(ds, w2_ref[...], preferred_element_type=jnp.float32) + b2_ref[...]
    fv = jnp.maximum(fv, 0.0)                                          # [25, C2]
    wsum_ref[...] = jnp.sum(fv, axis=0, keepdims=True)[None]           # [1, 1, C2]


def pallas_gvcnn_views(x_cl, W1, b1, wc, wf, bias_total, pool_mat, W2, b2):
    """x_cl: [NV, HW, 3] channel-last views -> (scores [NV], window_sums [NV, C2])."""
    NV, HW, C_in = x_cl.shape
    C1 = W1.shape[1]
    C2 = W2.shape[1]
    KW = pool_mat.shape[0]        # 25 pooled positions inside the 5x5 window

    scores, wsum = pl.pallas_call(
        _gvcnn_view_kernel,
        out_shape=(
            jax.ShapeDtypeStruct((NV, 1, 1), jnp.float32),
            jax.ShapeDtypeStruct((NV, 1, C2), jnp.float32),
        ),
        grid_spec=pltpu.PrefetchScalarGridSpec(
            num_scalar_prefetch=0,
            grid=(NV,),
            in_specs=[
                pl.BlockSpec(memory_space=pltpu.MemorySpace.SMEM),     # bias_total (1,1)
                pl.BlockSpec((C_in, C1), lambda i: (0, 0)),            # W1
                pl.BlockSpec((1, C1), lambda i: (0, 0)),               # b1
                pl.BlockSpec((1, C1), lambda i: (0, 0)),               # wc (row)
                pl.BlockSpec((1, HW), lambda i: (0, 0)),               # wf (row, lane-dense)
                pl.BlockSpec((KW, HW), lambda i: (0, 0)),              # pooling matrix
                pl.BlockSpec((C1, C2), lambda i: (0, 0)),              # W2
                pl.BlockSpec((1, C2), lambda i: (0, 0)),               # b2
                pl.BlockSpec((1, HW, C_in), lambda i: (i, 0, 0)),      # x (per view)
            ],
            out_specs=[
                pl.BlockSpec((1, 1, 1), lambda i: (i, 0, 0)),          # score
                pl.BlockSpec((1, 1, C2), lambda i: (i, 0, 0)),         # window sum
            ],
            scratch_shapes=[pltpu.VMEM((HW, C1), jnp.float32)],        # per-view y tile
        ),
        compiler_params=pltpu.CompilerParams(
            dimension_semantics=("parallel",),
            vmem_limit_bytes=32 * 1024 * 1024,
        ),
    )(
        bias_total.astype(jnp.float32),
        W1.astype(jnp.float32),
        b1.reshape(1, C1).astype(jnp.float32),
        wc.reshape(1, C1).astype(jnp.float32),
        wf.reshape(1, HW).astype(jnp.float32),
        pool_mat.astype(jnp.float32),
        W2.astype(jnp.float32),
        b2.reshape(1, C2).astype(jnp.float32),
        x_cl.astype(jnp.float32),
    )
    return scores.reshape(NV), wsum.reshape(NV, C2)


# -----------------------------------------------------------------------------
# view_pool / group_pool score arithmetic (tiny [N, V] work -> plain JAX glue).
# Returns per-view weights a_v / (Z * 25) so that
#   avgpool5x5(group_pool(fv, scores)) == sum_v weight_v * window_sum(fv_v).
# -----------------------------------------------------------------------------
def group_weights(view_scores, num_grps=7):
    interval = 1.0 / (num_grps + 1)
    g = jnp.clip(jnp.floor(view_scores / interval).astype(jnp.int32), 0, num_grps - 1)
    onehot = (g[..., None] == jnp.arange(num_grps)[None, None, :]).astype(jnp.float32)
    count = onehot.sum(axis=1)                              # [N, G]
    safe_count = jnp.maximum(count, 1.0)
    ceil_term = jnp.ceil(view_scores[..., None] * count[:, None, :])
    score_g = jnp.sum(onehot * ceil_term, axis=1) / safe_count
    score_g = jnp.where(count > 0, score_g, 0.0)            # [N, G]
    z_norm = jnp.maximum(jnp.sum(score_g, axis=1), 1e-6)    # [N] (guarded)
    per_view = jnp.sum(onehot * (score_g / safe_count)[:, None, :], axis=-1)
    return per_view / (z_norm[:, None] * 25.0)              # [N, V]


def build_pool_matrix(h=52, w=52, win=5, k=6):
    """[win*win, h*w] matrix: 6x6/stride-6 average over the top-left 48x48,
    restricted to the 5x5 downsampled positions used by AvgPool2d(5, 5)."""
    m = np.zeros((win * win, h * w), np.float32)
    inv = 1.0 / (k * k)
    for p in range(win):
        for q in range(win):
            r = p * win + q
            for di in range(k):
                for dj in range(k):
                    m[r, (p * k + di) * w + (q * k + dj)] = inv
    return jnp.asarray(m)


# -----------------------------------------------------------------------------
# GVCNN forward (E).
# -----------------------------------------------------------------------------
def gvcnn_forward(p, x):
    """x: [N, V, 3, H, W] -> shape descriptor [N, 1536]."""
    # TODO(synk): Icpv4.inceptionv4() features[0:5] / features[5:] are external
    # dependencies; they are replaced by deterministic synthetic 1x1-conv stems
    # (3->192 and, after a 6x6 avg-pool downsample, 192->1536) with the same
    # tensor shapes as the original GVCNN pipeline.
    Nall, V, C_in, H, W = x.shape
    NV = Nall * V
    HW = H * W
    x_cl = x.reshape(NV, C_in, HW).transpose(0, 2, 1)          # [NV, HW, 3]

    bias_total = (p["bc"] * jnp.sum(p["wf"]) + p["bf"]).reshape(1, 1)
    raw_scores, wsum = pallas_gvcnn_views(
        x_cl, p["W1"], p["b1"], p["wc"], p["wf"], bias_total,
        p["Ppool"], p["W2"], p["b2"])

    view_scores = jax.nn.softmax(raw_scores.reshape(Nall, V), axis=1)   # [N, V]
    w = group_weights(view_scores)                                      # [N, V]
    C2 = p["W2"].shape[1]
    # group_pool + AvgPool2d(5,5): weighted sum of per-view window sums (tiny).
    z = jnp.einsum("nv,nvc->nc", w, wsum.reshape(Nall, V, C2))          # [N, 1536]
    return z


# -----------------------------------------------------------------------------
# MVTER forward.
# -----------------------------------------------------------------------------
def mvter_forward(p, im1, im2):
    nb = im1.shape[0]
    # Batch the two GVCNN passes into one pallas grid (fewer launches, more
    # parallel grid extent for megacore sharding).
    ims = jnp.concatenate([im1, im2], axis=0)                  # [2N, V, 3, H, W]
    feats = gvcnn_forward(p, ims)                              # [2N, 1536]
    f1, f2 = feats[:nb], feats[nb:]
    f = jnp.concatenate([f1, f2], axis=1)                      # [N, 3072]
    # Tiny heads: plain XLA matmuls (pallas_call fixed cost would dominate).
    t_out = f1 @ p["WT"] + p["bT"]                             # T(f1): [N, 33]
    d_out = f @ p["WD"] + p["bD"]                              # D(f):  [N, 3]
    return t_out, d_out


def init_params(key):
    ks = jax.random.split(key, 6)
    hw = 52 * 52
    p = {
        # synthetic fcn_1 stem: 1x1 conv 3 -> 192
        "W1": jax.random.normal(ks[0], (3, 192), jnp.float32) / math.sqrt(3.0),
        "b1": jnp.zeros((192,), jnp.float32),
        # synthetic fcn_2 tail: 1x1 conv 192 -> 1536
        "W2": jax.random.normal(ks[1], (192, 1536), jnp.float32) / math.sqrt(192.0),
        "b2": jnp.zeros((1536,), jnp.float32),
        # OneConvFc: Conv2d(192, 1, 1) + Linear(52*52, 1)   (zero biases per init_weights)
        "wc": jax.random.normal(ks[2], (192, 1), jnp.float32) / math.sqrt(192.0),
        "bc": jnp.zeros((), jnp.float32),
        "wf": jax.random.normal(ks[3], (hw, 1), jnp.float32) / math.sqrt(float(hw)),
        "bf": jnp.zeros((), jnp.float32),
        # T: Linear(1536, 33), D: Linear(3072, 3)
        "WT": jax.random.normal(ks[4], (1536, 33), jnp.float32) / math.sqrt(1536.0),
        "bT": jnp.zeros((33,), jnp.float32),
        "WD": jax.random.normal(ks[5], (3072, 3), jnp.float32) / math.sqrt(3072.0),
        "bD": jnp.zeros((3,), jnp.float32),
        # constant pooling matrix (6x6 avg-pool restricted to the 5x5 window)
        "Ppool": build_pool_matrix(52, 52, 5, 6),
    }
    return p


if __name__ == "__main__":
    root = jax.random.PRNGKey(0)
    kp, ki1, ki2 = jax.random.split(root, 3)
    params = init_params(kp)

    N, V, H, W = 2, 12, 52, 52   # num_views=12 and 52x52/192-ch schema are fixed by the module
    im1 = jax.random.normal(ki1, (N, V, 3, H, W), jnp.float32)
    im2 = jax.random.normal(ki2, (N, V, 3, H, W), jnp.float32)

    fwd = jax.jit(mvter_forward)
    t_out, d_out = fwd(params, im1, im2)
    jax.block_until_ready((t_out, d_out))

    assert t_out.shape == (N, 33), t_out.shape
    assert d_out.shape == (N, 3), d_out.shape
    assert bool(jnp.all(jnp.isfinite(t_out))) and bool(jnp.all(jnp.isfinite(d_out)))
    print("KERNEL_OK")
</pallas_src>

<mosaic_0001>
module attributes {stable_mosaic.version = 11 : i64} {
  func.func @_gvcnn_view_kernel(%arg0: i32, %arg1: memref<1x1xf32, #tpu.memory_space<smem>>, %arg2: memref<3x192xf32, #tpu.memory_space<vmem>>, %arg3: memref<1x192xf32, #tpu.memory_space<vmem>>, %arg4: memref<1x192xf32, #tpu.memory_space<vmem>>, %arg5: memref<1x2704xf32, #tpu.memory_space<vmem>>, %arg6: memref<25x2704xf32, #tpu.memory_space<vmem>>, %arg7: memref<192x1536xf32, #tpu.memory_space<vmem>>, %arg8: memref<1x1536xf32, #tpu.memory_space<vmem>>, %arg9: memref<1x2704x3xf32, #tpu.memory_space<vmem>>, %arg10: memref<1x1x1xf32, #tpu.memory_space<vmem>>, %arg11: memref<1x1x1536xf32, #tpu.memory_space<vmem>>, %arg12: memref<2704x192xf32, #tpu.memory_space<vmem>>) attributes {dimension_semantics = [#tpu.dimension_semantics<parallel>], iteration_bounds = array<i64: 48>, scalar_prefetch = 0 : i64, scratch_operands = 1 : i64, tpu.core_type = #tpu.core_type<tc>, window_params = [{transform_indices = @transform_0, window_bounds = array<i64: 1, 1>}, {pipeline_mode = #tpu.pipeline_mode<synchronous>, transform_indices = @transform_1, window_bounds = array<i64: 3, 192>}, {pipeline_mode = #tpu.pipeline_mode<synchronous>, transform_indices = @transform_2, window_bounds = array<i64: 1, 192>}, {pipeline_mode = #tpu.pipeline_mode<synchronous>, transform_indices = @transform_3, window_bounds = array<i64: 1, 192>}, {pipeline_mode = #tpu.pipeline_mode<synchronous>, transform_indices = @transform_4, window_bounds = array<i64: 1, 2704>}, {pipeline_mode = #tpu.pipeline_mode<synchronous>, transform_indices = @transform_5, window_bounds = array<i64: 25, 2704>}, {pipeline_mode = #tpu.pipeline_mode<synchronous>, transform_indices = @transform_6, window_bounds = array<i64: 192, 1536>}, {pipeline_mode = #tpu.pipeline_mode<synchronous>, transform_indices = @transform_7, window_bounds = array<i64: 1, 1536>}, {transform_indices = @transform_8, window_bounds = array<i64: 1, 2704, 3>}, {transform_indices = @transform_9, window_bounds = array<i64: 1, 1, 1>}, {transform_indices = @transform_10, window_bounds = array<i64: 1, 1, 1536>}]} {
    %c0 = arith.constant 0 : index
    %c0_0 = arith.constant 0 : index
    %c0_1 = arith.constant 0 : index
    %0 = vector.load %arg9[%c0, %c0_0, %c0_1] : memref<1x2704x3xf32, #tpu.memory_space<vmem>>, vector<1x2704x3xf32>
    %1 = vector.shape_cast %0 : vector<1x2704x3xf32> to vector<2704x3xf32>
    %c0_2 = arith.constant 0 : index
    %c0_3 = arith.constant 0 : index
    %2 = vector.load %arg2[%c0_2, %c0_3] : memref<3x192xf32, #tpu.memory_space<vmem>>, vector<3x192xf32>
    %cst = arith.constant dense<0.000000e+00> : vector<2704x192xf32>
    %3 = tpu.matmul %1, %2, %cst {dimension_numbers = #tpu.dot_dimension_numbers<[1], [0], [0], [1], [0, 0, 1, 1], [], []>} : vector<2704x3xf32>, vector<3x192xf32>, vector<2704x192xf32> -> vector<2704x192xf32>
    %c0_4 = arith.constant 0 : index
    %c0_5 = arith.constant 0 : index
    %4 = vector.load %arg3[%c0_4, %c0_5] : memref<1x192xf32, #tpu.memory_space<vmem>>, vector<1x192xf32>
    %5 = vector.broadcast %4 : vector<1x192xf32> to vector<2704x192xf32>
    %6 = arith.addf %3, %5 : vector<2704x192xf32>
    %cst_6 = arith.constant 0.000000e+00 : f32
    %7 = vector.broadcast %cst_6 : f32 to vector<2704x192xf32>
    %8 = arith.maximumf %6, %7 : vector<2704x192xf32>
    %c0_7 = arith.constant 0 : index
    %c0_8 = arith.constant 0 : index
    %9 = vector.load %arg12[%c0_7, %c0_8] : memref<2704x192xf32, #tpu.memory_space<vmem>>, vector<2704x192xf32>
    tpu.vector_store %arg12[%c0_7, %c0_8], %8 {strides = array<i32>} : memref<2704x192xf32, #tpu.memory_space<vmem>>, vector<2704x192xf32>,
    %c0_9 = arith.constant 0 : index
    %c0_10 = arith.constant 0 : index
    %10 = vector.load %arg5[%c0_9, %c0_10] : memref<1x2704xf32, #tpu.memory_space<vmem>>, vector<1x2704xf32>
    %c0_11 = arith.constant 0 : index
    %c0_12 = arith.constant 0 : index
    %11 = vector.load %arg12[%c0_11, %c0_12] : memref<2704x192xf32, #tpu.memory_space<vmem>>, vector<2704x192xf32>
    %cst_13 = arith.constant dense<0.000000e+00> : vector<1x192xf32>
    %12 = tpu.matmul %10, %11, %cst_13 {dimension_numbers = #tpu.dot_dimension_numbers<[1], [0], [0], [1], [0, 0, 1, 1], [], []>} : vector<1x2704xf32>, vector<2704x192xf32>, vector<1x192xf32> -> vector<1x192xf32>
    %c0_14 = arith.constant 0 : index
    %c0_15 = arith.constant 0 : index
    %13 = vector.load %arg4[%c0_14, %c0_15] : memref<1x192xf32, #tpu.memory_space<vmem>>, vector<1x192xf32>
    %14 = arith.mulf %12, %13 : vector<1x192xf32>
    %15 = vector.shape_cast %14 : vector<1x192xf32> to vector<1x1x192xf32>
    %cst_16 = arith.constant dense<0.000000e+00> : vector<1xf32>
    %16 = vector.multi_reduction <add>, %15, %cst_16 [1, 2] : vector<1x1x192xf32> to vector<1xf32>
    %17 = vector.shape_cast %16 : vector<1xf32> to vector<1x1x1xf32>
    %18 = vector.extract %17[0, 0, 0] : f32 from vector<1x1x1xf32>
    %c0_17 = arith.constant 0 : index
    %c0_18 = arith.constant 0 : index
    %19 = memref.load %arg1[%c0_17, %c0_18] : memref<1x1xf32, #tpu.memory_space<smem>>
    %20 = arith.addf %18, %19 : f32
    %21 = math.absf %20 : f32
    %22 = math.log %21 : f32
    %23 = arith.negf %22 : f32
    %24 = math.exp %23 : f32
    %cst_19 = arith.constant 1.000000e+00 : f32
    %25 = arith.addf %cst_19, %24 : f32
    %26 = arith.divf %cst_19, %25 : f32
    %27 = vector.broadcast %26 : f32 to vector<1x1x1xf32>
    %c0_20 = arith.constant 0 : index
    %c0_21 = arith.constant 0 : index
    %c0_22 = arith.constant 0 : index
    %28 = vector.load %arg10[%c0_20, %c0_21, %c0_22] : memref<1x1x1xf32, #tpu.memory_space<vmem>>, vector<1x1x1xf32>
    tpu.vector_store %arg10[%c0_20, %c0_21, %c0_22], %27 {strides = array<i32>} : memref<1x1x1xf32, #tpu.memory_space<vmem>>, vector<1x1x1xf32>,
    %c0_23 = arith.constant 0 : index
    %c0_24 = arith.constant 0 : index
    %29 = vector.load %arg6[%c0_23, %c0_24] : memref<25x2704xf32, #tpu.memory_space<vmem>>, vector<25x2704xf32>
    %c0_25 = arith.constant 0 : index
    %c0_26 = arith.constant 0 : index
    %30 = vector.load %arg12[%c0_25, %c0_26] : memref<2704x192xf32, #tpu.memory_space<vmem>>, vector<2704x192xf32>
    %cst_27 = arith.constant dense<0.000000e+00> : vector<25x192xf32>
    %31 = tpu.matmul %29, %30, %cst_27 {dimension_numbers = #tpu.dot_dimension_numbers<[1], [0], [0], [1], [0, 0, 1, 1], [], []>} : vector<25x2704xf32>, vector<2704x192xf32>, vector<25x192xf32> -> vector<25x192xf32>
    %c0_28 = arith.constant 0 : index
    %c0_29 = arith.constant 0 : index
    %32 = vector.load %arg7[%c0_28, %c0_29] : memref<192x1536xf32, #tpu.memory_space<vmem>>, vector<192x1536xf32>
    %cst_30 = arith.constant dense<0.000000e+00> : vector<25x1536xf32>
    %33 = tpu.matmul %31, %32, %cst_30 {dimension_numbers = #tpu.dot_dimension_numbers<[1], [0], [0], [1], [0, 0, 1, 1], [], []>} : vector<25x192xf32>, vector<192x1536xf32>, vector<25x1536xf32> -> vector<25x1536xf32>
    %c0_31 = arith.constant 0 : index
    %c0_32 = arith.constant 0 : index
    %34 = vector.load %arg8[%c0_31, %c0_32] : memref<1x1536xf32, #tpu.memory_space<vmem>>, vector<1x1536xf32>
    %35 = vector.broadcast %34 : vector<1x1536xf32> to vector<25x1536xf32>
    %36 = arith.addf %33, %35 : vector<25x1536xf32>
    %cst_33 = arith.constant 0.000000e+00 : f32
    %37 = vector.broadcast %cst_33 : f32 to vector<25x1536xf32>
    %38 = arith.maximumf %36, %37 : vector<25x1536xf32>
    %cst_34 = arith.constant dense<0.000000e+00> : vector<1536xf32>
    %39 = vector.multi_reduction <add>, %38, %cst_34 [0] : vector<25x1536xf32> to vector<1536xf32>
    %40 = vector.shape_cast %39 : vector<1536xf32> to vector<1x1536xf32>
    %41 = vector.shape_cast %40 : vector<1x1536xf32> to vector<1x1x1536xf32>
    %c0_35 = arith.constant 0 : index
    %c0_36 = arith.constant 0 : index
    %c0_37 = arith.constant 0 : index
    %42 = vector.load %arg11[%c0_35, %c0_36, %c0_37] : memref<1x1x1536xf32, #tpu.memory_space<vmem>>, vector<1x1x1536xf32>
    tpu.vector_store %arg11[%c0_35, %c0_36, %c0_37], %41 {strides = array<i32>} : memref<1x1x1536xf32, #tpu.memory_space<vmem>>, vector<1x1x1536xf32>,
    return
  }
  func.func @transform_0(%arg0: i32) -> (i32, i32) {
    %c0_i32 = arith.constant 0 : i32
    %c0_i32_0 = arith.constant 0 : i32
    %c0_i32_1 = arith.constant 0 : i32
    return %c0_i32, %c0_i32_0 : i32, i32
  }
  func.func @transform_1(%arg0: i32) -> (i32, i32) {
    %c0_i32 = arith.constant 0 : i32
    %c0_i32_0 = arith.constant 0 : i32
    %c0_i32_1 = arith.constant 0 : i32
    return %c0_i32, %c0_i32_0 : i32, i32
  }
  func.func @transform_2(%arg0: i32) -> (i32, i32) {
    %c0_i32 = arith.constant 0 : i32
    %c0_i32_0 = arith.constant 0 : i32
    %c0_i32_1 = arith.constant 0 : i32
    return %c0_i32, %c0_i32_0 : i32, i32
  }
  func.func @transform_3(%arg0: i32) -> (i32, i32) {
    %c0_i32 = arith.constant 0 : i32
    %c0_i32_0 = arith.constant 0 : i32
    %c0_i32_1 = arith.constant 0 : i32
    return %c0_i32, %c0_i32_0 : i32, i32
  }
  func.func @transform_4(%arg0: i32) -> (i32, i32) {
    %c0_i32 = arith.constant 0 : i32
    %c0_i32_0 = arith.constant 0 : i32
    %c0_i32_1 = arith.constant 0 : i32
    return %c0_i32, %c0_i32_0 : i32, i32
  }
  func.func @transform_5(%arg0: i32) -> (i32, i32) {
    %c0_i32 = arith.constant 0 : i32
    %c0_i32_0 = arith.constant 0 : i32
    %c0_i32_1 = arith.constant 0 : i32
    return %c0_i32, %c0_i32_0 : i32, i32
  }
  func.func @transform_6(%arg0: i32) -> (i32, i32) {
    %c0_i32 = arith.constant 0 : i32
    %c0_i32_0 = arith.constant 0 : i32
    %c0_i32_1 = arith.constant 0 : i32
    return %c0_i32, %c0_i32_0 : i32, i32
  }
  func.func @transform_7(%arg0: i32) -> (i32, i32) {
    %c0_i32 = arith.constant 0 : i32
    %c0_i32_0 = arith.constant 0 : i32
    %c0_i32_1 = arith.constant 0 : i32
    return %c0_i32, %c0_i32_0 : i32, i32
  }
  func.func @transform_8(%arg0: i32) -> (i32, i32, i32) {
    %c0_i32 = arith.constant 0 : i32
    %c0_i32_0 = arith.constant 0 : i32
    %c0_i32_1 = arith.constant 0 : i32
    return %arg0, %c0_i32, %c0_i32_0 : i32, i32, i32
  }
  func.func @transform_9(%arg0: i32) -> (i32, i32, i32) {
    %c0_i32 = arith.constant 0 : i32
    %c0_i32_0 = arith.constant 0 : i32
    %c0_i32_1 = arith.constant 0 : i32
    return %arg0, %c0_i32, %c0_i32_0 : i32, i32, i32
  }
  func.func @transform_10(%arg0: i32) -> (i32, i32, i32) {
    %c0_i32 = arith.constant 0 : i32
    %c0_i32_0 = arith.constant 0 : i32
    %c0_i32_1 = arith.constant 0 : i32
    return %arg0, %c0_i32, %c0_i32_0 : i32, i32, i32
  }
}

</mosaic_0001>

<bundles_post_ra>
// kernel: mvter_forward.1
= control target key start
LH: loop header
LB: loop body
LE: loop exit
PB: predicated region body
PF: predicated region fallthrough
CT: control target
= control target key end

     0   :  { %s10326_s15 = smov 0   ;;  %s16307_s0 = inlined_call_operand.<no memory space> [shape: f32[1,1], index: 0, kind: input, shape index: {}]   ;;  %s16308_s1 = inlined_call_operand.vmem [shape: f32[3,192], index: 1, kind: input, shape index: {}]   ;;  %s16309_s2 = inlined_call_operand.vmem [shape: f32[1,192], index: 2, kind: input, shape index: {}]   ;;  %s16310_s3 = inlined_call_operand.vmem [shape: f32[1,192], index: 3, kind: input, shape index: {}]   ;;  %s16311_s4 = inlined_call_operand.vmem [shape: f32[1,2704], index: 4, kind: input, shape index: {}]   ;;  %s16312_s5 = inlined_call_operand.vmem [shape: f32[25,2704], index: 5, kind: input, shape index: {}]   ;;  %s16313_s6 = inlined_call_operand.vmem [shape: f32[192,1536], index: 6, kind: input, shape index: {}]   ;;  %s16314_s7 = inlined_call_operand.vmem [shape: f32[1,1536], index: 7, kind: input, shape index: {}]   ;;  %s16315_s8 = inlined_call_operand.vmem [shape: f32[48,2704,3], index: 8, kind: input, shape index: {}]   ;;  %s16316_s9 = inlined_call_operand.vmem [shape: f32[48,1,1], index: 9, kind: output, shape index: {0}]   ;;  %s16317_s10 = inlined_call_operand.vmem [shape: f32[48,1,1536], index: 10, kind: output, shape index: {1}]  }
   0x1   :  { %16 = sst [smem:[#allocation3]] %s16307_s0 }
   0x2 LB: > { %s9801_s16 = sadd.s32 4294967295, %s10264_s15   ;;  %p9805_p0 = scmp.ge.s32.totalorder %s10264_s15, 1  ;;  %s10264_s15 = sphi %s10326_s15, %s22_s15  }
   0x3   : > { %p316_p1 = scmp.lt.s32.totalorder %s10264_s15, 49 }
   0x5   : > { %p317_p2 = pnand %p9805_p0, %p316_p1 }
   0x7   : > { %320 = sbr.rel (%p317_p2) target bundleno = 2864 (0xb30), region = 56 }
   0xc   : > { %v706_v0 = vld [vmem:[%s16308_s1] sm:$0x77]  ;;  %vm1736_vm0 = vcmask 1042432   ;;  %p356_p3 = scmp.lt.s32.totalorder %s9801_s16, 47  ;;  %v10266_v2 = vmov 0.0   ;;  %vm721_vm1 = vcmask 23552   ;;  %v16318_v49 = vlaneseq }
   0xd   : > { %v720_v1 = vcombine.high %v706_v0, %v706_v0  ;;  %1805 = vmatprep.mubr.f32.mxu0 %v10266_v2  ;;  %v707_v54 = vld [vmem:[%s16309_s2] sm:$0x3]  ;;  %vm4511_vm2 = vcmask 523264   ;;  %vm5978_vm3 = vcmask 130048   ;;  %vm6776_vm4 = vcmask 1040384   ;;  %s14925_s22 = sld [smem:[#allocation3]] }
   0xe   : > { %s16336_s16 = smov (!%p356_p3, %s9801_s16), 47  ;;  %v10486_v51 = vshrl.u32 %v16318_v49, 7  ;;  %vm6778_vm5 = vcmask 516096   ;;  %vm6807_vm6 = vcmask 0   ;;  %v8789_v49 = vld [vmem:[%s16313_s6 + $0x708] sm:$0xff] }
   0xf   : > { %9807 = vmatprep.subr.msk.mxu0 %vm1736_vm0, %v720_v1  ;;  %s10226_s0 = smul.u32 2704, %s16336_s16 }
  0x10   : > { %9808 = vmatpush1.msk.msra.mxu0 %vm1736_vm0, %v706_v0  ;;  %16324 = vst [vmem:[#allocation4_spill] sm:$0xff] %v10486_v51  ;;  %v10492_v53 = vsub.s32 0, %v10486_v51  ;;  %v10498_v55 = vsub.s32 1, %v10486_v51  ;;  %s10227_s30 = smul.u32 12, %s16336_s16 }
  0x11   : > { %s10344_s21 = scalar_lea.vmem %s16315_s8, %s10226_s0 }
  0x12   : > { %v368_v3 = vld [vmem:[%s10344_s21] sm:$0xff]  ;;  %v369_v4 = vld [vmem:[%s10344_s21 + $0x8] sm:$0xff]  ;;  %v370_v5 = vld [vmem:[%s10344_s21 + $0x10] sm:$0xff]  ;;  %v10503_v56 = vrot.slane %v707_v54, %v10492_v53  ;;  %v10507_v58 = vrot.slane %v707_v54, %v10498_v55 }
  0x13   : > { %9809 = vmatmul.mubr.msk.f32.vlgmr.msra.gmra.mxu0 %vm721_vm1, %v368_v3  ;;  %v371_v6 = vld [vmem:[%s10344_s21 + $0x18] sm:$0xff]  ;;  %v372_v7 = vld [vmem:[%s10344_s21 + $0x20] sm:$0xff]  ;;  %v373_v8 = vld [vmem:[%s10344_s21 + $0x28] sm:$0xff] }
  0x14   : > { %1811 = vmatprep.mubr.f32.mxu0 %v10266_v2  ;;  %v374_v9 = vld [vmem:[%s10344_s21 + $0x30] sm:$0xff]  ;;  %v375_v10 = vld [vmem:[%s10344_s21 + $0x38] sm:$0xff]  ;;  %v376_v11 = vld [vmem:[%s10344_s21 + $0x40] sm:$0xff] }
  0x15   : > { %v377_v12 = vld [vmem:[%s10344_s21 + $0x48] sm:$0xff]  ;;  %v378_v13 = vld [vmem:[%s10344_s21 + $0x50] sm:$0xff]  ;;  %v379_v14 = vld [vmem:[%s10344_s21 + $0x58] sm:$0xff] }
  0x16   : > { %v380_v15 = vld [vmem:[%s10344_s21 + $0x60] sm:$0xff]  ;;  %v381_v16 = vld [vmem:[%s10344_s21 + $0x68] sm:$0xff]  ;;  %v382_v17 = vld [vmem:[%s10344_s21 + $0x70] sm:$0xff] }
  0x17   : > { %9810 = vmatmul.mubr.msk.f32.gmra.mxu0 %vm721_vm1, %v369_v4  ;;  %v383_v18 = vld [vmem:[%s10344_s21 + $0x78] sm:$0xff]  ;;  %v384_v19 = vld [vmem:[%s10344_s21 + $0x80] sm:$0xff]  ;;  %v385_v20 = vld [vmem:[%s10344_s21 + $0x88] sm:$0xff] }
  0x18   : > { %1817 = vmatprep.mubr.f32.mxu0 %v10266_v2  ;;  %v386_v21 = vld [vmem:[%s10344_s21 + $0x90] sm:$0xff]  ;;  %v387_v22 = vld [vmem:[%s10344_s21 + $0x98] sm:$0xff]  ;;  %v388_v23 = vld [vmem:[%s10344_s21 + $0xa0] sm:$0xff] }
  0x19   : > { %v389_v24 = vld [vmem:[%s10344_s21 + $0xa8] sm:$0xff]  ;;  %v390_v25 = vld [vmem:[%s10344_s21 + $0xb0] sm:$0xff]  ;;  %v391_v26 = vld [vmem:[%s10344_s21 + $0xb8] sm:$0xff] }
  0x1a   : > { %v392_v27 = vld [vmem:[%s10344_s21 + $0xc0] sm:$0xff]  ;;  %v393_v28 = vld [vmem:[%s10344_s21 + $0xc8] sm:$0xff]  ;;  %v394_v29 = vld [vmem:[%s10344_s21 + $0xd0] sm:$0xff] }
  0x1b   : > { %9811 = vmatmul.mubr.msk.f32.gmra.mxu0 %vm721_vm1, %v370_v5  ;;  %v395_v30 = vld [vmem:[%s10344_s21 + $0xd8] sm:$0xff]  ;;  %v396_v31 = vld [vmem:[%s10344_s21 + $0xe0] sm:$0xff]  ;;  %v397_v32 = vld [vmem:[%s10344_s21 + $0xe8] sm:$0xff] }
  0x1c   : > { %1823 = vmatprep.mubr.f32.mxu0 %v10266_v2  ;;  %v398_v33 = vld [vmem:[%s10344_s21 + $0xf0] sm:$0xff]  ;;  %v399_v34 = vld [vmem:[%s10344_s21 + $0xf8] sm:$0xff]  ;;  %v400_v35 = vld [vmem:[%s10344_s21 + $0x100] sm:$0xff] }
  0x1d   : > { %v401_v36 = vld [vmem:[%s10344_s21 + $0x108] sm:$0xff]  ;;  %v402_v37 = vld [vmem:[%s10344_s21 + $0x110] sm:$0xff]  ;;  %v403_v38 = vld [vmem:[%s10344_s21 + $0x118] sm:$0xff] }
  0x1e   : > { %v404_v39 = vld [vmem:[%s10344_s21 + $0x120] sm:$0xff]  ;;  %v405_v40 = vld [vmem:[%s10344_s21 + $0x128] sm:$0xff]  ;;  %v406_v41 = vld [vmem:[%s10344_s21 + $0x130] sm:$0xff] }
  0x1f   : > { %9812 = vmatmul.mubr.msk.f32.gmra.mxu0 %vm721_vm1, %v371_v6  ;;  %v407_v42 = vld [vmem:[%s10344_s21 + $0x138] sm:$0xff]  ;;  %v408_v43 = vld [vmem:[%s10344_s21 + $0x140] sm:$0xff]  ;;  %v409_v44 = vld [vmem:[%s10344_s21 + $0x148] sm:$0xff] }
  0x20   : > { %1829 = vmatprep.mubr.f32.mxu0 %v10266_v2  ;;  %v410_v45 = vld [vmem:[%s10344_s21 + $0x150] sm:$0xff]  ;;  %v411_v46 = vld [vmem:[%s10344_s21 + $0x158] sm:$0xff]  ;;  %v412_v47 = vld [vmem:[%s10344_s21 + $0x160] sm:$0xff] }
  0x21   : > { %v413_v48 = vld [vmem:[%s10344_s21 + $0x168] sm:$0xff]  ;;  %v414_v50 = vld [vmem:[%s10344_s21 + $0x170] sm:$0xff]  ;;  %v415_v52 = vld [vmem:[%s10344_s21 + $0x178] sm:$0xff] }
  0x22   : > { %v416_v57 = vld [vmem:[%s10344_s21 + $0x180] sm:$0xff]  ;;  %v417_v61 = vld [vmem:[%s10344_s21 + $0x188] sm:$0xff]  ;;  %v418_v5 = vld [vmem:[%s10344_s21 + $0x190] sm:$0xff] }
  0x23   : > { %9813 = vmatmul.mubr.msk.f32.gmra.mxu0 %vm721_vm1, %v372_v7 }
  0x24   : > { %1835 = vmatprep.mubr.f32.mxu0 %v10266_v2 }
  0x27   : > { %9814 = vmatmul.mubr.msk.f32.gmra.mxu0 %vm721_vm1, %v373_v8 }
  0x28   : > { %1841 = vmatprep.mubr.f32.mxu0 %v10266_v2 }
  0x2b   : > { %9815 = vmatmul.mubr.msk.f32.gmra.mxu0 %vm721_vm1, %v374_v9 }
  0x2c   : > { %1847 = vmatprep.mubr.f32.mxu0 %v10266_v2 }
  0x2f   : > { %9816 = vmatmul.mubr.msk.f32.gmra.mxu0 %vm721_vm1, %v375_v10 }
  0x30   : > { %1853 = vmatprep.mubr.f32.mxu0 %v10266_v2 }
  0x33   : > { %9817 = vmatmul.mubr.msk.f32.gmra.mxu0 %vm721_vm1, %v376_v11 }
  0x34   : > { %1859 = vmatprep.mubr.f32.mxu0 %v10266_v2 }
  0x37   : > { %9818 = vmatmul.mubr.msk.f32.gmra.mxu0 %vm721_vm1, %v377_v12  ;;  %v419_v12 = vld [vmem:[%s10344_s21 + $0x198] sm:$0xff] }
  0x38   : > { %1865 = vmatprep.mubr.f32.mxu0 %v10266_v2 }
  0x3b   : > { %9819 = vmatmul.mubr.msk.f32.gmra.mxu0 %vm721_vm1, %v378_v13 }
  0x3c   : > { %1871 = vmatprep.mubr.f32.mxu0 %v10266_v2 }
  0x3f   : > { %9820 = vmatmul.mubr.msk.f32.gmra.mxu0 %vm721_vm1, %v379_v14 }
  0x40   : > { %1877 = vmatprep.mubr.f32.mxu0 %v10266_v2 }
  0x43   : > { %9821 = vmatmul.mubr.msk.f32.gmra.mxu0 %vm721_vm1, %v380_v15 }
  0x44   : > { %1883 = vmatprep.mubr.f32.mxu0 %v10266_v2 }
  0x47   : > { %9822 = vmatmul.mubr.msk.f32.gmra.mxu0 %vm721_vm1, %v381_v16 }
  0x48   : > { %1889 = vmatprep.mubr.f32.mxu0 %v10266_v2 }
  0x4b   : > { %9823 = vmatmul.mubr.msk.f32.gmra.mxu0 %vm721_vm1, %v382_v17 }
  0x4c   : > { %1895 = vmatprep.mubr.f32.mxu0 %v10266_v2 }
  0x4f   : > { %9824 = vmatmul.mubr.msk.f32.gmra.mxu0 %vm721_vm1, %v383_v18 }
  0x50   : > { %1901 = vmatprep.mubr.f32.mxu0 %v10266_v2 }
  0x53   : > { %9825 = vmatmul.mubr.msk.f32.gmra.mxu0 %vm721_vm1, %v384_v19  ;;  %v420_v19 = vld [vmem:[%s10344_s21 + $0x1a0] sm:$0xff] }
  0x54   : > { %1907 = vmatprep.mubr.f32.mxu0 %v10266_v2 }
  0x57   : > { %9826 = vmatmul.mubr.msk.f32.gmra.mxu0 %vm721_vm1, %v385_v20 }
  0x58   : > { %1913 = vmatprep.mubr.f32.mxu0 %v10266_v2 }
  0x5b   : > { %9827 = vmatmul.mubr.msk.f32.gmra.mxu0 %vm721_vm1, %v386_v21 }
  0x5c   : > { %1919 = vmatprep.mubr.f32.mxu0 %v10266_v2 }
  0x5f   : > { %9828 = vmatmul.mubr.msk.f32.gmra.mxu0 %vm721_vm1, %v387_v22 }
  0x60   : > { %1925 = vmatprep.mubr.f32.mxu0 %v10266_v2 }
  0x63   : > { %9829 = vmatmul.mubr.msk.f32.gmra.mxu0 %vm721_vm1, %v388_v23 }
  0x64   : > { %1931 = vmatprep.mubr.f32.mxu0 %v10266_v2 }
  0x67   : > { %9830 = vmatmul.mubr.msk.f32.gmra.mxu0 %vm721_vm1, %v389_v24 }
  0x68   : > { %1937 = vmatprep.mubr.f32.mxu0 %v10266_v2 }
  0x6b   : > { %9831 = vmatmul.mubr.msk.f32.gmra.mxu0 %vm721_vm1, %v390_v25 }
  0x6c   : > { %1943 = vmatprep.mubr.f32.mxu0 %v10266_v2 }
  0x6f   : > { %9832 = vmatmul.mubr.msk.f32.gmra.mxu0 %vm721_vm1, %v391_v26  ;;  %v421_v26 = vld [vmem:[%s10344_s21 + $0x1a8] sm:$0xff] }
  0x70   : > { %1949 = vmatprep.mubr.f32.mxu0 %v10266_v2 }
  0x73   : > { %9833 = vmatmul.mubr.msk.f32.gmra.mxu0 %vm721_vm1, %v392_v27 }
  0x74   : > { %1955 = vmatprep.mubr.f32.mxu0 %v10266_v2 }
  0x77   : > { %9834 = vmatmul.mubr.msk.f32.gmra.mxu0 %vm721_vm1, %v393_v28 }
  0x78   : > { %1961 = vmatprep.mubr.f32.mxu0 %v10266_v2 }
  0x7b   : > { %9835 = vmatmul.mubr.msk.f32.gmra.mxu0 %vm721_vm1, %v394_v29 }
  0x7c   : > { %1967 = vmatprep.mubr.f32.mxu0 %v10266_v2 }
  0x7f   : > { %9836 = vmatmul.mubr.msk.f32.gmra.mxu0 %vm721_vm1, %v395_v30 }
  0x80   : > { %1973 = vmatprep.mubr.f32.mxu0 %v10266_v2 }
  0x83   : > { %9837 = vmatmul.mubr.msk.f32.gmra.mxu0 %vm721_vm1, %v396_v31 }
  0x84   : > { %1979 = vmatprep.mubr.f32.mxu0 %v10266_v2 }
  0x87   : > { %9838 = vmatmul.mubr.msk.f32.gmra.mxu0 %vm721_vm1, %v397_v32 }
  0x88   : > { %1985 = vmatprep.mubr.f32.mxu0 %v10266_v2 }
  0x8b   : > { %9839 = vmatmul.mubr.msk.f32.gmra.mxu0 %vm721_vm1, %v398_v33  ;;  %v422_v33 = vld [vmem:[%s10344_s21 + $0x1b0] sm:$0xff] }
  0x8c   : > { %1991 = vmatprep.mubr.f32.mxu0 %v10266_v2 }
  0x8f   : > { %9840 = vmatmul.mubr.msk.f32.gmra.mxu0 %vm721_vm1, %v399_v34 }
  0x90   : > { %1997 = vmatprep.mubr.f32.mxu0 %v10266_v2 }
  0x93   : > { %9841 = vmatmul.mubr.msk.f32.gmra.mxu0 %vm721_vm1, %v400_v35 }
  0x94   : > { %2003 = vmatprep.mubr.f32.mxu0 %v10266_v2 }
  0x97   : > { %9842 = vmatmul.mubr.msk.f32.gmra.mxu0 %vm721_vm1, %v401_v36 }
  0x98   : > { %2009 = vmatprep.mubr.f32.mxu0 %v10266_v2 }
  0x9b   : > { %9843 = vmatmul.mubr.msk.f32.gmra.mxu0 %vm721_vm1, %v402_v37 }
  0x9c   : > { %2015 = vmatprep.mubr.f32.mxu0 %v10266_v2 }
  0x9f   : > { %9844 = vmatmul.mubr.msk.f32.gmra.mxu0 %vm721_vm1, %v403_v38 }
  0xa0   : > { %2021 = vmatprep.mubr.f32.mxu0 %v10266_v2 }
  0xa3   : > { %9845 = vmatmul.mubr.msk.f32.gmra.mxu0 %vm721_vm1, %v404_v39 }
  0xa4   : > { %2027 = vmatprep.mubr.f32.mxu0 %v10266_v2 }
  0xa7   : > { %9846 = vmatmul.mubr.msk.f32.gmra.mxu0 %vm721_vm1, %v405_v40  ;;  %v423_v40 = vld [vmem:[%s10344_s21 + $0x1b8] sm:$0xff] }
  0xa8   : > { %2033 = vmatprep.mubr.f32.mxu0 %v10266_v2 }
  0xab   : > { %9847 = vmatmul.mubr.msk.f32.gmra.mxu0 %vm721_vm1, %v406_v41 }
  0xac   : > { %2039 = vmatprep.mubr.f32.mxu0 %v10266_v2 }
  0xaf   : > { %9848 = vmatmul.mubr.msk.f32.gmra.mxu0 %vm721_vm1, %v407_v42 }
  0xb0   : > { %2045 = vmatprep.mubr.f32.mxu0 %v10266_v2 }
  0xb3   : > { %9849 = vmatmul.mubr.msk.f32.gmra.mxu0 %vm721_vm1, %v408_v43 }
  0xb4   : > { %2051 = vmatprep.mubr.f32.mxu0 %v10266_v2 }
  0xb7   : > { %9850 = vmatmul.mubr.msk.f32.gmra.mxu0 %vm721_vm1, %v409_v44 }
  0xb8   : > { %2057 = vmatprep.mubr.f32.mxu0 %v10266_v2 }
  0xbb   : > { %9851 = vmatmul.mubr.msk.f32.gmra.mxu0 %vm721_vm1, %v410_v45 }
  0xbc   : > { %2063 = vmatprep.mubr.f32.mxu0 %v10266_v2 }
  0xbf   : > { %9852 = vmatmul.mubr.msk.f32.gmra.mxu0 %vm721_vm1, %v411_v46 }
  0xc0   : > { %2069 = vmatprep.mubr.f32.mxu0 %v10266_v2 }
  0xc3   : > { %9853 = vmatmul.mubr.msk.f32.gmra.mxu0 %vm721_vm1, %v412_v47  ;;  %v424_v47 = vld [vmem:[%s10344_s21 + $0x1c0] sm:$0xff] }
  0xc4   : > { %2075 = vmatprep.mubr.f32.mxu0 %v10266_v2 }
  0xc7   : > { %9854 = vmatmul.mubr.msk.f32.gmra.mxu0 %vm721_vm1, %v413_v48 }
  0xc8   : > { %2081 = vmatprep.mubr.f32.mxu0 %v10266_v2 }
  0xcb   : > { %9855 = vmatmul.mubr.msk.f32.gmra.mxu0 %vm721_vm1, %v414_v50 }
  0xcc   : > { %2087 = vmatprep.mubr.f32.mxu0 %v10266_v2 }
  0xcf   : > { %9856 = vmatmul.mubr.msk.f32.gmra.mxu0 %vm721_vm1, %v415_v52 }
  0xd0   : > { %2093 = vmatprep.mubr.f32.mxu0 %v10266_v2 }
  0xd3   : > { %v1807_v59 = vpop.f32.mrf.mxu0  ;;  %9857 = vmatmul.mubr.msk.f32.gmra.mxu0 %vm721_vm1, %v416_v57 }
  0xd4   : > { %v10511_v60 = vadd.f32 %v1807_v59, %v10503_v56  ;;  %2099 = vmatprep.mubr.f32.mxu0 %v10266_v2 }
  0xd5   : > { %v1809_v62 = vpop.f32.mrf.mxu0 }
  0xd6   : > { %v3834_v63 = vmax.f32 %v10511_v60, 0.0  ;;  %v1810_v0 = vadd.f32 %v1809_v62, %v10507_v58  ;;  %v444_v60 = vld [vmem:[%s10344_s21 + $0x260] sm:$0xff] }
  0xd7   : > { %v1813_v1 = vpop.f32.mrf.mxu0  ;;  %9858 = vmatmul.mubr.msk.f32.gmra.mxu0 %vm721_vm1, %v417_v61  ;;  %v425_v61 = vld [vmem:[%s10344_s21 + $0x1c8] sm:$0xff] }
  0xd8   : > { %4510 = vst [vmem:[#allocation2] sm:$0xff] %v3834_v63  ;;  %v3835_v3 = vmax.f32 %v1810_v0, 0.0  ;;  %v10521_v4 = vadd.f32 %v1813_v1, %v10503_v56  ;;  %2105 = vmatprep.mubr.f32.mxu0 %v10266_v2 }
  0xd9   : > { %v1815_v6 = vpop.f32.mrf.mxu0 }
  0xda   : > { %4512 = vst.msk [vmem:[#allocation2 + $0x8] sm:$0xff] %vm4511_vm2, %v3835_v3  ;;  %v3836_v7 = vmax.f32 %v10521_v4, 0.0  ;;  %v1816_v8 = vadd.f32 %v1815_v6, %v10507_v58 }
  0xdb   : > { %v1819_v9 = vpop.f32.mrf.mxu0  ;;  %9859 = vmatmul.mubr.msk.f32.gmra.mxu0 %vm721_vm1, %v418_v5 }
  0xdc   : > { %4513 = vst [vmem:[#allocation2 + $0x10] sm:$0xff] %v3836_v7  ;;  %v3837_v10 = vmax.f32 %v1816_v8, 0.0  ;;  %v10532_v11 = vadd.f32 %v1819_v9, %v10503_v56  ;;  %2111 = vmatprep.mubr.f32.mxu0 %v10266_v2  ;;  %v426_v8 = vld [vmem:[%s10344_s21 + $0x1d0] sm:$0xff] }
  0xdd   : > { %v1821_v13 = vpop.f32.mrf.mxu0 }
  0xde   : > { %4514 = vst.msk [vmem:[#allocation2 + $0x18] sm:$0xff] %vm4511_vm2, %v3837_v10  ;;  %v3838_v14 = vmax.f32 %v10532_v11, 0.0  ;;  %v1822_v15 = vadd.f32 %v1821_v13, %v10507_v58 }
  0xdf   : > { %v1825_v16 = vpop.f32.mrf.mxu0  ;;  %9860 = vmatmul.mubr.msk.f32.gmra.mxu0 %vm721_vm1, %v419_v12 }
  0xe0   : > { %4515 = vst [vmem:[#allocation2 + $0x20] sm:$0xff] %v3838_v14  ;;  %v3839_v17 = vmax.f32 %v1822_v15, 0.0  ;;  %v10543_v18 = vadd.f32 %v1825_v16, %v10503_v56  ;;  %2117 = vmatprep.mubr.f32.mxu0 %v10266_v2 }
  0xe1   : > { %v1827_v20 = vpop.f32.mrf.mxu0 }
  0xe2   : > { %4516 = vst.msk [vmem:[#allocation2 + $0x28] sm:$0xff] %vm4511_vm2, %v3839_v17  ;;  %v3840_v21 = vmax.f32 %v10543_v18, 0.0  ;;  %v1828_v22 = vadd.f32 %v1827_v20, %v10507_v58  ;;  %v427_v17 = vld [vmem:[%s10344_s21 + $0x1d8] sm:$0xff] }
  0xe3   : > { %v1831_v23 = vpop.f32.mrf.mxu0  ;;  %9861 = vmatmul.mubr.msk.f32.gmra.mxu0 %vm721_vm1, %v420_v19 }
  0xe4   : > { %4517 = vst [vmem:[#allocation2 + $0x30] sm:$0xff] %v3840_v21  ;;  %v3841_v24 = vmax.f32 %v1828_v22, 0.0  ;;  %v10554_v25 = vadd.f32 %v1831_v23, %v10503_v56  ;;  %2123 = vmatprep.mubr.f32.mxu0 %v10266_v2 }
  0xe5   : > { %v1833_v27 = vpop.f32.mrf.mxu0 }
  0xe6   : > { %4518 = vst.msk [vmem:[#allocation2 + $0x38] sm:$0xff] %vm4511_vm2, %v3841_v24  ;;  %v3842_v28 = vmax.f32 %v10554_v25, 0.0  ;;  %v1834_v29 = vadd.f32 %v1833_v27, %v10507_v58  ;;  %v428_v27 = vld [vmem:[%s10344_s21 + $0x1e0] sm:$0xff] }
  0xe7   : > { %v1837_v30 = vpop.f32.mrf.mxu0  ;;  %9862 = vmatmul.mubr.msk.f32.gmra.mxu0 %vm721_vm1, %v421_v26 }
  0xe8   : > { %4519 = vst [vmem:[#allocation2 + $0x40] sm:$0xff] %v3842_v28  ;;  %v3843_v31 = vmax.f32 %v1834_v29, 0.0  ;;  %v10565_v32 = vadd.f32 %v1837_v30, %v10503_v56  ;;  %2129 = vmatprep.mubr.f32.mxu0 %v10266_v2 }
  0xe9   : > { %v1839_v34 = vpop.f32.mrf.mxu0 }
  0xea   : > { %4520 = vst.msk [vmem:[#allocation2 + $0x48] sm:$0xff] %vm4511_vm2, %v3843_v31  ;;  %v3844_v35 = vmax.f32 %v10565_v32, 0.0  ;;  %v1840_v36 = vadd.f32 %v1839_v34, %v10507_v58 }
  0xeb   : > { %v1843_v37 = vpop.f32.mrf.mxu0  ;;  %9863 = vmatmul.mubr.msk.f32.gmra.mxu0 %vm721_vm1, %v422_v33 }
  0xec   : > { %4521 = vst [vmem:[#allocation2 + $0x50] sm:$0xff] %v3844_v35  ;;  %v3845_v38 = vmax.f32 %v1840_v36, 0.0  ;;  %v10576_v39 = vadd.f32 %v1843_v37, %v10503_v56  ;;  %2135 = vmatprep.mubr.f32.mxu0 %v10266_v2  ;;  %v429_v37 = vld [vmem:[%s10344_s21 + $0x1e8] sm:$0xff] }
  0xed   : > { %v1845_v41 = vpop.f32.mrf.mxu0 }
  0xee   : > { %4522 = vst.msk [vmem:[#allocation2 + $0x58] sm:$0xff] %vm4511_vm2, %v3845_v38  ;;  %v3846_v42 = vmax.f32 %v10576_v39, 0.0  ;;  %v1846_v43 = vadd.f32 %v1845_v41, %v10507_v58 }
  0xef   : > { %v1849_v44 = vpop.f32.mrf.mxu0  ;;  %9864 = vmatmul.mubr.msk.f32.gmra.mxu0 %vm721_vm1, %v423_v40 }
  0xf0   : > { %4523 = vst [vmem:[#allocation2 + $0x60] sm:$0xff] %v3846_v42  ;;  %v3847_v45 = vmax.f32 %v1846_v43, 0.0  ;;  %v10587_v46 = vadd.f32 %v1849_v44, %v10503_v56  ;;  %2141 = vmatprep.mubr.f32.mxu0 %v10266_v2 }
  0xf1   : > { %v1851_v48 = vpop.f32.mrf.mxu0 }
  0xf2   : > { %4524 = vst.msk [vmem:[#allocation2 + $0x68] sm:$0xff] %vm4511_vm2, %v3847_v45  ;;  %v3848_v50 = vmax.f32 %v10587_v46, 0.0  ;;  %v1852_v52 = vadd.f32 %v1851_v48, %v10507_v58 }
  0xf3   : > { %v1855_v54 = vpop.f32.mrf.mxu0  ;;  %9865 = vmatmul.mubr.msk.f32.gmra.mxu0 %vm721_vm1, %v424_v47  ;;  %v430_v47 = vld [vmem:[%s10344_s21 + $0x1f0] sm:$0xff] }
  0xf4   : > { %4525 = vst [vmem:[#allocation2 + $0x70] sm:$0xff] %v3848_v50  ;;  %v3849_v57 = vmax.f32 %v1852_v52, 0.0  ;;  %v10598_v59 = vadd.f32 %v1855_v54, %v10503_v56  ;;  %2147 = vmatprep.mubr.f32.mxu0 %v10266_v2 }
  0xf5   : > { %v1857_v62 = vpop.f32.mrf.mxu0 }
  0xf6   : > { %4526 = vst.msk [vmem:[#allocation2 + $0x78] sm:$0xff] %vm4511_vm2, %v3849_v57  ;;  %v3850_v0 = vmax.f32 %v10598_v59, 0.0  ;;  %v1858_v1 = vadd.f32 %v1857_v62, %v10507_v58 }
  0xf7   : > { %v1861_v3 = vpop.f32.mrf.mxu0  ;;  %9866 = vmatmul.mubr.msk.f32.gmra.mxu0 %vm721_vm1, %v425_v61 }
  0xf8   : > { %4527 = vst [vmem:[#allocation2 + $0x80] sm:$0xff] %v3850_v0  ;;  %v3851_v5 = vmax.f32 %v1858_v1, 0.0  ;;  %v10609_v6 = vadd.f32 %v1861_v3, %v10503_v56  ;;  %2153 = vmatprep.mubr.f32.mxu0 %v10266_v2  ;;  %v431_v1 = vld [vmem:[%s10344_s21 + $0x1f8] sm:$0xff] }
  0xf9   : > { %v1863_v9 = vpop.f32.mrf.mxu0 }
  0xfa   : > { %4528 = vst.msk [vmem:[#allocation2 + $0x88] sm:$0xff] %vm4511_vm2, %v3851_v5  ;;  %v3852_v10 = vmax.f32 %v10609_v6, 0.0  ;;  %v1864_v12 = vadd.f32 %v1863_v9, %v10507_v58 }
  0xfb   : > { %v1867_v13 = vpop.f32.mrf.mxu0  ;;  %9867 = vmatmul.mubr.msk.f32.gmra.mxu0 %vm721_vm1, %v426_v8 }
  0xfc   : > { %4529 = vst [vmem:[#allocation2 + $0x90] sm:$0xff] %v3852_v10  ;;  %v3853_v15 = vmax.f32 %v1864_v12, 0.0  ;;  %v10620_v16 = vadd.f32 %v1867_v13, %v10503_v56  ;;  %2159 = vmatprep.mubr.f32.mxu0 %v10266_v2 }
  0xfd   : > { %v1869_v19 = vpop.f32.mrf.mxu0 }
  0xfe   : > { %4530 = vst.msk [vmem:[#allocation2 + $0x98] sm:$0xff] %vm4511_vm2, %v3853_v15  ;;  %v3854_v20 = vmax.f32 %v10620_v16, 0.0  ;;  %v1870_v22 = vadd.f32 %v1869_v19, %v10507_v58  ;;  %v432_v15 = vld [vmem:[%s10344_s21 + $0x200] sm:$0xff] }
  0xff   : > { %v1873_v23 = vpop.f32.mrf.mxu0  ;;  %9868 = vmatmul.mubr.msk.f32.gmra.mxu0 %vm721_vm1, %v427_v17 }
 0x100   : > { %4531 = vst [vmem:[#allocation2 + $0xa0] sm:$0xff] %v3854_v20  ;;  %v3855_v24 = vmax.f32 %v1870_v22, 0.0  ;;  %v10631_v26 = vadd.f32 %v1873_v23, %v10503_v56  ;;  %2165 = vmatprep.mubr.f32.mxu0 %v10266_v2 }
 0x101   : > { %v1875_v29 = vpop.f32.mrf.mxu0 }
 0x102   : > { %4532 = vst.msk [vmem:[#allocation2 + $0xa8] sm:$0xff] %vm4511_vm2, %v3855_v24  ;;  %v3856_v30 = vmax.f32 %v10631_v26, 0.0  ;;  %v1876_v31 = vadd.f32 %v1875_v29, %v10507_v58  ;;  %v433_v29 = vld [vmem:[%s10344_s21 + $0x208] sm:$0xff] }
 0x103   : > { %v1879_v33 = vpop.f32.mrf.mxu0  ;;  %9869 = vmatmul.mubr.msk.f32.gmra.mxu0 %vm721_vm1, %v428_v27 }
 0x104   : > { %4533 = vst [vmem:[#allocation2 + $0xb0] sm:$0xff] %v3856_v30  ;;  %v3857_v34 = vmax.f32 %v1876_v31, 0.0  ;;  %v10642_v36 = vadd.f32 %v1879_v33, %v10503_v56  ;;  %2171 = vmatprep.mubr.f32.mxu0 %v10266_v2 }
 0x105   : > { %v1881_v38 = vpop.f32.mrf.mxu0 }
 0x106   : > { %4534 = vst.msk [vmem:[#allocation2 + $0xb8] sm:$0xff] %vm4511_vm2, %v3857_v34  ;;  %v3858_v40 = vmax.f32 %v10642_v36, 0.0  ;;  %v1882_v41 = vadd.f32 %v1881_v38, %v10507_v58 }
 0x107   : > { %v1885_v43 = vpop.f32.mrf.mxu0  ;;  %9870 = vmatmul.mubr.msk.f32.gmra.mxu0 %vm721_vm1, %v429_v37 }
 0x108   : > { %4535 = vst [vmem:[#allocation2 + $0xc0] sm:$0xff] %v3858_v40  ;;  %v3859_v44 = vmax.f32 %v1882_v41, 0.0  ;;  %v10653_v45 = vadd.f32 %v1885_v43, %v10503_v56  ;;  %2177 = vmatprep.mubr.f32.mxu0 %v10266_v2  ;;  %v434_v43 = vld [vmem:[%s10344_s21 + $0x210] sm:$0xff] }
 0x109   : > { %v1887_v48 = vpop.f32.mrf.mxu0 }
 0x10a   : > { %4536 = vst.msk [vmem:[#allocation2 + $0xc8] sm:$0xff] %vm4511_vm2, %v3859_v44  ;;  %v3860_v52 = vmax.f32 %v10653_v45, 0.0  ;;  %v1888_v54 = vadd.f32 %v1887_v48, %v10507_v58 }
 0x10b   : > { %v1891_v57 = vpop.f32.mrf.mxu0  ;;  %9871 = vmatmul.mubr.msk.f32.gmra.mxu0 %vm721_vm1, %v430_v47 }
 0x10c   : > { %4537 = vst [vmem:[#allocation2 + $0xd0] sm:$0xff] %v3860_v52  ;;  %v3861_v61 = vmax.f32 %v1888_v54, 0.0  ;;  %v10664_v62 = vadd.f32 %v1891_v57, %v10503_v56  ;;  %2183 = vmatprep.mubr.f32.mxu0 %v10266_v2  ;;  %v10701_v57 = vld [vmem:[%s16311_s4] sm:$0xff] }
 0x10d   : > { %v1893_v3 = vpop.f32.mrf.mxu0 }
 0x10e   : > { %4538 = vst.msk [vmem:[#allocation2 + $0xd8] sm:$0xff] %vm4511_vm2, %v3861_v61  ;;  %v3862_v5 = vmax.f32 %v10664_v62, 0.0  ;;  %v1894_v8 = vadd.f32 %v1893_v3, %v10507_v58  ;;  %v5876_v3 = vrot.slane %v10701_v57, %v10498_v55 }
 0x10f   : > { %v1897_v9 = vpop.f32.mrf.mxu0  ;;  %9872 = vmatmul.mubr.msk.f32.gmra.mxu0 %vm721_vm1, %v431_v1  ;;  %v435_v1 = vld [vmem:[%s10344_s21 + $0x218] sm:$0xff] }
 0x110   : > { %4539 = vst [vmem:[#allocation2 + $0xe0] sm:$0xff] %v3862_v5  ;;  %v3863_v12 = vmax.f32 %v1894_v8, 0.0  ;;  %v1898_v13 = vadd.f32 %v1897_v9, %v10503_v56  ;;  %2189 = vmatprep.mubr.f32.mxu0 %v10266_v2  ;;  %6045 = vmatprep.mubr.f32.mxu1 %v5876_v3  ;;  %v438_v3 = vld [vmem:[%s10344_s21 + $0x230] sm:$0xff] }
 0x111   : > { %v1899_v17 = vpop.f32.mrf.mxu0 }
 0x112   : > { %4540 = vst.msk [vmem:[#allocation2 + $0xe8] sm:$0xff] %vm4511_vm2, %v3863_v12  ;;  %v3864_v19 = vmax.f32 %v1898_v13, 0.0  ;;  %v1900_v22 = vadd.f32 %v1899_v17, %v10507_v58 }
 0x113   : > { %v1903_v23 = vpop.f32.mrf.mxu0  ;;  %9873 = vmatmul.mubr.msk.f32.gmra.mxu0 %vm721_vm1, %v432_v15 }
 0x114   : > { %4541 = vst [vmem:[#allocation2 + $0xf0] sm:$0xff] %v3864_v19  ;;  %v3865_v24 = vmax.f32 %v1900_v22, 0.0  ;;  %v10679_v27 = vadd.f32 %v1903_v23, %v10503_v56  ;;  %2195 = vmatprep.mubr.f32.mxu0 %v10266_v2 }
 0x115   : > { %v1905_v31 = vpop.f32.mrf.mxu0 }
 0x116   : > { %4542 = vst.msk [vmem:[#allocation2 + $0xf8] sm:$0xff] %vm4511_vm2, %v3865_v24  ;;  %v3866_v33 = vmax.f32 %v10679_v27, 0.0  ;;  %v1906_v34 = vadd.f32 %v1905_v31, %v10507_v58  ;;  %v436_v24 = vld [vmem:[%s10344_s21 + $0x220] sm:$0xff]  ;;  %v5217_v31 = vld [vmem:[#allocation2 + $0xd8] sm:$0xff] }
 0x117   : > { %v1909_v37 = vpop.f32.mrf.mxu0  ;;  %9874 = vmatmul.mubr.msk.f32.gmra.mxu0 %vm721_vm1, %v433_v29  ;;  %v460_v27 = vld [vmem:[%s10344_s21 + $0x2e0] sm:$0xff] }
 0x118   : > { %4543 = vst [vmem:[#allocation2 + $0x100] sm:$0xff] %v3866_v33  ;;  %v3867_v38 = vmax.f32 %v1906_v34, 0.0  ;;  %v10690_v41 = vadd.f32 %v1909_v37, %v10503_v56  ;;  %2201 = vmatprep.mubr.f32.mxu0 %v10266_v2 }
 0x119   : > { %v1911_v44 = vpop.f32.mrf.mxu0  ;;  %v5219_v17 = vld [vmem:[#allocation2 + $0xe8] sm:$0xff] }
 0x11a   : > { %4544 = vst.msk [vmem:[#allocation2 + $0x108] sm:$0xff] %vm4511_vm2, %v3867_v38  ;;  %v3868_v47 = vmax.f32 %v10690_v41, 0.0  ;;  %v1912_v48 = vadd.f32 %v1911_v44, %v10507_v58  ;;  %v5215_v38 = vld [vmem:[#allocation2 + $0xc8] sm:$0xff] }
 0x11b   : > { %v1915_v54 = vpop.f32.mrf.mxu0  ;;  %9875 = vmatmul.mubr.msk.f32.gmra.mxu0 %vm721_vm1, %v434_v43  ;;  %v437_v44 = vld [vmem:[%s10344_s21 + $0x228] sm:$0xff] }
 0x11c   : > { %4545 = vst [vmem:[#allocation2 + $0x110] sm:$0xff] %v3868_v47  ;;  %v3869_v61 = vmax.f32 %v1912_v48, 0.0  ;;  %v10706_v62 = vadd.f32 %v1915_v54, %v10503_v56  ;;  %2207 = vmatprep.mubr.f32.mxu0 %v10266_v2  ;;  %v5213_v54 = vld [vmem:[#allocation2 + $0xb8] sm:$0xff] }
 0x11d   : > { %v1917_v8 = vpop.f32.mrf.mxu0  ;;  %v5221_v9 = vld [vmem:[#allocation2 + $0xf8] sm:$0xff] }
 0x11e   : > { %4546 = vst.msk [vmem:[#allocation2 + $0x118] sm:$0xff] %vm4511_vm2, %v3869_v61  ;;  %v3870_v12 = vmax.f32 %v10706_v62, 0.0  ;;  %v1918_v13 = vadd.f32 %v1917_v8, %v10507_v58  ;;  %5981 = vmatprep.subr.mxu1 %v5221_v9  ;;  %v5209_v9 = vld [vmem:[#allocation2 + $0x98] sm:$0xff] }
 0x11f   : > { %v1921_v15 = vpop.f32.mrf.mxu0  ;;  %9876 = vmatmul.mubr.msk.f32.gmra.mxu0 %vm721_vm1, %v435_v1  ;;  %5982 = vmatpush1.msra.mxu1 %v3864_v19  ;;  %v5211_v1 = vld [vmem:[#allocation2 + $0xa8] sm:$0xff] }
 0x120   : > { %4547 = vst [vmem:[#allocation2 + $0x120] sm:$0xff] %v3870_v12  ;;  %v3871_v22 = vmax.f32 %v1918_v13, 0.0  ;;  %v10719_v23 = vadd.f32 %v1921_v15, %v10503_v56  ;;  %5983 = vmatprep.subr.mxu1 %v5219_v17  ;;  %2213 = vmatprep.mubr.f32.mxu0 %v10266_v2  ;;  %v5207_v15 = vld [vmem:[#allocation2 + $0x88] sm:$0xff]  ;;  %v439_v17 = vld [vmem:[%s10344_s21 + $0x238] sm:$0xff] }
 0x121   : > { %v1923_v29 = vpop.f32.mrf.mxu0  ;;  %5984 = vmatpush1.msra.mxu1 %v3862_v5  ;;  %v5223_v62 = vld [vmem:[#allocation2 + $0x108] sm:$0xff] }
 0x122   : > { %4548 = vst.msk [vmem:[#allocation2 + $0x128] sm:$0xff] %vm4511_vm2, %v3871_v22  ;;  %v3872_v19 = vmax.f32 %v10719_v23, 0.0  ;;  %v1924_v34 = vadd.f32 %v1923_v29, %v10507_v58  ;;  %5985 = vmatprep.subr.mxu1 %v5217_v31  ;;  %v5203_v31 = vld [vmem:[#allocation2 + $0x68] sm:$0xff] }
 0x123   : > { %v1927_v37 = vpop.f32.mrf.mxu0  ;;  %9877 = vmatmul.mubr.msk.f32.gmra.mxu0 %vm721_vm1, %v436_v24  ;;  %5986 = vmatpush1.msra.mxu1 %v3860_v52  ;;  %v5205_v24 = vld [vmem:[#allocation2 + $0x78] sm:$0xff] }
 0x124   : > { %4549 = vst [vmem:[#allocation2 + $0x130] sm:$0xff] %v3872_v19  ;;  %v3873_v43 = vmax.f32 %v1924_v34, 0.0  ;;  %v10732_v5 = vadd.f32 %v1927_v37, %v10503_v56  ;;  %5987 = vmatprep.subr.mxu1 %v5215_v38  ;;  %2219 = vmatprep.mubr.f32.mxu0 %v10266_v2  ;;  %v440_v34 = vld [vmem:[%s10344_s21 + $0x240] sm:$0xff]  ;;  %v5201_v38 = vld [vmem:[#allocation2 + $0x58] sm:$0xff] }
 0x125   : > { %v1929_v48 = vpop.f32.mrf.mxu0  ;;  %5988 = vmatpush1.msra.mxu1 %v3858_v40 }
 0x126   : > { %4550 = vst.msk [vmem:[#allocation2 + $0x138] sm:$0xff] %vm4511_vm2, %v3873_v43  ;;  %v3874_v45 = vmax.f32 %v10732_v5, 0.0  ;;  %v1930_v52 = vadd.f32 %v1929_v48, %v10507_v58  ;;  %5989 = vmatprep.subr.mxu1 %v5213_v54  ;;  %v441_v48 = vld [vmem:[%s10344_s21 + $0x248] sm:$0xff] }
 0x127   : > { %v1933_v61 = vpop.f32.mrf.mxu0  ;;  %9878 = vmatmul.mubr.msk.f32.gmra.mxu0 %vm721_vm1, %v437_v44  ;;  %5990 = vmatpush1.msra.mxu1 %v3856_v30  ;;  %v5199_v44 = vld [vmem:[#allocation2 + $0x48] sm:$0xff] }
 0x128   : > { %4551 = vst [vmem:[#allocation2 + $0x140] sm:$0xff] %v3874_v45  ;;  %v3875_v36 = vmax.f32 %v1930_v52, 0.0  ;;  %v10747_v40 = vadd.f32 %v1933_v61, %v10503_v56  ;;  %5991 = vmatprep.subr.mxu1 %v5211_v1  ;;  %2225 = vmatprep.mubr.f32.mxu0 %v10266_v2  ;;  %v5197_v52 = vld [vmem:[#allocation2 + $0x38] sm:$0xff]  ;;  %v5195_v1 = vld [vmem:[#allocation2 + $0x28] sm:$0xff] }
 0x129   : > { %v1935_v8 = vpop.f32.mrf.mxu0  ;;  %5992 = vmatpush1.msra.mxu1 %v3854_v20 }
 0x12a   : > { %4552 = vst.msk [vmem:[#allocation2 + $0x148] sm:$0xff] %vm4511_vm2, %v3875_v36  ;;  %v3876_v26 = vmax.f32 %v10747_v40, 0.0  ;;  %v1936_v30 = vadd.f32 %v1935_v8, %v10507_v58  ;;  %5993 = vmatprep.subr.mxu1 %v5209_v9  ;;  %v442_v36 = vld [vmem:[%s10344_s21 + $0x250] sm:$0xff]  ;;  %v5193_v8 = vld [vmem:[#allocation2 + $0x18] sm:$0xff] }
 0x12b   : > { %v1939_v13 = vpop.f32.mrf.mxu0  ;;  %9879 = vmatmul.mubr.msk.f32.gmra.mxu0 %vm721_vm1, %v438_v3  ;;  %5994 = vmatpush1.msra.mxu1 %v3852_v10 }
 0x12c   : > { %4553 = vst [vmem:[#allocation2 + $0x150] sm:$0xff] %v3876_v26  ;;  %v3877_v16 = vmax.f32 %v1936_v30, 0.0  ;;  %v10762_v20 = vadd.f32 %v1939_v13, %v10503_v56  ;;  %5995 = vmatprep.subr.mxu1 %v5207_v15  ;;  %2231 = vmatprep.mubr.f32.mxu0 %v10266_v2  ;;  %v5191_v30 = vld [vmem:[#allocation2 + $0x8] sm:$0xff]  ;;  %v443_v13 = vld [vmem:[%s10344_s21 + $0x258] sm:$0xff] }
 0x12d   : > { %v1941_v22 = vpop.f32.mrf.mxu0  ;;  %5996 = vmatpush1.msra.mxu1 %v3850_v0 }
 0x12e   : > { %4554 = vst.msk [vmem:[#allocation2 + $0x158] sm:$0xff] %vm4511_vm2, %v3877_v16  ;;  %v3878_v6 = vmax.f32 %v10762_v20, 0.0  ;;  %v1942_v10 = vadd.f32 %v1941_v22, %v10507_v58  ;;  %5997 = vmatprep.subr.mxu1 %v5205_v24 }
 0x12f   : > { %v1945_v29 = vpop.f32.mrf.mxu0  ;;  %9880 = vmatmul.mubr.msk.f32.gmra.mxu0 %vm721_vm1, %v439_v17  ;;  %5998 = vmatpush1.msra.mxu1 %v3848_v50 }
 0x130   : > { %4555 = vst [vmem:[#allocation2 + $0x160] sm:$0xff] %v3878_v6  ;;  %v3879_v59 = vmax.f32 %v1942_v10, 0.0  ;;  %v10777_v0 = vadd.f32 %v1945_v29, %v10503_v56  ;;  %5999 = vmatprep.subr.mxu1 %v5203_v31  ;;  %2237 = vmatprep.mubr.f32.mxu0 %v10266_v2 }
 0x131   : > { %v1947_v37 = vpop.f32.mrf.mxu0  ;;  %6000 = vmatpush1.msra.mxu1 %v3846_v42 }
 0x132   : > { %4556 = vst.msk [vmem:[#allocation2 + $0x168] sm:$0xff] %vm4511_vm2, %v3879_v59  ;;  %v3880_v46 = vmax.f32 %v10777_v0, 0.0  ;;  %v1948_v50 = vadd.f32 %v1947_v37, %v10507_v58  ;;  %6001 = vmatprep.subr.mxu1 %v5201_v38 }
 0x133   : > { %v1951_v43 = vpop.f32.mrf.mxu0  ;;  %9881 = vmatmul.mubr.msk.f32.gmra.mxu0 %vm721_vm1, %v440_v34  ;;  %6002 = vmatpush1.msra.mxu1 %v3844_v35  ;;  %v445_v34 = vld [vmem:[%s10344_s21 + $0x268] sm:$0xff] }
 0x134   : > { %4557 = vst [vmem:[#allocation2 + $0x170] sm:$0xff] %v3880_v46  ;;  %v3881_v39 = vmax.f32 %v1948_v50, 0.0  ;;  %v10792_v42 = vadd.f32 %v1951_v43, %v10503_v56  ;;  %6003 = vmatprep.subr.mxu1 %v5199_v44  ;;  %2243 = vmatprep.mubr.f32.mxu0 %v10266_v2 }
 0x135   : > { %v1953_v54 = vpop.f32.mrf.mxu0  ;;  %6004 = vmatpush1.msra.mxu1 %v3842_v28 }
 0x136   : > { %4558 = vst.msk [vmem:[#allocation2 + $0x178] sm:$0xff] %vm4511_vm2, %v3881_v39  ;;  %v3882_v32 = vmax.f32 %v10792_v42, 0.0  ;;  %v1954_v35 = vadd.f32 %v1953_v54, %v10507_v58  ;;  %6005 = vmatprep.subr.mxu1 %v5197_v52 }
 0x137   : > { %v1957_v61 = vpop.f32.mrf.mxu0  ;;  %9882 = vmatmul.mubr.msk.f32.gmra.mxu0 %vm721_vm1, %v441_v48  ;;  %6006 = vmatpush1.msra.mxu1 %v3840_v21  ;;  %v446_v48 = vld [vmem:[%s10344_s21 + $0x270] sm:$0xff] }
 0x138   : > { %4559 = vst [vmem:[#allocation2 + $0x180] sm:$0xff] %v3882_v32  ;;  %v3883_v25 = vmax.f32 %v1954_v35, 0.0  ;;  %v10807_v28 = vadd.f32 %v1957_v61, %v10503_v56  ;;  %6007 = vmatprep.subr.mxu1 %v5195_v1  ;;  %2249 = vmatprep.mubr.f32.mxu0 %v10266_v2 }
 0x139   : > { %v1959_v3 = vpop.f32.mrf.mxu0  ;;  %6008 = vmatpush1.msra.mxu1 %v3838_v14 }
 0x13a   : > { %4560 = vst.msk [vmem:[#allocation2 + $0x188] sm:$0xff] %vm4511_vm2, %v3883_v25  ;;  %v3884_v18 = vmax.f32 %v10807_v28, 0.0  ;;  %v1960_v21 = vadd.f32 %v1959_v3, %v10507_v58  ;;  %6009 = vmatprep.subr.mxu1 %v5193_v8 }
 0x13b   : > { %v1963_v9 = vpop.f32.mrf.mxu0  ;;  %9883 = vmatmul.mubr.msk.f32.gmra.mxu0 %vm721_vm1, %v442_v36  ;;  %6010 = vmatpush1.msra.mxu1 %v3836_v7  ;;  %v447_v36 = vld [vmem:[%s10344_s21 + $0x278] sm:$0xff] }
 0x13c   : > { %4561 = vst [vmem:[#allocation2 + $0x190] sm:$0xff] %v3884_v18  ;;  %v3885_v11 = vmax.f32 %v1960_v21, 0.0  ;;  %v10822_v14 = vadd.f32 %v1963_v9, %v10503_v56  ;;  %6011 = vmatprep.subr.mxu1 %v5191_v30  ;;  %2255 = vmatprep.mubr.f32.mxu0 %v10266_v2 }
 0x13d   : > { %v1965_v15 = vpop.f32.mrf.mxu0  ;;  %6012 = vmatpush1.msra.mxu1 %v3834_v63 }
 0x13e   : > { %4562 = vst.msk [vmem:[#allocation2 + $0x198] sm:$0xff] %vm4511_vm2, %v3885_v11  ;;  %v3886_v4 = vmax.f32 %v10822_v14, 0.0  ;;  %v1966_v7 = vadd.f32 %v1965_v15, %v10507_v58 }
 0x13f   : > { %v1969_v16 = vpop.f32.mrf.mxu0  ;;  %9884 = vmatmul.mubr.msk.f32.gmra.mxu0 %vm721_vm1, %v443_v13  ;;  %v448_v13 = vld [vmem:[%s10344_s21 + $0x280] sm:$0xff] }
 0x140   : > { %4563 = vst [vmem:[#allocation2 + $0x1a0] sm:$0xff] %v3886_v4  ;;  %v3887_v17 = vmax.f32 %v1966_v7, 0.0  ;;  %v10835_v22 = vadd.f32 %v1969_v16, %v10503_v56  ;;  %2261 = vmatprep.mubr.f32.mxu0 %v10266_v2 }
 0x141   : > { %v1971_v63 = vpop.f32.mrf.mxu0 }
 0x142   : > { %4564 = vst.msk [vmem:[#allocation2 + $0x1a8] sm:$0xff] %vm4511_vm2, %v3887_v17  ;;  %v3888_v24 = vmax.f32 %v10835_v22, 0.0  ;;  %v1972_v10 = vadd.f32 %v1971_v63, %v10507_v58 }
 0x143   : > { %v1975_v29 = vpop.f32.mrf.mxu0  ;;  %9885 = vmatmul.mubr.msk.f32.gmra.mxu0 %vm721_vm1, %v444_v60 }
 0x144   : > { %4565 = vst [vmem:[#allocation2 + $0x1b0] sm:$0xff] %v3888_v24  ;;  %v3889_v31 = vmax.f32 %v1972_v10, 0.0  ;;  %v10846_v59 = vadd.f32 %v1975_v29, %v10503_v56  ;;  %2267 = vmatprep.mubr.f32.mxu0 %v10266_v2  ;;  %v449_v10 = vld [vmem:[%s10344_s21 + $0x288] sm:$0xff] }
 0x145   : > { %v1977_v37 = vpop.f32.mrf.mxu0 }
 0x146   : > { %4566 = vst.msk [vmem:[#allocation2 + $0x1b8] sm:$0xff] %vm4511_vm2, %v3889_v31  ;;  %v3890_v38 = vmax.f32 %v10846_v59, 0.0  ;;  %v1978_v50 = vadd.f32 %v1977_v37, %v10507_v58 }
 0x147   : > { %v1981_v43 = vpop.f32.mrf.mxu0  ;;  %9886 = vmatmul.mubr.msk.f32.gmra.mxu0 %vm721_vm1, %v445_v34 }
 0x148   : > { %4567 = vst [vmem:[#allocation2 + $0x1c0] sm:$0xff] %v3890_v38  ;;  %v3891_v44 = vmax.f32 %v1978_v50, 0.0  ;;  %v10857_v39 = vadd.f32 %v1981_v43, %v10503_v56  ;;  %2273 = vmatprep.mubr.f32.mxu0 %v10266_v2 }
 0x149   : > { %v1983_v54 = vpop.f32.mrf.mxu0 }
 0x14a   : > { %4568 = vst.msk [vmem:[#allocation2 + $0x1c8] sm:$0xff] %vm4511_vm2, %v3891_v44  ;;  %v3892_v52 = vmax.f32 %v10857_v39, 0.0  ;;  %v1984_v35 = vadd.f32 %v1983_v54, %v10507_v58  ;;  %v450_v44 = vld [vmem:[%s10344_s21 + $0x290] sm:$0xff] }
 0x14b   : > { %v1987_v61 = vpop.f32.mrf.mxu0  ;;  %9887 = vmatmul.mubr.msk.f32.gmra.mxu0 %vm721_vm1, %v446_v48 }
 0x14c   : > { %4569 = vst [vmem:[#allocation2 + $0x1d0] sm:$0xff] %v3892_v52  ;;  %v3893_v1 = vmax.f32 %v1984_v35, 0.0  ;;  %v10868_v25 = vadd.f32 %v1987_v61, %v10503_v56  ;;  %2279 = vmatprep.mubr.f32.mxu0 %v10266_v2 }
 0x14d   : > { %v1989_v3 = vpop.f32.mrf.mxu0 }
 0x14e   : > { %4570 = vst.msk [vmem:[#allocation2 + $0x1d8] sm:$0xff] %vm4511_vm2, %v3893_v1  ;;  %v3894_v8 = vmax.f32 %v10868_v25, 0.0  ;;  %v1990_v21 = vadd.f32 %v1989_v3, %v10507_v58 }
 0x14f   : > { %v1993_v9 = vpop.f32.mrf.mxu0  ;;  %9888 = vmatmul.mubr.msk.f32.gmra.mxu0 %vm721_vm1, %v447_v36  ;;  %v451_v36 = vld [vmem:[%s10344_s21 + $0x298] sm:$0xff] }
 0x150   : > { %4571 = vst [vmem:[#allocation2 + $0x1e0] sm:$0xff] %v3894_v8  ;;  %v3895_v30 = vmax.f32 %v1990_v21, 0.0  ;;  %v1994_v11 = vadd.f32 %v1993_v9, %v10503_v56  ;;  %2285 = vmatprep.mubr.f32.mxu0 %v10266_v2 }
 0x151   : > { %v1995_v15 = vpop.f32.mrf.mxu0 }
 0x152   : > { %4572 = vst.msk [vmem:[#allocation2 + $0x1e8] sm:$0xff] %vm4511_vm2, %v3895_v30  ;;  %v3896_v7 = vmax.f32 %v1994_v11, 0.0  ;;  %v1996_v16 = vadd.f32 %v1995_v15, %v10507_v58 }
 0x153   : > { %v1999_v17 = vpop.f32.mrf.mxu0  ;;  %9889 = vmatmul.mubr.msk.f32.gmra.mxu0 %vm721_vm1, %v448_v13 }
 0x154   : > { %4573 = vst [vmem:[#allocation2 + $0x1f0] sm:$0xff] %v3896_v7  ;;  %v3897_v60 = vmax.f32 %v1996_v16, 0.0  ;;  %v10883_v63 = vadd.f32 %v1999_v17, %v10503_v56  ;;  %2291 = vmatprep.mubr.f32.mxu0 %v10266_v2  ;;  %v452_v17 = vld [vmem:[%s10344_s21 + $0x2a0] sm:$0xff] }
 0x155   : > { %v2001_v29 = vpop.f32.mrf.mxu0 }
 0x156   : > { %4574 = vst.msk [vmem:[#allocation2 + $0x1f8] sm:$0xff] %vm4511_vm2, %v3897_v60  ;;  %v3898_v31 = vmax.f32 %v10883_v63, 0.0  ;;  %v2002_v34 = vadd.f32 %v2001_v29, %v10507_v58  ;;  %v476_v63 = vld [vmem:[%s10344_s21 + $0x360] sm:$0xff] }
 0x157   : > { %v2005_v37 = vpop.f32.mrf.mxu0  ;;  %9890 = vmatmul.mubr.msk.f32.gmra.mxu0 %vm721_vm1, %v449_v10  ;;  %v5249_v10 = vld [vmem:[#allocation2 + $0x1d8] sm:$0xff] }
 0x158   : > { %4575 = vst [vmem:[#allocation2 + $0x200] sm:$0xff] %v3898_v31  ;;  %v3899_v50 = vmax.f32 %v2002_v34, 0.0  ;;  %v10894_v43 = vadd.f32 %v2005_v37, %v10503_v56  ;;  %2297 = vmatprep.mubr.f32.mxu0 %v10266_v2  ;;  %v5247_v37 = vld [vmem:[#allocation2 + $0x1c8] sm:$0xff] }
 0x159   : > { %v2007_v48 = vpop.f32.mrf.mxu0  ;;  %v5251_v13 = vld [vmem:[#allocation2 + $0x1e8] sm:$0xff] }
 0x15a   : > { %4576 = vst.msk [vmem:[#allocation2 + $0x208] sm:$0xff] %vm4511_vm2, %v3899_v50  ;;  %v3900_v54 = vmax.f32 %v10894_v43, 0.0  ;;  %v2008_v35 = vadd.f32 %v2007_v48, %v10507_v58 }
 0x15b   : > { %v2011_v61 = vpop.f32.mrf.mxu0  ;;  %9891 = vmatmul.mubr.msk.f32.gmra.mxu0 %vm721_vm1, %v450_v44  ;;  %v453_v44 = vld [vmem:[%s10344_s21 + $0x2a8] sm:$0xff] }
 0x15c   : > { %4577 = vst [vmem:[#allocation2 + $0x210] sm:$0xff] %v3900_v54  ;;  %v3901_v1 = vmax.f32 %v2008_v35, 0.0  ;;  %v10905_v25 = vadd.f32 %v2011_v61, %v10503_v56  ;;  %2303 = vmatprep.mubr.f32.mxu0 %v10266_v2  ;;  %v5245_v35 = vld [vmem:[#allocation2 + $0x1b8] sm:$0xff] }
 0x15d   : > { %v2013_v3 = vpop.f32.mrf.mxu0  ;;  %v5253_v21 = vld [vmem:[#allocation2 + $0x1f8] sm:$0xff] }
 0x15e   : > { %4578 = vst.msk [vmem:[#allocation2 + $0x218] sm:$0xff] %vm4511_vm2, %v3901_v1  ;;  %v3902_v9 = vmax.f32 %v10905_v25, 0.0  ;;  %v2014_v30 = vadd.f32 %v2013_v3, %v10507_v58  ;;  %6013 = vmatprep.subr.mxu1 %v5253_v21  ;;  %v5243_v1 = vld [vmem:[#allocation2 + $0x1a8] sm:$0xff]  ;;  %v5241_v21 = vld [vmem:[#allocation2 + $0x198] sm:$0xff] }
 0x15f   : > { %v2017_v11 = vpop.f32.mrf.mxu0  ;;  %9892 = vmatmul.mubr.msk.f32.gmra.mxu0 %vm721_vm1, %v451_v36  ;;  %6014 = vmatpush2.msra.mxu1 %v3896_v7  ;;  %v454_v36 = vld [vmem:[%s10344_s21 + $0x2b0] sm:$0xff] }
 0x160   : > { %4579 = vst [vmem:[#allocation2 + $0x220] sm:$0xff] %v3902_v9  ;;  %v3903_v15 = vmax.f32 %v2014_v30, 0.0  ;;  %v10916_v16 = vadd.f32 %v2017_v11, %v10503_v56  ;;  %6015 = vmatprep.subr.mxu1 %v5251_v13  ;;  %2309 = vmatprep.mubr.f32.mxu0 %v10266_v2  ;;  %v5239_v11 = vld [vmem:[#allocation2 + $0x188] sm:$0xff]  ;;  %v455_v13 = vld [vmem:[%s10344_s21 + $0x2b8] sm:$0xff] }
 0x161   : > { %v2019_v60 = vpop.f32.mrf.mxu0  ;;  %6016 = vmatpush2.msra.mxu1 %v3894_v8 }
 0x162   : > { %4580 = vst.msk [vmem:[#allocation2 + $0x228] sm:$0xff] %vm4511_vm2, %v3903_v15  ;;  %v3904_v7 = vmax.f32 %v10916_v16, 0.0  ;;  %v2020_v29 = vadd.f32 %v2019_v60, %v10507_v58  ;;  %6017 = vmatprep.subr.mxu1 %v5249_v10  ;;  %v5235_v10 = vld [vmem:[#allocation2 + $0x168] sm:$0xff] }
 0x163   : > { %v2023_v34 = vpop.f32.mrf.mxu0  ;;  %9893 = vmatmul.mubr.msk.f32.gmra.mxu0 %vm721_vm1, %v452_v17  ;;  %6018 = vmatpush2.msra.mxu1 %v3892_v52  ;;  %v5237_v17 = vld [vmem:[#allocation2 + $0x178] sm:$0xff] }
 0x164   : > { %4581 = vst [vmem:[#allocation2 + $0x230] sm:$0xff] %v3904_v7  ;;  %v3905_v50 = vmax.f32 %v2020_v29, 0.0  ;;  %v10929_v8 = vadd.f32 %v2023_v34, %v10503_v56  ;;  %6019 = vmatprep.subr.mxu1 %v5247_v37  ;;  %2315 = vmatprep.mubr.f32.mxu0 %v10266_v2  ;;  %v456_v29 = vld [vmem:[%s10344_s21 + $0x2c0] sm:$0xff]  ;;  %v5233_v37 = vld [vmem:[#allocation2 + $0x158] sm:$0xff] }
 0x165   : > { %v2025_v48 = vpop.f32.mrf.mxu0  ;;  %6020 = vmatpush2.msra.mxu1 %v3890_v38 }
 0x166   : > { %4582 = vst.msk [vmem:[#allocation2 + $0x238] sm:$0xff] %vm4511_vm2, %v3905_v50  ;;  %v3906_v39 = vmax.f32 %v10929_v8, 0.0  ;;  %v2026_v52 = vadd.f32 %v2025_v48, %v10507_v58  ;;  %6021 = vmatprep.subr.mxu1 %v5245_v35  ;;  %v457_v48 = vld [vmem:[%s10344_s21 + $0x2c8] sm:$0xff] }
 0x167   : > { %v2029_v61 = vpop.f32.mrf.mxu0  ;;  %9894 = vmatmul.mubr.msk.f32.gmra.mxu0 %vm721_vm1, %v453_v44  ;;  %6022 = vmatpush2.msra.mxu1 %v3888_v24  ;;  %v5231_v44 = vld [vmem:[#allocation2 + $0x148] sm:$0xff] }
 0x168   : > { %4583 = vst [vmem:[#allocation2 + $0x240] sm:$0xff] %v3906_v39  ;;  %v3907_v59 = vmax.f32 %v2026_v52, 0.0  ;;  %v10944_v38 = vadd.f32 %v2029_v61, %v10503_v56  ;;  %6023 = vmatprep.subr.mxu1 %v5243_v1  ;;  %2321 = vmatprep.mubr.f32.mxu0 %v10266_v2  ;;  %v5229_v52 = vld [vmem:[#allocation2 + $0x138] sm:$0xff]  ;;  %v5227_v1 = vld [vmem:[#allocation2 + $0x128] sm:$0xff] }
 0x169   : > { %v2031_v3 = vpop.f32.mrf.mxu0  ;;  %6024 = vmatpush2.msra.mxu1 %v3886_v4 }
 0x16a   : > { %4584 = vst.msk [vmem:[#allocation2 + $0x248] sm:$0xff] %vm4511_vm2, %v3907_v59  ;;  %v3908_v22 = vmax.f32 %v10944_v38, 0.0  ;;  %v2032_v24 = vadd.f32 %v2031_v3, %v10507_v58  ;;  %6025 = vmatprep.subr.mxu1 %v5241_v21  ;;  %v458_v59 = vld [vmem:[%s10344_s21 + $0x2d0] sm:$0xff]  ;;  %v5225_v3 = vld [vmem:[#allocation2 + $0x118] sm:$0xff]  ;;  %v5872_v21 = vrot.slane %v10701_v57, %v10492_v53 }
 0x16b   : > { %v2035_v30 = vpop.f32.mrf.mxu0  ;;  %9895 = vmatmul.mubr.msk.f32.gmra.mxu0 %vm721_vm1, %v454_v36  ;;  %6026 = vmatpush2.msra.mxu1 %v3884_v18 }
 0x16c   : > { %4585 = vst [vmem:[#allocation2 + $0x250] sm:$0xff] %v3908_v22  ;;  %v3909_v14 = vmax.f32 %v2032_v24, 0.0  ;;  %v10959_v4 = vadd.f32 %v2035_v30, %v10503_v56  ;;  %6027 = vmatprep.subr.mxu1 %v5239_v11  ;;  %2327 = vmatprep.mubr.f32.mxu0 %v10266_v2  ;;  %v459_v11 = vld [vmem:[%s10344_s21 + $0x2d8] sm:$0xff] }
 0x16d   : > { %v2037_v15 = vpop.f32.mrf.mxu0  ;;  %6028 = vmatpush2.msra.mxu1 %v3882_v32 }
 0x16e   : > { %4586 = vst.msk [vmem:[#allocation2 + $0x258] sm:$0xff] %vm4511_vm2, %v3909_v14  ;;  %v3910_v28 = vmax.f32 %v10959_v4, 0.0  ;;  %v2038_v18 = vadd.f32 %v2037_v15, %v10507_v58  ;;  %6029 = vmatprep.subr.mxu1 %v5237_v17 }
 0x16f   : > { %v2041_v60 = vpop.f32.mrf.mxu0  ;;  %9896 = vmatmul.mubr.msk.f32.gmra.mxu0 %vm721_vm1, %v455_v13  ;;  %6030 = vmatpush2.msra.mxu1 %v3880_v46 }
 0x170   : > { %4587 = vst [vmem:[#allocation2 + $0x260] sm:$0xff] %v3910_v28  ;;  %v3911_v42 = vmax.f32 %v2038_v18, 0.0  ;;  %v10974_v32 = vadd.f32 %v2041_v60, %v10503_v56  ;;  %6031 = vmatprep.subr.mxu1 %v5235_v10  ;;  %2333 = vmatprep.mubr.f32.mxu0 %v10266_v2 }
 0x171   : > { %v2043_v34 = vpop.f32.mrf.mxu0  ;;  %6032 = vmatpush2.msra.mxu1 %v3878_v6 }
 0x172   : > { %4588 = vst.msk [vmem:[#allocation2 + $0x268] sm:$0xff] %vm4511_vm2, %v3911_v42  ;;  %v3912_v0 = vmax.f32 %v10974_v32, 0.0  ;;  %v2044_v46 = vadd.f32 %v2043_v34, %v10507_v58  ;;  %6033 = vmatprep.subr.mxu1 %v5233_v37  ;;  %v461_v34 = vld [vmem:[%s10344_s21 + $0x2e8] sm:$0xff] }
 0x173   : > { %v2047_v50 = vpop.f32.mrf.mxu0  ;;  %9897 = vmatmul.mubr.msk.f32.gmra.mxu0 %vm721_vm1, %v456_v29  ;;  %6034 = vmatpush2.msra.mxu1 %v3876_v26 }
 0x174   : > { %4589 = vst [vmem:[#allocation2 + $0x270] sm:$0xff] %v3912_v0  ;;  %v3913_v20 = vmax.f32 %v2044_v46, 0.0  ;;  %v10989_v6 = vadd.f32 %v2047_v50, %v10503_v56  ;;  %6035 = vmatprep.subr.mxu1 %v5231_v44  ;;  %2339 = vmatprep.mubr.f32.mxu0 %v10266_v2 }
 0x175   : > { %v2049_v35 = vpop.f32.mrf.mxu0  ;;  %6036 = vmatpush2.msra.mxu1 %v3874_v45 }
 0x176   : > { %4590 = vst.msk [vmem:[#allocation2 + $0x278] sm:$0xff] %vm4511_vm2, %v3913_v20  ;;  %v3914_v40 = vmax.f32 %v10989_v6, 0.0  ;;  %v2050_v26 = vadd.f32 %v2049_v35, %v10507_v58  ;;  %6037 = vmatprep.subr.mxu1 %v5229_v52  ;;  %v462_v35 = vld [vmem:[%s10344_s21 + $0x2f0] sm:$0xff] }
 0x177   : > { %v2053_v61 = vpop.f32.mrf.mxu0  ;;  %9898 = vmatmul.mubr.msk.f32.gmra.mxu0 %vm721_vm1, %v457_v48  ;;  %6038 = vmatpush2.msra.mxu1 %v3872_v19 }
 0x178   : > { %4591 = vst [vmem:[#allocation2 + $0x280] sm:$0xff] %v3914_v40  ;;  %v3915_v5 = vmax.f32 %v2050_v26, 0.0  ;;  %v11004_v45 = vadd.f32 %v2053_v61, %v10503_v56  ;;  %6039 = vmatprep.subr.mxu1 %v5227_v1  ;;  %2345 = vmatprep.mubr.f32.mxu0 %v10266_v2 }
 0x179   : > { %v2055_v36 = vpop.f32.mrf.mxu0  ;;  %6040 = vmatpush2.msra.mxu1 %v3870_v12 }
 0x17a   : > { %4592 = vst.msk [vmem:[#allocation2 + $0x288] sm:$0xff] %vm4511_vm2, %v3915_v5  ;;  %v3916_v23 = vmax.f32 %v11004_v45, 0.0  ;;  %v2056_v19 = vadd.f32 %v2055_v36, %v10507_v58  ;;  %6041 = vmatprep.subr.mxu1 %v5225_v3  ;;  %v463_v36 = vld [vmem:[%s10344_s21 + $0x2f8] sm:$0xff] }
 0x17b   : > { %v2059_v24 = vpop.f32.mrf.mxu0  ;;  %9899 = vmatmul.mubr.msk.f32.gmra.mxu0 %vm721_vm1, %v458_v59  ;;  %6042 = vmatpush2.msra.mxu1 %v3868_v47 }
 0x17c   : > { %4593 = vst [vmem:[#allocation2 + $0x290] sm:$0xff] %v3916_v23  ;;  %v3917_v12 = vmax.f32 %v2056_v19, 0.0  ;;  %v11021_v30 = vadd.f32 %v2059_v24, %v10503_v56  ;;  %6043 = vmatprep.subr.mxu1 %v5223_v62  ;;  %2351 = vmatprep.mubr.f32.mxu0 %v10266_v2 }
 0x17d   : > { %v2061_v14 = vpop.f32.mrf.mxu0  ;;  %6044 = vmatpush2.msra.mxu1 %v3866_v33 }
 0x17e   : > { %4594 = vst.msk [vmem:[#allocation2 + $0x298] sm:$0xff] %vm4511_vm2, %v3917_v12  ;;  %v3918_v41 = vmax.f32 %v11021_v30, 0.0  ;;  %v2062_v47 = vadd.f32 %v2061_v14, %v10507_v58  ;;  %6046 = vmatmul.mubr.f32.vlgmr.msra.gmra.mxu1 %v5872_v21 }
 0x17f   : > { %v2065_v13 = vpop.f32.mrf.mxu0  ;;  %9900 = vmatmul.mubr.msk.f32.gmra.mxu0 %vm721_vm1, %v459_v11  ;;  %v464_v11 = vld [vmem:[%s10344_s21 + $0x300] sm:$0xff] }
 0x180   : > { %4595 = vst [vmem:[#allocation2 + $0x2a0] sm:$0xff] %v3918_v41  ;;  %v3919_v15 = vmax.f32 %v2062_v47, 0.0  ;;  %v11034_v17 = vadd.f32 %v2065_v13, %v10503_v56  ;;  %2357 = vmatprep.mubr.f32.mxu0 %v10266_v2 }
 0x181   : > { %v2067_v33 = vpop.f32.mrf.mxu0 }
 0x182   : > { %4596 = vst.msk [vmem:[#allocation2 + $0x2a8] sm:$0xff] %vm4511_vm2, %v3919_v15  ;;  %v3920_v18 = vmax.f32 %v11034_v17, 0.0  ;;  %v2068_v60 = vadd.f32 %v2067_v33, %v10507_v58 }
 0x183   : > { %v2071_v10 = vpop.f32.mrf.mxu0  ;;  %9901 = vmatmul.mubr.msk.f32.gmra.mxu0 %vm721_vm1, %v460_v27 }
 0x184   : > { %4597 = vst [vmem:[#allocation2 + $0x2b0] sm:$0xff] %v3920_v18  ;;  %v3921_v42 = vmax.f32 %v2068_v60, 0.0  ;;  %v11045_v29 = vadd.f32 %v2071_v10, %v10503_v56  ;;  %2363 = vmatprep.mubr.f32.mxu0 %v10266_v2  ;;  %v465_v60 = vld [vmem:[%s10344_s21 + $0x308] sm:$0xff] }
 0x185   : > { %v2073_v37 = vpop.f32.mrf.mxu0 }
 0x186   : > { %4598 = vst.msk [vmem:[#allocation2 + $0x2b8] sm:$0xff] %vm4511_vm2, %v3921_v42  ;;  %v3922_v46 = vmax.f32 %v11045_v29, 0.0  ;;  %v2074_v50 = vadd.f32 %v2073_v37, %v10507_v58 }
 0x187   : > { %v2077_v44 = vpop.f32.mrf.mxu0  ;;  %9902 = vmatmul.mubr.msk.f32.gmra.mxu0 %vm721_vm1, %v461_v34 }
 0x188   : > { %4599 = vst [vmem:[#allocation2 + $0x2c0] sm:$0xff] %v3922_v46  ;;  %v3923_v20 = vmax.f32 %v2074_v50, 0.0  ;;  %v11056_v48 = vadd.f32 %v2077_v44, %v10503_v56  ;;  %2369 = vmatprep.mubr.f32.mxu0 %v10266_v2 }
 0x189   : > { %v2079_v52 = vpop.f32.mrf.mxu0 }
 0x18a   : > { %4600 = vst.msk [vmem:[#allocation2 + $0x2c8] sm:$0xff] %vm4511_vm2, %v3923_v20  ;;  %v3924_v26 = vmax.f32 %v11056_v48, 0.0  ;;  %v2080_v61 = vadd.f32 %v2079_v52, %v10507_v58  ;;  %v466_v20 = vld [vmem:[%s10344_s21 + $0x310] sm:$0xff] }
 0x18b   : > { %v2083_v1 = vpop.f32.mrf.mxu0  ;;  %9903 = vmatmul.mubr.msk.f32.gmra.mxu0 %vm721_vm1, %v462_v35 }
 0x18c   : > { %4601 = vst [vmem:[#allocation2 + $0x2d0] sm:$0xff] %v3924_v26  ;;  %v3925_v5 = vmax.f32 %v2080_v61, 0.0  ;;  %v11067_v59 = vadd.f32 %v2083_v1, %v10503_v56  ;;  %2375 = vmatprep.mubr.f32.mxu0 %v10266_v2  ;;  %v11101_v1 = vsub.s32 3, %v10486_v51 }
 0x18d   : > { %v2085_v3 = vpop.f32.mrf.mxu0 }
 0x18e   : > { %4602 = vst.msk [vmem:[#allocation2 + $0x2d8] sm:$0xff] %vm4511_vm2, %v3925_v5  ;;  %v3926_v19 = vmax.f32 %v11067_v59, 0.0  ;;  %v2086_v21 = vadd.f32 %v2085_v3, %v10507_v58  ;;  %v467_v3 = vld [vmem:[%s10344_s21 + $0x318] sm:$0xff] }
 0x18f   : > { %v2089_v24 = vpop.f32.mrf.mxu0  ;;  %9904 = vmatmul.mubr.msk.f32.gmra.mxu0 %vm721_vm1, %v463_v36 }
 0x190   : > { %4603 = vst [vmem:[#allocation2 + $0x2e0] sm:$0xff] %v3926_v19  ;;  %v3927_v62 = vmax.f32 %v2086_v21, 0.0  ;;  %v2090_v12 = vadd.f32 %v2089_v24, %v10503_v56  ;;  %2381 = vmatprep.mubr.f32.mxu0 %v10266_v2  ;;  %v5884_v21 = vrot.slane %v10701_v57, %v11101_v1 }
 0x191   : > { %v2091_v14 = vpop.f32.mrf.mxu0 }
 0x192   : > { %4604 = vst.msk [vmem:[#allocation2 + $0x2e8] sm:$0xff] %vm4511_vm2, %v3927_v62  ;;  %v3928_v47 = vmax.f32 %v2090_v12, 0.0  ;;  %v2092_v13 = vadd.f32 %v2091_v14, %v10507_v58  ;;  %6116 = vmatprep.mubr.f32.mxu1 %v5884_v21  ;;  %v470_v21 = vld [vmem:[%s10344_s21 + $0x330] sm:$0xff] }
 0x193   : > { %v2095_v15 = vpop.f32.mrf.mxu0  ;;  %9905 = vmatmul.mubr.msk.f32.gmra.mxu0 %vm721_vm1, %v464_v11 }
 0x194   : > { %4605 = vst [vmem:[#allocation2 + $0x2f0] sm:$0xff] %v3928_v47  ;;  %v3929_v27 = vmax.f32 %v2092_v13, 0.0  ;;  %v11082_v33 = vadd.f32 %v2095_v15, %v10503_v56  ;;  %2387 = vmatprep.mubr.f32.mxu0 %v10266_v2 }
 0x195   : > { %v2097_v10 = vpop.f32.mrf.mxu0 }
 0x196   : > { %4606 = vst.msk [vmem:[#allocation2 + $0x2f8] sm:$0xff] %vm4511_vm2, %v3929_v27  ;;  %v3930_v42 = vmax.f32 %v11082_v33, 0.0  ;;  %v2098_v34 = vadd.f32 %v2097_v10, %v10507_v58  ;;  %v468_v27 = vld [vmem:[%s10344_s21 + $0x320] sm:$0xff]  ;;  %v5281_v10 = vld [vmem:[#allocation2 + $0x2d8] sm:$0xff] }
 0x197   : > { %v2101_v37 = vpop.f32.mrf.mxu0  ;;  %9906 = vmatmul.mubr.msk.f32.gmra.mxu0 %vm721_vm1, %v465_v60  ;;  %v492_v33 = vld [vmem:[%s10344_s21 + $0x3e0] sm:$0xff] }
 0x198   : > { %4607 = vst [vmem:[#allocation2 + $0x300] sm:$0xff] %v3930_v42  ;;  %v3931_v50 = vmax.f32 %v2098_v34, 0.0  ;;  %v11093_v44 = vadd.f32 %v2101_v37, %v10503_v56  ;;  %2393 = vmatprep.mubr.f32.mxu0 %v10266_v2 }
 0x199   : > { %v2103_v35 = vpop.f32.mrf.mxu0  ;;  %v5283_v13 = vld [vmem:[#allocation2 + $0x2e8] sm:$0xff] }
 0x19a   : > { %4608 = vst.msk [vmem:[#allocation2 + $0x308] sm:$0xff] %vm4511_vm2, %v3931_v50  ;;  %v3932_v52 = vmax.f32 %v11093_v44, 0.0  ;;  %v2104_v61 = vadd.f32 %v2103_v35, %v10507_v58  ;;  %v5279_v50 = vld [vmem:[#allocation2 + $0x2c8] sm:$0xff] }
 0x19b   : > { %v2107_v5 = vpop.f32.mrf.mxu0  ;;  %9907 = vmatmul.mubr.msk.f32.gmra.mxu0 %vm721_vm1, %v466_v20  ;;  %v469_v35 = vld [vmem:[%s10344_s21 + $0x328] sm:$0xff] }
 0x19c   : > { %4609 = vst [vmem:[#allocation2 + $0x310] sm:$0xff] %v3932_v52  ;;  %v3933_v59 = vmax.f32 %v2104_v61, 0.0  ;;  %v11107_v36 = vadd.f32 %v2107_v5, %v10503_v56  ;;  %2399 = vmatprep.mubr.f32.mxu0 %v10266_v2  ;;  %v5277_v5 = vld [vmem:[#allocation2 + $0x2b8] sm:$0xff] }
 0x19d   : > { %v2109_v24 = vpop.f32.mrf.mxu0  ;;  %v5285_v62 = vld [vmem:[#allocation2 + $0x2f8] sm:$0xff] }
 0x19e   : > { %4610 = vst.msk [vmem:[#allocation2 + $0x318] sm:$0xff] %vm4511_vm2, %v3933_v59  ;;  %v3934_v12 = vmax.f32 %v11107_v36, 0.0  ;;  %v2110_v11 = vadd.f32 %v2109_v24, %v10507_v58  ;;  %6052 = vmatprep.subr.mxu1 %v5285_v62  ;;  %v5273_v62 = vld [vmem:[#allocation2 + $0x298] sm:$0xff] }
 0x19f   : > { %v2113_v14 = vpop.f32.mrf.mxu0  ;;  %9908 = vmatmul.mubr.msk.f32.gmra.mxu0 %vm721_vm1, %v467_v3  ;;  %6053 = vmatpush1.msra.mxu1 %v3928_v47  ;;  %v5275_v3 = vld [vmem:[#allocation2 + $0x2a8] sm:$0xff] }
 0x1a0   : > { %4611 = vst [vmem:[#allocation2 + $0x320] sm:$0xff] %v3934_v12  ;;  %v3935_v57 = vmax.f32 %v2110_v11, 0.0  ;;  %v11120_v15 = vadd.f32 %v2113_v14, %v10503_v56  ;;  %6054 = vmatprep.subr.mxu1 %v5283_v13  ;;  %2405 = vmatprep.mubr.f32.mxu0 %v10266_v2  ;;  %v5271_v14 = vld [vmem:[#allocation2 + $0x288] sm:$0xff]  ;;  %v471_v13 = vld [vmem:[%s10344_s21 + $0x338] sm:$0xff] }
 0x1a1   : > { %v2115_v60 = vpop.f32.mrf.mxu0  ;;  %6055 = vmatpush1.msra.mxu1 %v3926_v19  ;;  %v5287_v36 = vld [vmem:[#allocation2 + $0x308] sm:$0xff] }
 0x1a2   : > { %4612 = vst.msk [vmem:[#allocation2 + $0x328] sm:$0xff] %vm4511_vm2, %v3935_v57  ;;  %v3936_v47 = vmax.f32 %v11120_v15, 0.0  ;;  %v2116_v34 = vadd.f32 %v2115_v60, %v10507_v58  ;;  %6056 = vmatprep.subr.mxu1 %v5281_v10  ;;  %v5267_v10 = vld [vmem:[#allocation2 + $0x268] sm:$0xff] }
 0x1a3   : > { %v2119_v37 = vpop.f32.mrf.mxu0  ;;  %9909 = vmatmul.mubr.msk.f32.gmra.mxu0 %vm721_vm1, %v468_v27  ;;  %6057 = vmatpush1.msra.mxu1 %v3924_v26  ;;  %v5269_v27 = vld [vmem:[#allocation2 + $0x278] sm:$0xff] }
 0x1a4   : > { %4613 = vst [vmem:[#allocation2 + $0x330] sm:$0xff] %v3936_v47  ;;  %v3937_v20 = vmax.f32 %v2116_v34, 0.0  ;;  %v11133_v19 = vadd.f32 %v2119_v37, %v10503_v56  ;;  %6058 = vmatprep.subr.mxu1 %v5279_v50  ;;  %2411 = vmatprep.mubr.f32.mxu0 %v10266_v2  ;;  %v472_v34 = vld [vmem:[%s10344_s21 + $0x340] sm:$0xff]  ;;  %v5265_v50 = vld [vmem:[#allocation2 + $0x258] sm:$0xff] }
 0x1a5   : > { %v2121_v61 = vpop.f32.mrf.mxu0  ;;  %6059 = vmatpush1.msra.mxu1 %v3922_v46 }
 0x1a6   : > { %4614 = vst.msk [vmem:[#allocation2 + $0x338] sm:$0xff] %vm4511_vm2, %v3937_v20  ;;  %v3938_v48 = vmax.f32 %v11133_v19, 0.0  ;;  %v2122_v26 = vadd.f32 %v2121_v61, %v10507_v58  ;;  %6060 = vmatprep.subr.mxu1 %v5277_v5  ;;  %v473_v61 = vld [vmem:[%s10344_s21 + $0x348] sm:$0xff] }
 0x1a7   : > { %v2125_v59 = vpop.f32.mrf.mxu0  ;;  %9910 = vmatmul.mubr.msk.f32.gmra.mxu0 %vm721_vm1, %v469_v35  ;;  %6061 = vmatpush1.msra.mxu1 %v3920_v18  ;;  %v5263_v35 = vld [vmem:[#allocation2 + $0x248] sm:$0xff] }
 0x1a8   : > { %4615 = vst [vmem:[#allocation2 + $0x340] sm:$0xff] %v3938_v48  ;;  %v3939_v29 = vmax.f32 %v2122_v26, 0.0  ;;  %v11148_v46 = vadd.f32 %v2125_v59, %v10503_v56  ;;  %6062 = vmatprep.subr.mxu1 %v5275_v3  ;;  %2417 = vmatprep.mubr.f32.mxu0 %v10266_v2  ;;  %v5261_v26 = vld [vmem:[#allocation2 + $0x238] sm:$0xff]  ;;  %v5259_v3 = vld [vmem:[#allocation2 + $0x228] sm:$0xff] }
 0x1a9   : > { %v2127_v24 = vpop.f32.mrf.mxu0  ;;  %6063 = vmatpush1.msra.mxu1 %v3918_v41  ;;  %v5291_v19 = vld [vmem:[#allocation2 + $0x328] sm:$0xff] }
 0x1aa   : > { %4616 = vst.msk [vmem:[#allocation2 + $0x348] sm:$0xff] %vm4511_vm2, %v3939_v29  ;;  %v3940_v17 = vmax.f32 %v11148_v46, 0.0  ;;  %v2128_v18 = vadd.f32 %v2127_v24, %v10507_v58  ;;  %6064 = vmatprep.subr.mxu1 %v5273_v62  ;;  %v474_v29 = vld [vmem:[%s10344_s21 + $0x350] sm:$0xff]  ;;  %v5257_v24 = vld [vmem:[#allocation2 + $0x218] sm:$0xff] }
 0x1ab   : > { %v2131_v11 = vpop.f32.mrf.mxu0  ;;  %9911 = vmatmul.mubr.msk.f32.gmra.mxu0 %vm721_vm1, %v470_v21  ;;  %6065 = vmatpush1.msra.mxu1 %v3916_v23 }
 0x1ac   : > { %4617 = vst [vmem:[#allocation2 + $0x350] sm:$0xff] %v3940_v17  ;;  %v3941_v30 = vmax.f32 %v2128_v18, 0.0  ;;  %v11163_v41 = vadd.f32 %v2131_v11, %v10503_v56  ;;  %6066 = vmatprep.subr.mxu1 %v5271_v14  ;;  %2423 = vmatprep.mubr.f32.mxu0 %v10266_v2  ;;  %v5255_v18 = vld [vmem:[#allocation2 + $0x208] sm:$0xff]  ;;  %v475_v11 = vld [vmem:[%s10344_s21 + $0x358] sm:$0xff] }
 0x1ad   : > { %v2133_v57 = vpop.f32.mrf.mxu0  ;;  %6067 = vmatpush1.msra.mxu1 %v3914_v40 }
 0x1ae   : > { %4618 = vst.msk [vmem:[#allocation2 + $0x358] sm:$0xff] %vm4511_vm2, %v3941_v30  ;;  %v3942_v45 = vmax.f32 %v11163_v41, 0.0  ;;  %v2134_v23 = vadd.f32 %v2133_v57, %v10507_v58  ;;  %6068 = vmatprep.subr.mxu1 %v5269_v27 }
 0x1af   : > { %v2137_v60 = vpop.f32.mrf.mxu0  ;;  %9912 = vmatmul.mubr.msk.f32.gmra.mxu0 %vm721_vm1, %v471_v13  ;;  %6069 = vmatpush1.msra.mxu1 %v3912_v0 }
 0x1b0   : > { %4619 = vst [vmem:[#allocation2 + $0x360] sm:$0xff] %v3942_v45  ;;  %v3943_v6 = vmax.f32 %v2134_v23, 0.0  ;;  %v11178_v40 = vadd.f32 %v2137_v60, %v10503_v56  ;;  %6070 = vmatprep.subr.mxu1 %v5267_v10  ;;  %2429 = vmatprep.mubr.f32.mxu0 %v10266_v2 }
 0x1b1   : > { %v2139_v37 = vpop.f32.mrf.mxu0  ;;  %6071 = vmatpush1.msra.mxu1 %v3910_v28 }
 0x1b2   : > { %4620 = vst.msk [vmem:[#allocation2 + $0x368] sm:$0xff] %vm4511_vm2, %v3943_v6  ;;  %v3944_v32 = vmax.f32 %v11178_v40, 0.0  ;;  %v2140_v0 = vadd.f32 %v2139_v37, %v10507_v58  ;;  %6072 = vmatprep.subr.mxu1 %v5265_v50 }
 0x1b3   : > { %v2143_v20 = vpop.f32.mrf.mxu0  ;;  %9913 = vmatmul.mubr.msk.f32.gmra.mxu0 %vm721_vm1, %v472_v34  ;;  %6073 = vmatpush1.msra.mxu1 %v3908_v22  ;;  %v477_v34 = vld [vmem:[%s10344_s21 + $0x368] sm:$0xff] }
 0x1b4   : > { %4621 = vst [vmem:[#allocation2 + $0x370] sm:$0xff] %v3944_v32  ;;  %v3945_v4 = vmax.f32 %v2140_v0, 0.0  ;;  %v11193_v28 = vadd.f32 %v2143_v20, %v10503_v56  ;;  %6074 = vmatprep.subr.mxu1 %v5263_v35  ;;  %2435 = vmatprep.mubr.f32.mxu0 %v10266_v2 }
 0x1b5   : > { %v2145_v5 = vpop.f32.mrf.mxu0  ;;  %6075 = vmatpush1.msra.mxu1 %v3906_v39 }
 0x1b6   : > { %4622 = vst.msk [vmem:[#allocation2 + $0x378] sm:$0xff] %vm4511_vm2, %v3945_v4  ;;  %v3946_v38 = vmax.f32 %v11193_v28, 0.0  ;;  %v2146_v22 = vadd.f32 %v2145_v5, %v10507_v58  ;;  %6076 = vmatprep.subr.mxu1 %v5261_v26 }
 0x1b7   : > { %v2149_v59 = vpop.f32.mrf.mxu0  ;;  %9914 = vmatmul.mubr.msk.f32.gmra.mxu0 %vm721_vm1, %v473_v61  ;;  %6077 = vmatpush1.msra.mxu1 %v3904_v7  ;;  %v478_v61 = vld [vmem:[%s10344_s21 + $0x370] sm:$0xff] }
 0x1b8   : > { %4623 = vst [vmem:[#allocation2 + $0x380] sm:$0xff] %v3946_v38  ;;  %v3947_v8 = vmax.f32 %v2146_v22, 0.0  ;;  %v11208_v39 = vadd.f32 %v2149_v59, %v10503_v56  ;;  %6078 = vmatprep.subr.mxu1 %v5259_v3  ;;  %2441 = vmatprep.mubr.f32.mxu0 %v10266_v2 }
 0x1b9   : > { %v2151_v21 = vpop.f32.mrf.mxu0  ;;  %6079 = vmatpush1.msra.mxu1 %v3902_v9 }
 0x1ba   : > { %4624 = vst.msk [vmem:[#allocation2 + $0x388] sm:$0xff] %vm4511_vm2, %v3947_v8  ;;  %v3948_v16 = vmax.f32 %v11208_v39, 0.0  ;;  %v2152_v7 = vadd.f32 %v2151_v21, %v10507_v58  ;;  %6080 = vmatprep.subr.mxu1 %v5257_v24 }
 0x1bb   : > { %v2155_v62 = vpop.f32.mrf.mxu0  ;;  %9915 = vmatmul.mubr.msk.f32.gmra.mxu0 %vm721_vm1, %v474_v29  ;;  %6081 = vmatpush1.msra.mxu1 %v3900_v54  ;;  %v479_v29 = vld [vmem:[%s10344_s21 + $0x378] sm:$0xff] }
 0x1bc   : > { %4625 = vst [vmem:[#allocation2 + $0x390] sm:$0xff] %v3948_v16  ;;  %v3949_v25 = vmax.f32 %v2152_v7, 0.0  ;;  %v11223_v9 = vadd.f32 %v2155_v62, %v10503_v56  ;;  %6082 = vmatprep.subr.mxu1 %v5255_v18  ;;  %2447 = vmatprep.mubr.f32.mxu0 %v10266_v2 }
 0x1bd   : > { %v2157_v14 = vpop.f32.mrf.mxu0  ;;  %6083 = vmatpush1.msra.mxu1 %v3898_v31 }
 0x1be   : > { %4626 = vst.msk [vmem:[#allocation2 + $0x398] sm:$0xff] %vm4511_vm2, %v3949_v25  ;;  %v3950_v43 = vmax.f32 %v11223_v9, 0.0  ;;  %v2158_v54 = vadd.f32 %v2157_v14, %v10507_v58 }
 0x1bf   : > { %v2161_v30 = vpop.f32.mrf.mxu0  ;;  %9916 = vmatmul.mubr.msk.f32.gmra.mxu0 %vm721_vm1, %v475_v11  ;;  %v480_v11 = vld [vmem:[%s10344_s21 + $0x380] sm:$0xff] }
 0x1c0   : > { %4627 = vst [vmem:[#allocation2 + $0x3a0] sm:$0xff] %v3950_v43  ;;  %v3951_v13 = vmax.f32 %v2158_v54, 0.0  ;;  %v11236_v57 = vadd.f32 %v2161_v30, %v10503_v56  ;;  %2453 = vmatprep.mubr.f32.mxu0 %v10266_v2 }
 0x1c1   : > { %v2163_v31 = vpop.f32.mrf.mxu0 }
 0x1c2   : > { %4628 = vst.msk [vmem:[#allocation2 + $0x3a8] sm:$0xff] %vm4511_vm2, %v3951_v13  ;;  %v3952_v27 = vmax.f32 %v11236_v57, 0.0  ;;  %v2164_v23 = vadd.f32 %v2163_v31, %v10507_v58 }
 0x1c3   : > { %v2167_v60 = vpop.f32.mrf.mxu0  ;;  %9917 = vmatmul.mubr.msk.f32.gmra.mxu0 %vm721_vm1, %v476_v63 }
 0x1c4   : > { %4629 = vst [vmem:[#allocation2 + $0x3b0] sm:$0xff] %v3952_v27  ;;  %v3953_v10 = vmax.f32 %v2164_v23, 0.0  ;;  %v11247_v6 = vadd.f32 %v2167_v60, %v10503_v56  ;;  %2459 = vmatprep.mubr.f32.mxu0 %v10266_v2  ;;  %v481_v23 = vld [vmem:[%s10344_s21 + $0x388] sm:$0xff] }
 0x1c5   : > { %v2169_v37 = vpop.f32.mrf.mxu0 }
 0x1c6   : > { %4630 = vst.msk [vmem:[#allocation2 + $0x3b8] sm:$0xff] %vm4511_vm2, %v3953_v10  ;;  %v3954_v50 = vmax.f32 %v11247_v6, 0.0  ;;  %v2170_v0 = vadd.f32 %v2169_v37, %v10507_v58 }
 0x1c7   : > { %v2173_v20 = vpop.f32.mrf.mxu0  ;;  %9918 = vmatmul.mubr.msk.f32.gmra.mxu0 %vm721_vm1, %v477_v34 }
 0x1c8   : > { %4631 = vst [vmem:[#allocation2 + $0x3c0] sm:$0xff] %v3954_v50  ;;  %v3955_v35 = vmax.f32 %v2170_v0, 0.0  ;;  %v11258_v4 = vadd.f32 %v2173_v20, %v10503_v56  ;;  %2465 = vmatprep.mubr.f32.mxu0 %v10266_v2 }
 0x1c9   : > { %v2175_v5 = vpop.f32.mrf.mxu0 }
 0x1ca   : > { %4632 = vst.msk [vmem:[#allocation2 + $0x3c8] sm:$0xff] %vm4511_vm2, %v3955_v35  ;;  %v3956_v26 = vmax.f32 %v11258_v4, 0.0  ;;  %v2176_v22 = vadd.f32 %v2175_v5, %v10507_v58  ;;  %v482_v35 = vld [vmem:[%s10344_s21 + $0x390] sm:$0xff] }
 0x1cb   : > { %v2179_v59 = vpop.f32.mrf.mxu0  ;;  %9919 = vmatmul.mubr.msk.f32.gmra.mxu0 %vm721_vm1, %v478_v61 }
 0x1cc   : > { %4633 = vst [vmem:[#allocation2 + $0x3d0] sm:$0xff] %v3956_v26  ;;  %v3957_v3 = vmax.f32 %v2176_v22, 0.0  ;;  %v11269_v8 = vadd.f32 %v2179_v59, %v10503_v56  ;;  %2471 = vmatprep.mubr.f32.mxu0 %v10266_v2 }
 0x1cd   : > { %v2181_v21 = vpop.f32.mrf.mxu0 }
 0x1ce   : > { %4634 = vst.msk [vmem:[#allocation2 + $0x3d8] sm:$0xff] %vm4511_vm2, %v3957_v3  ;;  %v3958_v24 = vmax.f32 %v11269_v8, 0.0  ;;  %v2182_v7 = vadd.f32 %v2181_v21, %v10507_v58 }
 0x1cf   : > { %v2185_v62 = vpop.f32.mrf.mxu0  ;;  %9920 = vmatmul.mubr.msk.f32.gmra.mxu0 %vm721_vm1, %v479_v29  ;;  %v483_v29 = vld [vmem:[%s10344_s21 + $0x398] sm:$0xff] }
 0x1d0   : > { %4635 = vst [vmem:[#allocation2 + $0x3e0] sm:$0xff] %v3958_v24  ;;  %v3959_v18 = vmax.f32 %v2182_v7, 0.0  ;;  %v2186_v25 = vadd.f32 %v2185_v62, %v10503_v56  ;;  %2477 = vmatprep.mubr.f32.mxu0 %v10266_v2 }
 0x1d1   : > { %v2187_v14 = vpop.f32.mrf.mxu0 }
 0x1d2   : > { %4636 = vst.msk [vmem:[#allocation2 + $0x3e8] sm:$0xff] %vm4511_vm2, %v3959_v18  ;;  %v3960_v54 = vmax.f32 %v2186_v25, 0.0  ;;  %v2188_v30 = vadd.f32 %v2187_v14, %v10507_v58 }
 0x1d3   : > { %v2191_v13 = vpop.f32.mrf.mxu0  ;;  %9921 = vmatmul.mubr.msk.f32.gmra.mxu0 %vm721_vm1, %v480_v11 }
 0x1d4   : > { %4637 = vst [vmem:[#allocation2 + $0x3f0] sm:$0xff] %v3960_v54  ;;  %v3961_v63 = vmax.f32 %v2188_v30, 0.0  ;;  %v11284_v31 = vadd.f32 %v2191_v13, %v10503_v56  ;;  %2483 = vmatprep.mubr.f32.mxu0 %v10266_v2  ;;  %v484_v13 = vld [vmem:[%s10344_s21 + $0x3a0] sm:$0xff] }
 0x1d5   : > { %v2193_v60 = vpop.f32.mrf.mxu0 }
 0x1d6   : > { %4638 = vst.msk [vmem:[#allocation2 + $0x3f8] sm:$0xff] %vm4511_vm2, %v3961_v63  ;;  %v3962_v10 = vmax.f32 %v11284_v31, 0.0  ;;  %v2194_v34 = vadd.f32 %v2193_v60, %v10507_v58  ;;  %v508_v31 = vld [vmem:[%s10344_s21 + $0x460] sm:$0xff] }
 0x1d7   : > { %v2197_v37 = vpop.f32.mrf.mxu0  ;;  %9922 = vmatmul.mubr.msk.f32.gmra.mxu0 %vm721_vm1, %v481_v23  ;;  %v5313_v23 = vld [vmem:[#allocation2 + $0x3d8] sm:$0xff] }
 0x1d8   : > { %4639 = vst [vmem:[#allocation2 + $0x400] sm:$0xff] %v3962_v10  ;;  %v3963_v0 = vmax.f32 %v2194_v34, 0.0  ;;  %v11295_v20 = vadd.f32 %v2197_v37, %v10503_v56  ;;  %2489 = vmatprep.mubr.f32.mxu0 %v10266_v2  ;;  %v5311_v37 = vld [vmem:[#allocation2 + $0x3c8] sm:$0xff] }
 0x1d9   : > { %v2199_v61 = vpop.f32.mrf.mxu0  ;;  %v5315_v11 = vld [vmem:[#allocation2 + $0x3e8] sm:$0xff] }
 0x1da   : > { %4640 = vst.msk [vmem:[#allocation2 + $0x408] sm:$0xff] %vm4511_vm2, %v3963_v0  ;;  %v3964_v5 = vmax.f32 %v11295_v20, 0.0  ;;  %v2200_v22 = vadd.f32 %v2199_v61, %v10507_v58 }
 0x1db   : > { %v2203_v59 = vpop.f32.mrf.mxu0  ;;  %9923 = vmatmul.mubr.msk.f32.gmra.mxu0 %vm721_vm1, %v482_v35  ;;  %v485_v35 = vld [vmem:[%s10344_s21 + $0x3a8] sm:$0xff] }
 0x1dc   : > { %4641 = vst [vmem:[#allocation2 + $0x410] sm:$0xff] %v3964_v5  ;;  %v3965_v3 = vmax.f32 %v2200_v22, 0.0  ;;  %v11306_v8 = vadd.f32 %v2203_v59, %v10503_v56  ;;  %2495 = vmatprep.mubr.f32.mxu0 %v10266_v2  ;;  %v5309_v22 = vld [vmem:[#allocation2 + $0x3b8] sm:$0xff] }
 0x1dd   : > { %v2205_v21 = vpop.f32.mrf.mxu0  ;;  %v5317_v7 = vld [vmem:[#allocation2 + $0x3f8] sm:$0xff] }
 0x1de   : > { %4642 = vst.msk [vmem:[#allocation2 + $0x418] sm:$0xff] %vm4511_vm2, %v3965_v3  ;;  %v3966_v62 = vmax.f32 %v11306_v8, 0.0  ;;  %v2206_v18 = vadd.f32 %v2205_v21, %v10507_v58  ;;  %6084 = vmatprep.subr.mxu1 %v5317_v7  ;;  %v5307_v3 = vld [vmem:[#allocation2 + $0x3a8] sm:$0xff]  ;;  %v5305_v7 = vld [vmem:[#allocation2 + $0x398] sm:$0xff] }
 0x1df   : > { %v2209_v25 = vpop.f32.mrf.mxu0  ;;  %9924 = vmatmul.mubr.msk.f32.gmra.mxu0 %vm721_vm1, %v483_v29  ;;  %6085 = vmatpush2.msra.mxu1 %v3960_v54  ;;  %v486_v29 = vld [vmem:[%s10344_s21 + $0x3b0] sm:$0xff] }
 0x1e0   : > { %4643 = vst [vmem:[#allocation2 + $0x420] sm:$0xff] %v3966_v62  ;;  %v3967_v14 = vmax.f32 %v2206_v18, 0.0  ;;  %v11317_v30 = vadd.f32 %v2209_v25, %v10503_v56  ;;  %6086 = vmatprep.subr.mxu1 %v5315_v11  ;;  %2501 = vmatprep.mubr.f32.mxu0 %v10266_v2  ;;  %v5303_v25 = vld [vmem:[#allocation2 + $0x388] sm:$0xff]  ;;  %v487_v11 = vld [vmem:[%s10344_s21 + $0x3b8] sm:$0xff] }
 0x1e1   : > { %v2211_v63 = vpop.f32.mrf.mxu0  ;;  %6087 = vmatpush2.msra.mxu1 %v3958_v24 }
 0x1e2   : > { %4644 = vst.msk [vmem:[#allocation2 + $0x428] sm:$0xff] %vm4511_vm2, %v3967_v14  ;;  %v3968_v54 = vmax.f32 %v11317_v30, 0.0  ;;  %v2212_v60 = vadd.f32 %v2211_v63, %v10507_v58  ;;  %6088 = vmatprep.subr.mxu1 %v5313_v23  ;;  %v5299_v23 = vld [vmem:[#allocation2 + $0x368] sm:$0xff] }
 0x1e3   : > { %v2215_v34 = vpop.f32.mrf.mxu0  ;;  %9925 = vmatmul.mubr.msk.f32.gmra.mxu0 %vm721_vm1, %v484_v13  ;;  %6089 = vmatpush2.msra.mxu1 %v3956_v26  ;;  %v5301_v13 = vld [vmem:[#allocation2 + $0x378] sm:$0xff] }
 0x1e4   : > { %4645 = vst [vmem:[#allocation2 + $0x430] sm:$0xff] %v3968_v54  ;;  %v3969_v0 = vmax.f32 %v2212_v60, 0.0  ;;  %v11330_v24 = vadd.f32 %v2215_v34, %v10503_v56  ;;  %6090 = vmatprep.subr.mxu1 %v5311_v37  ;;  %2507 = vmatprep.mubr.f32.mxu0 %v10266_v2  ;;  %v488_v60 = vld [vmem:[%s10344_s21 + $0x3c0] sm:$0xff]  ;;  %v5297_v37 = vld [vmem:[#allocation2 + $0x358] sm:$0xff] }
 0x1e5   : > { %v2217_v61 = vpop.f32.mrf.mxu0  ;;  %6091 = vmatpush2.msra.mxu1 %v3954_v50 }
 0x1e6   : > { %4646 = vst.msk [vmem:[#allocation2 + $0x438] sm:$0xff] %vm4511_vm2, %v3969_v0  ;;  %v3970_v4 = vmax.f32 %v11330_v24, 0.0  ;;  %v2218_v26 = vadd.f32 %v2217_v61, %v10507_v58  ;;  %6092 = vmatprep.subr.mxu1 %v5309_v22  ;;  %v489_v61 = vld [vmem:[%s10344_s21 + $0x3c8] sm:$0xff] }
 0x1e7   : > { %v2221_v59 = vpop.f32.mrf.mxu0  ;;  %9926 = vmatmul.mubr.msk.f32.gmra.mxu0 %vm721_vm1, %v485_v35  ;;  %6093 = vmatpush2.msra.mxu1 %v3952_v27  ;;  %v5295_v35 = vld [vmem:[#allocation2 + $0x348] sm:$0xff] }
 0x1e8   : > { %4647 = vst [vmem:[#allocation2 + $0x440] sm:$0xff] %v3970_v4  ;;  %v3971_v6 = vmax.f32 %v2218_v26, 0.0  ;;  %v11345_v50 = vadd.f32 %v2221_v59, %v10503_v56  ;;  %6094 = vmatprep.subr.mxu1 %v5307_v3  ;;  %2513 = vmatprep.mubr.f32.mxu0 %v10266_v2  ;;  %v5293_v26 = vld [vmem:[#allocation2 + $0x338] sm:$0xff]  ;;  %v11400_v59 = vsub.s32 2, %v10486_v51 }
 0x1e9   : > { %v2223_v21 = vpop.f32.mrf.mxu0  ;;  %6095 = vmatpush2.msra.mxu1 %v3950_v43 }
 0x1ea   : > { %4648 = vst.msk [vmem:[#allocation2 + $0x448] sm:$0xff] %vm4511_vm2, %v3971_v6  ;;  %v3972_v57 = vmax.f32 %v11345_v50, 0.0  ;;  %v2224_v27 = vadd.f32 %v2223_v21, %v10507_v58  ;;  %6096 = vmatprep.subr.mxu1 %v5305_v7  ;;  %v5289_v7 = vld [vmem:[#allocation2 + $0x318] sm:$0xff] }
 0x1eb   : > { %v2227_v18 = vpop.f32.mrf.mxu0  ;;  %9927 = vmatmul.mubr.msk.f32.gmra.mxu0 %vm721_vm1, %v486_v29  ;;  %6097 = vmatpush2.msra.mxu1 %v3948_v16  ;;  %v490_v29 = vld [vmem:[%s10344_s21 + $0x3d0] sm:$0xff] }
 0x1ec   : > { %4649 = vst [vmem:[#allocation2 + $0x450] sm:$0xff] %v3972_v57  ;;  %v3973_v9 = vmax.f32 %v2224_v27, 0.0  ;;  %v11360_v43 = vadd.f32 %v2227_v18, %v10503_v56  ;;  %6098 = vmatprep.subr.mxu1 %v5303_v25  ;;  %2519 = vmatprep.mubr.f32.mxu0 %v10266_v2  ;;  %v11420_v27 = vld [vmem:[%s16311_s4] sm:$0xff] }
 0x1ed   : > { %v2229_v14 = vpop.f32.mrf.mxu0  ;;  %6099 = vmatpush2.msra.mxu1 %v3946_v38  ;;  %v5880_v18 = vrot.slane %v11420_v27, %v11400_v59 }
 0x1ee   : > { %4650 = vst.msk [vmem:[#allocation2 + $0x458] sm:$0xff] %vm4511_vm2, %v3973_v9  ;;  %v3974_v39 = vmax.f32 %v11360_v43, 0.0  ;;  %v2230_v16 = vadd.f32 %v2229_v14, %v10507_v58  ;;  %6100 = vmatprep.subr.mxu1 %v5301_v13 }
 0x1ef   : > { %v2233_v63 = vpop.f32.mrf.mxu0  ;;  %9928 = vmatmul.mubr.msk.f32.gmra.mxu0 %vm721_vm1, %v487_v11  ;;  %6101 = vmatpush2.msra.mxu1 %v3944_v32  ;;  %v491_v11 = vld [vmem:[%s10344_s21 + $0x3d8] sm:$0xff] }
 0x1f0   : > { %4651 = vst [vmem:[#allocation2 + $0x460] sm:$0xff] %v3974_v39  ;;  %v3975_v28 = vmax.f32 %v2230_v16, 0.0  ;;  %v11375_v38 = vadd.f32 %v2233_v63, %v10503_v56  ;;  %6102 = vmatprep.subr.mxu1 %v5299_v23  ;;  %2525 = vmatprep.mubr.f32.mxu0 %v10266_v2 }
 0x1f1   : > { %v2235_v34 = vpop.f32.mrf.mxu0  ;;  %6103 = vmatpush2.msra.mxu1 %v3942_v45 }
 0x1f2   : > { %4652 = vst.msk [vmem:[#allocation2 + $0x468] sm:$0xff] %vm4511_vm2, %v3975_v28  ;;  %v3976_v40 = vmax.f32 %v11375_v38, 0.0  ;;  %v2236_v32 = vadd.f32 %v2235_v34, %v10507_v58  ;;  %6104 = vmatprep.subr.mxu1 %v5297_v37 }
 0x1f3   : > { %v2239_v0 = vpop.f32.mrf.mxu0  ;;  %9929 = vmatmul.mubr.msk.f32.gmra.mxu0 %vm721_vm1, %v488_v60  ;;  %6105 = vmatpush2.msra.mxu1 %v3940_v17 }
 0x1f4   : > { %4653 = vst [vmem:[#allocation2 + $0x470] sm:$0xff] %v3976_v40  ;;  %v3977_v41 = vmax.f32 %v2236_v32, 0.0  ;;  %v11390_v45 = vadd.f32 %v2239_v0, %v10503_v56  ;;  %6106 = vmatprep.subr.mxu1 %v5295_v35  ;;  %2531 = vmatprep.mubr.f32.mxu0 %v10266_v2  ;;  %v493_v32 = vld [vmem:[%s10344_s21 + $0x3e8] sm:$0xff] }
 0x1f5   : > { %v2241_v22 = vpop.f32.mrf.mxu0  ;;  %6107 = vmatpush2.msra.mxu1 %v3938_v48 }
 0x1f6   : > { %4654 = vst.msk [vmem:[#allocation2 + $0x478] sm:$0xff] %vm4511_vm2, %v3977_v41  ;;  %v3978_v46 = vmax.f32 %v11390_v45, 0.0  ;;  %v2242_v17 = vadd.f32 %v2241_v22, %v10507_v58  ;;  %6108 = vmatprep.subr.mxu1 %v5293_v26 }
 0x1f7   : > { %v2245_v3 = vpop.f32.mrf.mxu0  ;;  %9930 = vmatmul.mubr.msk.f32.gmra.mxu0 %vm721_vm1, %v489_v61  ;;  %6109 = vmatpush2.msra.mxu1 %v3936_v47 }
 0x1f8   : > { %4655 = vst [vmem:[#allocation2 + $0x480] sm:$0xff] %v3978_v46  ;;  %v3979_v48 = vmax.f32 %v2242_v17, 0.0  ;;  %v11408_v6 = vadd.f32 %v2245_v3, %v10503_v56  ;;  %6110 = vmatprep.subr.mxu1 %v5291_v19  ;;  %2537 = vmatprep.mubr.f32.mxu0 %v10266_v2  ;;  %v494_v17 = vld [vmem:[%s10344_s21 + $0x3f0] sm:$0xff] }
 0x1f9   : > { %v2247_v21 = vpop.f32.mrf.mxu0  ;;  %6111 = vmatpush2.msra.mxu1 %v3934_v12 }
 0x1fa   : > { %4656 = vst.msk [vmem:[#allocation2 + $0x488] sm:$0xff] %vm4511_vm2, %v3979_v48  ;;  %v3980_v15 = vmax.f32 %v11408_v6, 0.0  ;;  %v2248_v47 = vadd.f32 %v2247_v21, %v10507_v58  ;;  %6112 = vmatprep.subr.mxu1 %v5289_v7 }
 0x1fb   : > { %v2251_v25 = vpop.f32.mrf.mxu0  ;;  %9931 = vmatmul.mubr.msk.f32.gmra.mxu0 %vm721_vm1, %v490_v29  ;;  %6113 = vmatpush2.msra.mxu1 %v3932_v52 }
 0x1fc   : > { %4657 = vst [vmem:[#allocation2 + $0x490] sm:$0xff] %v3980_v15  ;;  %v3981_v12 = vmax.f32 %v2248_v47, 0.0  ;;  %v11430_v9 = vadd.f32 %v2251_v25, %v10503_v56  ;;  %6114 = vmatprep.subr.mxu1 %v5287_v36  ;;  %2543 = vmatprep.mubr.f32.mxu0 %v10266_v2  ;;  %v495_v47 = vld [vmem:[%s10344_s21 + $0x3f8] sm:$0xff] }
 0x1fd   : > { %v2253_v14 = vpop.f32.mrf.mxu0  ;;  %6115 = vmatpush2.msra.mxu1 %v3930_v42 }
 0x1fe   : > { %4658 = vst.msk [vmem:[#allocation2 + $0x498] sm:$0xff] %vm4511_vm2, %v3981_v12  ;;  %v3982_v44 = vmax.f32 %v11430_v9, 0.0  ;;  %v2254_v52 = vadd.f32 %v2253_v14, %v10507_v58  ;;  %6117 = vmatmul.mubr.f32.vlgmr.msra.gmra.mxu1 %v5880_v18 }
 0x1ff   : > { %v2257_v13 = vpop.f32.mrf.mxu0  ;;  %9932 = vmatmul.mubr.msk.f32.gmra.mxu0 %vm721_vm1, %v491_v11 }
 0x200   : > { %4659 = vst [vmem:[#allocation2 + $0x4a0] sm:$0xff] %v3982_v44  ;;  %v3983_v16 = vmax.f32 %v2254_v52, 0.0  ;;  %v11443_v63 = vadd.f32 %v2257_v13, %v10503_v56  ;;  %2549 = vmatprep.mubr.f32.mxu0 %v10266_v2  ;;  %v496_v52 = vld [vmem:[%s10344_s21 + $0x400] sm:$0xff] }
 0x201   : > { %v2259_v42 = vpop.f32.mrf.mxu0 }
 0x202   : > { %4660 = vst.msk [vmem:[#allocation2 + $0x4a8] sm:$0xff] %vm4511_vm2, %v3983_v16  ;;  %v3984_v23 = vmax.f32 %v11443_v63, 0.0  ;;  %v2260_v28 = vadd.f32 %v2259_v42, %v10507_v58 }
 0x203   : > { %v2263_v60 = vpop.f32.mrf.mxu0  ;;  %9933 = vmatmul.mubr.msk.f32.gmra.mxu0 %vm721_vm1, %v492_v33 }
 0x204   : > { %4661 = vst [vmem:[#allocation2 + $0x4b0] sm:$0xff] %v3984_v23  ;;  %v3985_v34 = vmax.f32 %v2260_v28, 0.0  ;;  %v11454_v37 = vadd.f32 %v2263_v60, %v10503_v56  ;;  %2555 = vmatprep.mubr.f32.mxu0 %v10266_v2 }
 0x205   : > { %v2265_v0 = vpop.f32.mrf.mxu0 }
 0x206   : > { %4662 = vst.msk [vmem:[#allocation2 + $0x4b8] sm:$0xff] %vm4511_vm2, %v3985_v34  ;;  %v3986_v35 = vmax.f32 %v11454_v37, 0.0  ;;  %v2266_v41 = vadd.f32 %v2265_v0, %v10507_v58  ;;  %v497_v34 = vld [vmem:[%s10344_s21 + $0x408] sm:$0xff] }
 0x207   : > { %v2269_v61 = vpop.f32.mrf.mxu0  ;;  %9934 = vmatmul.mubr.msk.f32.gmra.mxu0 %vm721_vm1, %v493_v32 }
 0x208   : > { %4663 = vst [vmem:[#allocation2 + $0x4c0] sm:$0xff] %v3986_v35  ;;  %v3987_v22 = vmax.f32 %v2266_v41, 0.0  ;;  %v11465_v26 = vadd.f32 %v2269_v61, %v10503_v56  ;;  %2561 = vmatprep.mubr.f32.mxu0 %v10266_v2 }
 0x209   : > { %v2271_v3 = vpop.f32.mrf.mxu0 }
 0x20a   : > { %4664 = vst.msk [vmem:[#allocation2 + $0x4c8] sm:$0xff] %vm4511_vm2, %v3987_v22  ;;  %v3988_v19 = vmax.f32 %v11465_v26, 0.0  ;;  %v2272_v48 = vadd.f32 %v2271_v3, %v10507_v58  ;;  %v498_v3 = vld [vmem:[%s10344_s21 + $0x410] sm:$0xff] }
 0x20b   : > { %v2275_v29 = vpop.f32.mrf.mxu0  ;;  %9935 = vmatmul.mubr.msk.f32.gmra.mxu0 %vm721_vm1, %v494_v17 }
 0x20c   : > { %4665 = vst [vmem:[#allocation2 + $0x4d0] sm:$0xff] %v3988_v19  ;;  %v3989_v21 = vmax.f32 %v2272_v48, 0.0  ;;  %v11476_v7 = vadd.f32 %v2275_v29, %v10503_v56  ;;  %2567 = vmatprep.mubr.f32.mxu0 %v10266_v2 }
 0x20d   : > { %v2277_v18 = vpop.f32.mrf.mxu0 }
 0x20e   : > { %4666 = vst.msk [vmem:[#allocation2 + $0x4d8] sm:$0xff] %vm4511_vm2, %v3989_v21  ;;  %v3990_v25 = vmax.f32 %v11476_v7, 0.0  ;;  %v2278_v36 = vadd.f32 %v2277_v18, %v10507_v58  ;;  %v11510_v7 = vsub.s32 5, %v10486_v51 }
 0x20f   : > { %v2281_v12 = vpop.f32.mrf.mxu0  ;;  %9936 = vmatmul.mubr.msk.f32.gmra.mxu0 %vm721_vm1, %v495_v47 }
 0x210   : > { %4667 = vst [vmem:[#allocation2 + $0x4e0] sm:$0xff] %v3990_v25  ;;  %v3991_v11 = vmax.f32 %v2278_v36, 0.0  ;;  %v2282_v14 = vadd.f32 %v2281_v12, %v10503_v56  ;;  %2573 = vmatprep.mubr.f32.mxu0 %v10266_v2  ;;  %16325 = vst [vmem:[#allocation5_spill] sm:$0xff] %v11510_v7  ;;  %v499_v12 = vld [vmem:[%s10344_s21 + $0x418] sm:$0xff] }
 0x211   : > { %v2283_v13 = vpop.f32.mrf.mxu0 }
 0x212   : > { %4668 = vst.msk [vmem:[#allocation2 + $0x4e8] sm:$0xff] %vm4511_vm2, %v3991_v11  ;;  %v3992_v16 = vmax.f32 %v2282_v14, 0.0  ;;  %v2284_v33 = vadd.f32 %v2283_v13, %v10507_v58  ;;  %v5892_v11 = vrot.slane %v11420_v27, %v11510_v7 }
 0x213   : > { %v2287_v42 = vpop.f32.mrf.mxu0  ;;  %9937 = vmatmul.mubr.msk.f32.gmra.mxu0 %vm721_vm1, %v496_v52 }
 0x214   : > { %4669 = vst [vmem:[#allocation2 + $0x4f0] sm:$0xff] %v3992_v16  ;;  %v3993_v28 = vmax.f32 %v2284_v33, 0.0  ;;  %v11491_v60 = vadd.f32 %v2287_v42, %v10503_v56  ;;  %2579 = vmatprep.mubr.f32.mxu0 %v10266_v2  ;;  %6187 = vmatprep.mubr.f32.mxu1 %v5892_v11  ;;  %v5341_v11 = vld [vmem:[#allocation2 + $0x4b8] sm:$0xff] }
 0x215   : > { %v2289_v32 = vpop.f32.mrf.mxu0 }
 0x216   : > { %4670 = vst.msk [vmem:[#allocation2 + $0x4f8] sm:$0xff] %vm4511_vm2, %v3993_v28  ;;  %v3994_v0 = vmax.f32 %v11491_v60, 0.0  ;;  %v2290_v41 = vadd.f32 %v2289_v32, %v10507_v58  ;;  %v524_v60 = vld [vmem:[%s10344_s21 + $0x4e0] sm:$0xff] }
 0x217   : > { %v2293_v61 = vpop.f32.mrf.mxu0  ;;  %9938 = vmatmul.mubr.msk.f32.gmra.mxu0 %vm721_vm1, %v497_v34 }
 0x218   : > { %4671 = vst [vmem:[#allocation2 + $0x500] sm:$0xff] %v3994_v0  ;;  %v3995_v22 = vmax.f32 %v2290_v41, 0.0  ;;  %v11502_v17 = vadd.f32 %v2293_v61, %v10503_v56  ;;  %2585 = vmatprep.mubr.f32.mxu0 %v10266_v2  ;;  %v500_v41 = vld [vmem:[%s10344_s21 + $0x420] sm:$0xff] }
 0x219   : > { %v2295_v48 = vpop.f32.mrf.mxu0  ;;  %v5347_v28 = vld [vmem:[#allocation2 + $0x4e8] sm:$0xff] }
 0x21a   : > { %4672 = vst.msk [vmem:[#allocation2 + $0x508] sm:$0xff] %vm4511_vm2, %v3995_v22  ;;  %v3996_v29 = vmax.f32 %v11502_v17, 0.0  ;;  %v2296_v21 = vadd.f32 %v2295_v48, %v10507_v58  ;;  %v5345_v22 = vld [vmem:[#allocation2 + $0x4d8] sm:$0xff] }
 0x21b   : > { %v2299_v47 = vpop.f32.mrf.mxu0  ;;  %9939 = vmatmul.mubr.msk.f32.gmra.mxu0 %vm721_vm1, %v498_v3 }
 0x21c   : > { %4673 = vst [vmem:[#allocation2 + $0x510] sm:$0xff] %v3996_v29  ;;  %v3997_v18 = vmax.f32 %v2296_v21, 0.0  ;;  %v11516_v36 = vadd.f32 %v2299_v47, %v10503_v56  ;;  %2591 = vmatprep.mubr.f32.mxu0 %v10266_v2  ;;  %v5343_v21 = vld [vmem:[#allocation2 + $0x4c8] sm:$0xff] }
 0x21d   : > { %v2301_v14 = vpop.f32.mrf.mxu0  ;;  %v5349_v52 = vld [vmem:[#allocation2 + $0x4f8] sm:$0xff] }
 0x21e   : > { %4674 = vst.msk [vmem:[#allocation2 + $0x518] sm:$0xff] %vm4511_vm2, %v3997_v18  ;;  %v3998_v13 = vmax.f32 %v11516_v36, 0.0  ;;  %v2302_v33 = vadd.f32 %v2301_v14, %v10507_v58  ;;  %6123 = vmatprep.subr.mxu1 %v5349_v52  ;;  %v501_v18 = vld [vmem:[%s10344_s21 + $0x428] sm:$0xff] }
 0x21f   : > { %v2305_v42 = vpop.f32.mrf.mxu0  ;;  %9940 = vmatmul.mubr.msk.f32.gmra.mxu0 %vm721_vm1, %v499_v12  ;;  %6124 = vmatpush1.msra.mxu1 %v3992_v16  ;;  %v5339_v52 = vld [vmem:[#allocation2 + $0x4a8] sm:$0xff] }
 0x220   : > { %4675 = vst [vmem:[#allocation2 + $0x520] sm:$0xff] %v3998_v13  ;;  %v3999_v34 = vmax.f32 %v2302_v33, 0.0  ;;  %v11529_v32 = vadd.f32 %v2305_v42, %v10503_v56  ;;  %6125 = vmatprep.subr.mxu1 %v5347_v28  ;;  %2597 = vmatprep.mubr.f32.mxu0 %v10266_v2  ;;  %v502_v33 = vld [vmem:[%s10344_s21 + $0x430] sm:$0xff]  ;;  %v5337_v28 = vld [vmem:[#allocation2 + $0x498] sm:$0xff] }
 0x221   : > { %v2307_v61 = vpop.f32.mrf.mxu0  ;;  %6126 = vmatpush1.msra.mxu1 %v3990_v25  ;;  %v5351_v36 = vld [vmem:[#allocation2 + $0x508] sm:$0xff] }
 0x222   : > { %4676 = vst.msk [vmem:[#allocation2 + $0x528] sm:$0xff] %vm4511_vm2, %v3999_v34  ;;  %v4000_v16 = vmax.f32 %v11529_v32, 0.0  ;;  %v2308_v3 = vadd.f32 %v2307_v61, %v10507_v58  ;;  %6127 = vmatprep.subr.mxu1 %v5345_v22  ;;  %v503_v61 = vld [vmem:[%s10344_s21 + $0x438] sm:$0xff] }
 0x223   : > { %v2311_v48 = vpop.f32.mrf.mxu0  ;;  %9941 = vmatmul.mubr.msk.f32.gmra.mxu0 %vm721_vm1, %v500_v41  ;;  %6128 = vmatpush1.msra.mxu1 %v3988_v19  ;;  %v5335_v41 = vld [vmem:[#allocation2 + $0x488] sm:$0xff] }
 0x224   : > { %4677 = vst [vmem:[#allocation2 + $0x530] sm:$0xff] %v4000_v16  ;;  %v4001_v47 = vmax.f32 %v2308_v3, 0.0  ;;  %v11542_v25 = vadd.f32 %v2311_v48, %v10503_v56  ;;  %6129 = vmatprep.subr.mxu1 %v5343_v21  ;;  %2603 = vmatprep.mubr.f32.mxu0 %v10266_v2  ;;  %v5333_v3 = vld [vmem:[#allocation2 + $0x478] sm:$0xff]  ;;  %v5331_v21 = vld [vmem:[#allocation2 + $0x468] sm:$0xff] }
 0x225   : > { %v2313_v12 = vpop.f32.mrf.mxu0  ;;  %6130 = vmatpush1.msra.mxu1 %v3986_v35 }
 0x226   : > { %4678 = vst.msk [vmem:[#allocation2 + $0x538] sm:$0xff] %vm4511_vm2, %v4001_v47  ;;  %v4002_v26 = vmax.f32 %v11542_v25, 0.0  ;;  %v2314_v19 = vadd.f32 %v2313_v12, %v10507_v58  ;;  %6131 = vmatprep.subr.mxu1 %v5341_v11  ;;  %v504_v47 = vld [vmem:[%s10344_s21 + $0x440] sm:$0xff]  ;;  %v5329_v12 = vld [vmem:[#allocation2 + $0x458] sm:$0xff] }
 0x227   : > { %v2317_v14 = vpop.f32.mrf.mxu0  ;;  %9942 = vmatmul.mubr.msk.f32.gmra.mxu0 %vm721_vm1, %v501_v18  ;;  %6132 = vmatpush1.msra.mxu1 %v3984_v23 }
 0x228   : > { %4679 = vst [vmem:[#allocation2 + $0x540] sm:$0xff] %v4002_v26  ;;  %v4003_v37 = vmax.f32 %v2314_v19, 0.0  ;;  %v11557_v35 = vadd.f32 %v2317_v14, %v10503_v56  ;;  %6133 = vmatprep.subr.mxu1 %v5339_v52  ;;  %2609 = vmatprep.mubr.f32.mxu0 %v10266_v2  ;;  %v5327_v19 = vld [vmem:[#allocation2 + $0x448] sm:$0xff] }
 0x229   : > { %v2319_v42 = vpop.f32.mrf.mxu0  ;;  %6134 = vmatpush1.msra.mxu1 %v3982_v44  ;;  %v505_v14 = vld [vmem:[%s10344_s21 + $0x448] sm:$0xff] }
 0x22a   : > { %4680 = vst.msk [vmem:[#allocation2 + $0x548] sm:$0xff] %vm4511_vm2, %v4003_v37  ;;  %v4004_v63 = vmax.f32 %v11557_v35, 0.0  ;;  %v2320_v23 = vadd.f32 %v2319_v42, %v10507_v58  ;;  %6135 = vmatprep.subr.mxu1 %v5337_v28  ;;  %v5325_v37 = vld [vmem:[#allocation2 + $0x438] sm:$0xff]  ;;  %v5323_v42 = vld [vmem:[#allocation2 + $0x428] sm:$0xff]  ;;  %v506_v28 = vld [vmem:[%s10344_s21 + $0x450] sm:$0xff] }
 0x22b   : > { %v2323_v34 = vpop.f32.mrf.mxu0  ;;  %9943 = vmatmul.mubr.msk.f32.gmra.mxu0 %vm721_vm1, %v502_v33  ;;  %6136 = vmatpush1.msra.mxu1 %v3980_v15  ;;  %v5355_v25 = vld [vmem:[#allocation2 + $0x528] sm:$0xff] }
 0x22c   : > { %4681 = vst [vmem:[#allocation2 + $0x550] sm:$0xff] %v4004_v63  ;;  %v4005_v9 = vmax.f32 %v2320_v23, 0.0  ;;  %v11572_v44 = vadd.f32 %v2323_v34, %v10503_v56  ;;  %6137 = vmatprep.subr.mxu1 %v5335_v41  ;;  %2615 = vmatprep.mubr.f32.mxu0 %v10266_v2  ;;  %v5321_v34 = vld [vmem:[#allocation2 + $0x418] sm:$0xff] }
 0x22d   : > { %v2325_v22 = vpop.f32.mrf.mxu0  ;;  %6138 = vmatpush1.msra.mxu1 %v3978_v46 }
 0x22e   : > { %4682 = vst.msk [vmem:[#allocation2 + $0x558] sm:$0xff] %vm4511_vm2, %v4005_v9  ;;  %v4006_v6 = vmax.f32 %v11572_v44, 0.0  ;;  %v2326_v15 = vadd.f32 %v2325_v22, %v10507_v58  ;;  %6139 = vmatprep.subr.mxu1 %v5333_v3  ;;  %v5319_v9 = vld [vmem:[#allocation2 + $0x408] sm:$0xff] }
 0x22f   : > { %v2329_v48 = vpop.f32.mrf.mxu0  ;;  %9944 = vmatmul.mubr.msk.f32.gmra.mxu0 %vm721_vm1, %v503_v61  ;;  %6140 = vmatpush1.msra.mxu1 %v3976_v40  ;;  %v507_v61 = vld [vmem:[%s10344_s21 + $0x458] sm:$0xff] }
 0x230   : > { %4683 = vst [vmem:[#allocation2 + $0x560] sm:$0xff] %v4006_v6  ;;  %v4007_v45 = vmax.f32 %v2326_v15, 0.0  ;;  %v11587_v46 = vadd.f32 %v2329_v48, %v10503_v56  ;;  %6141 = vmatprep.subr.mxu1 %v5331_v21  ;;  %2621 = vmatprep.mubr.f32.mxu0 %v10266_v2 }
 0x231   : > { %v2331_v18 = vpop.f32.mrf.mxu0  ;;  %6142 = vmatpush1.msra.mxu1 %v3974_v39 }
 0x232   : > { %4684 = vst.msk [vmem:[#allocation2 + $0x568] sm:$0xff] %vm4511_vm2, %v4007_v45  ;;  %v4008_v38 = vmax.f32 %v11587_v46, 0.0  ;;  %v2332_v40 = vadd.f32 %v2331_v18, %v10507_v58  ;;  %6143 = vmatprep.subr.mxu1 %v5329_v12 }
 0x233   : > { %v2335_v11 = vpop.f32.mrf.mxu0  ;;  %9945 = vmatmul.mubr.msk.f32.gmra.mxu0 %vm721_vm1, %v504_v47  ;;  %6144 = vmatpush1.msra.mxu1 %v3972_v57 }
 0x234   : > { %4685 = vst [vmem:[#allocation2 + $0x570] sm:$0xff] %v4008_v38  ;;  %v4009_v43 = vmax.f32 %v2332_v40, 0.0  ;;  %v11602_v39 = vadd.f32 %v2335_v11, %v10503_v56  ;;  %6145 = vmatprep.subr.mxu1 %v5327_v19  ;;  %2627 = vmatprep.mubr.f32.mxu0 %v10266_v2  ;;  %v509_v40 = vld [vmem:[%s10344_s21 + $0x468] sm:$0xff] }
 0x235   : > { %v2337_v52 = vpop.f32.mrf.mxu0  ;;  %6146 = vmatpush1.msra.mxu1 %v3970_v4 }
 0x236   : > { %4686 = vst.msk [vmem:[#allocation2 + $0x578] sm:$0xff] %vm4511_vm2, %v4009_v43  ;;  %v4010_v50 = vmax.f32 %v11602_v39, 0.0  ;;  %v2338_v57 = vadd.f32 %v2337_v52, %v10507_v58  ;;  %6147 = vmatprep.subr.mxu1 %v5325_v37 }
 0x237   : > { %v2341_v33 = vpop.f32.mrf.mxu0  ;;  %9946 = vmatmul.mubr.msk.f32.gmra.mxu0 %vm721_vm1, %v505_v14  ;;  %6148 = vmatpush1.msra.mxu1 %v3968_v54 }
 0x238   : > { %4687 = vst [vmem:[#allocation2 + $0x580] sm:$0xff] %v4010_v50  ;;  %v4011_v24 = vmax.f32 %v2338_v57, 0.0  ;;  %v11617_v4 = vadd.f32 %v2341_v33, %v10503_v56  ;;  %6149 = vmatprep.subr.mxu1 %v5323_v42  ;;  %2633 = vmatprep.mubr.f32.mxu0 %v10266_v2  ;;  %v510_v57 = vld [vmem:[%s10344_s21 + $0x470] sm:$0xff] }
 0x239   : > { %v2343_v23 = vpop.f32.mrf.mxu0  ;;  %6150 = vmatpush1.msra.mxu1 %v3966_v62 }
 0x23a   : > { %4688 = vst.msk [vmem:[#allocation2 + $0x588] sm:$0xff] %vm4511_vm2, %v4011_v24  ;;  %v4012_v30 = vmax.f32 %v11617_v4, 0.0  ;;  %v2344_v54 = vadd.f32 %v2343_v23, %v10507_v58  ;;  %6151 = vmatprep.subr.mxu1 %v5321_v34 }
 0x23b   : > { %v2347_v41 = vpop.f32.mrf.mxu0  ;;  %9947 = vmatmul.mubr.msk.f32.gmra.mxu0 %vm721_vm1, %v506_v28  ;;  %6152 = vmatpush1.msra.mxu1 %v3964_v5 }
 0x23c   : > { %4689 = vst [vmem:[#allocation2 + $0x590] sm:$0xff] %v4012_v30  ;;  %v4013_v8 = vmax.f32 %v2344_v54, 0.0  ;;  %v11632_v62 = vadd.f32 %v2347_v41, %v10503_v56  ;;  %6153 = vmatprep.subr.mxu1 %v5319_v9  ;;  %2639 = vmatprep.mubr.f32.mxu0 %v10266_v2  ;;  %v511_v54 = vld [vmem:[%s10344_s21 + $0x478] sm:$0xff] }
 0x23d   : > { %v2349_v22 = vpop.f32.mrf.mxu0  ;;  %6154 = vmatpush1.msra.mxu1 %v3962_v10 }
 0x23e   : > { %4690 = vst.msk [vmem:[#allocation2 + $0x598] sm:$0xff] %vm4511_vm2, %v4013_v8  ;;  %v4014_v20 = vmax.f32 %v11632_v62, 0.0  ;;  %v2350_v5 = vadd.f32 %v2349_v22, %v10507_v58 }
 0x23f   : > { %v2353_v3 = vpop.f32.mrf.mxu0  ;;  %9948 = vmatmul.mubr.msk.f32.gmra.mxu0 %vm721_vm1, %v507_v61 }
 0x240   : > { %4691 = vst [vmem:[#allocation2 + $0x5a0] sm:$0xff] %v4014_v20  ;;  %v4015_v15 = vmax.f32 %v2350_v5, 0.0  ;;  %v11645_v48 = vadd.f32 %v2353_v3, %v10503_v56  ;;  %2645 = vmatprep.mubr.f32.mxu0 %v10266_v2  ;;  %v512_v3 = vld [vmem:[%s10344_s21 + $0x480] sm:$0xff] }
 0x241   : > { %v2355_v10 = vpop.f32.mrf.mxu0 }
 0x242   : > { %4692 = vst.msk [vmem:[#allocation2 + $0x5a8] sm:$0xff] %vm4511_vm2, %v4015_v15  ;;  %v4016_v21 = vmax.f32 %v11645_v48, 0.0  ;;  %v2356_v45 = vadd.f32 %v2355_v10, %v10507_v58 }
 0x243   : > { %v2359_v47 = vpop.f32.mrf.mxu0  ;;  %9949 = vmatmul.mubr.msk.f32.gmra.mxu0 %vm721_vm1, %v508_v31 }
 0x244   : > { %4693 = vst [vmem:[#allocation2 + $0x5b0] sm:$0xff] %v4016_v21  ;;  %v4017_v18 = vmax.f32 %v2356_v45, 0.0  ;;  %v11656_v12 = vadd.f32 %v2359_v47, %v10503_v56  ;;  %2651 = vmatprep.mubr.f32.mxu0 %v10266_v2 }
 0x245   : > { %v2361_v11 = vpop.f32.mrf.mxu0 }
 0x246   : > { %4694 = vst.msk [vmem:[#allocation2 + $0x5b8] sm:$0xff] %vm4511_vm2, %v4017_v18  ;;  %v4018_v19 = vmax.f32 %v11656_v12, 0.0  ;;  %v2362_v43 = vadd.f32 %v2361_v11, %v10507_v58 }
 0x247   : > { %v2365_v14 = vpop.f32.mrf.mxu0  ;;  %9950 = vmatmul.mubr.msk.f32.gmra.mxu0 %vm721_vm1, %v509_v40  ;;  %v513_v40 = vld [vmem:[%s10344_s21 + $0x488] sm:$0xff] }
 0x248   : > { %4695 = vst [vmem:[#allocation2 + $0x5c0] sm:$0xff] %v4018_v19  ;;  %v4019_v52 = vmax.f32 %v2362_v43, 0.0  ;;  %v11667_v37 = vadd.f32 %v2365_v14, %v10503_v56  ;;  %2657 = vmatprep.mubr.f32.mxu0 %v10266_v2 }
 0x249   : > { %v2367_v33 = vpop.f32.mrf.mxu0 }
 0x24a   : > { %4696 = vst.msk [vmem:[#allocation2 + $0x5c8] sm:$0xff] %vm4511_vm2, %v4019_v52  ;;  %v4020_v42 = vmax.f32 %v11667_v37, 0.0  ;;  %v2368_v24 = vadd.f32 %v2367_v33, %v10507_v58 }
 0x24b   : > { %v2371_v28 = vpop.f32.mrf.mxu0  ;;  %9951 = vmatmul.mubr.msk.f32.gmra.mxu0 %vm721_vm1, %v510_v57 }
 0x24c   : > { %4697 = vst [vmem:[#allocation2 + $0x5d0] sm:$0xff] %v4020_v42  ;;  %v4021_v23 = vmax.f32 %v2368_v24, 0.0  ;;  %v11678_v34 = vadd.f32 %v2371_v28, %v10503_v56  ;;  %2663 = vmatprep.mubr.f32.mxu0 %v10266_v2  ;;  %v514_v24 = vld [vmem:[%s10344_s21 + $0x490] sm:$0xff] }
 0x24d   : > { %v2373_v41 = vpop.f32.mrf.mxu0 }
 0x24e   : > { %4698 = vst.msk [vmem:[#allocation2 + $0x5d8] sm:$0xff] %vm4511_vm2, %v4021_v23  ;;  %v4022_v9 = vmax.f32 %v11678_v34, 0.0  ;;  %v2374_v8 = vadd.f32 %v2373_v41, %v10507_v58 }
 0x24f   : > { %v2377_v61 = vpop.f32.mrf.mxu0  ;;  %9952 = vmatmul.mubr.msk.f32.gmra.mxu0 %vm721_vm1, %v511_v54 }
 0x250   : > { %4699 = vst [vmem:[#allocation2 + $0x5e0] sm:$0xff] %v4022_v9  ;;  %v4023_v22 = vmax.f32 %v2374_v8, 0.0  ;;  %v2378_v5 = vadd.f32 %v2377_v61, %v10503_v56  ;;  %2669 = vmatprep.mubr.f32.mxu0 %v10266_v2  ;;  %v515_v61 = vld [vmem:[%s10344_s21 + $0x498] sm:$0xff] }
 0x251   : > { %v2379_v15 = vpop.f32.mrf.mxu0 }
 0x252   : > { %4700 = vst.msk [vmem:[#allocation2 + $0x5e8] sm:$0xff] %vm4511_vm2, %v4023_v22  ;;  %v4024_v31 = vmax.f32 %v2378_v5, 0.0  ;;  %v2380_v10 = vadd.f32 %v2379_v15, %v10507_v58 }
 0x253   : > { %v2383_v45 = vpop.f32.mrf.mxu0  ;;  %9953 = vmatmul.mubr.msk.f32.gmra.mxu0 %vm721_vm1, %v512_v3 }
 0x254   : > { %4701 = vst [vmem:[#allocation2 + $0x5f0] sm:$0xff] %v4024_v31  ;;  %v4025_v47 = vmax.f32 %v2380_v10, 0.0  ;;  %v11693_v18 = vadd.f32 %v2383_v45, %v10503_v56  ;;  %2675 = vmatprep.mubr.f32.mxu0 %v10266_v2 }
 0x255   : > { %v2385_v11 = vpop.f32.mrf.mxu0 }
 0x256   : > { %4702 = vst.msk [vmem:[#allocation2 + $0x5f8] sm:$0xff] %vm4511_vm2, %v4025_v47  ;;  %v4026_v43 = vmax.f32 %v11693_v18, 0.0  ;;  %v2386_v14 = vadd.f32 %v2385_v11, %v10507_v58  ;;  %v516_v11 = vld [vmem:[%s10344_s21 + $0x4a0] sm:$0xff] }
 0x257   : > { %v2389_v52 = vpop.f32.mrf.mxu0  ;;  %9954 = vmatmul.mubr.msk.f32.gmra.mxu0 %vm721_vm1, %v513_v40  ;;  %v540_v18 = vld [vmem:[%s10344_s21 + $0x560] sm:$0xff] }
 0x258   : > { %4703 = vst [vmem:[#allocation2 + $0x600] sm:$0xff] %v4026_v43  ;;  %v4027_v57 = vmax.f32 %v2386_v14, 0.0  ;;  %v11704_v33 = vadd.f32 %v2389_v52, %v10503_v56  ;;  %2681 = vmatprep.mubr.f32.mxu0 %v10266_v2  ;;  %v5377_v52 = vld [vmem:[#allocation2 + $0x5d8] sm:$0xff] }
 0x259   : > { %v2391_v28 = vpop.f32.mrf.mxu0  ;;  %v5379_v45 = vld [vmem:[#allocation2 + $0x5e8] sm:$0xff] }
 0x25a   : > { %4704 = vst.msk [vmem:[#allocation2 + $0x608] sm:$0xff] %vm4511_vm2, %v4027_v57  ;;  %v4028_v23 = vmax.f32 %v11704_v33, 0.0  ;;  %v2392_v34 = vadd.f32 %v2391_v28, %v10507_v58  ;;  %v5375_v28 = vld [vmem:[#allocation2 + $0x5c8] sm:$0xff] }
 0x25b   : > { %v2395_v54 = vpop.f32.mrf.mxu0  ;;  %9955 = vmatmul.mubr.msk.f32.gmra.mxu0 %vm721_vm1, %v514_v24 }
 0x25c   : > { %4705 = vst [vmem:[#allocation2 + $0x610] sm:$0xff] %v4028_v23  ;;  %v4029_v41 = vmax.f32 %v2392_v34, 0.0  ;;  %v11715_v8 = vadd.f32 %v2395_v54, %v10503_v56  ;;  %2687 = vmatprep.mubr.f32.mxu0 %v10266_v2  ;;  %v517_v54 = vld [vmem:[%s10344_s21 + $0x4a8] sm:$0xff] }
 0x25d   : > { %v2397_v22 = vpop.f32.mrf.mxu0  ;;  %v5381_v5 = vld [vmem:[#allocation2 + $0x5f8] sm:$0xff] }
 0x25e   : > { %4706 = vst.msk [vmem:[#allocation2 + $0x618] sm:$0xff] %vm4511_vm2, %v4029_v41  ;;  %v4030_v3 = vmax.f32 %v11715_v8, 0.0  ;;  %v2398_v15 = vadd.f32 %v2397_v22, %v10507_v58  ;;  %6155 = vmatprep.subr.mxu1 %v5381_v5  ;;  %v5371_v5 = vld [vmem:[#allocation2 + $0x5a8] sm:$0xff] }
 0x25f   : > { %v2401_v10 = vpop.f32.mrf.mxu0  ;;  %9956 = vmatmul.mubr.msk.f32.gmra.mxu0 %vm721_vm1, %v515_v61  ;;  %6156 = vmatpush2.msra.mxu1 %v4024_v31  ;;  %v5373_v61 = vld [vmem:[#allocation2 + $0x5b8] sm:$0xff] }
 0x260   : > { %4707 = vst [vmem:[#allocation2 + $0x620] sm:$0xff] %v4030_v3  ;;  %v4031_v47 = vmax.f32 %v2398_v15, 0.0  ;;  %v11726_v40 = vadd.f32 %v2401_v10, %v10503_v56  ;;  %6157 = vmatprep.subr.mxu1 %v5379_v45  ;;  %2693 = vmatprep.mubr.f32.mxu0 %v10266_v2  ;;  %v518_v15 = vld [vmem:[%s10344_s21 + $0x4b0] sm:$0xff]  ;;  %v5369_v45 = vld [vmem:[#allocation2 + $0x598] sm:$0xff] }
 0x261   : > { %v2403_v14 = vpop.f32.mrf.mxu0  ;;  %6158 = vmatpush2.msra.mxu1 %v4022_v9 }
 0x262   : > { %4708 = vst.msk [vmem:[#allocation2 + $0x628] sm:$0xff] %vm4511_vm2, %v4031_v47  ;;  %v4032_v31 = vmax.f32 %v11726_v40, 0.0  ;;  %v2404_v57 = vadd.f32 %v2403_v14, %v10507_v58  ;;  %6159 = vmatprep.subr.mxu1 %v5377_v52  ;;  %v519_v14 = vld [vmem:[%s10344_s21 + $0x4b8] sm:$0xff] }
 0x263   : > { %v2407_v24 = vpop.f32.mrf.mxu0  ;;  %9957 = vmatmul.mubr.msk.f32.gmra.mxu0 %vm721_vm1, %v516_v11  ;;  %6160 = vmatpush2.msra.mxu1 %v4020_v42  ;;  %v5367_v11 = vld [vmem:[#allocation2 + $0x588] sm:$0xff] }
 0x264   : > { %4709 = vst [vmem:[#allocation2 + $0x630] sm:$0xff] %v4032_v31  ;;  %v4033_v34 = vmax.f32 %v2404_v57, 0.0  ;;  %v11739_v9 = vadd.f32 %v2407_v24, %v10503_v56  ;;  %6161 = vmatprep.subr.mxu1 %v5375_v28  ;;  %2699 = vmatprep.mubr.f32.mxu0 %v10266_v2  ;;  %v5365_v57 = vld [vmem:[#allocation2 + $0x578] sm:$0xff]  ;;  %v5363_v28 = vld [vmem:[#allocation2 + $0x568] sm:$0xff] }
 0x265   : > { %v2409_v41 = vpop.f32.mrf.mxu0  ;;  %6162 = vmatpush2.msra.mxu1 %v4018_v19 }
 0x266   : > { %4710 = vst.msk [vmem:[#allocation2 + $0x638] sm:$0xff] %vm4511_vm2, %v4033_v34  ;;  %v4034_v37 = vmax.f32 %v11739_v9, 0.0  ;;  %v2410_v42 = vadd.f32 %v2409_v41, %v10507_v58  ;;  %6163 = vmatprep.subr.mxu1 %v5373_v61  ;;  %v520_v34 = vld [vmem:[%s10344_s21 + $0x4c0] sm:$0xff]  ;;  %v5361_v41 = vld [vmem:[#allocation2 + $0x558] sm:$0xff] }
 0x267   : > { %v2413_v22 = vpop.f32.mrf.mxu0  ;;  %9958 = vmatmul.mubr.msk.f32.gmra.mxu0 %vm721_vm1, %v517_v54  ;;  %6164 = vmatpush2.msra.mxu1 %v4016_v21 }
 0x268   : > { %4711 = vst [vmem:[#allocation2 + $0x640] sm:$0xff] %v4034_v37  ;;  %v4035_v12 = vmax.f32 %v2410_v42, 0.0  ;;  %v11754_v19 = vadd.f32 %v2413_v22, %v10503_v56  ;;  %6165 = vmatprep.subr.mxu1 %v5371_v5  ;;  %2705 = vmatprep.mubr.f32.mxu0 %v10266_v2  ;;  %v5359_v42 = vld [vmem:[#allocation2 + $0x548] sm:$0xff] }
 0x269   : > { %v2415_v10 = vpop.f32.mrf.mxu0  ;;  %6166 = vmatpush2.msra.mxu1 %v4014_v20  ;;  %v521_v22 = vld [vmem:[%s10344_s21 + $0x4c8] sm:$0xff] }
 0x26a   : > { %4712 = vst.msk [vmem:[#allocation2 + $0x648] sm:$0xff] %vm4511_vm2, %v4035_v12  ;;  %v4036_v48 = vmax.f32 %v11754_v19, 0.0  ;;  %v2416_v21 = vadd.f32 %v2415_v10, %v10507_v58  ;;  %6167 = vmatprep.subr.mxu1 %v5369_v45  ;;  %v5357_v12 = vld [vmem:[#allocation2 + $0x538] sm:$0xff] }
 0x26b   : > { %v2419_v47 = vpop.f32.mrf.mxu0  ;;  %9959 = vmatmul.mubr.msk.f32.gmra.mxu0 %vm721_vm1, %v518_v15  ;;  %6168 = vmatpush2.msra.mxu1 %v4012_v30  ;;  %v11809_v15 = vsub.s32 4, %v10486_v51 }
 0x26c   : > { %4713 = vst [vmem:[#allocation2 + $0x650] sm:$0xff] %v4036_v48  ;;  %v4037_v62 = vmax.f32 %v2416_v21, 0.0  ;;  %v11769_v20 = vadd.f32 %v2419_v47, %v10503_v56  ;;  %6169 = vmatprep.subr.mxu1 %v5367_v11  ;;  %2711 = vmatprep.mubr.f32.mxu0 %v10266_v2  ;;  %v522_v21 = vld [vmem:[%s10344_s21 + $0x4d0] sm:$0xff]  ;;  %v5353_v11 = vld [vmem:[#allocation2 + $0x518] sm:$0xff] }
 0x26d   : > { %v2421_v52 = vpop.f32.mrf.mxu0  ;;  %6170 = vmatpush2.msra.mxu1 %v4010_v50  ;;  %16326 = vst [vmem:[#allocation6_spill] sm:$0xff] %v11809_v15 }
 0x26e   : > { %4714 = vst.msk [vmem:[#allocation2 + $0x658] sm:$0xff] %vm4511_vm2, %v4037_v62  ;;  %v4038_v4 = vmax.f32 %v11769_v20, 0.0  ;;  %v2422_v30 = vadd.f32 %v2421_v52, %v10507_v58  ;;  %6171 = vmatprep.subr.mxu1 %v5365_v57  ;;  %v5888_v62 = vrot.slane %v11420_v27, %v11809_v15  ;;  %v523_v57 = vld [vmem:[%s10344_s21 + $0x4d8] sm:$0xff] }
 0x26f   : > { %v2425_v24 = vpop.f32.mrf.mxu0  ;;  %9960 = vmatmul.mubr.msk.f32.gmra.mxu0 %vm721_vm1, %v519_v14  ;;  %6172 = vmatpush2.msra.mxu1 %v4008_v38 }
 0x270   : > { %4715 = vst [vmem:[#allocation2 + $0x660] sm:$0xff] %v4038_v4  ;;  %v4039_v39 = vmax.f32 %v2422_v30, 0.0  ;;  %v11784_v50 = vadd.f32 %v2425_v24, %v10503_v56  ;;  %6173 = vmatprep.subr.mxu1 %v5363_v28  ;;  %2717 = vmatprep.mubr.f32.mxu0 %v10266_v2 }
 0x271   : > { %v2427_v54 = vpop.f32.mrf.mxu0  ;;  %6174 = vmatpush2.msra.mxu1 %v4006_v6 }
 0x272   : > { %4716 = vst.msk [vmem:[#allocation2 + $0x668] sm:$0xff] %vm4511_vm2, %v4039_v39  ;;  %v4040_v46 = vmax.f32 %v11784_v50, 0.0  ;;  %v2428_v38 = vadd.f32 %v2427_v54, %v10507_v58  ;;  %6175 = vmatprep.subr.mxu1 %v5361_v41 }
 0x273   : > { %v2431_v61 = vpop.f32.mrf.mxu0  ;;  %9961 = vmatmul.mubr.msk.f32.gmra.mxu0 %vm721_vm1, %v520_v34  ;;  %6176 = vmatpush2.msra.mxu1 %v4004_v63 }
 0x274   : > { %4717 = vst [vmem:[#allocation2 + $0x670] sm:$0xff] %v4040_v46  ;;  %v4041_v44 = vmax.f32 %v2428_v38, 0.0  ;;  %v11799_v6 = vadd.f32 %v2431_v61, %v10503_v56  ;;  %6177 = vmatprep.subr.mxu1 %v5359_v42  ;;  %2723 = vmatprep.mubr.f32.mxu0 %v10266_v2  ;;  %v525_v61 = vld [vmem:[%s10344_s21 + $0x4e8] sm:$0xff] }
 0x275   : > { %v2433_v5 = vpop.f32.mrf.mxu0  ;;  %6178 = vmatpush2.msra.mxu1 %v4002_v26 }
 0x276   : > { %4718 = vst.msk [vmem:[#allocation2 + $0x678] sm:$0xff] %vm4511_vm2, %v4041_v44  ;;  %v4042_v35 = vmax.f32 %v11799_v6, 0.0  ;;  %v2434_v63 = vadd.f32 %v2433_v5, %v10507_v58  ;;  %6179 = vmatprep.subr.mxu1 %v5357_v12 }
 0x277   : > { %v2437_v10 = vpop.f32.mrf.mxu0  ;;  %9962 = vmatmul.mubr.msk.f32.gmra.mxu0 %vm721_vm1, %v521_v22  ;;  %6180 = vmatpush2.msra.mxu1 %v4000_v16 }
 0x278   : > { %4719 = vst [vmem:[#allocation2 + $0x680] sm:$0xff] %v4042_v35  ;;  %v4043_v26 = vmax.f32 %v2434_v63, 0.0  ;;  %v11817_v45 = vadd.f32 %v2437_v10, %v10503_v56  ;;  %6181 = vmatprep.subr.mxu1 %v5355_v25  ;;  %2729 = vmatprep.mubr.f32.mxu0 %v10266_v2  ;;  %v526_v10 = vld [vmem:[%s10344_s21 + $0x4f0] sm:$0xff] }
 0x279   : > { %v2439_v47 = vpop.f32.mrf.mxu0  ;;  %6182 = vmatpush2.msra.mxu1 %v3998_v13 }
 0x27a   : > { %4720 = vst.msk [vmem:[#allocation2 + $0x688] sm:$0xff] %vm4511_vm2, %v4043_v26  ;;  %v4044_v32 = vmax.f32 %v11817_v45, 0.0  ;;  %v2440_v16 = vadd.f32 %v2439_v47, %v10507_v58  ;;  %6183 = vmatprep.subr.mxu1 %v5353_v11 }
 0x27b   : > { %v2443_v14 = vpop.f32.mrf.mxu0  ;;  %9963 = vmatmul.mubr.msk.f32.gmra.mxu0 %vm721_vm1, %v522_v21  ;;  %6184 = vmatpush2.msra.mxu1 %v3996_v29 }
 0x27c   : > { %4721 = vst [vmem:[#allocation2 + $0x690] sm:$0xff] %v4044_v32  ;;  %v4045_v13 = vmax.f32 %v2440_v16, 0.0  ;;  %v11834_v52 = vadd.f32 %v2443_v14, %v10503_v56  ;;  %6185 = vmatprep.subr.mxu1 %v5351_v36  ;;  %2735 = vmatprep.mubr.f32.mxu0 %v10266_v2 }
 0x27d   : > { %v2445_v27 = vpop.f32.mrf.mxu0  ;;  %6186 = vmatpush2.msra.mxu1 %v3994_v0 }
 0x27e   : > { %4722 = vst.msk [vmem:[#allocation2 + $0x698] sm:$0xff] %vm4511_vm2, %v4045_v13  ;;  %v4046_v17 = vmax.f32 %v11834_v52, 0.0  ;;  %v2446_v29 = vadd.f32 %v2445_v27, %v10507_v58  ;;  %6188 = vmatmul.mubr.f32.vlgmr.msra.gmra.mxu1 %v5888_v62  ;;  %v527_v62 = vld [vmem:[%s10344_s21 + $0x4f8] sm:$0xff] }
 0x27f   : > { %v2449_v30 = vpop.f32.mrf.mxu0  ;;  %9964 = vmatmul.mubr.msk.f32.gmra.mxu0 %vm721_vm1, %v523_v57 }
 0x280   : > { %4723 = vst [vmem:[#allocation2 + $0x6a0] sm:$0xff] %v4046_v17  ;;  %v4047_v24 = vmax.f32 %v2446_v29, 0.0  ;;  %v11847_v28 = vadd.f32 %v2449_v30, %v10503_v56  ;;  %2741 = vmatprep.mubr.f32.mxu0 %v10266_v2  ;;  %v528_v30 = vld [vmem:[%s10344_s21 + $0x500] sm:$0xff] }
 0x281   : > { %v2451_v0 = vpop.f32.mrf.mxu0 }
 0x282   : > { %4724 = vst.msk [vmem:[#allocation2 + $0x6a8] sm:$0xff] %vm4511_vm2, %v4047_v24  ;;  %v4048_v39 = vmax.f32 %v11847_v28, 0.0  ;;  %v2452_v34 = vadd.f32 %v2451_v0, %v10507_v58 }
 0x283   : > { %v2455_v54 = vpop.f32.mrf.mxu0  ;;  %9965 = vmatmul.mubr.msk.f32.gmra.mxu0 %vm721_vm1, %v524_v60 }
 0x284   : > { %4725 = vst [vmem:[#allocation2 + $0x6b0] sm:$0xff] %v4048_v39  ;;  %v4049_v41 = vmax.f32 %v2452_v34, 0.0  ;;  %v11858_v38 = vadd.f32 %v2455_v54, %v10503_v56  ;;  %2747 = vmatprep.mubr.f32.mxu0 %v10266_v2 }
 0x285   : > { %v2457_v42 = vpop.f32.mrf.mxu0 }
 0x286   : > { %4726 = vst.msk [vmem:[#allocation2 + $0x6b8] sm:$0xff] %vm4511_vm2, %v4049_v41  ;;  %v4050_v44 = vmax.f32 %v11858_v38, 0.0  ;;  %v2458_v22 = vadd.f32 %v2457_v42, %v10507_v58 }
 0x287   : > { %v2461_v5 = vpop.f32.mrf.mxu0  ;;  %9966 = vmatmul.mubr.msk.f32.gmra.mxu0 %vm721_vm1, %v525_v61  ;;  %v529_v61 = vld [vmem:[%s10344_s21 + $0x508] sm:$0xff] }
 0x288   : > { %4727 = vst [vmem:[#allocation2 + $0x6c0] sm:$0xff] %v4050_v44  ;;  %v4051_v12 = vmax.f32 %v2458_v22, 0.0  ;;  %v11869_v63 = vadd.f32 %v2461_v5, %v10503_v56  ;;  %2753 = vmatprep.mubr.f32.mxu0 %v10266_v2 }
 0x289   : > { %v2463_v25 = vpop.f32.mrf.mxu0 }
 0x28a   : > { %4728 = vst.msk [vmem:[#allocation2 + $0x6c8] sm:$0xff] %vm4511_vm2, %v4051_v12  ;;  %v4052_v26 = vmax.f32 %v11869_v63, 0.0  ;;  %v2464_v21 = vadd.f32 %v2463_v25, %v10507_v58 }
 0x28b   : > { %v2467_v47 = vpop.f32.mrf.mxu0  ;;  %9967 = vmatmul.mubr.msk.f32.gmra.mxu0 %vm721_vm1, %v526_v10 }
 0x28c   : > { %4729 = vst [vmem:[#allocation2 + $0x6d0] sm:$0xff] %v4052_v26  ;;  %v4053_v11 = vmax.f32 %v2464_v21, 0.0  ;;  %v11880_v16 = vadd.f32 %v2467_v47, %v10503_v56  ;;  %2759 = vmatprep.mubr.f32.mxu0 %v10266_v2  ;;  %v530_v21 = vld [vmem:[%s10344_s21 + $0x510] sm:$0xff] }
 0x28d   : > { %v2469_v14 = vpop.f32.mrf.mxu0 }
 0x28e   : > { %4730 = vst.msk [vmem:[#allocation2 + $0x6d8] sm:$0xff] %vm4511_vm2, %v4053_v11  ;;  %v4054_v36 = vmax.f32 %v11880_v16, 0.0  ;;  %v2470_v13 = vadd.f32 %v2469_v14, %v10507_v58 }
 0x28f   : > { %v2473_v57 = vpop.f32.mrf.mxu0  ;;  %9968 = vmatmul.mubr.msk.f32.gmra.mxu0 %vm721_vm1, %v527_v62  ;;  %v11914_v62 = vsub.s32 7, %v10486_v51 }
 0x290   : > { %4731 = vst [vmem:[#allocation2 + $0x6e0] sm:$0xff] %v4054_v36  ;;  %v4055_v27 = vmax.f32 %v2470_v13, 0.0  ;;  %v2474_v29 = vadd.f32 %v2473_v57, %v10503_v56  ;;  %2765 = vmatprep.mubr.f32.mxu0 %v10266_v2 }
 0x291   : > { %v2475_v24 = vpop.f32.mrf.mxu0  ;;  %16327 = vst [vmem:[#allocation7_spill] sm:$0xff] %v11914_v62 }
 0x292   : > { %4732 = vst.msk [vmem:[#allocation2 + $0x6e8] sm:$0xff] %vm4511_vm2, %v4055_v27  ;;  %v4056_v60 = vmax.f32 %v2474_v29, 0.0  ;;  %v2476_v0 = vadd.f32 %v2475_v24, %v10507_v58  ;;  %v531_v27 = vld [vmem:[%s10344_s21 + $0x518] sm:$0xff]  ;;  %v11927_v29 = vld [vmem:[%s16311_s4] sm:$0xff] }
 0x293   : > { %v2479_v34 = vpop.f32.mrf.mxu0  ;;  %9969 = vmatmul.mubr.msk.f32.gmra.mxu0 %vm721_vm1, %v528_v30  ;;  %v5900_v30 = vrot.slane %v11927_v29, %v11914_v62 }
 0x294   : > { %4733 = vst [vmem:[#allocation2 + $0x6f0] sm:$0xff] %v4056_v60  ;;  %v4057_v54 = vmax.f32 %v2476_v0, 0.0  ;;  %v11895_v41 = vadd.f32 %v2479_v34, %v10503_v56  ;;  %2771 = vmatprep.mubr.f32.mxu0 %v10266_v2 }
 0x295   : > { %v2481_v42 = vpop.f32.mrf.mxu0  ;;  %6258 = vmatprep.mubr.f32.mxu1 %v5900_v30  ;;  %v533_v30 = vld [vmem:[%s10344_s21 + $0x528] sm:$0xff] }
 0x296   : > { %4734 = vst.msk [vmem:[#allocation2 + $0x6f8] sm:$0xff] %vm4511_vm2, %v4057_v54  ;;  %v4058_v22 = vmax.f32 %v11895_v41, 0.0  ;;  %v2482_v5 = vadd.f32 %v2481_v42, %v10507_v58  ;;  %v556_v41 = vld [vmem:[%s10344_s21 + $0x5e0] sm:$0xff] }
 0x297   : > { %v2485_v12 = vpop.f32.mrf.mxu0  ;;  %9970 = vmatmul.mubr.msk.f32.gmra.mxu0 %vm721_vm1, %v529_v61 }
 0x298   : > { %4735 = vst [vmem:[#allocation2 + $0x700] sm:$0xff] %v4058_v22  ;;  %v4059_v10 = vmax.f32 %v2482_v5, 0.0  ;;  %v11906_v25 = vadd.f32 %v2485_v12, %v10503_v56  ;;  %2777 = vmatprep.mubr.f32.mxu0 %v10266_v2 }
 0x299   : > { %v2487_v47 = vpop.f32.mrf.mxu0  ;;  %v5411_v42 = vld [vmem:[#allocation2 + $0x6e8] sm:$0xff] }
 0x29a   : > { %4736 = vst.msk [vmem:[#allocation2 + $0x708] sm:$0xff] %vm4511_vm2, %v4059_v10  ;;  %v4060_v11 = vmax.f32 %v11906_v25, 0.0  ;;  %v2488_v16 = vadd.f32 %v2487_v47, %v10507_v58  ;;  %v532_v10 = vld [vmem:[%s10344_s21 + $0x520] sm:$0xff]  ;;  %v5409_v47 = vld [vmem:[#allocation2 + $0x6d8] sm:$0xff] }
 0x29b   : > { %v2491_v14 = vpop.f32.mrf.mxu0  ;;  %9971 = vmatmul.mubr.msk.f32.gmra.mxu0 %vm721_vm1, %v530_v21 }
 0x29c   : > { %4737 = vst [vmem:[#allocation2 + $0x710] sm:$0xff] %v4060_v11  ;;  %v4061_v13 = vmax.f32 %v2488_v16, 0.0  ;;  %v11920_v57 = vadd.f32 %v2491_v14, %v10503_v56  ;;  %2783 = vmatprep.mubr.f32.mxu0 %v10266_v2 }
 0x29d   : > { %v2493_v24 = vpop.f32.mrf.mxu0  ;;  %v5413_v0 = vld [vmem:[#allocation2 + $0x6f8] sm:$0xff] }
 0x29e   : > { %4738 = vst.msk [vmem:[#allocation2 + $0x718] sm:$0xff] %vm4511_vm2, %v4061_v13  ;;  %v4062_v34 = vmax.f32 %v11920_v57, 0.0  ;;  %v2494_v54 = vadd.f32 %v2493_v24, %v10507_v58  ;;  %6194 = vmatprep.subr.mxu1 %v5413_v0  ;;  %v5407_v13 = vld [vmem:[#allocation2 + $0x6c8] sm:$0xff]  ;;  %v5405_v0 = vld [vmem:[#allocation2 + $0x6b8] sm:$0xff] }
 0x29f   : > { %v2497_v61 = vpop.f32.mrf.mxu0  ;;  %9972 = vmatmul.mubr.msk.f32.gmra.mxu0 %vm721_vm1, %v531_v27  ;;  %6195 = vmatpush1.msra.mxu1 %v4056_v60 }
 0x2a0   : > { %4739 = vst [vmem:[#allocation2 + $0x720] sm:$0xff] %v4062_v34  ;;  %v4063_v5 = vmax.f32 %v2494_v54, 0.0  ;;  %v11938_v12 = vadd.f32 %v2497_v61, %v10503_v56  ;;  %6196 = vmatprep.subr.mxu1 %v5411_v42  ;;  %2789 = vmatprep.mubr.f32.mxu0 %v10266_v2  ;;  %v5403_v61 = vld [vmem:[#allocation2 + $0x6a8] sm:$0xff]  ;;  %v534_v42 = vld [vmem:[%s10344_s21 + $0x530] sm:$0xff] }
 0x2a1   : > { %v2499_v21 = vpop.f32.mrf.mxu0  ;;  %6197 = vmatpush1.msra.mxu1 %v4054_v36  ;;  %v5415_v57 = vld [vmem:[#allocation2 + $0x708] sm:$0xff] }
 0x2a2   : > { %4740 = vst.msk [vmem:[#allocation2 + $0x728] sm:$0xff] %vm4511_vm2, %v4063_v5  ;;  %v4064_v60 = vmax.f32 %v11938_v12, 0.0  ;;  %v2500_v16 = vadd.f32 %v2499_v21, %v10507_v58  ;;  %6198 = vmatprep.subr.mxu1 %v5409_v47  ;;  %v5399_v47 = vld [vmem:[#allocation2 + $0x688] sm:$0xff] }
 0x2a3   : > { %v2503_v14 = vpop.f32.mrf.mxu0  ;;  %9973 = vmatmul.mubr.msk.f32.gmra.mxu0 %vm721_vm1, %v532_v10  ;;  %6199 = vmatpush1.msra.mxu1 %v4052_v26  ;;  %v5401_v10 = vld [vmem:[#allocation2 + $0x698] sm:$0xff] }
 0x2a4   : > { %4741 = vst [vmem:[#allocation2 + $0x730] sm:$0xff] %v4064_v60  ;;  %v4065_v27 = vmax.f32 %v2500_v16, 0.0  ;;  %v11951_v36 = vadd.f32 %v2503_v14, %v10503_v56  ;;  %6200 = vmatprep.subr.mxu1 %v5407_v13  ;;  %2795 = vmatprep.mubr.f32.mxu0 %v10266_v2  ;;  %v535_v16 = vld [vmem:[%s10344_s21 + $0x538] sm:$0xff] }
 0x2a5   : > { %v2505_v24 = vpop.f32.mrf.mxu0  ;;  %6201 = vmatpush1.msra.mxu1 %v4050_v44  ;;  %v5397_v13 = vld [vmem:[#allocation2 + $0x678] sm:$0xff] }
 0x2a6   : > { %4742 = vst.msk [vmem:[#allocation2 + $0x738] sm:$0xff] %vm4511_vm2, %v4065_v27  ;;  %v4066_v63 = vmax.f32 %v11951_v36, 0.0  ;;  %v2506_v26 = vadd.f32 %v2505_v24, %v10507_v58  ;;  %6202 = vmatprep.subr.mxu1 %v5405_v0  ;;  %v536_v24 = vld [vmem:[%s10344_s21 + $0x540] sm:$0xff] }
 0x2a7   : > { %v2509_v54 = vpop.f32.mrf.mxu0  ;;  %9974 = vmatmul.mubr.msk.f32.gmra.mxu0 %vm721_vm1, %v533_v30  ;;  %6203 = vmatpush1.msra.mxu1 %v4048_v39  ;;  %v5395_v30 = vld [vmem:[#allocation2 + $0x668] sm:$0xff] }
 0x2a8   : > { %4743 = vst [vmem:[#allocation2 + $0x740] sm:$0xff] %v4066_v63  ;;  %v4067_v38 = vmax.f32 %v2506_v26, 0.0  ;;  %v11966_v44 = vadd.f32 %v2509_v54, %v10503_v56  ;;  %6204 = vmatprep.subr.mxu1 %v5403_v61  ;;  %2801 = vmatprep.mubr.f32.mxu0 %v10266_v2  ;;  %v5393_v26 = vld [vmem:[#allocation2 + $0x658] sm:$0xff]  ;;  %v5391_v61 = vld [vmem:[#allocation2 + $0x648] sm:$0xff] }
 0x2a9   : > { %v2511_v5 = vpop.f32.mrf.mxu0  ;;  %6205 = vmatpush1.msra.mxu1 %v4046_v17  ;;  %v5419_v36 = vld [vmem:[#allocation2 + $0x728] sm:$0xff] }
 0x2aa   : > { %4744 = vst.msk [vmem:[#allocation2 + $0x748] sm:$0xff] %vm4511_vm2, %v4067_v38  ;;  %v4068_v28 = vmax.f32 %v11966_v44, 0.0  ;;  %v2512_v39 = vadd.f32 %v2511_v5, %v10507_v58  ;;  %6206 = vmatprep.subr.mxu1 %v5401_v10  ;;  %v537_v38 = vld [vmem:[%s10344_s21 + $0x548] sm:$0xff]  ;;  %v5389_v5 = vld [vmem:[#allocation2 + $0x638] sm:$0xff] }
 0x2ab   : > { %v2515_v21 = vpop.f32.mrf.mxu0  ;;  %9975 = vmatmul.mubr.msk.f32.gmra.mxu0 %vm721_vm1, %v534_v42  ;;  %6207 = vmatpush1.msra.mxu1 %v4044_v32 }
 0x2ac   : > { %4745 = vst [vmem:[#allocation2 + $0x750] sm:$0xff] %v4068_v28  ;;  %v4069_v52 = vmax.f32 %v2512_v39, 0.0  ;;  %v11981_v17 = vadd.f32 %v2515_v21, %v10503_v56  ;;  %6208 = vmatprep.subr.mxu1 %v5399_v47  ;;  %2807 = vmatprep.mubr.f32.mxu0 %v10266_v2  ;;  %v5387_v39 = vld [vmem:[#allocation2 + $0x628] sm:$0xff]  ;;  %v538_v21 = vld [vmem:[%s10344_s21 + $0x550] sm:$0xff] }
 0x2ad   : > { %v2517_v14 = vpop.f32.mrf.mxu0  ;;  %6209 = vmatpush1.msra.mxu1 %v4042_v35 }
 0x2ae   : > { %4746 = vst.msk [vmem:[#allocation2 + $0x758] sm:$0xff] %vm4511_vm2, %v4069_v52  ;;  %v4070_v45 = vmax.f32 %v11981_v17, 0.0  ;;  %v2518_v32 = vadd.f32 %v2517_v14, %v10507_v58  ;;  %6210 = vmatprep.subr.mxu1 %v5397_v13  ;;  %v5385_v52 = vld [vmem:[#allocation2 + $0x618] sm:$0xff]  ;;  %v5383_v14 = vld [vmem:[#allocation2 + $0x608] sm:$0xff] }
 0x2af   : > { %v2521_v27 = vpop.f32.mrf.mxu0  ;;  %9976 = vmatmul.mubr.msk.f32.gmra.mxu0 %vm721_vm1, %v535_v16  ;;  %6211 = vmatpush1.msra.mxu1 %v4040_v46  ;;  %v539_v13 = vld [vmem:[%s10344_s21 + $0x558] sm:$0xff] }
 0x2b0   : > { %4747 = vst [vmem:[#allocation2 + $0x760] sm:$0xff] %v4070_v45  ;;  %v4071_v6 = vmax.f32 %v2518_v32, 0.0  ;;  %v11996_v35 = vadd.f32 %v2521_v27, %v10503_v56  ;;  %6212 = vmatprep.subr.mxu1 %v5395_v30  ;;  %2813 = vmatprep.mubr.f32.mxu0 %v10266_v2 }
 0x2b1   : > { %v2523_v0 = vpop.f32.mrf.mxu0  ;;  %6213 = vmatpush1.msra.mxu1 %v4038_v4 }
 0x2b2   : > { %4748 = vst.msk [vmem:[#allocation2 + $0x768] sm:$0xff] %vm4511_vm2, %v4071_v6  ;;  %v4072_v50 = vmax.f32 %v11996_v35, 0.0  ;;  %v2524_v46 = vadd.f32 %v2523_v0, %v10507_v58  ;;  %6214 = vmatprep.subr.mxu1 %v5393_v26 }
 0x2b3   : > { %v2527_v54 = vpop.f32.mrf.mxu0  ;;  %9977 = vmatmul.mubr.msk.f32.gmra.mxu0 %vm721_vm1, %v536_v24  ;;  %6215 = vmatpush1.msra.mxu1 %v4036_v48 }
 0x2b4   : > { %4749 = vst [vmem:[#allocation2 + $0x770] sm:$0xff] %v4072_v50  ;;  %v4073_v20 = vmax.f32 %v2524_v46, 0.0  ;;  %v12011_v4 = vadd.f32 %v2527_v54, %v10503_v56  ;;  %6216 = vmatprep.subr.mxu1 %v5391_v61  ;;  %2819 = vmatprep.mubr.f32.mxu0 %v10266_v2  ;;  %v541_v61 = vld [vmem:[%s10344_s21 + $0x568] sm:$0xff] }
 0x2b5   : > { %v2529_v42 = vpop.f32.mrf.mxu0  ;;  %6217 = vmatpush1.msra.mxu1 %v4034_v37 }
 0x2b6   : > { %4750 = vst.msk [vmem:[#allocation2 + $0x778] sm:$0xff] %vm4511_vm2, %v4073_v20  ;;  %v4074_v19 = vmax.f32 %v12011_v4, 0.0  ;;  %v2530_v48 = vadd.f32 %v2529_v42, %v10507_v58  ;;  %6218 = vmatprep.subr.mxu1 %v5389_v5 }
 0x2b7   : > { %v2533_v10 = vpop.f32.mrf.mxu0  ;;  %9978 = vmatmul.mubr.msk.f32.gmra.mxu0 %vm721_vm1, %v537_v38  ;;  %6219 = vmatpush1.msra.mxu1 %v4032_v31 }
 0x2b8   : > { %4751 = vst [vmem:[#allocation2 + $0x780] sm:$0xff] %v4074_v19  ;;  %v4075_v9 = vmax.f32 %v2530_v48, 0.0  ;;  %v12026_v37 = vadd.f32 %v2533_v10, %v10503_v56  ;;  %6220 = vmatprep.subr.mxu1 %v5387_v39  ;;  %2825 = vmatprep.mubr.f32.mxu0 %v10266_v2  ;;  %v542_v39 = vld [vmem:[%s10344_s21 + $0x570] sm:$0xff] }
 0x2b9   : > { %v2535_v47 = vpop.f32.mrf.mxu0  ;;  %6221 = vmatpush1.msra.mxu1 %v4030_v3 }
 0x2ba   : > { %4752 = vst.msk [vmem:[#allocation2 + $0x788] sm:$0xff] %vm4511_vm2, %v4075_v9  ;;  %v4076_v40 = vmax.f32 %v12026_v37, 0.0  ;;  %v2536_v31 = vadd.f32 %v2535_v47, %v10507_v58  ;;  %6222 = vmatprep.subr.mxu1 %v5385_v52 }
 0x2bb   : > { %v2539_v16 = vpop.f32.mrf.mxu0  ;;  %9979 = vmatmul.mubr.msk.f32.gmra.mxu0 %vm721_vm1, %v538_v21  ;;  %6223 = vmatpush1.msra.mxu1 %v4028_v23 }
 0x2bc   : > { %4753 = vst [vmem:[#allocation2 + $0x790] sm:$0xff] %v4076_v40  ;;  %v4077_v8 = vmax.f32 %v2536_v31, 0.0  ;;  %v12041_v3 = vadd.f32 %v2539_v16, %v10503_v56  ;;  %6224 = vmatprep.subr.mxu1 %v5383_v14  ;;  %2831 = vmatprep.mubr.f32.mxu0 %v10266_v2  ;;  %v543_v14 = vld [vmem:[%s10344_s21 + $0x578] sm:$0xff] }
 0x2bd   : > { %v2541_v32 = vpop.f32.mrf.mxu0  ;;  %6225 = vmatpush1.msra.mxu1 %v4026_v43 }
 0x2be   : > { %4754 = vst.msk [vmem:[#allocation2 + $0x798] sm:$0xff] %vm4511_vm2, %v4077_v8  ;;  %v4078_v33 = vmax.f32 %v12041_v3, 0.0  ;;  %v2542_v23 = vadd.f32 %v2541_v32, %v10507_v58 }
 0x2bf   : > { %v2545_v27 = vpop.f32.mrf.mxu0  ;;  %9980 = vmatmul.mubr.msk.f32.gmra.mxu0 %vm721_vm1, %v539_v13 }
 0x2c0   : > { %4755 = vst [vmem:[#allocation2 + $0x7a0] sm:$0xff] %v4078_v33  ;;  %v4079_v30 = vmax.f32 %v2542_v23, 0.0  ;;  %v12054_v6 = vadd.f32 %v2545_v27, %v10503_v56  ;;  %2837 = vmatprep.mubr.f32.mxu0 %v10266_v2 }
 0x2c1   : > { %v2547_v43 = vpop.f32.mrf.mxu0 }
 0x2c2   : > { %4756 = vst.msk [vmem:[#allocation2 + $0x7a8] sm:$0xff] %vm4511_vm2, %v4079_v30  ;;  %v4080_v24 = vmax.f32 %v12054_v6, 0.0  ;;  %v2548_v0 = vadd.f32 %v2547_v43, %v10507_v58 }
 0x2c3   : > { %v2551_v26 = vpop.f32.mrf.mxu0  ;;  %9981 = vmatmul.mubr.msk.f32.gmra.mxu0 %vm721_vm1, %v540_v18  ;;  %v544_v18 = vld [vmem:[%s10344_s21 + $0x580] sm:$0xff] }
 0x2c4   : > { %4757 = vst [vmem:[#allocation2 + $0x7b0] sm:$0xff] %v4080_v24  ;;  %v4081_v46 = vmax.f32 %v2548_v0, 0.0  ;;  %v12065_v54 = vadd.f32 %v2551_v26, %v10503_v56  ;;  %2843 = vmatprep.mubr.f32.mxu0 %v10266_v2 }
 0x2c5   : > { %v2553_v20 = vpop.f32.mrf.mxu0 }
 0x2c6   : > { %4758 = vst.msk [vmem:[#allocation2 + $0x7b8] sm:$0xff] %vm4511_vm2, %v4081_v46  ;;  %v4082_v38 = vmax.f32 %v12065_v54, 0.0  ;;  %v2554_v42 = vadd.f32 %v2553_v20, %v10507_v58 }
 0x2c7   : > { %v2557_v5 = vpop.f32.mrf.mxu0  ;;  %9982 = vmatmul.mubr.msk.f32.gmra.mxu0 %vm721_vm1, %v541_v61 }
 0x2c8   : > { %4759 = vst [vmem:[#allocation2 + $0x7c0] sm:$0xff] %v4082_v38  ;;  %v4083_v48 = vmax.f32 %v2554_v42, 0.0  ;;  %v12076_v10 = vadd.f32 %v2557_v5, %v10503_v56  ;;  %2849 = vmatprep.mubr.f32.mxu0 %v10266_v2  ;;  %v545_v42 = vld [vmem:[%s10344_s21 + $0x588] sm:$0xff] }
 0x2c9   : > { %v2559_v9 = vpop.f32.mrf.mxu0 }
 0x2ca   : > { %4760 = vst.msk [vmem:[#allocation2 + $0x7c8] sm:$0xff] %vm4511_vm2, %v4083_v48  ;;  %v4084_v21 = vmax.f32 %v12076_v10, 0.0  ;;  %v2560_v47 = vadd.f32 %v2559_v9, %v10507_v58 }
 0x2cb   : > { %v2563_v52 = vpop.f32.mrf.mxu0  ;;  %9983 = vmatmul.mubr.msk.f32.gmra.mxu0 %vm721_vm1, %v542_v39 }
 0x2cc   : > { %4761 = vst [vmem:[#allocation2 + $0x7d0] sm:$0xff] %v4084_v21  ;;  %v4085_v31 = vmax.f32 %v2560_v47, 0.0  ;;  %v12087_v16 = vadd.f32 %v2563_v52, %v10503_v56  ;;  %2855 = vmatprep.mubr.f32.mxu0 %v10266_v2 }
 0x2cd   : > { %v2565_v8 = vpop.f32.mrf.mxu0 }
 0x2ce   : > { %4762 = vst.msk [vmem:[#allocation2 + $0x7d8] sm:$0xff] %vm4511_vm2, %v4085_v31  ;;  %v4086_v13 = vmax.f32 %v12087_v16, 0.0  ;;  %v2566_v32 = vadd.f32 %v2565_v8, %v10507_v58  ;;  %v546_v31 = vld [vmem:[%s10344_s21 + $0x590] sm:$0xff] }
 0x2cf   : > { %v2569_v23 = vpop.f32.mrf.mxu0  ;;  %9984 = vmatmul.mubr.msk.f32.gmra.mxu0 %vm721_vm1, %v543_v14 }
 0x2d0   : > { %4763 = vst [vmem:[#allocation2 + $0x7e0] sm:$0xff] %v4086_v13  ;;  %v4087_v27 = vmax.f32 %v2566_v32, 0.0  ;;  %v2570_v30 = vadd.f32 %v2569_v23, %v10503_v56  ;;  %2861 = vmatprep.mubr.f32.mxu0 %v10266_v2 }
 0x2d1   : > { %v2571_v43 = vpop.f32.mrf.mxu0 }
 0x2d2   : > { %4764 = vst.msk [vmem:[#allocation2 + $0x7e8] sm:$0xff] %vm4511_vm2, %v4087_v27  ;;  %v4088_v0 = vmax.f32 %v2570_v30, 0.0  ;;  %v2572_v26 = vadd.f32 %v2571_v43, %v10507_v58  ;;  %v547_v30 = vld [vmem:[%s10344_s21 + $0x598] sm:$0xff] }
 0x2d3   : > { %v2575_v46 = vpop.f32.mrf.mxu0  ;;  %9985 = vmatmul.mubr.msk.f32.gmra.mxu0 %vm721_vm1, %v544_v18 }
 0x2d4   : > { %4765 = vst [vmem:[#allocation2 + $0x7f0] sm:$0xff] %v4088_v0  ;;  %v4089_v61 = vmax.f32 %v2572_v26, 0.0  ;;  %v12102_v20 = vadd.f32 %v2575_v46, %v10503_v56  ;;  %2867 = vmatprep.mubr.f32.mxu0 %v10266_v2 }
 0x2d5   : > { %v2577_v5 = vpop.f32.mrf.mxu0 }
 0x2d6   : > { %4766 = vst.msk [vmem:[#allocation2 + $0x7f8] sm:$0xff] %vm4511_vm2, %v4089_v61  ;;  %v4090_v48 = vmax.f32 %v12102_v20, 0.0  ;;  %v2578_v39 = vadd.f32 %v2577_v5, %v10507_v58  ;;  %v572_v20 = vld [vmem:[%s10344_s21 + $0x660] sm:$0xff] }
 0x2d7   : > { %v2581_v9 = vpop.f32.mrf.mxu0  ;;  %9986 = vmatmul.mubr.msk.f32.gmra.mxu0 %vm721_vm1, %v545_v42 }
 0x2d8   : > { %4767 = vst [vmem:[#allocation2 + $0x800] sm:$0xff] %v4090_v48  ;;  %v4091_v47 = vmax.f32 %v2578_v39, 0.0  ;;  %v12113_v52 = vadd.f32 %v2581_v9, %v10503_v56  ;;  %2873 = vmatprep.mubr.f32.mxu0 %v10266_v2  ;;  %v548_v9 = vld [vmem:[%s10344_s21 + $0x5a0] sm:$0xff] }
 0x2d9   : > { %v2583_v16 = vpop.f32.mrf.mxu0  ;;  %v5443_v42 = vld [vmem:[#allocation2 + $0x7e8] sm:$0xff] }
 0x2da   : > { %4768 = vst.msk [vmem:[#allocation2 + $0x808] sm:$0xff] %vm4511_vm2, %v4091_v47  ;;  %v4092_v14 = vmax.f32 %v12113_v52, 0.0  ;;  %v2584_v8 = vadd.f32 %v2583_v16, %v10507_v58 }
 0x2db   : > { %v2587_v32 = vpop.f32.mrf.mxu0  ;;  %9987 = vmatmul.mubr.msk.f32.gmra.mxu0 %vm721_vm1, %v546_v31  ;;  %v5441_v31 = vld [vmem:[#allocation2 + $0x7d8] sm:$0xff] }
 0x2dc   : > { %4769 = vst [vmem:[#allocation2 + $0x810] sm:$0xff] %v4092_v14  ;;  %v4093_v23 = vmax.f32 %v2584_v8, 0.0  ;;  %v12124_v27 = vadd.f32 %v2587_v32, %v10503_v56  ;;  %2879 = vmatprep.mubr.f32.mxu0 %v10266_v2  ;;  %v5439_v32 = vld [vmem:[#allocation2 + $0x7c8] sm:$0xff] }
 0x2dd   : > { %v2589_v18 = vpop.f32.mrf.mxu0  ;;  %v5445_v43 = vld [vmem:[#allocation2 + $0x7f8] sm:$0xff] }
 0x2de   : > { %4770 = vst.msk [vmem:[#allocation2 + $0x818] sm:$0xff] %vm4511_vm2, %v4093_v23  ;;  %v4094_v26 = vmax.f32 %v12124_v27, 0.0  ;;  %v2590_v46 = vadd.f32 %v2589_v18, %v10507_v58  ;;  %6226 = vmatprep.subr.mxu1 %v5445_v43  ;;  %v5437_v43 = vld [vmem:[#allocation2 + $0x7b8] sm:$0xff] }
 0x2df   : > { %v2593_v61 = vpop.f32.mrf.mxu0  ;;  %9988 = vmatmul.mubr.msk.f32.gmra.mxu0 %vm721_vm1, %v547_v30  ;;  %6227 = vmatpush2.msra.mxu1 %v4088_v0  ;;  %v549_v30 = vld [vmem:[%s10344_s21 + $0x5a8] sm:$0xff] }
 0x2e0   : > { %4771 = vst [vmem:[#allocation2 + $0x820] sm:$0xff] %v4094_v26  ;;  %v4095_v5 = vmax.f32 %v2590_v46, 0.0  ;;  %v12135_v39 = vadd.f32 %v2593_v61, %v10503_v56  ;;  %6228 = vmatprep.subr.mxu1 %v5443_v42  ;;  %2885 = vmatprep.mubr.f32.mxu0 %v10266_v2  ;;  %v5435_v61 = vld [vmem:[#allocation2 + $0x7a8] sm:$0xff]  ;;  %v550_v42 = vld [vmem:[%s10344_s21 + $0x5b0] sm:$0xff] }
 0x2e1   : > { %v2595_v47 = vpop.f32.mrf.mxu0  ;;  %6229 = vmatpush2.msra.mxu1 %v4086_v13 }
 0x2e2   : > { %4772 = vst.msk [vmem:[#allocation2 + $0x828] sm:$0xff] %vm4511_vm2, %v4095_v5  ;;  %v4096_v0 = vmax.f32 %v12135_v39, 0.0  ;;  %v2596_v16 = vadd.f32 %v2595_v47, %v10507_v58  ;;  %6230 = vmatprep.subr.mxu1 %v5441_v31  ;;  %v5431_v31 = vld [vmem:[#allocation2 + $0x788] sm:$0xff] }
 0x2e3   : > { %v2599_v8 = vpop.f32.mrf.mxu0  ;;  %9989 = vmatmul.mubr.msk.f32.gmra.mxu0 %vm721_vm1, %v548_v9  ;;  %6231 = vmatpush2.msra.mxu1 %v4084_v21  ;;  %v5433_v9 = vld [vmem:[#allocation2 + $0x798] sm:$0xff] }
 0x2e4   : > { %4773 = vst [vmem:[#allocation2 + $0x830] sm:$0xff] %v4096_v0  ;;  %v4097_v23 = vmax.f32 %v2596_v16, 0.0  ;;  %v12148_v13 = vadd.f32 %v2599_v8, %v10503_v56  ;;  %6232 = vmatprep.subr.mxu1 %v5439_v32  ;;  %2891 = vmatprep.mubr.f32.mxu0 %v10266_v2  ;;  %v551_v16 = vld [vmem:[%s10344_s21 + $0x5b8] sm:$0xff] }
 0x2e5   : > { %v2601_v18 = vpop.f32.mrf.mxu0  ;;  %6233 = vmatpush2.msra.mxu1 %v4082_v38  ;;  %v5429_v32 = vld [vmem:[#allocation2 + $0x778] sm:$0xff] }
 0x2e6   : > { %4774 = vst.msk [vmem:[#allocation2 + $0x838] sm:$0xff] %vm4511_vm2, %v4097_v23  ;;  %v4098_v10 = vmax.f32 %v12148_v13, 0.0  ;;  %v2602_v21 = vadd.f32 %v2601_v18, %v10507_v58  ;;  %6234 = vmatprep.subr.mxu1 %v5437_v43  ;;  %v552_v18 = vld [vmem:[%s10344_s21 + $0x5c0] sm:$0xff] }
 0x2e7   : > { %v2605_v46 = vpop.f32.mrf.mxu0  ;;  %9990 = vmatmul.mubr.msk.f32.gmra.mxu0 %vm721_vm1, %v549_v30  ;;  %6235 = vmatpush2.msra.mxu1 %v4080_v24  ;;  %v5427_v30 = vld [vmem:[#allocation2 + $0x768] sm:$0xff] }
 0x2e8   : > { %4775 = vst [vmem:[#allocation2 + $0x840] sm:$0xff] %v4098_v10  ;;  %v4099_v54 = vmax.f32 %v2602_v21, 0.0  ;;  %v12163_v38 = vadd.f32 %v2605_v46, %v10503_v56  ;;  %6236 = vmatprep.subr.mxu1 %v5435_v61  ;;  %2897 = vmatprep.mubr.f32.mxu0 %v10266_v2  ;;  %v5425_v21 = vld [vmem:[#allocation2 + $0x758] sm:$0xff]  ;;  %v5423_v61 = vld [vmem:[#allocation2 + $0x748] sm:$0xff] }
 0x2e9   : > { %v2607_v5 = vpop.f32.mrf.mxu0  ;;  %6237 = vmatpush2.msra.mxu1 %v4078_v33 }
 0x2ea   : > { %4776 = vst.msk [vmem:[#allocation2 + $0x848] sm:$0xff] %vm4511_vm2, %v4099_v54  ;;  %v4100_v6 = vmax.f32 %v12163_v38, 0.0  ;;  %v2608_v24 = vadd.f32 %v2607_v5, %v10507_v58  ;;  %6238 = vmatprep.subr.mxu1 %v5433_v9  ;;  %v553_v54 = vld [vmem:[%s10344_s21 + $0x5c8] sm:$0xff]  ;;  %v5421_v5 = vld [vmem:[#allocation2 + $0x738] sm:$0xff]  ;;  %v12218_v9 = vsub.s32 6, %v10486_v51  ;;  %v8788_v51 = vld [vmem:[%s16313_s6 + $0x700] sm:$0xff] }
 0x2eb   : > { %v2611_v47 = vpop.f32.mrf.mxu0  ;;  %9991 = vmatmul.mubr.msk.f32.gmra.mxu0 %vm721_vm1, %v550_v42  ;;  %6239 = vmatpush2.msra.mxu1 %v4076_v40 }
 0x2ec   : > { %4777 = vst [vmem:[#allocation2 + $0x850] sm:$0xff] %v4100_v6  ;;  %v4101_v3 = vmax.f32 %v2608_v24, 0.0  ;;  %v12178_v33 = vadd.f32 %v2611_v47, %v10503_v56  ;;  %6240 = vmatprep.subr.mxu1 %v5431_v31  ;;  %2903 = vmatprep.mubr.f32.mxu0 %v10266_v2  ;;  %16328 = vst [vmem:[#allocation8_spill] sm:$0xff] %v12218_v9  ;;  %v554_v31 = vld [vmem:[%s10344_s21 + $0x5d0] sm:$0xff] }
 0x2ed   : > { %v2613_v8 = vpop.f32.mrf.mxu0  ;;  %6241 = vmatpush2.msra.mxu1 %v4074_v19 }
 0x2ee   : > { %4778 = vst.msk [vmem:[#allocation2 + $0x858] sm:$0xff] %vm4511_vm2, %v4101_v3  ;;  %v4102_v37 = vmax.f32 %v12178_v33, 0.0  ;;  %v2614_v40 = vadd.f32 %v2613_v8, %v10507_v58  ;;  %6242 = vmatprep.subr.mxu1 %v5429_v32  ;;  %v5896_v8 = vrot.slane %v11927_v29, %v12218_v9 }
 0x2ef   : > { %v2617_v23 = vpop.f32.mrf.mxu0  ;;  %9992 = vmatmul.mubr.msk.f32.gmra.mxu0 %vm721_vm1, %v551_v16  ;;  %6243 = vmatpush2.msra.mxu1 %v4072_v50  ;;  %v5417_v16 = vld [vmem:[#allocation2 + $0x718] sm:$0xff] }
 0x2f0   : > { %4779 = vst [vmem:[#allocation2 + $0x860] sm:$0xff] %v4102_v37  ;;  %v4103_v4 = vmax.f32 %v2614_v40, 0.0  ;;  %v12193_v19 = vadd.f32 %v2617_v23, %v10503_v56  ;;  %6244 = vmatprep.subr.mxu1 %v5427_v30  ;;  %2909 = vmatprep.mubr.f32.mxu0 %v10266_v2  ;;  %v555_v23 = vld [vmem:[%s10344_s21 + $0x5d8] sm:$0xff] }
 0x2f1   : > { %v2619_v43 = vpop.f32.mrf.mxu0  ;;  %6245 = vmatpush2.msra.mxu1 %v4070_v45 }
 0x2f2   : > { %4780 = vst.msk [vmem:[#allocation2 + $0x868] sm:$0xff] %vm4511_vm2, %v4103_v4  ;;  %v4104_v35 = vmax.f32 %v12193_v19, 0.0  ;;  %v2620_v50 = vadd.f32 %v2619_v43, %v10507_v58  ;;  %6246 = vmatprep.subr.mxu1 %v5425_v21 }
 0x2f3   : > { %v2623_v46 = vpop.f32.mrf.mxu0  ;;  %9993 = vmatmul.mubr.msk.f32.gmra.mxu0 %vm721_vm1, %v552_v18  ;;  %6247 = vmatpush2.msra.mxu1 %v4068_v28 }
 0x2f4   : > { %4781 = vst [vmem:[#allocation2 + $0x870] sm:$0xff] %v4104_v35  ;;  %v4105_v17 = vmax.f32 %v2620_v50, 0.0  ;;  %v12208_v45 = vadd.f32 %v2623_v46, %v10503_v56  ;;  %6248 = vmatprep.subr.mxu1 %v5423_v61  ;;  %2915 = vmatprep.mubr.f32.mxu0 %v10266_v2 }
 0x2f5   : > { %v2625_v42 = vpop.f32.mrf.mxu0  ;;  %6249 = vmatpush2.msra.mxu1 %v4066_v63 }
 0x2f6   : > { %4782 = vst.msk [vmem:[#allocation2 + $0x878] sm:$0xff] %vm4511_vm2, %v4105_v17  ;;  %v4106_v44 = vmax.f32 %v12208_v45, 0.0  ;;  %v2626_v28 = vadd.f32 %v2625_v42, %v10507_v58  ;;  %6250 = vmatprep.subr.mxu1 %v5421_v5  ;;  %v557_v17 = vld [vmem:[%s10344_s21 + $0x5e8] sm:$0xff] }
 0x2f7   : > { %v2629_v24 = vpop.f32.mrf.mxu0  ;;  %9994 = vmatmul.mubr.msk.f32.gmra.mxu0 %vm721_vm1, %v553_v54  ;;  %6251 = vmatpush2.msra.mxu1 %v4064_v60 }
 0x2f8   : > { %4783 = vst [vmem:[#allocation2 + $0x880] sm:$0xff] %v4106_v44  ;;  %v4107_v63 = vmax.f32 %v2626_v28, 0.0  ;;  %v12226_v47 = vadd.f32 %v2629_v24, %v10503_v56  ;;  %6252 = vmatprep.subr.mxu1 %v5419_v36  ;;  %2921 = vmatprep.mubr.f32.mxu0 %v10266_v2 }
 0x2f9   : > { %v2631_v3 = vpop.f32.mrf.mxu0  ;;  %6253 = vmatpush2.msra.mxu1 %v4062_v34 }
 0x2fa   : > { %4784 = vst.msk [vmem:[#allocation2 + $0x888] sm:$0xff] %vm4511_vm2, %v4107_v63  ;;  %v4108_v12 = vmax.f32 %v12226_v47, 0.0  ;;  %v2632_v60 = vadd.f32 %v2631_v3, %v10507_v58  ;;  %6254 = vmatprep.subr.mxu1 %v5417_v16  ;;  %v558_v63 = vld [vmem:[%s10344_s21 + $0x5f0] sm:$0xff] }
 0x2fb   : > { %v2635_v32 = vpop.f32.mrf.mxu0  ;;  %9995 = vmatmul.mubr.msk.f32.gmra.mxu0 %vm721_vm1, %v554_v31  ;;  %6255 = vmatpush2.msra.mxu1 %v4060_v11 }
 0x2fc   : > { %4785 = vst [vmem:[#allocation2 + $0x890] sm:$0xff] %v4108_v12  ;;  %v4109_v34 = vmax.f32 %v2632_v60, 0.0  ;;  %v12243_v40 = vadd.f32 %v2635_v32, %v10503_v56  ;;  %6256 = vmatprep.subr.mxu1 %v5415_v57  ;;  %2927 = vmatprep.mubr.f32.mxu0 %v10266_v2  ;;  %v559_v57 = vld [vmem:[%s10344_s21 + $0x5f8] sm:$0xff] }
 0x2fd   : > { %v2637_v29 = vpop.f32.mrf.mxu0  ;;  %6257 = vmatpush2.msra.mxu1 %v4058_v22 }
 0x2fe   : > { %4786 = vst.msk [vmem:[#allocation2 + $0x898] sm:$0xff] %vm4511_vm2, %v4109_v34  ;;  %v4110_v25 = vmax.f32 %v12243_v40, 0.0  ;;  %v2638_v11 = vadd.f32 %v2637_v29, %v10507_v58  ;;  %6259 = vmatmul.mubr.f32.vlgmr.msra.gmra.mxu1 %v5896_v8 }
 0x2ff   : > { %v2641_v30 = vpop.f32.mrf.mxu0  ;;  %9996 = vmatmul.mubr.msk.f32.gmra.mxu0 %vm721_vm1, %v555_v23 }
 0x300   : > { %4787 = vst [vmem:[#allocation2 + $0x8a0] sm:$0xff] %v4110_v25  ;;  %v4111_v4 = vmax.f32 %v2638_v11, 0.0  ;;  %v12256_v18 = vadd.f32 %v2641_v30, %v10503_v56  ;;  %2933 = vmatprep.mubr.f32.mxu0 %v10266_v2 }
 0x301   : > { %v2643_v22 = vpop.f32.mrf.mxu0 }
 0x302   : > { %4788 = vst.msk [vmem:[#allocation2 + $0x8a8] sm:$0xff] %vm4511_vm2, %v4111_v4  ;;  %v4112_v43 = vmax.f32 %v12256_v18, 0.0  ;;  %v2644_v21 = vadd.f32 %v2643_v22, %v10507_v58 }
 0x303   : > { %v2647_v50 = vpop.f32.mrf.mxu0  ;;  %9997 = vmatmul.mubr.msk.f32.gmra.mxu0 %vm721_vm1, %v556_v41  ;;  %v560_v41 = vld [vmem:[%s10344_s21 + $0x600] sm:$0xff] }
 0x304   : > { %4789 = vst [vmem:[#allocation2 + $0x8b0] sm:$0xff] %v4112_v43  ;;  %v4113_v46 = vmax.f32 %v2644_v21, 0.0  ;;  %v12267_v61 = vadd.f32 %v2647_v50, %v10503_v56  ;;  %2939 = vmatprep.mubr.f32.mxu0 %v10266_v2 }
 0x305   : > { %v2649_v54 = vpop.f32.mrf.mxu0 }
 0x306   : > { %4790 = vst.msk [vmem:[#allocation2 + $0x8b8] sm:$0xff] %vm4511_vm2, %v4113_v46  ;;  %v4114_v42 = vmax.f32 %v12267_v61, 0.0  ;;  %v2650_v5 = vadd.f32 %v2649_v54, %v10507_v58 }
 0x307   : > { %v2653_v28 = vpop.f32.mrf.mxu0  ;;  %9998 = vmatmul.mubr.msk.f32.gmra.mxu0 %vm721_vm1, %v557_v17 }
 0x308   : > { %4791 = vst [vmem:[#allocation2 + $0x8c0] sm:$0xff] %v4114_v42  ;;  %v4115_v24 = vmax.f32 %v2650_v5, 0.0  ;;  %v12278_v36 = vadd.f32 %v2653_v28, %v10503_v56  ;;  %2945 = vmatprep.mubr.f32.mxu0 %v10266_v2  ;;  %v561_v5 = vld [vmem:[%s10344_s21 + $0x608] sm:$0xff] }
 0x309   : > { %v2655_v31 = vpop.f32.mrf.mxu0 }
 0x30a   : > { %4792 = vst.msk [vmem:[#allocation2 + $0x8c8] sm:$0xff] %vm4511_vm2, %v4115_v24  ;;  %v4116_v3 = vmax.f32 %v12278_v36, 0.0  ;;  %v2656_v16 = vadd.f32 %v2655_v31, %v10507_v58 }
 0x30b   : > { %v2659_v60 = vpop.f32.mrf.mxu0  ;;  %9999 = vmatmul.mubr.msk.f32.gmra.mxu0 %vm721_vm1, %v558_v63 }
 0x30c   : > { %4793 = vst [vmem:[#allocation2 + $0x8d0] sm:$0xff] %v4116_v3  ;;  %v4117_v8 = vmax.f32 %v2656_v16, 0.0  ;;  %v12289_v32 = vadd.f32 %v2659_v60, %v10503_v56  ;;  %2951 = vmatprep.mubr.f32.mxu0 %v10266_v2 }
 0x30d   : > { %v2661_v34 = vpop.f32.mrf.mxu0 }
 0x30e   : > { %4794 = vst.msk [vmem:[#allocation2 + $0x8d8] sm:$0xff] %vm4511_vm2, %v4117_v8  ;;  %v4118_v23 = vmax.f32 %v12289_v32, 0.0  ;;  %v2662_v29 = vadd.f32 %v2661_v34, %v10507_v58  ;;  %v562_v8 = vld [vmem:[%s10344_s21 + $0x610] sm:$0xff] }
 0x30f   : > { %v2665_v11 = vpop.f32.mrf.mxu0  ;;  %10000 = vmatmul.mubr.msk.f32.gmra.mxu0 %vm721_vm1, %v559_v57 }
 0x310   : > { %4795 = vst [vmem:[#allocation2 + $0x8e0] sm:$0xff] %v4118_v23  ;;  %v4119_v30 = vmax.f32 %v2662_v29, 0.0  ;;  %v2666_v4 = vadd.f32 %v2665_v11, %v10503_v56  ;;  %2957 = vmatprep.mubr.f32.mxu0 %v10266_v2  ;;  %v12326_v11 = vld [vmem:[%s16311_s4 + $0x8] sm:$0xff] }
 0x311   : > { %v2667_v22 = vpop.f32.mrf.mxu0 }
 0x312   : > { %4796 = vst.msk [vmem:[#allocation2 + $0x8e8] sm:$0xff] %vm4511_vm2, %v4119_v30  ;;  %v4120_v21 = vmax.f32 %v2666_v4, 0.0  ;;  %v2668_v50 = vadd.f32 %v2667_v22, %v10507_v58  ;;  %v5908_v22 = vrot.slane %v12326_v11, %v10498_v55 }
 0x313   : > { %v2671_v46 = vpop.f32.mrf.mxu0  ;;  %10001 = vmatmul.mubr.msk.f32.gmra.mxu0 %vm721_vm1, %v560_v41  ;;  %v563_v41 = vld [vmem:[%s10344_s21 + $0x618] sm:$0xff] }
 0x314   : > { %4797 = vst [vmem:[#allocation2 + $0x8f0] sm:$0xff] %v4120_v21  ;;  %v4121_v17 = vmax.f32 %v2668_v50, 0.0  ;;  %v12304_v54 = vadd.f32 %v2671_v46, %v10503_v56  ;;  %2963 = vmatprep.mubr.f32.mxu0 %v10266_v2  ;;  %6329 = vmatprep.mubr.f32.mxu1 %v5908_v22 }
 0x315   : > { %v2673_v28 = vpop.f32.mrf.mxu0 }
 0x316   : > { %4798 = vst.msk [vmem:[#allocation2 + $0x8f8] sm:$0xff] %vm4511_vm2, %v4121_v17  ;;  %v4122_v24 = vmax.f32 %v12304_v54, 0.0  ;;  %v2674_v63 = vadd.f32 %v2673_v28, %v10507_v58  ;;  %v588_v54 = vld [vmem:[%s10344_s21 + $0x6e0] sm:$0xff] }
 0x317   : > { %v2677_v31 = vpop.f32.mrf.mxu0  ;;  %10002 = vmatmul.mubr.msk.f32.gmra.mxu0 %vm721_vm1, %v561_v5 }
 0x318   : > { %4799 = vst [vmem:[#allocation2 + $0x900] sm:$0xff] %v4122_v24  ;;  %v4123_v16 = vmax.f32 %v2674_v63, 0.0  ;;  %v12315_v60 = vadd.f32 %v2677_v31, %v10503_v56  ;;  %2969 = vmatprep.mubr.f32.mxu0 %v10266_v2 }
 0x319   : > { %v2679_v32 = vpop.f32.mrf.mxu0  ;;  %v5475_v63 = vld [vmem:[#allocation2 + $0x8e8] sm:$0xff] }
 0x31a   : > { %4800 = vst.msk [vmem:[#allocation2 + $0x908] sm:$0xff] %vm4511_vm2, %v4123_v16  ;;  %v4124_v57 = vmax.f32 %v12315_v60, 0.0  ;;  %v2680_v34 = vadd.f32 %v2679_v32, %v10507_v58 }
 0x31b   : > { %v2683_v29 = vpop.f32.mrf.mxu0  ;;  %10003 = vmatmul.mubr.msk.f32.gmra.mxu0 %vm721_vm1, %v562_v8  ;;  %v564_v8 = vld [vmem:[%s10344_s21 + $0x620] sm:$0xff] }
 0x31c   : > { %4801 = vst [vmem:[#allocation2 + $0x910] sm:$0xff] %v4124_v57  ;;  %v4125_v30 = vmax.f32 %v2680_v34, 0.0  ;;  %v12331_v4 = vadd.f32 %v2683_v29, %v10503_v56  ;;  %2975 = vmatprep.mubr.f32.mxu0 %v10266_v2  ;;  %v5473_v34 = vld [vmem:[#allocation2 + $0x8d8] sm:$0xff] }
 0x31d   : > { %v2685_v50 = vpop.f32.mrf.mxu0  ;;  %v5477_v46 = vld [vmem:[#allocation2 + $0x8f8] sm:$0xff] }
 0x31e   : > { %4802 = vst.msk [vmem:[#allocation2 + $0x918] sm:$0xff] %vm4511_vm2, %v4125_v30  ;;  %v4126_v17 = vmax.f32 %v12331_v4, 0.0  ;;  %v2686_v5 = vadd.f32 %v2685_v50, %v10507_v58  ;;  %6265 = vmatprep.subr.mxu1 %v5477_v46  ;;  %v565_v50 = vld [vmem:[%s10344_s21 + $0x628] sm:$0xff] }
 0x31f   : > { %v2689_v28 = vpop.f32.mrf.mxu0  ;;  %10004 = vmatmul.mubr.msk.f32.gmra.mxu0 %vm721_vm1, %v563_v41  ;;  %6266 = vmatpush1.msra.mxu1 %v4120_v21  ;;  %v5471_v41 = vld [vmem:[#allocation2 + $0x8c8] sm:$0xff] }
 0x320   : > { %4803 = vst [vmem:[#allocation2 + $0x920] sm:$0xff] %v4126_v17  ;;  %v4127_v31 = vmax.f32 %v2686_v5, 0.0  ;;  %v12344_v16 = vadd.f32 %v2689_v28, %v10503_v56  ;;  %6267 = vmatprep.subr.mxu1 %v5475_v63  ;;  %2981 = vmatprep.mubr.f32.mxu0 %v10266_v2  ;;  %v5469_v5 = vld [vmem:[#allocation2 + $0x8b8] sm:$0xff]  ;;  %v5467_v63 = vld [vmem:[#allocation2 + $0x8a8] sm:$0xff] }
 0x321   : > { %v2691_v32 = vpop.f32.mrf.mxu0  ;;  %6268 = vmatpush1.msra.mxu1 %v4118_v23  ;;  %v5479_v4 = vld [vmem:[#allocation2 + $0x908] sm:$0xff] }
 0x322   : > { %4804 = vst.msk [vmem:[#allocation2 + $0x928] sm:$0xff] %vm4511_vm2, %v4127_v31  ;;  %v4128_v21 = vmax.f32 %v12344_v16, 0.0  ;;  %v2692_v29 = vadd.f32 %v2691_v32, %v10507_v58  ;;  %6269 = vmatprep.subr.mxu1 %v5473_v34  ;;  %v566_v31 = vld [vmem:[%s10344_s21 + $0x630] sm:$0xff]  ;;  %v5465_v32 = vld [vmem:[#allocation2 + $0x898] sm:$0xff] }
 0x323   : > { %v2695_v30 = vpop.f32.mrf.mxu0  ;;  %10005 = vmatmul.mubr.msk.f32.gmra.mxu0 %vm721_vm1, %v564_v8  ;;  %6270 = vmatpush1.msra.mxu1 %v4116_v3 }
 0x324   : > { %4805 = vst [vmem:[#allocation2 + $0x930] sm:$0xff] %v4128_v21  ;;  %v4129_v22 = vmax.f32 %v2692_v29, 0.0  ;;  %v12357_v23 = vadd.f32 %v2695_v30, %v10503_v56  ;;  %6271 = vmatprep.subr.mxu1 %v5471_v41  ;;  %2987 = vmatprep.mubr.f32.mxu0 %v10266_v2  ;;  %v5463_v29 = vld [vmem:[#allocation2 + $0x888] sm:$0xff]  ;;  %v567_v30 = vld [vmem:[%s10344_s21 + $0x638] sm:$0xff] }
 0x325   : > { %v2697_v46 = vpop.f32.mrf.mxu0  ;;  %6272 = vmatpush1.msra.mxu1 %v4114_v42 }
 0x326   : > { %4806 = vst.msk [vmem:[#allocation2 + $0x938] sm:$0xff] %vm4511_vm2, %v4129_v22  ;;  %v4130_v36 = vmax.f32 %v12357_v23, 0.0  ;;  %v2698_v3 = vadd.f32 %v2697_v46, %v10507_v58  ;;  %6273 = vmatprep.subr.mxu1 %v5469_v5  ;;  %v5461_v22 = vld [vmem:[#allocation2 + $0x878] sm:$0xff]  ;;  %v5459_v46 = vld [vmem:[#allocation2 + $0x868] sm:$0xff]  ;;  %v568_v5 = vld [vmem:[%s10344_s21 + $0x640] sm:$0xff] }
 0x327   : > { %v2701_v28 = vpop.f32.mrf.mxu0  ;;  %10006 = vmatmul.mubr.msk.f32.gmra.mxu0 %vm721_vm1, %v565_v50  ;;  %6274 = vmatpush1.msra.mxu1 %v4112_v43 }
 0x328   : > { %4807 = vst [vmem:[#allocation2 + $0x940] sm:$0xff] %v4130_v36  ;;  %v4131_v61 = vmax.f32 %v2698_v3, 0.0  ;;  %v12372_v42 = vadd.f32 %v2701_v28, %v10503_v56  ;;  %6275 = vmatprep.subr.mxu1 %v5467_v63  ;;  %2993 = vmatprep.mubr.f32.mxu0 %v10266_v2  ;;  %v5457_v28 = vld [vmem:[#allocation2 + $0x858] sm:$0xff] }
 0x329   : > { %v2703_v8 = vpop.f32.mrf.mxu0  ;;  %6276 = vmatpush1.msra.mxu1 %v4110_v25 }
 0x32a   : > { %4808 = vst.msk [vmem:[#allocation2 + $0x948] sm:$0xff] %vm4511_vm2, %v4131_v61  ;;  %v4132_v18 = vmax.f32 %v12372_v42, 0.0  ;;  %v2704_v43 = vadd.f32 %v2703_v8, %v10507_v58  ;;  %6277 = vmatprep.subr.mxu1 %v5465_v32  ;;  %v5455_v61 = vld [vmem:[#allocation2 + $0x848] sm:$0xff]  ;;  %v5453_v32 = vld [vmem:[#allocation2 + $0x838] sm:$0xff] }
 0x32b   : > { %v2707_v34 = vpop.f32.mrf.mxu0  ;;  %10007 = vmatmul.mubr.msk.f32.gmra.mxu0 %vm721_vm1, %v566_v31  ;;  %6278 = vmatpush1.msra.mxu1 %v4108_v12  ;;  %v569_v31 = vld [vmem:[%s10344_s21 + $0x648] sm:$0xff] }
 0x32c   : > { %4809 = vst [vmem:[#allocation2 + $0x950] sm:$0xff] %v4132_v18  ;;  %v4133_v40 = vmax.f32 %v2704_v43, 0.0  ;;  %v12387_v25 = vadd.f32 %v2707_v34, %v10503_v56  ;;  %6279 = vmatprep.subr.mxu1 %v5463_v29  ;;  %2999 = vmatprep.mubr.f32.mxu0 %v10266_v2  ;;  %v5451_v34 = vld [vmem:[#allocation2 + $0x828] sm:$0xff]  ;;  %v570_v29 = vld [vmem:[%s10344_s21 + $0x650] sm:$0xff] }
 0x32d   : > { %v2709_v41 = vpop.f32.mrf.mxu0  ;;  %6280 = vmatpush1.msra.mxu1 %v4106_v44 }
 0x32e   : > { %4810 = vst.msk [vmem:[#allocation2 + $0x958] sm:$0xff] %vm4511_vm2, %v4133_v40  ;;  %v4134_v47 = vmax.f32 %v12387_v25, 0.0  ;;  %v2710_v12 = vadd.f32 %v2709_v41, %v10507_v58  ;;  %6281 = vmatprep.subr.mxu1 %v5461_v22  ;;  %v5447_v22 = vld [vmem:[#allocation2 + $0x808] sm:$0xff] }
 0x32f   : > { %v2713_v50 = vpop.f32.mrf.mxu0  ;;  %10008 = vmatmul.mubr.msk.f32.gmra.mxu0 %vm721_vm1, %v567_v30  ;;  %6282 = vmatpush1.msra.mxu1 %v4104_v35  ;;  %v5449_v30 = vld [vmem:[#allocation2 + $0x818] sm:$0xff] }
 0x330   : > { %4811 = vst [vmem:[#allocation2 + $0x960] sm:$0xff] %v4134_v47  ;;  %v4135_v45 = vmax.f32 %v2710_v12, 0.0  ;;  %v12402_v44 = vadd.f32 %v2713_v50, %v10503_v56  ;;  %6283 = vmatprep.subr.mxu1 %v5459_v46  ;;  %3005 = vmatprep.mubr.f32.mxu0 %v10266_v2  ;;  %v571_v12 = vld [vmem:[%s10344_s21 + $0x658] sm:$0xff] }
 0x331   : > { %v2715_v3 = vpop.f32.mrf.mxu0  ;;  %6284 = vmatpush1.msra.mxu1 %v4102_v37 }
 0x332   : > { %4812 = vst.msk [vmem:[#allocation2 + $0x968] sm:$0xff] %vm4511_vm2, %v4135_v45  ;;  %v4136_v19 = vmax.f32 %v12402_v44, 0.0  ;;  %v2716_v35 = vadd.f32 %v2715_v3, %v10507_v58  ;;  %6285 = vmatprep.subr.mxu1 %v5457_v28 }
 0x333   : > { %v2719_v63 = vpop.f32.mrf.mxu0  ;;  %10009 = vmatmul.mubr.msk.f32.gmra.mxu0 %vm721_vm1, %v568_v5  ;;  %6286 = vmatpush1.msra.mxu1 %v4100_v6 }
 0x334   : > { %4813 = vst [vmem:[#allocation2 + $0x970] sm:$0xff] %v4136_v19  ;;  %v4137_v33 = vmax.f32 %v2716_v35, 0.0  ;;  %v12417_v37 = vadd.f32 %v2719_v63, %v10503_v56  ;;  %6287 = vmatprep.subr.mxu1 %v5455_v61  ;;  %3011 = vmatprep.mubr.f32.mxu0 %v10266_v2 }
 0x335   : > { %v2721_v8 = vpop.f32.mrf.mxu0  ;;  %6288 = vmatpush1.msra.mxu1 %v4098_v10 }
 0x336   : > { %4814 = vst.msk [vmem:[#allocation2 + $0x978] sm:$0xff] %vm4511_vm2, %v4137_v33  ;;  %v4138_v38 = vmax.f32 %v12417_v37, 0.0  ;;  %v2722_v6 = vadd.f32 %v2721_v8, %v10507_v58  ;;  %6289 = vmatprep.subr.mxu1 %v5453_v32  ;;  %v573_v33 = vld [vmem:[%s10344_s21 + $0x668] sm:$0xff] }
 0x337   : > { %v2725_v43 = vpop.f32.mrf.mxu0  ;;  %10010 = vmatmul.mubr.msk.f32.gmra.mxu0 %vm721_vm1, %v569_v31  ;;  %6290 = vmatpush1.msra.mxu1 %v4096_v0 }
 0x338   : > { %4815 = vst [vmem:[#allocation2 + $0x980] sm:$0xff] %v4138_v38  ;;  %v4139_v13 = vmax.f32 %v2722_v6, 0.0  ;;  %v12432_v10 = vadd.f32 %v2725_v43, %v10503_v56  ;;  %6291 = vmatprep.subr.mxu1 %v5451_v34  ;;  %3017 = vmatprep.mubr.f32.mxu0 %v10266_v2 }
 0x339   : > { %v2727_v40 = vpop.f32.mrf.mxu0  ;;  %6292 = vmatpush1.msra.mxu1 %v4094_v26 }
 0x33a   : > { %4816 = vst.msk [vmem:[#allocation2 + $0x988] sm:$0xff] %vm4511_vm2, %v4139_v13  ;;  %v4140_v39 = vmax.f32 %v12432_v10, 0.0  ;;  %v2728_v0 = vadd.f32 %v2727_v40, %v10507_v58  ;;  %6293 = vmatprep.subr.mxu1 %v5449_v30  ;;  %v574_v13 = vld [vmem:[%s10344_s21 + $0x670] sm:$0xff] }
 0x33b   : > { %v2731_v41 = vpop.f32.mrf.mxu0  ;;  %10011 = vmatmul.mubr.msk.f32.gmra.mxu0 %vm721_vm1, %v570_v29  ;;  %6294 = vmatpush1.msra.mxu1 %v4092_v14 }
 0x33c   : > { %4817 = vst [vmem:[#allocation2 + $0x990] sm:$0xff] %v4140_v39  ;;  %v4141_v27 = vmax.f32 %v2728_v0, 0.0  ;;  %v12447_v26 = vadd.f32 %v2731_v41, %v10503_v56  ;;  %6295 = vmatprep.subr.mxu1 %v5447_v22  ;;  %3023 = vmatprep.mubr.f32.mxu0 %v10266_v2 }
 0x33d   : > { %v2733_v50 = vpop.f32.mrf.mxu0  ;;  %6296 = vmatpush1.msra.mxu1 %v4090_v48 }
 0x33e   : > { %4818 = vst.msk [vmem:[#allocation2 + $0x998] sm:$0xff] %vm4511_vm2, %v4141_v27  ;;  %v4142_v52 = vmax.f32 %v12447_v26, 0.0  ;;  %v2734_v14 = vadd.f32 %v2733_v50, %v10507_v58  ;;  %v575_v27 = vld [vmem:[%s10344_s21 + $0x678] sm:$0xff] }
 0x33f   : > { %v2737_v46 = vpop.f32.mrf.mxu0  ;;  %10012 = vmatmul.mubr.msk.f32.gmra.mxu0 %vm721_vm1, %v571_v12 }
 0x340   : > { %4819 = vst [vmem:[#allocation2 + $0x9a0] sm:$0xff] %v4142_v52  ;;  %v4143_v45 = vmax.f32 %v2734_v14, 0.0  ;;  %v12460_v5 = vadd.f32 %v2737_v46, %v10503_v56  ;;  %3029 = vmatprep.mubr.f32.mxu0 %v10266_v2 }
 0x341   : > { %v2739_v48 = vpop.f32.mrf.mxu0 }
 0x342   : > { %4820 = vst.msk [vmem:[#allocation2 + $0x9a8] sm:$0xff] %vm4511_vm2, %v4143_v45  ;;  %v4144_v3 = vmax.f32 %v12460_v5, 0.0  ;;  %v2740_v28 = vadd.f32 %v2739_v48, %v10507_v58  ;;  %v576_v48 = vld [vmem:[%s10344_s21 + $0x680] sm:$0xff] }
 0x343   : > { %v2743_v35 = vpop.f32.mrf.mxu0  ;;  %10013 = vmatmul.mubr.msk.f32.gmra.mxu0 %vm721_vm1, %v572_v20 }
 0x344   : > { %4821 = vst [vmem:[#allocation2 + $0x9b0] sm:$0xff] %v4144_v3  ;;  %v4145_v63 = vmax.f32 %v2740_v28, 0.0  ;;  %v12471_v61 = vadd.f32 %v2743_v35, %v10503_v56  ;;  %3035 = vmatprep.mubr.f32.mxu0 %v10266_v2 }
 0x345   : > { %v2745_v31 = vpop.f32.mrf.mxu0 }
 0x346   : > { %4822 = vst.msk [vmem:[#allocation2 + $0x9b8] sm:$0xff] %vm4511_vm2, %v4145_v63  ;;  %v4146_v8 = vmax.f32 %v12471_v61, 0.0  ;;  %v2746_v32 = vadd.f32 %v2745_v31, %v10507_v58 }
 0x347   : > { %v2749_v6 = vpop.f32.mrf.mxu0  ;;  %10014 = vmatmul.mubr.msk.f32.gmra.mxu0 %vm721_vm1, %v573_v33 }
 0x348   : > { %4823 = vst [vmem:[#allocation2 + $0x9c0] sm:$0xff] %v4146_v8  ;;  %v4147_v43 = vmax.f32 %v2746_v32, 0.0  ;;  %v12482_v34 = vadd.f32 %v2749_v6, %v10503_v56  ;;  %3041 = vmatprep.mubr.f32.mxu0 %v10266_v2  ;;  %v577_v6 = vld [vmem:[%s10344_s21 + $0x688] sm:$0xff] }
 0x349   : > { %v2751_v29 = vpop.f32.mrf.mxu0 }
 0x34a   : > { %4824 = vst.msk [vmem:[#allocation2 + $0x9c8] sm:$0xff] %vm4511_vm2, %v4147_v43  ;;  %v4148_v40 = vmax.f32 %v12482_v34, 0.0  ;;  %v2752_v30 = vadd.f32 %v2751_v29, %v10507_v58 }
 0x34b   : > { %v2755_v0 = vpop.f32.mrf.mxu0  ;;  %10015 = vmatmul.mubr.msk.f32.gmra.mxu0 %vm721_vm1, %v574_v13 }
 0x34c   : > { %4825 = vst [vmem:[#allocation2 + $0x9d0] sm:$0xff] %v4148_v40  ;;  %v4149_v41 = vmax.f32 %v2752_v30, 0.0  ;;  %v12493_v22 = vadd.f32 %v2755_v0, %v10503_v56  ;;  %3047 = vmatprep.mubr.f32.mxu0 %v10266_v2 }
 0x34d   : > { %v2757_v12 = vpop.f32.mrf.mxu0 }
 0x34e   : > { %4826 = vst.msk [vmem:[#allocation2 + $0x9d8] sm:$0xff] %vm4511_vm2, %v4149_v41  ;;  %v4150_v50 = vmax.f32 %v12493_v22, 0.0  ;;  %v2758_v14 = vadd.f32 %v2757_v12, %v10507_v58  ;;  %v578_v22 = vld [vmem:[%s10344_s21 + $0x690] sm:$0xff] }
 0x34f   : > { %v2761_v46 = vpop.f32.mrf.mxu0  ;;  %10016 = vmatmul.mubr.msk.f32.gmra.mxu0 %vm721_vm1, %v575_v27 }
 0x350   : > { %4827 = vst [vmem:[#allocation2 + $0x9e0] sm:$0xff] %v4150_v50  ;;  %v4151_v45 = vmax.f32 %v2758_v14, 0.0  ;;  %v2762_v20 = vadd.f32 %v2761_v46, %v10503_v56  ;;  %3053 = vmatprep.mubr.f32.mxu0 %v10266_v2 }
 0x351   : > { %v2763_v28 = vpop.f32.mrf.mxu0 }
 0x352   : > { %4828 = vst.msk [vmem:[#allocation2 + $0x9e8] sm:$0xff] %vm4511_vm2, %v4151_v45  ;;  %v4152_v35 = vmax.f32 %v2762_v20, 0.0  ;;  %v2764_v63 = vadd.f32 %v2763_v28, %v10507_v58 }
 0x353   : > { %v2767_v33 = vpop.f32.mrf.mxu0  ;;  %10017 = vmatmul.mubr.msk.f32.gmra.mxu0 %vm721_vm1, %v576_v48  ;;  %v579_v48 = vld [vmem:[%s10344_s21 + $0x698] sm:$0xff] }
 0x354   : > { %4829 = vst [vmem:[#allocation2 + $0x9f0] sm:$0xff] %v4152_v35  ;;  %v4153_v31 = vmax.f32 %v2764_v63, 0.0  ;;  %v12508_v32 = vadd.f32 %v2767_v33, %v10503_v56  ;;  %3059 = vmatprep.mubr.f32.mxu0 %v10266_v2 }
 0x355   : > { %v2769_v43 = vpop.f32.mrf.mxu0 }
 0x356   : > { %4830 = vst.msk [vmem:[#allocation2 + $0x9f8] sm:$0xff] %vm4511_vm2, %v4153_v31  ;;  %v4154_v13 = vmax.f32 %v12508_v32, 0.0  ;;  %v2770_v29 = vadd.f32 %v2769_v43, %v10507_v58  ;;  %v604_v32 = vld [vmem:[%s10344_s21 + $0x760] sm:$0xff] }
 0x357   : > { %v2773_v30 = vpop.f32.mrf.mxu0  ;;  %10018 = vmatmul.mubr.msk.f32.gmra.mxu0 %vm721_vm1, %v577_v6 }
 0x358   : > { %4831 = vst [vmem:[#allocation2 + $0xa00] sm:$0xff] %v4154_v13  ;;  %v4155_v0 = vmax.f32 %v2770_v29, 0.0  ;;  %v12519_v41 = vadd.f32 %v2773_v30, %v10503_v56  ;;  %3065 = vmatprep.mubr.f32.mxu0 %v10266_v2 }
 0x359   : > { %v2775_v27 = vpop.f32.mrf.mxu0  ;;  %v5507_v43 = vld [vmem:[#allocation2 + $0x9e8] sm:$0xff] }
 0x35a   : > { %4832 = vst.msk [vmem:[#allocation2 + $0xa08] sm:$0xff] %vm4511_vm2, %v4155_v0  ;;  %v4156_v12 = vmax.f32 %v12519_v41, 0.0  ;;  %v2776_v14 = vadd.f32 %v2775_v27, %v10507_v58  ;;  %v580_v0 = vld [vmem:[%s10344_s21 + $0x6a0] sm:$0xff]  ;;  %v5505_v27 = vld [vmem:[#allocation2 + $0x9d8] sm:$0xff] }
 0x35b   : > { %v2779_v46 = vpop.f32.mrf.mxu0  ;;  %10019 = vmatmul.mubr.msk.f32.gmra.mxu0 %vm721_vm1, %v578_v22 }
 0x35c   : > { %4833 = vst [vmem:[#allocation2 + $0xa10] sm:$0xff] %v4156_v12  ;;  %v4157_v45 = vmax.f32 %v2776_v14, 0.0  ;;  %v12530_v20 = vadd.f32 %v2779_v46, %v10503_v56  ;;  %3071 = vmatprep.mubr.f32.mxu0 %v10266_v2 }
 0x35d   : > { %v2781_v28 = vpop.f32.mrf.mxu0  ;;  %v5509_v63 = vld [vmem:[#allocation2 + $0x9f8] sm:$0xff] }
 0x35e   : > { %4834 = vst.msk [vmem:[#allocation2 + $0xa18] sm:$0xff] %vm4511_vm2, %v4157_v45  ;;  %v4158_v33 = vmax.f32 %v12530_v20, 0.0  ;;  %v2782_v31 = vadd.f32 %v2781_v28, %v10507_v58  ;;  %6297 = vmatprep.subr.mxu1 %v5509_v63  ;;  %v5503_v45 = vld [vmem:[#allocation2 + $0x9c8] sm:$0xff] }
 0x35f   : > { %v2785_v6 = vpop.f32.mrf.mxu0  ;;  %10020 = vmatmul.mubr.msk.f32.gmra.mxu0 %vm721_vm1, %v579_v48  ;;  %6298 = vmatpush2.msra.mxu1 %v4152_v35  ;;  %v581_v28 = vld [vmem:[%s10344_s21 + $0x6a8] sm:$0xff] }
 0x360   : > { %4835 = vst [vmem:[#allocation2 + $0xa20] sm:$0xff] %v4158_v33  ;;  %v4159_v29 = vmax.f32 %v2782_v31, 0.0  ;;  %v12541_v30 = vadd.f32 %v2785_v6, %v10503_v56  ;;  %6299 = vmatprep.subr.mxu1 %v5507_v43  ;;  %3077 = vmatprep.mubr.f32.mxu0 %v10266_v2  ;;  %v5501_v31 = vld [vmem:[#allocation2 + $0x9b8] sm:$0xff]  ;;  %v5499_v43 = vld [vmem:[#allocation2 + $0x9a8] sm:$0xff] }
 0x361   : > { %v2787_v22 = vpop.f32.mrf.mxu0  ;;  %6300 = vmatpush2.msra.mxu1 %v4150_v50 }
 0x362   : > { %4836 = vst.msk [vmem:[#allocation2 + $0xa28] sm:$0xff] %vm4511_vm2, %v4159_v29  ;;  %v4160_v35 = vmax.f32 %v12541_v30, 0.0  ;;  %v2788_v14 = vadd.f32 %v2787_v22, %v10507_v58  ;;  %6301 = vmatprep.subr.mxu1 %v5505_v27  ;;  %v582_v29 = vld [vmem:[%s10344_s21 + $0x6b0] sm:$0xff]  ;;  %v5497_v22 = vld [vmem:[#allocation2 + $0x998] sm:$0xff] }
 0x363   : > { %v2791_v46 = vpop.f32.mrf.mxu0  ;;  %10021 = vmatmul.mubr.msk.f32.gmra.mxu0 %vm721_vm1, %v580_v0  ;;  %6302 = vmatpush2.msra.mxu1 %v4148_v40 }
 0x364   : > { %4837 = vst [vmem:[#allocation2 + $0xa30] sm:$0xff] %v4160_v35  ;;  %v4161_v48 = vmax.f32 %v2788_v14, 0.0  ;;  %v12554_v50 = vadd.f32 %v2791_v46, %v10503_v56  ;;  %6303 = vmatprep.subr.mxu1 %v5503_v45  ;;  %3083 = vmatprep.mubr.f32.mxu0 %v10266_v2  ;;  %v5495_v14 = vld [vmem:[#allocation2 + $0x988] sm:$0xff]  ;;  %v583_v46 = vld [vmem:[%s10344_s21 + $0x6b8] sm:$0xff] }
 0x365   : > { %v2793_v63 = vpop.f32.mrf.mxu0  ;;  %6304 = vmatpush2.msra.mxu1 %v4146_v8 }
 0x366   : > { %4838 = vst.msk [vmem:[#allocation2 + $0xa38] sm:$0xff] %vm4511_vm2, %v4161_v48  ;;  %v4162_v34 = vmax.f32 %v12554_v50, 0.0  ;;  %v2794_v40 = vadd.f32 %v2793_v63, %v10507_v58  ;;  %6305 = vmatprep.subr.mxu1 %v5501_v31  ;;  %v5493_v48 = vld [vmem:[#allocation2 + $0x978] sm:$0xff]  ;;  %v5491_v63 = vld [vmem:[#allocation2 + $0x968] sm:$0xff]  ;;  %v584_v31 = vld [vmem:[%s10344_s21 + $0x6c0] sm:$0xff] }
 0x367   : > { %v2797_v6 = vpop.f32.mrf.mxu0  ;;  %10022 = vmatmul.mubr.msk.f32.gmra.mxu0 %vm721_vm1, %v581_v28  ;;  %6306 = vmatpush2.msra.mxu1 %v4144_v3 }
 0x368   : > { %4839 = vst [vmem:[#allocation2 + $0xa40] sm:$0xff] %v4162_v34  ;;  %v4163_v61 = vmax.f32 %v2794_v40, 0.0  ;;  %v12569_v8 = vadd.f32 %v2797_v6, %v10503_v56  ;;  %6307 = vmatprep.subr.mxu1 %v5499_v43  ;;  %3089 = vmatprep.mubr.f32.mxu0 %v10266_v2  ;;  %v5489_v6 = vld [vmem:[#allocation2 + $0x958] sm:$0xff] }
 0x369   : > { %v2799_v0 = vpop.f32.mrf.mxu0  ;;  %6308 = vmatpush2.msra.mxu1 %v4142_v52 }
 0x36a   : > { %4840 = vst.msk [vmem:[#allocation2 + $0xa48] sm:$0xff] %vm4511_vm2, %v4163_v61  ;;  %v4164_v5 = vmax.f32 %v12569_v8, 0.0  ;;  %v2800_v3 = vadd.f32 %v2799_v0, %v10507_v58  ;;  %6309 = vmatprep.subr.mxu1 %v5497_v22  ;;  %v5487_v61 = vld [vmem:[#allocation2 + $0x948] sm:$0xff]  ;;  %v5485_v22 = vld [vmem:[#allocation2 + $0x938] sm:$0xff] }
 0x36b   : > { %v2803_v27 = vpop.f32.mrf.mxu0  ;;  %10023 = vmatmul.mubr.msk.f32.gmra.mxu0 %vm721_vm1, %v582_v29  ;;  %6310 = vmatpush2.msra.mxu1 %v4140_v39  ;;  %v585_v29 = vld [vmem:[%s10344_s21 + $0x6c8] sm:$0xff] }
 0x36c   : > { %4841 = vst [vmem:[#allocation2 + $0xa50] sm:$0xff] %v4164_v5  ;;  %v4165_v26 = vmax.f32 %v2800_v3, 0.0  ;;  %v12584_v52 = vadd.f32 %v2803_v27, %v10503_v56  ;;  %6311 = vmatprep.subr.mxu1 %v5495_v14  ;;  %3095 = vmatprep.mubr.f32.mxu0 %v10266_v2  ;;  %v5483_v27 = vld [vmem:[#allocation2 + $0x928] sm:$0xff]  ;;  %v586_v14 = vld [vmem:[%s10344_s21 + $0x6d0] sm:$0xff] }
 0x36d   : > { %v2805_v45 = vpop.f32.mrf.mxu0  ;;  %6312 = vmatpush2.msra.mxu1 %v4138_v38 }
 0x36e   : > { %4842 = vst.msk [vmem:[#allocation2 + $0xa58] sm:$0xff] %vm4511_vm2, %v4165_v26  ;;  %v4166_v10 = vmax.f32 %v12584_v52, 0.0  ;;  %v2806_v39 = vadd.f32 %v2805_v45, %v10507_v58  ;;  %6313 = vmatprep.subr.mxu1 %v5493_v48  ;;  %v5904_v45 = vrot.slane %v12326_v11, %v10492_v53 }
 0x36f   : > { %v2809_v28 = vpop.f32.mrf.mxu0  ;;  %10024 = vmatmul.mubr.msk.f32.gmra.mxu0 %vm721_vm1, %v583_v46  ;;  %6314 = vmatpush2.msra.mxu1 %v4136_v19  ;;  %v5481_v46 = vld [vmem:[#allocation2 + $0x918] sm:$0xff] }
 0x370   : > { %4843 = vst [vmem:[#allocation2 + $0xa60] sm:$0xff] %v4166_v10  ;;  %v4167_v37 = vmax.f32 %v2806_v39, 0.0  ;;  %v12599_v38 = vadd.f32 %v2809_v28, %v10503_v56  ;;  %6315 = vmatprep.subr.mxu1 %v5491_v63  ;;  %3101 = vmatprep.mubr.f32.mxu0 %v10266_v2  ;;  %v587_v63 = vld [vmem:[%s10344_s21 + $0x6d8] sm:$0xff] }
 0x371   : > { %v2811_v40 = vpop.f32.mrf.mxu0  ;;  %6316 = vmatpush2.msra.mxu1 %v4134_v47 }
 0x372   : > { %4844 = vst.msk [vmem:[#allocation2 + $0xa68] sm:$0xff] %vm4511_vm2, %v4167_v37  ;;  %v4168_v44 = vmax.f32 %v12599_v38, 0.0  ;;  %v2812_v19 = vadd.f32 %v2811_v40, %v10507_v58  ;;  %6317 = vmatprep.subr.mxu1 %v5489_v6 }
 0x373   : > { %v2815_v43 = vpop.f32.mrf.mxu0  ;;  %10025 = vmatmul.mubr.msk.f32.gmra.mxu0 %vm721_vm1, %v584_v31  ;;  %6318 = vmatpush2.msra.mxu1 %v4132_v18 }
 0x374   : > { %4845 = vst [vmem:[#allocation2 + $0xa70] sm:$0xff] %v4168_v44  ;;  %v4169_v25 = vmax.f32 %v2812_v19, 0.0  ;;  %v12614_v47 = vadd.f32 %v2815_v43, %v10503_v56  ;;  %6319 = vmatprep.subr.mxu1 %v5487_v61  ;;  %3107 = vmatprep.mubr.f32.mxu0 %v10266_v2 }
 0x375   : > { %v2817_v0 = vpop.f32.mrf.mxu0  ;;  %6320 = vmatpush2.msra.mxu1 %v4130_v36 }
 0x376   : > { %4846 = vst.msk [vmem:[#allocation2 + $0xa78] sm:$0xff] %vm4511_vm2, %v4169_v25  ;;  %v4170_v42 = vmax.f32 %v12614_v47, 0.0  ;;  %v2818_v18 = vadd.f32 %v2817_v0, %v10507_v58  ;;  %6321 = vmatprep.subr.mxu1 %v5485_v22 }
 0x377   : > { %v2821_v3 = vpop.f32.mrf.mxu0  ;;  %10026 = vmatmul.mubr.msk.f32.gmra.mxu0 %vm721_vm1, %v585_v29  ;;  %6322 = vmatpush2.msra.mxu1 %v4128_v21  ;;  %v589_v29 = vld [vmem:[%s10344_s21 + $0x6e8] sm:$0xff] }
 0x378   : > { %4847 = vst [vmem:[#allocation2 + $0xa80] sm:$0xff] %v4170_v42  ;;  %v4171_v23 = vmax.f32 %v2818_v18, 0.0  ;;  %v12629_v36 = vadd.f32 %v2821_v3, %v10503_v56  ;;  %6323 = vmatprep.subr.mxu1 %v5483_v27  ;;  %3113 = vmatprep.mubr.f32.mxu0 %v10266_v2 }
 0x379   : > { %v2823_v26 = vpop.f32.mrf.mxu0  ;;  %6324 = vmatpush2.msra.mxu1 %v4126_v17  ;;  %v5916_v17 = vrot.slane %v12326_v11, %v11101_v1 }
 0x37a   : > { %4848 = vst.msk [vmem:[#allocation2 + $0xa88] sm:$0xff] %vm4511_vm2, %v4171_v23  ;;  %v4172_v16 = vmax.f32 %v12629_v36, 0.0  ;;  %v2824_v21 = vadd.f32 %v2823_v26, %v10507_v58  ;;  %6325 = vmatprep.subr.mxu1 %v5481_v46 }
 0x37b   : > { %v2827_v48 = vpop.f32.mrf.mxu0  ;;  %10027 = vmatmul.mubr.msk.f32.gmra.mxu0 %vm721_vm1, %v586_v14  ;;  %6326 = vmatpush2.msra.mxu1 %v4124_v57  ;;  %v590_v14 = vld [vmem:[%s10344_s21 + $0x6f0] sm:$0xff] }
 0x37c   : > { %4849 = vst [vmem:[#allocation2 + $0xa90] sm:$0xff] %v4172_v16  ;;  %v4173_v39 = vmax.f32 %v2824_v21, 0.0  ;;  %v12648_v28 = vadd.f32 %v2827_v48, %v10503_v56  ;;  %6327 = vmatprep.subr.mxu1 %v5479_v4  ;;  %3119 = vmatprep.mubr.f32.mxu0 %v10266_v2 }
 0x37d   : > { %v2829_v37 = vpop.f32.mrf.mxu0  ;;  %6328 = vmatpush2.msra.mxu1 %v4122_v24 }
 0x37e   : > { %4850 = vst.msk [vmem:[#allocation2 + $0xa98] sm:$0xff] %vm4511_vm2, %v4173_v39  ;;  %v4174_v60 = vmax.f32 %v12648_v28, 0.0  ;;  %v2830_v57 = vadd.f32 %v2829_v37, %v10507_v58  ;;  %6330 = vmatmul.mubr.f32.vlgmr.msra.gmra.mxu1 %v5904_v45 }
 0x37f   : > { %v2833_v11 = vpop.f32.mrf.mxu0  ;;  %10028 = vmatmul.mubr.msk.f32.gmra.mxu0 %vm721_vm1, %v587_v63  ;;  %6400 = vmatprep.mubr.f32.mxu1 %v5916_v17  ;;  %v591_v17 = vld [vmem:[%s10344_s21 + $0x6f8] sm:$0xff] }
 0x380   : > { %4851 = vst [vmem:[#allocation2 + $0xaa0] sm:$0xff] %v4174_v60  ;;  %v4175_v31 = vmax.f32 %v2830_v57, 0.0  ;;  %v12661_v40 = vadd.f32 %v2833_v11, %v10503_v56  ;;  %3125 = vmatprep.mubr.f32.mxu0 %v10266_v2 }
 0x381   : > { %v2835_v24 = vpop.f32.mrf.mxu0 }
 0x382   : > { %4852 = vst.msk [vmem:[#allocation2 + $0xaa8] sm:$0xff] %vm4511_vm2, %v4175_v31  ;;  %v4176_v6 = vmax.f32 %v12661_v40, 0.0  ;;  %v2836_v19 = vadd.f32 %v2835_v24, %v10507_v58 }
 0x383   : > { %v2839_v43 = vpop.f32.mrf.mxu0  ;;  %10029 = vmatmul.mubr.msk.f32.gmra.mxu0 %vm721_vm1, %v588_v54  ;;  %v592_v54 = vld [vmem:[%s10344_s21 + $0x700] sm:$0xff] }
 0x384   : > { %4853 = vst [vmem:[#allocation2 + $0xab0] sm:$0xff] %v4176_v6  ;;  %v4177_v61 = vmax.f32 %v2836_v19, 0.0  ;;  %v12672_v25 = vadd.f32 %v2839_v43, %v10503_v56  ;;  %3131 = vmatprep.mubr.f32.mxu0 %v10266_v2 }
 0x385   : > { %v2841_v0 = vpop.f32.mrf.mxu0 }
 0x386   : > { %4854 = vst.msk [vmem:[#allocation2 + $0xab8] sm:$0xff] %vm4511_vm2, %v4177_v61  ;;  %v4178_v22 = vmax.f32 %v12672_v25, 0.0  ;;  %v2842_v18 = vadd.f32 %v2841_v0, %v10507_v58 }
 0x387   : > { %v2845_v3 = vpop.f32.mrf.mxu0  ;;  %10030 = vmatmul.mubr.msk.f32.gmra.mxu0 %vm721_vm1, %v589_v29 }
 0x388   : > { %4855 = vst [vmem:[#allocation2 + $0xac0] sm:$0xff] %v4178_v22  ;;  %v4179_v27 = vmax.f32 %v2842_v18, 0.0  ;;  %v12683_v23 = vadd.f32 %v2845_v3, %v10503_v56  ;;  %3137 = vmatprep.mubr.f32.mxu0 %v10266_v2  ;;  %v593_v18 = vld [vmem:[%s10344_s21 + $0x708] sm:$0xff] }
 0x389   : > { %v2847_v26 = vpop.f32.mrf.mxu0 }
 0x38a   : > { %4856 = vst.msk [vmem:[#allocation2 + $0xac8] sm:$0xff] %vm4511_vm2, %v4179_v27  ;;  %v4180_v46 = vmax.f32 %v12683_v23, 0.0  ;;  %v2848_v21 = vadd.f32 %v2847_v26, %v10507_v58 }
 0x38b   : > { %v2851_v45 = vpop.f32.mrf.mxu0  ;;  %10031 = vmatmul.mubr.msk.f32.gmra.mxu0 %vm721_vm1, %v590_v14 }
 0x38c   : > { %4857 = vst [vmem:[#allocation2 + $0xad0] sm:$0xff] %v4180_v46  ;;  %v4181_v48 = vmax.f32 %v2848_v21, 0.0  ;;  %v12694_v4 = vadd.f32 %v2851_v45, %v10503_v56  ;;  %3143 = vmatprep.mubr.f32.mxu0 %v10266_v2 }
 0x38d   : > { %v2853_v39 = vpop.f32.mrf.mxu0 }
 0x38e   : > { %4858 = vst.msk [vmem:[#allocation2 + $0xad8] sm:$0xff] %vm4511_vm2, %v4181_v48  ;;  %v4182_v63 = vmax.f32 %v12694_v4, 0.0  ;;  %v2854_v37 = vadd.f32 %v2853_v39, %v10507_v58  ;;  %v594_v48 = vld [vmem:[%s10344_s21 + $0x710] sm:$0xff] }
 0x38f   : > { %v2857_v57 = vpop.f32.mrf.mxu0  ;;  %10032 = vmatmul.mubr.msk.f32.gmra.mxu0 %vm721_vm1, %v591_v17 }
 0x390   : > { %4859 = vst [vmem:[#allocation2 + $0xae0] sm:$0xff] %v4182_v63  ;;  %v4183_v11 = vmax.f32 %v2854_v37, 0.0  ;;  %v2858_v31 = vadd.f32 %v2857_v57, %v10503_v56  ;;  %3149 = vmatprep.mubr.f32.mxu0 %v10266_v2 }
 0x391   : > { %v2859_v24 = vpop.f32.mrf.mxu0 }
 0x392   : > { %4860 = vst.msk [vmem:[#allocation2 + $0xae8] sm:$0xff] %vm4511_vm2, %v4183_v11  ;;  %v4184_v19 = vmax.f32 %v2858_v31, 0.0  ;;  %v2860_v43 = vadd.f32 %v2859_v24, %v10507_v58  ;;  %v595_v31 = vld [vmem:[%s10344_s21 + $0x718] sm:$0xff] }
 0x393   : > { %v2863_v61 = vpop.f32.mrf.mxu0  ;;  %10033 = vmatmul.mubr.msk.f32.gmra.mxu0 %vm721_vm1, %v592_v54 }
 0x394   : > { %4861 = vst [vmem:[#allocation2 + $0xaf0] sm:$0xff] %v4184_v19  ;;  %v4185_v29 = vmax.f32 %v2860_v43, 0.0  ;;  %v12709_v0 = vadd.f32 %v2863_v61, %v10503_v56  ;;  %3155 = vmatprep.mubr.f32.mxu0 %v10266_v2 }
 0x395   : > { %v2865_v3 = vpop.f32.mrf.mxu0 }
 0x396   : > { %4862 = vst.msk [vmem:[#allocation2 + $0xaf8] sm:$0xff] %vm4511_vm2, %v4185_v29  ;;  %v4186_v27 = vmax.f32 %v12709_v0, 0.0  ;;  %v2866_v14 = vadd.f32 %v2865_v3, %v10507_v58  ;;  %v620_v0 = vld [vmem:[%s10344_s21 + $0x7e0] sm:$0xff] }
 0x397   : > { %v2869_v26 = vpop.f32.mrf.mxu0  ;;  %10034 = vmatmul.mubr.msk.f32.gmra.mxu0 %vm721_vm1, %v593_v18 }
 0x398   : > { %4863 = vst [vmem:[#allocation2 + $0xb00] sm:$0xff] %v4186_v27  ;;  %v4187_v21 = vmax.f32 %v2866_v14, 0.0  ;;  %v12720_v45 = vadd.f32 %v2869_v26, %v10503_v56  ;;  %3161 = vmatprep.mubr.f32.mxu0 %v10266_v2  ;;  %v596_v26 = vld [vmem:[%s10344_s21 + $0x720] sm:$0xff] }
 0x399   : > { %v2871_v4 = vpop.f32.mrf.mxu0  ;;  %v5539_v18 = vld [vmem:[#allocation2 + $0xae8] sm:$0xff] }
 0x39a   : > { %4864 = vst.msk [vmem:[#allocation2 + $0xb08] sm:$0xff] %vm4511_vm2, %v4187_v21  ;;  %v4188_v17 = vmax.f32 %v12720_v45, 0.0  ;;  %v2872_v39 = vadd.f32 %v2871_v4, %v10507_v58 }
 0x39b   : > { %v2875_v37 = vpop.f32.mrf.mxu0  ;;  %10035 = vmatmul.mubr.msk.f32.gmra.mxu0 %vm721_vm1, %v594_v48  ;;  %v5537_v48 = vld [vmem:[#allocation2 + $0xad8] sm:$0xff] }
 0x39c   : > { %4865 = vst [vmem:[#allocation2 + $0xb10] sm:$0xff] %v4188_v17  ;;  %v4189_v57 = vmax.f32 %v2872_v39, 0.0  ;;  %v12731_v11 = vadd.f32 %v2875_v37, %v10503_v56  ;;  %3167 = vmatprep.mubr.f32.mxu0 %v10266_v2  ;;  %v5535_v37 = vld [vmem:[#allocation2 + $0xac8] sm:$0xff] }
 0x39d   : > { %v2877_v54 = vpop.f32.mrf.mxu0  ;;  %v5541_v24 = vld [vmem:[#allocation2 + $0xaf8] sm:$0xff] }
 0x39e   : > { %4866 = vst.msk [vmem:[#allocation2 + $0xb18] sm:$0xff] %vm4511_vm2, %v4189_v57  ;;  %v4190_v43 = vmax.f32 %v12731_v11, 0.0  ;;  %v2878_v61 = vadd.f32 %v2877_v54, %v10507_v58  ;;  %6336 = vmatprep.subr.mxu1 %v5541_v24  ;;  %v5533_v24 = vld [vmem:[#allocation2 + $0xab8] sm:$0xff] }
 0x39f   : > { %v2881_v29 = vpop.f32.mrf.mxu0  ;;  %10036 = vmatmul.mubr.msk.f32.gmra.mxu0 %vm721_vm1, %v595_v31  ;;  %6337 = vmatpush1.msra.mxu1 %v4184_v19  ;;  %v597_v31 = vld [vmem:[%s10344_s21 + $0x728] sm:$0xff] }
 0x3a0   : > { %4867 = vst [vmem:[#allocation2 + $0xb20] sm:$0xff] %v4190_v43  ;;  %v4191_v3 = vmax.f32 %v2878_v61, 0.0  ;;  %v12742_v14 = vadd.f32 %v2881_v29, %v10503_v56  ;;  %6338 = vmatprep.subr.mxu1 %v5539_v18  ;;  %3173 = vmatprep.mubr.f32.mxu0 %v10266_v2  ;;  %v5531_v29 = vld [vmem:[#allocation2 + $0xaa8] sm:$0xff]  ;;  %v598_v18 = vld [vmem:[%s10344_s21 + $0x730] sm:$0xff] }
 0x3a1   : > { %v2883_v21 = vpop.f32.mrf.mxu0  ;;  %6339 = vmatpush1.msra.mxu1 %v4182_v63  ;;  %v5543_v11 = vld [vmem:[#allocation2 + $0xb08] sm:$0xff] }
 0x3a2   : > { %4868 = vst.msk [vmem:[#allocation2 + $0xb28] sm:$0xff] %vm4511_vm2, %v4191_v3  ;;  %v4192_v19 = vmax.f32 %v12742_v14, 0.0  ;;  %v2884_v4 = vadd.f32 %v2883_v21, %v10507_v58  ;;  %6340 = vmatprep.subr.mxu1 %v5537_v48  ;;  %v5527_v48 = vld [vmem:[#allocation2 + $0xa88] sm:$0xff] }
 0x3a3   : > { %v2887_v39 = vpop.f32.mrf.mxu0  ;;  %10037 = vmatmul.mubr.msk.f32.gmra.mxu0 %vm721_vm1, %v596_v26  ;;  %6341 = vmatpush1.msra.mxu1 %v4180_v46  ;;  %v5529_v26 = vld [vmem:[#allocation2 + $0xa98] sm:$0xff] }
 0x3a4   : > { %4869 = vst [vmem:[#allocation2 + $0xb30] sm:$0xff] %v4192_v19  ;;  %v4193_v57 = vmax.f32 %v2884_v4, 0.0  ;;  %v12755_v63 = vadd.f32 %v2887_v39, %v10503_v56  ;;  %6342 = vmatprep.subr.mxu1 %v5535_v37  ;;  %3179 = vmatprep.mubr.f32.mxu0 %v10266_v2  ;;  %v599_v4 = vld [vmem:[%s10344_s21 + $0x738] sm:$0xff] }
 0x3a5   : > { %v2889_v54 = vpop.f32.mrf.mxu0  ;;  %6343 = vmatpush1.msra.mxu1 %v4178_v22  ;;  %v5525_v37 = vld [vmem:[#allocation2 + $0xa78] sm:$0xff] }
 0x3a6   : > { %4870 = vst.msk [vmem:[#allocation2 + $0xb38] sm:$0xff] %vm4511_vm2, %v4193_v57  ;;  %v4194_v23 = vmax.f32 %v12755_v63, 0.0  ;;  %v2890_v46 = vadd.f32 %v2889_v54, %v10507_v58  ;;  %6344 = vmatprep.subr.mxu1 %v5533_v24  ;;  %v600_v54 = vld [vmem:[%s10344_s21 + $0x740] sm:$0xff] }
 0x3a7   : > { %v2893_v61 = vpop.f32.mrf.mxu0  ;;  %10038 = vmatmul.mubr.msk.f32.gmra.mxu0 %vm721_vm1, %v597_v31  ;;  %6345 = vmatpush1.msra.mxu1 %v4176_v6  ;;  %v5523_v31 = vld [vmem:[#allocation2 + $0xa68] sm:$0xff] }
 0x3a8   : > { %4871 = vst [vmem:[#allocation2 + $0xb40] sm:$0xff] %v4194_v23  ;;  %v4195_v25 = vmax.f32 %v2890_v46, 0.0  ;;  %v12770_v22 = vadd.f32 %v2893_v61, %v10503_v56  ;;  %6346 = vmatprep.subr.mxu1 %v5531_v29  ;;  %3185 = vmatprep.mubr.f32.mxu0 %v10266_v2  ;;  %v5521_v46 = vld [vmem:[#allocation2 + $0xa58] sm:$0xff]  ;;  %v5519_v29 = vld [vmem:[#allocation2 + $0xa48] sm:$0xff] }
 0x3a9   : > { %v2895_v3 = vpop.f32.mrf.mxu0  ;;  %6347 = vmatpush1.msra.mxu1 %v4174_v60 }
 0x3aa   : > { %4872 = vst.msk [vmem:[#allocation2 + $0xb48] sm:$0xff] %vm4511_vm2, %v4195_v25  ;;  %v4196_v40 = vmax.f32 %v12770_v22, 0.0  ;;  %v2896_v6 = vadd.f32 %v2895_v3, %v10507_v58  ;;  %6348 = vmatprep.subr.mxu1 %v5529_v26  ;;  %v601_v25 = vld [vmem:[%s10344_s21 + $0x748] sm:$0xff]  ;;  %v5517_v3 = vld [vmem:[#allocation2 + $0xa38] sm:$0xff] }
 0x3ab   : > { %v2899_v21 = vpop.f32.mrf.mxu0  ;;  %10039 = vmatmul.mubr.msk.f32.gmra.mxu0 %vm721_vm1, %v598_v18  ;;  %6349 = vmatpush1.msra.mxu1 %v4172_v16 }
 0x3ac   : > { %4873 = vst [vmem:[#allocation2 + $0xb50] sm:$0xff] %v4196_v40  ;;  %v4197_v28 = vmax.f32 %v2896_v6, 0.0  ;;  %v12785_v60 = vadd.f32 %v2899_v21, %v10503_v56  ;;  %6350 = vmatprep.subr.mxu1 %v5527_v48  ;;  %3191 = vmatprep.mubr.f32.mxu0 %v10266_v2  ;;  %v5515_v6 = vld [vmem:[#allocation2 + $0xa28] sm:$0xff]  ;;  %v602_v21 = vld [vmem:[%s10344_s21 + $0x750] sm:$0xff] }
 0x3ad   : > { %v2901_v39 = vpop.f32.mrf.mxu0  ;;  %6351 = vmatpush1.msra.mxu1 %v4170_v42 }
 0x3ae   : > { %4874 = vst.msk [vmem:[#allocation2 + $0xb58] sm:$0xff] %vm4511_vm2, %v4197_v28  ;;  %v4198_v36 = vmax.f32 %v12785_v60, 0.0  ;;  %v2902_v16 = vadd.f32 %v2901_v39, %v10507_v58  ;;  %6352 = vmatprep.subr.mxu1 %v5525_v37  ;;  %v5513_v28 = vld [vmem:[#allocation2 + $0xa18] sm:$0xff]  ;;  %v5511_v39 = vld [vmem:[#allocation2 + $0xa08] sm:$0xff] }
 0x3af   : > { %v2905_v57 = vpop.f32.mrf.mxu0  ;;  %10040 = vmatmul.mubr.msk.f32.gmra.mxu0 %vm721_vm1, %v599_v4  ;;  %6353 = vmatpush1.msra.mxu1 %v4168_v44  ;;  %v603_v37 = vld [vmem:[%s10344_s21 + $0x758] sm:$0xff] }
 0x3b0   : > { %4875 = vst [vmem:[#allocation2 + $0xb60] sm:$0xff] %v4198_v36  ;;  %v4199_v47 = vmax.f32 %v2902_v16, 0.0  ;;  %v12800_v42 = vadd.f32 %v2905_v57, %v10503_v56  ;;  %6354 = vmatprep.subr.mxu1 %v5523_v31  ;;  %3197 = vmatprep.mubr.f32.mxu0 %v10266_v2 }
 0x3b1   : > { %v2907_v24 = vpop.f32.mrf.mxu0  ;;  %6355 = vmatpush1.msra.mxu1 %v4166_v10 }
 0x3b2   : > { %4876 = vst.msk [vmem:[#allocation2 + $0xb68] sm:$0xff] %vm4511_vm2, %v4199_v47  ;;  %v4200_v38 = vmax.f32 %v12800_v42, 0.0  ;;  %v2908_v44 = vadd.f32 %v2907_v24, %v10507_v58  ;;  %6356 = vmatprep.subr.mxu1 %v5521_v46 }
 0x3b3   : > { %v2911_v61 = vpop.f32.mrf.mxu0  ;;  %10041 = vmatmul.mubr.msk.f32.gmra.mxu0 %vm721_vm1, %v600_v54  ;;  %6357 = vmatpush1.msra.mxu1 %v4164_v5 }
 0x3b4   : > { %4877 = vst [vmem:[#allocation2 + $0xb70] sm:$0xff] %v4200_v38  ;;  %v4201_v52 = vmax.f32 %v2908_v44, 0.0  ;;  %v12815_v10 = vadd.f32 %v2911_v61, %v10503_v56  ;;  %6358 = vmatprep.subr.mxu1 %v5519_v29  ;;  %3203 = vmatprep.mubr.f32.mxu0 %v10266_v2  ;;  %v605_v29 = vld [vmem:[%s10344_s21 + $0x768] sm:$0xff] }
 0x3b5   : > { %v2913_v18 = vpop.f32.mrf.mxu0  ;;  %6359 = vmatpush1.msra.mxu1 %v4162_v34 }
 0x3b6   : > { %4878 = vst.msk [vmem:[#allocation2 + $0xb78] sm:$0xff] %vm4511_vm2, %v4201_v52  ;;  %v4202_v8 = vmax.f32 %v12815_v10, 0.0  ;;  %v2914_v5 = vadd.f32 %v2913_v18, %v10507_v58  ;;  %6360 = vmatprep.subr.mxu1 %v5517_v3 }
 0x3b7   : > { %v2917_v26 = vpop.f32.mrf.mxu0  ;;  %10042 = vmatmul.mubr.msk.f32.gmra.mxu0 %vm721_vm1, %v601_v25  ;;  %6361 = vmatpush1.msra.mxu1 %v4160_v35 }
 0x3b8   : > { %4879 = vst [vmem:[#allocation2 + $0xb80] sm:$0xff] %v4202_v8  ;;  %v4203_v50 = vmax.f32 %v2914_v5, 0.0  ;;  %v12830_v34 = vadd.f32 %v2917_v26, %v10503_v56  ;;  %6362 = vmatprep.subr.mxu1 %v5515_v6  ;;  %3209 = vmatprep.mubr.f32.mxu0 %v10266_v2  ;;  %v606_v6 = vld [vmem:[%s10344_s21 + $0x770] sm:$0xff] }
 0x3b9   : > { %v2919_v48 = vpop.f32.mrf.mxu0  ;;  %6363 = vmatpush1.msra.mxu1 %v4158_v33 }
 0x3ba   : > { %4880 = vst.msk [vmem:[#allocation2 + $0xb88] sm:$0xff] %vm4511_vm2, %v4203_v50  ;;  %v4204_v30 = vmax.f32 %v12830_v34, 0.0  ;;  %v2920_v35 = vadd.f32 %v2919_v48, %v10507_v58  ;;  %6364 = vmatprep.subr.mxu1 %v5513_v28 }
 0x3bb   : > { %v2923_v4 = vpop.f32.mrf.mxu0  ;;  %10043 = vmatmul.mubr.msk.f32.gmra.mxu0 %vm721_vm1, %v602_v21  ;;  %6365 = vmatpush1.msra.mxu1 %v4156_v12 }
 0x3bc   : > { %4881 = vst [vmem:[#allocation2 + $0xb90] sm:$0xff] %v4204_v30  ;;  %v4205_v20 = vmax.f32 %v2920_v35, 0.0  ;;  %v12845_v33 = vadd.f32 %v2923_v4, %v10503_v56  ;;  %6366 = vmatprep.subr.mxu1 %v5511_v39  ;;  %3215 = vmatprep.mubr.f32.mxu0 %v10266_v2  ;;  %v607_v39 = vld [vmem:[%s10344_s21 + $0x778] sm:$0xff] }
 0x3bd   : > { %v2925_v16 = vpop.f32.mrf.mxu0  ;;  %6367 = vmatpush1.msra.mxu1 %v4154_v13 }
 0x3be   : > { %4882 = vst.msk [vmem:[#allocation2 + $0xb98] sm:$0xff] %vm4511_vm2, %v4205_v20  ;;  %v4206_v41 = vmax.f32 %v12845_v33, 0.0  ;;  %v2926_v12 = vadd.f32 %v2925_v16, %v10507_v58 }
 0x3bf   : > { %v2929_v57 = vpop.f32.mrf.mxu0  ;;  %10044 = vmatmul.mubr.msk.f32.gmra.mxu0 %vm721_vm1, %v603_v37 }
 0x3c0   : > { %4883 = vst [vmem:[#allocation2 + $0xba0] sm:$0xff] %v4206_v41  ;;  %v4207_v31 = vmax.f32 %v2926_v12, 0.0  ;;  %v12858_v47 = vadd.f32 %v2929_v57, %v10503_v56  ;;  %3221 = vmatprep.mubr.f32.mxu0 %v10266_v2 }
 0x3c1   : > { %v2931_v13 = vpop.f32.mrf.mxu0 }
 0x3c2   : > { %4884 = vst.msk [vmem:[#allocation2 + $0xba8] sm:$0xff] %vm4511_vm2, %v4207_v31  ;;  %v4208_v54 = vmax.f32 %v12858_v47, 0.0  ;;  %v2932_v24 = vadd.f32 %v2931_v13, %v10507_v58  ;;  %v8744_v47 = vld [vmem:[%s16313_s6 + $0x5a0] sm:$0xff] }
 0x3c3   : > { %v2935_v46 = vpop.f32.mrf.mxu0  ;;  %10045 = vmatmul.mubr.msk.f32.gmra.mxu0 %vm721_vm1, %v604_v32  ;;  %v608_v32 = vld [vmem:[%s10344_s21 + $0x780] sm:$0xff] }
 0x3c4   : > { %4885 = vst [vmem:[#allocation2 + $0xbb0] sm:$0xff] %v4208_v54  ;;  %v4209_v44 = vmax.f32 %v2932_v24, 0.0  ;;  %v12869_v61 = vadd.f32 %v2935_v46, %v10503_v56  ;;  %3227 = vmatprep.mubr.f32.mxu0 %v10266_v2 }
 0x3c5   : > { %v2937_v52 = vpop.f32.mrf.mxu0 }
 0x3c6   : > { %4886 = vst.msk [vmem:[#allocation2 + $0xbb8] sm:$0xff] %vm4511_vm2, %v4209_v44  ;;  %v4210_v25 = vmax.f32 %v12869_v61, 0.0  ;;  %v2938_v18 = vadd.f32 %v2937_v52, %v10507_v58 }
 0x3c7   : > { %v2941_v3 = vpop.f32.mrf.mxu0  ;;  %10046 = vmatmul.mubr.msk.f32.gmra.mxu0 %vm721_vm1, %v605_v29 }
 0x3c8   : > { %4887 = vst [vmem:[#allocation2 + $0xbc0] sm:$0xff] %v4210_v25  ;;  %v4211_v5 = vmax.f32 %v2938_v18, 0.0  ;;  %v12880_v26 = vadd.f32 %v2941_v3, %v10503_v56  ;;  %3233 = vmatprep.mubr.f32.mxu0 %v10266_v2  ;;  %v609_v18 = vld [vmem:[%s10344_s21 + $0x788] sm:$0xff] }
 0x3c9   : > { %v2943_v50 = vpop.f32.mrf.mxu0 }
 0x3ca   : > { %4888 = vst.msk [vmem:[#allocation2 + $0xbc8] sm:$0xff] %vm4511_vm2, %v4211_v5  ;;  %v4212_v21 = vmax.f32 %v12880_v26, 0.0  ;;  %v2944_v48 = vadd.f32 %v2943_v50, %v10507_v58 }
 0x3cb   : > { %v2947_v28 = vpop.f32.mrf.mxu0  ;;  %10047 = vmatmul.mubr.msk.f32.gmra.mxu0 %vm721_vm1, %v606_v6 }
 0x3cc   : > { %4889 = vst [vmem:[#allocation2 + $0xbd0] sm:$0xff] %v4212_v21  ;;  %v4213_v35 = vmax.f32 %v2944_v48, 0.0  ;;  %v12891_v4 = vadd.f32 %v2947_v28, %v10503_v56  ;;  %3239 = vmatprep.mubr.f32.mxu0 %v10266_v2 }
 0x3cd   : > { %v2949_v20 = vpop.f32.mrf.mxu0 }
 0x3ce   : > { %4890 = vst.msk [vmem:[#allocation2 + $0xbd8] sm:$0xff] %vm4511_vm2, %v4213_v35  ;;  %v4214_v37 = vmax.f32 %v12891_v4, 0.0  ;;  %v2950_v16 = vadd.f32 %v2949_v20, %v10507_v58  ;;  %v610_v35 = vld [vmem:[%s10344_s21 + $0x790] sm:$0xff] }
 0x3cf   : > { %v2953_v12 = vpop.f32.mrf.mxu0  ;;  %10048 = vmatmul.mubr.msk.f32.gmra.mxu0 %vm721_vm1, %v607_v39 }
 0x3d0   : > { %4891 = vst [vmem:[#allocation2 + $0xbe0] sm:$0xff] %v4214_v37  ;;  %v4215_v57 = vmax.f32 %v2950_v16, 0.0  ;;  %v2954_v31 = vadd.f32 %v2953_v12, %v10503_v56  ;;  %3245 = vmatprep.mubr.f32.mxu0 %v10266_v2 }
 0x3d1   : > { %v2955_v13 = vpop.f32.mrf.mxu0 }
 0x3d2   : > { %4892 = vst.msk [vmem:[#allocation2 + $0xbe8] sm:$0xff] %vm4511_vm2, %v4215_v57  ;;  %v4216_v24 = vmax.f32 %v2954_v31, 0.0  ;;  %v2956_v46 = vadd.f32 %v2955_v13, %v10507_v58  ;;  %v611_v31 = vld [vmem:[%s10344_s21 + $0x798] sm:$0xff] }
 0x3d3   : > { %v2959_v44 = vpop.f32.mrf.mxu0  ;;  %10049 = vmatmul.mubr.msk.f32.gmra.mxu0 %vm721_vm1, %v608_v32 }
 0x3d4   : > { %4893 = vst [vmem:[#allocation2 + $0xbf0] sm:$0xff] %v4216_v24  ;;  %v4217_v29 = vmax.f32 %v2956_v46, 0.0  ;;  %v12906_v52 = vadd.f32 %v2959_v44, %v10503_v56  ;;  %3251 = vmatprep.mubr.f32.mxu0 %v10266_v2 }
 0x3d5   : > { %v2961_v3 = vpop.f32.mrf.mxu0 }
 0x3d6   : > { %4894 = vst.msk [vmem:[#allocation2 + $0xbf8] sm:$0xff] %vm4511_vm2, %v4217_v29  ;;  %v4218_v5 = vmax.f32 %v12906_v52, 0.0  ;;  %v2962_v6 = vadd.f32 %v2961_v3, %v10507_v58  ;;  %v636_v52 = vld [vmem:[%s10344_s21 + $0x860] sm:$0xff] }
 0x3d7   : > { %v2965_v50 = vpop.f32.mrf.mxu0  ;;  %10050 = vmatmul.mubr.msk.f32.gmra.mxu0 %vm721_vm1, %v609_v18 }
 0x3d8   : > { %4895 = vst [vmem:[#allocation2 + $0xc00] sm:$0xff] %v4218_v5  ;;  %v4219_v48 = vmax.f32 %v2962_v6, 0.0  ;;  %v12917_v28 = vadd.f32 %v2965_v50, %v10503_v56  ;;  %3257 = vmatprep.mubr.f32.mxu0 %v10266_v2  ;;  %v612_v50 = vld [vmem:[%s10344_s21 + $0x7a0] sm:$0xff] }
 0x3d9   : > { %v2967_v4 = vpop.f32.mrf.mxu0  ;;  %v5571_v18 = vld [vmem:[#allocation2 + $0xbe8] sm:$0xff] }
 0x3da   : > { %4896 = vst.msk [vmem:[#allocation2 + $0xc08] sm:$0xff] %vm4511_vm2, %v4219_v48  ;;  %v4220_v39 = vmax.f32 %v12917_v28, 0.0  ;;  %v2968_v20 = vadd.f32 %v2967_v4, %v10507_v58 }
 0x3db   : > { %v2971_v16 = vpop.f32.mrf.mxu0  ;;  %10051 = vmatmul.mubr.msk.f32.gmra.mxu0 %vm721_vm1, %v610_v35  ;;  %v5569_v35 = vld [vmem:[#allocation2 + $0xbd8] sm:$0xff] }
 0x3dc   : > { %4897 = vst [vmem:[#allocation2 + $0xc10] sm:$0xff] %v4220_v39  ;;  %v4221_v12 = vmax.f32 %v2968_v20, 0.0  ;;  %v12928_v57 = vadd.f32 %v2971_v16, %v10503_v56  ;;  %3263 = vmatprep.mubr.f32.mxu0 %v10266_v2  ;;  %v5567_v16 = vld [vmem:[#allocation2 + $0xbc8] sm:$0xff] }
 0x3dd   : > { %v2973_v32 = vpop.f32.mrf.mxu0  ;;  %v5573_v13 = vld [vmem:[#allocation2 + $0xbf8] sm:$0xff] }
 0x3de   : > { %4898 = vst.msk [vmem:[#allocation2 + $0xc18] sm:$0xff] %vm4511_vm2, %v4221_v12  ;;  %v4222_v46 = vmax.f32 %v12928_v57, 0.0  ;;  %v2974_v44 = vadd.f32 %v2973_v32, %v10507_v58  ;;  %6368 = vmatprep.subr.mxu1 %v5573_v13  ;;  %v5565_v13 = vld [vmem:[#allocation2 + $0xbb8] sm:$0xff] }
 0x3df   : > { %v2977_v29 = vpop.f32.mrf.mxu0  ;;  %10052 = vmatmul.mubr.msk.f32.gmra.mxu0 %vm721_vm1, %v611_v31  ;;  %6369 = vmatpush2.msra.mxu1 %v4216_v24  ;;  %v613_v31 = vld [vmem:[%s10344_s21 + $0x7a8] sm:$0xff] }
 0x3e0   : > { %4899 = vst [vmem:[#allocation2 + $0xc20] sm:$0xff] %v4222_v46  ;;  %v4223_v3 = vmax.f32 %v2974_v44, 0.0  ;;  %v12939_v6 = vadd.f32 %v2977_v29, %v10503_v56  ;;  %6370 = vmatprep.subr.mxu1 %v5571_v18  ;;  %3269 = vmatprep.mubr.f32.mxu0 %v10266_v2  ;;  %v5563_v29 = vld [vmem:[#allocation2 + $0xba8] sm:$0xff]  ;;  %v614_v18 = vld [vmem:[%s10344_s21 + $0x7b0] sm:$0xff] }
 0x3e1   : > { %v2979_v48 = vpop.f32.mrf.mxu0  ;;  %6371 = vmatpush2.msra.mxu1 %v4214_v37 }
 0x3e2   : > { %4900 = vst.msk [vmem:[#allocation2 + $0xc28] sm:$0xff] %vm4511_vm2, %v4223_v3  ;;  %v4224_v24 = vmax.f32 %v12939_v6, 0.0  ;;  %v2980_v4 = vadd.f32 %v2979_v48, %v10507_v58  ;;  %6372 = vmatprep.subr.mxu1 %v5569_v35  ;;  %v8745_v3 = vld [vmem:[%s16313_s6 + $0x5a8] sm:$0xff] }
 0x3e3   : > { %v2983_v20 = vpop.f32.mrf.mxu0  ;;  %10053 = vmatmul.mubr.msk.f32.gmra.mxu0 %vm721_vm1, %v612_v50  ;;  %6373 = vmatpush2.msra.mxu1 %v4212_v21  ;;  %v5561_v50 = vld [vmem:[#allocation2 + $0xb98] sm:$0xff] }
 0x3e4   : > { %4901 = vst [vmem:[#allocation2 + $0xc30] sm:$0xff] %v4224_v24  ;;  %v4225_v12 = vmax.f32 %v2980_v4, 0.0  ;;  %v12952_v37 = vadd.f32 %v2983_v20, %v10503_v56  ;;  %6374 = vmatprep.subr.mxu1 %v5567_v16  ;;  %3275 = vmatprep.mubr.f32.mxu0 %v10266_v2  ;;  %v5559_v20 = vld [vmem:[#allocation2 + $0xb88] sm:$0xff]  ;;  %v615_v16 = vld [vmem:[%s10344_s21 + $0x7b8] sm:$0xff] }
 0x3e5   : > { %v2985_v32 = vpop.f32.mrf.mxu0  ;;  %6375 = vmatpush2.msra.mxu1 %v4210_v25  ;;  %8928 = vmatprep.subr.mxu0 %v8745_v3  ;;  %v617_v3 = vld [vmem:[%s10344_s21 + $0x7c8] sm:$0xff] }
 0x3e6   : > { %4902 = vst.msk [vmem:[#allocation2 + $0xc38] sm:$0xff] %vm4511_vm2, %v4225_v12  ;;  %v4226_v26 = vmax.f32 %v12952_v37, 0.0  ;;  %v2986_v21 = vadd.f32 %v2985_v32, %v10507_v58  ;;  %6376 = vmatprep.subr.mxu1 %v5565_v13  ;;  %8929 = vmatpush1.msra.mxu0 %v8744_v47  ;;  %v5555_v13 = vld [vmem:[#allocation2 + $0xb68] sm:$0xff] }
 0x3e7   : > { %v2989_v44 = vpop.f32.mrf.mxu0  ;;  %10054 = vmatmul.mubr.msk.f32.gmra.mxu0 %vm721_vm1, %v613_v31  ;;  %6377 = vmatpush2.msra.mxu1 %v4208_v54  ;;  %v5557_v31 = vld [vmem:[#allocation2 + $0xb78] sm:$0xff] }
 0x3e8   : > { %4903 = vst [vmem:[#allocation2 + $0xc40] sm:$0xff] %v4226_v26  ;;  %v4227_v61 = vmax.f32 %v2986_v21, 0.0  ;;  %v12967_v25 = vadd.f32 %v2989_v44, %v10503_v56  ;;  %6378 = vmatprep.subr.mxu1 %v5563_v29  ;;  %3281 = vmatprep.mubr.f32.mxu0 %v10266_v2  ;;  %v616_v21 = vld [vmem:[%s10344_s21 + $0x7c0] sm:$0xff]  ;;  %v5553_v29 = vld [vmem:[#allocation2 + $0xb58] sm:$0xff] }
 0x3e9   : > { %v2991_v54 = vpop.f32.mrf.mxu0  ;;  %6379 = vmatpush2.msra.mxu1 %v4206_v41 }
 0x3ea   : > { %4904 = vst.msk [vmem:[#allocation2 + $0xc48] sm:$0xff] %vm4511_vm2, %v4227_v61  ;;  %v4228_v48 = vmax.f32 %v12967_v25, 0.0  ;;  %v2992_v35 = vadd.f32 %v2991_v54, %v10507_v58  ;;  %6380 = vmatprep.subr.mxu1 %v5561_v50  ;;  %v5549_v54 = vld [vmem:[#allocation2 + $0xb38] sm:$0xff] }
 0x3eb   : > { %v2995_v4 = vpop.f32.mrf.mxu0  ;;  %10055 = vmatmul.mubr.msk.f32.gmra.mxu0 %vm721_vm1, %v614_v18  ;;  %6381 = vmatpush2.msra.mxu1 %v4204_v30  ;;  %v5551_v18 = vld [vmem:[#allocation2 + $0xb48] sm:$0xff] }
 0x3ec   : > { %4905 = vst [vmem:[#allocation2 + $0xc50] sm:$0xff] %v4228_v48  ;;  %v4229_v33 = vmax.f32 %v2992_v35, 0.0  ;;  %v12988_v41 = vadd.f32 %v2995_v4, %v10503_v56  ;;  %6382 = vmatprep.subr.mxu1 %v5559_v20  ;;  %3287 = vmatprep.mubr.f32.mxu0 %v10266_v2  ;;  %v5547_v35 = vld [vmem:[#allocation2 + $0xb28] sm:$0xff]  ;;  %v618_v4 = vld [vmem:[%s10344_s21 + $0x7d0] sm:$0xff] }
 0x3ed   : > { %v2997_v12 = vpop.f32.mrf.mxu0  ;;  %6383 = vmatpush2.msra.mxu1 %v4202_v8 }
 0x3ee   : > { %4906 = vst.msk [vmem:[#allocation2 + $0xc58] sm:$0xff] %vm4511_vm2, %v4229_v33  ;;  %v4230_v34 = vmax.f32 %v12988_v41, 0.0  ;;  %v2998_v30 = vadd.f32 %v2997_v12, %v10507_v58  ;;  %6384 = vmatprep.subr.mxu1 %v5557_v31  ;;  %v5545_v33 = vld [vmem:[#allocation2 + $0xb18] sm:$0xff] }
 0x3ef   : > { %v3001_v32 = vpop.f32.mrf.mxu0  ;;  %10056 = vmatmul.mubr.msk.f32.gmra.mxu0 %vm721_vm1, %v615_v16  ;;  %6385 = vmatpush2.msra.mxu1 %v4200_v38  ;;  %v13045_v16 = vld [vmem:[%s16311_s4 + $0x8] sm:$0xff] }
 0x3f0   : > { %4907 = vst [vmem:[#allocation2 + $0xc60] sm:$0xff] %v4230_v34  ;;  %v4231_v10 = vmax.f32 %v2998_v30, 0.0  ;;  %v13003_v8 = vadd.f32 %v3001_v32, %v10503_v56  ;;  %6386 = vmatprep.subr.mxu1 %v5555_v13  ;;  %3293 = vmatprep.mubr.f32.mxu0 %v10266_v2  ;;  %v5912_v12 = vrot.slane %v13045_v16, %v11400_v59  ;;  %v619_v13 = vld [vmem:[%s10344_s21 + $0x7d8] sm:$0xff] }
 0x3f1   : > { %v3003_v44 = vpop.f32.mrf.mxu0  ;;  %6387 = vmatpush2.msra.mxu1 %v4198_v36 }
 0x3f2   : > { %4908 = vst.msk [vmem:[#allocation2 + $0xc68] sm:$0xff] %vm4511_vm2, %v4231_v10  ;;  %v4232_v42 = vmax.f32 %v13003_v8, 0.0  ;;  %v3004_v38 = vadd.f32 %v3003_v44, %v10507_v58  ;;  %6388 = vmatprep.subr.mxu1 %v5553_v29 }
 0x3f3   : > { %v3007_v61 = vpop.f32.mrf.mxu0  ;;  %10057 = vmatmul.mubr.msk.f32.gmra.mxu0 %vm721_vm1, %v616_v21  ;;  %6389 = vmatpush2.msra.mxu1 %v4196_v40 }
 0x3f4   : > { %4909 = vst [vmem:[#allocation2 + $0xc70] sm:$0xff] %v4232_v42  ;;  %v4233_v60 = vmax.f32 %v3004_v38, 0.0  ;;  %v13018_v36 = vadd.f32 %v3007_v61, %v10503_v56  ;;  %6390 = vmatprep.subr.mxu1 %v5551_v18  ;;  %3299 = vmatprep.mubr.f32.mxu0 %v10266_v2 }
 0x3f5   : > { %v3009_v47 = vpop.f32.mrf.mxu0  ;;  %6391 = vmatpush2.msra.mxu1 %v4194_v23 }
 0x3f6   : > { %4910 = vst.msk [vmem:[#allocation2 + $0xc78] sm:$0xff] %vm4511_vm2, %v4233_v60  ;;  %v4234_v22 = vmax.f32 %v13018_v36, 0.0  ;;  %v3010_v40 = vadd.f32 %v3009_v47, %v10507_v58  ;;  %6392 = vmatprep.subr.mxu1 %v5549_v54  ;;  %v621_v47 = vld [vmem:[%s10344_s21 + $0x7e8] sm:$0xff] }
 0x3f7   : > { %v3013_v50 = vpop.f32.mrf.mxu0  ;;  %10058 = vmatmul.mubr.msk.f32.gmra.mxu0 %vm721_vm1, %v617_v3  ;;  %6393 = vmatpush2.msra.mxu1 %v4192_v19 }
 0x3f8   : > { %4911 = vst [vmem:[#allocation2 + $0xc80] sm:$0xff] %v4234_v22  ;;  %v4235_v63 = vmax.f32 %v3010_v40, 0.0  ;;  %v13033_v23 = vadd.f32 %v3013_v50, %v10503_v56  ;;  %6394 = vmatprep.subr.mxu1 %v5547_v35  ;;  %3305 = vmatprep.mubr.f32.mxu0 %v10266_v2 }
 0x3f9   : > { %v3015_v20 = vpop.f32.mrf.mxu0  ;;  %6395 = vmatpush2.msra.mxu1 %v4190_v43  ;;  %v5924_v43 = vrot.slane %v13045_v16, %v11510_v7 }
 0x3fa   : > { %4912 = vst.msk [vmem:[#allocation2 + $0xc88] sm:$0xff] %vm4511_vm2, %v4235_v63  ;;  %v4236_v14 = vmax.f32 %v13033_v23, 0.0  ;;  %v3016_v19 = vadd.f32 %v3015_v20, %v10507_v58  ;;  %6396 = vmatprep.subr.mxu1 %v5545_v33  ;;  %v622_v20 = vld [vmem:[%s10344_s21 + $0x7f0] sm:$0xff] }
 0x3fb   : > { %v3019_v31 = vpop.f32.mrf.mxu0  ;;  %10059 = vmatmul.mubr.msk.f32.gmra.mxu0 %vm721_vm1, %v618_v4  ;;  %6397 = vmatpush2.msra.mxu1 %v4188_v17 }
 0x3fc   : > { %4913 = vst [vmem:[#allocation2 + $0xc90] sm:$0xff] %v4236_v14  ;;  %v4237_v30 = vmax.f32 %v3016_v19, 0.0  ;;  %v13057_v32 = vadd.f32 %v3019_v31, %v10503_v56  ;;  %6398 = vmatprep.subr.mxu1 %v5543_v11  ;;  %3311 = vmatprep.mubr.f32.mxu0 %v10266_v2 }
 0x3fd   : > { %v3021_v10 = vpop.f32.mrf.mxu0  ;;  %6399 = vmatpush2.msra.mxu1 %v4186_v27 }
 0x3fe   : > { %4914 = vst.msk [vmem:[#allocation2 + $0xc98] sm:$0xff] %vm4511_vm2, %v4237_v30  ;;  %v4238_v45 = vmax.f32 %v13057_v32, 0.0  ;;  %v3022_v17 = vadd.f32 %v3021_v10, %v10507_v58  ;;  %6401 = vmatmul.mubr.f32.vlgmr.msra.gmra.mxu1 %v5912_v12  ;;  %v623_v30 = vld [vmem:[%s10344_s21 + $0x7f8] sm:$0xff] }
 0x3ff   : > { %v3025_v21 = vpop.f32.mrf.mxu0  ;;  %10060 = vmatmul.mubr.msk.f32.gmra.mxu0 %vm721_vm1, %v619_v13  ;;  %6471 = vmatprep.mubr.f32.mxu1 %v5924_v43 }
 0x400   : > { %4915 = vst [vmem:[#allocation2 + $0xca0] sm:$0xff] %v4238_v45  ;;  %v4239_v44 = vmax.f32 %v3022_v17, 0.0  ;;  %v13070_v29 = vadd.f32 %v3025_v21, %v10503_v56  ;;  %3317 = vmatprep.mubr.f32.mxu0 %v10266_v2 }
 0x401   : > { %v3027_v27 = vpop.f32.mrf.mxu0 }
 0x402   : > { %4916 = vst.msk [vmem:[#allocation2 + $0xca8] sm:$0xff] %vm4511_vm2, %v4239_v44  ;;  %v4240_v38 = vmax.f32 %v13070_v29, 0.0  ;;  %v3028_v61 = vadd.f32 %v3027_v27, %v10507_v58  ;;  %v624_v27 = vld [vmem:[%s10344_s21 + $0x800] sm:$0xff] }
 0x403   : > { %v3031_v18 = vpop.f32.mrf.mxu0  ;;  %10061 = vmatmul.mubr.msk.f32.gmra.mxu0 %vm721_vm1, %v620_v0 }
 0x404   : > { %4917 = vst [vmem:[#allocation2 + $0xcb0] sm:$0xff] %v4240_v38  ;;  %v4241_v60 = vmax.f32 %v3028_v61, 0.0  ;;  %v13081_v3 = vadd.f32 %v3031_v18, %v10503_v56  ;;  %3323 = vmatprep.mubr.f32.mxu0 %v10266_v2 }
 0x405   : > { %v3033_v54 = vpop.f32.mrf.mxu0 }
 0x406   : > { %4918 = vst.msk [vmem:[#allocation2 + $0xcb8] sm:$0xff] %vm4511_vm2, %v4241_v60  ;;  %v4242_v40 = vmax.f32 %v13081_v3, 0.0  ;;  %v3034_v50 = vadd.f32 %v3033_v54, %v10507_v58 }
 0x407   : > { %v3037_v35 = vpop.f32.mrf.mxu0  ;;  %10062 = vmatmul.mubr.msk.f32.gmra.mxu0 %vm721_vm1, %v621_v47 }
 0x408   : > { %4919 = vst [vmem:[#allocation2 + $0xcc0] sm:$0xff] %v4242_v40  ;;  %v4243_v63 = vmax.f32 %v3034_v50, 0.0  ;;  %v13092_v4 = vadd.f32 %v3037_v35, %v10503_v56  ;;  %3329 = vmatprep.mubr.f32.mxu0 %v10266_v2  ;;  %v625_v35 = vld [vmem:[%s10344_s21 + $0x808] sm:$0xff] }
 0x409   : > { %v3039_v33 = vpop.f32.mrf.mxu0 }
 0x40a   : > { %4920 = vst.msk [vmem:[#allocation2 + $0xcc8] sm:$0xff] %vm4511_vm2, %v4243_v63  ;;  %v4244_v19 = vmax.f32 %v13092_v4, 0.0  ;;  %v3040_v12 = vadd.f32 %v3039_v33, %v10507_v58 }
 0x40b   : > { %v3043_v31 = vpop.f32.mrf.mxu0  ;;  %10063 = vmatmul.mubr.msk.f32.gmra.mxu0 %vm721_vm1, %v622_v20 }
 0x40c   : > { %4921 = vst [vmem:[#allocation2 + $0xcd0] sm:$0xff] %v4244_v19  ;;  %v4245_v11 = vmax.f32 %v3040_v12, 0.0  ;;  %v13103_v43 = vadd.f32 %v3043_v31, %v10503_v56  ;;  %3335 = vmatprep.mubr.f32.mxu0 %v10266_v2 }
 0x40d   : > { %v3045_v13 = vpop.f32.mrf.mxu0 }
 0x40e   : > { %4922 = vst.msk [vmem:[#allocation2 + $0xcd8] sm:$0xff] %vm4511_vm2, %v4245_v11  ;;  %v4246_v10 = vmax.f32 %v13103_v43, 0.0  ;;  %v3046_v17 = vadd.f32 %v3045_v13, %v10507_v58  ;;  %v626_v43 = vld [vmem:[%s10344_s21 + $0x810] sm:$0xff] }
 0x40f   : > { %v3049_v21 = vpop.f32.mrf.mxu0  ;;  %10064 = vmatmul.mubr.msk.f32.gmra.mxu0 %vm721_vm1, %v623_v30 }
 0x410   : > { %4923 = vst [vmem:[#allocation2 + $0xce0] sm:$0xff] %v4246_v10  ;;  %v4247_v44 = vmax.f32 %v3046_v17, 0.0  ;;  %v3050_v0 = vadd.f32 %v3049_v21, %v10503_v56  ;;  %3341 = vmatprep.mubr.f32.mxu0 %v10266_v2 }
 0x411   : > { %v3051_v61 = vpop.f32.mrf.mxu0 }
 0x412   : > { %4924 = vst.msk [vmem:[#allocation2 + $0xce8] sm:$0xff] %vm4511_vm2, %v4247_v44  ;;  %v4248_v18 = vmax.f32 %v3050_v0, 0.0  ;;  %v3052_v60 = vadd.f32 %v3051_v61, %v10507_v58 }
 0x413   : > { %v3055_v47 = vpop.f32.mrf.mxu0  ;;  %10065 = vmatmul.mubr.msk.f32.gmra.mxu0 %vm721_vm1, %v624_v27  ;;  %v627_v27 = vld [vmem:[%s10344_s21 + $0x818] sm:$0xff] }
 0x414   : > { %4925 = vst [vmem:[#allocation2 + $0xcf0] sm:$0xff] %v4248_v18  ;;  %v4249_v54 = vmax.f32 %v3052_v60, 0.0  ;;  %v13118_v50 = vadd.f32 %v3055_v47, %v10503_v56  ;;  %3347 = vmatprep.mubr.f32.mxu0 %v10266_v2 }
 0x415   : > { %v3057_v63 = vpop.f32.mrf.mxu0 }
 0x416   : > { %4926 = vst.msk [vmem:[#allocation2 + $0xcf8] sm:$0xff] %vm4511_vm2, %v4249_v54  ;;  %v4250_v20 = vmax.f32 %v13118_v50, 0.0  ;;  %v3058_v33 = vadd.f32 %v3057_v63, %v10507_v58  ;;  %v652_v50 = vld [vmem:[%s10344_s21 + $0x8e0] sm:$0xff] }
 0x417   : > { %v3061_v12 = vpop.f32.mrf.mxu0  ;;  %10066 = vmatmul.mubr.msk.f32.gmra.mxu0 %vm721_vm1, %v625_v35 }
 0x418   : > { %4927 = vst [vmem:[#allocation2 + $0xd00] sm:$0xff] %v4250_v20  ;;  %v4251_v31 = vmax.f32 %v3058_v33, 0.0  ;;  %v13129_v11 = vadd.f32 %v3061_v12, %v10503_v56  ;;  %3353 = vmatprep.mubr.f32.mxu0 %v10266_v2 }
 0x419   : > { %v3063_v30 = vpop.f32.mrf.mxu0  ;;  %v5603_v63 = vld [vmem:[#allocation2 + $0xce8] sm:$0xff] }
 0x41a   : > { %4928 = vst.msk [vmem:[#allocation2 + $0xd08] sm:$0xff] %vm4511_vm2, %v4251_v31  ;;  %v4252_v13 = vmax.f32 %v13129_v11, 0.0  ;;  %v3064_v17 = vadd.f32 %v3063_v30, %v10507_v58  ;;  %v628_v31 = vld [vmem:[%s10344_s21 + $0x820] sm:$0xff] }
 0x41b   : > { %v3067_v21 = vpop.f32.mrf.mxu0  ;;  %10067 = vmatmul.mubr.msk.f32.gmra.mxu0 %vm721_vm1, %v626_v43  ;;  %v8733_v43 = vld [vmem:[%s16313_s6 + $0x548] sm:$0xff] }
 0x41c   : > { %4929 = vst [vmem:[#allocation2 + $0xd10] sm:$0xff] %v4252_v13  ;;  %v4253_v44 = vmax.f32 %v3064_v17, 0.0  ;;  %v13140_v0 = vadd.f32 %v3067_v21, %v10503_v56  ;;  %3359 = vmatprep.mubr.f32.mxu0 %v10266_v2  ;;  %v5601_v17 = vld [vmem:[#allocation2 + $0xcd8] sm:$0xff]  ;;  %8930 = vmatprep.subr.mxu0 %v8733_v43  ;;  %v630_v43 = vld [vmem:[%s10344_s21 + $0x830] sm:$0xff] }
 0x41d   : > { %v3069_v61 = vpop.f32.mrf.mxu0  ;;  %v5605_v60 = vld [vmem:[#allocation2 + $0xcf8] sm:$0xff] }
 0x41e   : > { %4930 = vst.msk [vmem:[#allocation2 + $0xd18] sm:$0xff] %vm4511_vm2, %v4253_v44  ;;  %v4254_v47 = vmax.f32 %v13140_v0, 0.0  ;;  %v3070_v54 = vadd.f32 %v3069_v61, %v10507_v58  ;;  %6407 = vmatprep.subr.mxu1 %v5605_v60  ;;  %v8732_v44 = vld [vmem:[%s16313_s6 + $0x540] sm:$0xff] }
 0x41f   : > { %v3073_v35 = vpop.f32.mrf.mxu0  ;;  %10068 = vmatmul.mubr.msk.f32.gmra.mxu0 %vm721_vm1, %v627_v27  ;;  %6408 = vmatpush1.msra.mxu1 %v4248_v18 }
 0x420   : > { %4931 = vst [vmem:[#allocation2 + $0xd20] sm:$0xff] %v4254_v47  ;;  %v4255_v33 = vmax.f32 %v3070_v54, 0.0  ;;  %v13151_v12 = vadd.f32 %v3073_v35, %v10503_v56  ;;  %6409 = vmatprep.subr.mxu1 %v5603_v63  ;;  %3365 = vmatprep.mubr.f32.mxu0 %v10266_v2  ;;  %v629_v54 = vld [vmem:[%s10344_s21 + $0x828] sm:$0xff]  ;;  %v5597_v63 = vld [vmem:[#allocation2 + $0xcb8] sm:$0xff] }
 0x421   : > { %v3075_v30 = vpop.f32.mrf.mxu0  ;;  %6410 = vmatpush1.msra.mxu1 %v4246_v10  ;;  %v5599_v10 = vld [vmem:[#allocation2 + $0xcc8] sm:$0xff]  ;;  %8931 = vmatpush1.msra.mxu0 %v8732_v44 }
 0x422   : > { %4932 = vst.msk [vmem:[#allocation2 + $0xd28] sm:$0xff] %vm4511_vm2, %v4255_v33  ;;  %v4256_v18 = vmax.f32 %v13151_v12, 0.0  ;;  %v3076_v21 = vadd.f32 %v3075_v30, %v10507_v58  ;;  %6411 = vmatprep.subr.mxu1 %v5601_v17  ;;  %v5593_v17 = vld [vmem:[#allocation2 + $0xc98] sm:$0xff]  ;;  %v5591_v44 = vld [vmem:[#allocation2 + $0xc88] sm:$0xff] }
 0x423   : > { %v3079_v27 = vpop.f32.mrf.mxu0  ;;  %10069 = vmatmul.mubr.msk.f32.gmra.mxu0 %vm721_vm1, %v628_v31  ;;  %6412 = vmatpush1.msra.mxu1 %v4244_v19  ;;  %v5595_v31 = vld [vmem:[#allocation2 + $0xca8] sm:$0xff] }
 0x424   : > { %4933 = vst [vmem:[#allocation2 + $0xd30] sm:$0xff] %v4256_v18  ;;  %v4257_v61 = vmax.f32 %v3076_v21, 0.0  ;;  %v13170_v60 = vadd.f32 %v3079_v27, %v10503_v56  ;;  %6413 = vmatprep.subr.mxu1 %v5599_v10  ;;  %3371 = vmatprep.mubr.f32.mxu0 %v10266_v2  ;;  %v631_v27 = vld [vmem:[%s10344_s21 + $0x838] sm:$0xff]  ;;  %v5607_v0 = vld [vmem:[#allocation2 + $0xd08] sm:$0xff] }
 0x425   : > { %v3081_v35 = vpop.f32.mrf.mxu0  ;;  %6414 = vmatpush1.msra.mxu1 %v4242_v40 }
 0x426   : > { %4934 = vst.msk [vmem:[#allocation2 + $0xd38] sm:$0xff] %vm4511_vm2, %v4257_v61  ;;  %v4258_v4 = vmax.f32 %v13170_v60, 0.0  ;;  %v3082_v19 = vadd.f32 %v3081_v35, %v10507_v58  ;;  %6415 = vmatprep.subr.mxu1 %v5597_v63  ;;  %v5589_v61 = vld [vmem:[#allocation2 + $0xc78] sm:$0xff]  ;;  %v5587_v35 = vld [vmem:[#allocation2 + $0xc68] sm:$0xff]  ;;  %v632_v63 = vld [vmem:[%s10344_s21 + $0x840] sm:$0xff] }
 0x427   : > { %v3085_v33 = vpop.f32.mrf.mxu0  ;;  %10070 = vmatmul.mubr.msk.f32.gmra.mxu0 %vm721_vm1, %v629_v54  ;;  %6416 = vmatpush1.msra.mxu1 %v4240_v38 }
 0x428   : > { %4935 = vst [vmem:[#allocation2 + $0xd40] sm:$0xff] %v4258_v4  ;;  %v4259_v3 = vmax.f32 %v3082_v19, 0.0  ;;  %v13185_v40 = vadd.f32 %v3085_v33, %v10503_v56  ;;  %6417 = vmatprep.subr.mxu1 %v5595_v31  ;;  %3377 = vmatprep.mubr.f32.mxu0 %v10266_v2  ;;  %v5585_v33 = vld [vmem:[#allocation2 + $0xc58] sm:$0xff] }
 0x429   : > { %v3087_v30 = vpop.f32.mrf.mxu0  ;;  %6418 = vmatpush1.msra.mxu1 %v4238_v45 }
 0x42a   : > { %4936 = vst.msk [vmem:[#allocation2 + $0xd48] sm:$0xff] %vm4511_vm2, %v4259_v3  ;;  %v4260_v29 = vmax.f32 %v13185_v40, 0.0  ;;  %v3088_v38 = vadd.f32 %v3087_v30, %v10507_v58  ;;  %6419 = vmatprep.subr.mxu1 %v5593_v17  ;;  %v5583_v3 = vld [vmem:[#allocation2 + $0xc48] sm:$0xff]  ;;  %v5581_v17 = vld [vmem:[#allocation2 + $0xc38] sm:$0xff] }
 0x42b   : > { %v3091_v21 = vpop.f32.mrf.mxu0  ;;  %10071 = vmatmul.mubr.msk.f32.gmra.mxu0 %vm721_vm1, %v630_v43  ;;  %6420 = vmatpush1.msra.mxu1 %v4236_v14  ;;  %v633_v43 = vld [vmem:[%s10344_s21 + $0x848] sm:$0xff] }
 0x42c   : > { %4937 = vst [vmem:[#allocation2 + $0xd50] sm:$0xff] %v4260_v29  ;;  %v4261_v32 = vmax.f32 %v3088_v38, 0.0  ;;  %v13200_v45 = vadd.f32 %v3091_v21, %v10503_v56  ;;  %6421 = vmatprep.subr.mxu1 %v5591_v44  ;;  %3383 = vmatprep.mubr.f32.mxu0 %v10266_v2  ;;  %v5579_v21 = vld [vmem:[#allocation2 + $0xc28] sm:$0xff]  ;;  %v634_v44 = vld [vmem:[%s10344_s21 + $0x850] sm:$0xff] }
 0x42d   : > { %v3093_v10 = vpop.f32.mrf.mxu0  ;;  %6422 = vmatpush1.msra.mxu1 %v4234_v22 }
 0x42e   : > { %4938 = vst.msk [vmem:[#allocation2 + $0xd58] sm:$0xff] %vm4511_vm2, %v4261_v32  ;;  %v4262_v23 = vmax.f32 %v13200_v45, 0.0  ;;  %v3094_v14 = vadd.f32 %v3093_v10, %v10507_v58  ;;  %6423 = vmatprep.subr.mxu1 %v5589_v61  ;;  %v5575_v61 = vld [vmem:[#allocation2 + $0xc08] sm:$0xff] }
 0x42f   : > { %v3097_v54 = vpop.f32.mrf.mxu0  ;;  %10072 = vmatmul.mubr.msk.f32.gmra.mxu0 %vm721_vm1, %v631_v27  ;;  %6424 = vmatpush1.msra.mxu1 %v4232_v42  ;;  %v5577_v27 = vld [vmem:[#allocation2 + $0xc18] sm:$0xff] }
 0x430   : > { %4939 = vst [vmem:[#allocation2 + $0xd60] sm:$0xff] %v4262_v23  ;;  %v4263_v36 = vmax.f32 %v3094_v14, 0.0  ;;  %v13215_v22 = vadd.f32 %v3097_v54, %v10503_v56  ;;  %6425 = vmatprep.subr.mxu1 %v5587_v35  ;;  %3389 = vmatprep.mubr.f32.mxu0 %v10266_v2  ;;  %v635_v14 = vld [vmem:[%s10344_s21 + $0x858] sm:$0xff] }
 0x431   : > { %v3099_v19 = vpop.f32.mrf.mxu0  ;;  %6426 = vmatpush1.msra.mxu1 %v4230_v34 }
 0x432   : > { %4940 = vst.msk [vmem:[#allocation2 + $0xd68] sm:$0xff] %vm4511_vm2, %v4263_v36  ;;  %v4264_v8 = vmax.f32 %v13215_v22, 0.0  ;;  %v3100_v42 = vadd.f32 %v3099_v19, %v10507_v58  ;;  %6427 = vmatprep.subr.mxu1 %v5585_v33 }
 0x433   : > { %v3103_v31 = vpop.f32.mrf.mxu0  ;;  %10073 = vmatmul.mubr.msk.f32.gmra.mxu0 %vm721_vm1, %v632_v63  ;;  %6428 = vmatpush1.msra.mxu1 %v4228_v48 }
 0x434   : > { %4941 = vst [vmem:[#allocation2 + $0xd70] sm:$0xff] %v4264_v8  ;;  %v4265_v41 = vmax.f32 %v3100_v42, 0.0  ;;  %v13230_v34 = vadd.f32 %v3103_v31, %v10503_v56  ;;  %6429 = vmatprep.subr.mxu1 %v5583_v3  ;;  %3395 = vmatprep.mubr.f32.mxu0 %v10266_v2 }
 0x435   : > { %v3105_v30 = vpop.f32.mrf.mxu0  ;;  %6430 = vmatpush1.msra.mxu1 %v4226_v26 }
 0x436   : > { %4942 = vst.msk [vmem:[#allocation2 + $0xd78] sm:$0xff] %vm4511_vm2, %v4265_v41  ;;  %v4266_v25 = vmax.f32 %v13230_v34, 0.0  ;;  %v3106_v48 = vadd.f32 %v3105_v30, %v10507_v58  ;;  %6431 = vmatprep.subr.mxu1 %v5581_v17  ;;  %v637_v41 = vld [vmem:[%s10344_s21 + $0x868] sm:$0xff] }
 0x437   : > { %v3109_v38 = vpop.f32.mrf.mxu0  ;;  %10074 = vmatmul.mubr.msk.f32.gmra.mxu0 %vm721_vm1, %v633_v43  ;;  %6432 = vmatpush1.msra.mxu1 %v4224_v24 }
 0x438   : > { %4943 = vst [vmem:[#allocation2 + $0xd80] sm:$0xff] %v4266_v25  ;;  %v4267_v37 = vmax.f32 %v3106_v48, 0.0  ;;  %v13245_v26 = vadd.f32 %v3109_v38, %v10503_v56  ;;  %6433 = vmatprep.subr.mxu1 %v5579_v21  ;;  %3401 = vmatprep.mubr.f32.mxu0 %v10266_v2 }
 0x439   : > { %v3111_v32 = vpop.f32.mrf.mxu0  ;;  %6434 = vmatpush1.msra.mxu1 %v4222_v46 }
 0x43a   : > { %4944 = vst.msk [vmem:[#allocation2 + $0xd88] sm:$0xff] %vm4511_vm2, %v4267_v37  ;;  %v4268_v6 = vmax.f32 %v13245_v26, 0.0  ;;  %v3112_v24 = vadd.f32 %v3111_v32, %v10507_v58  ;;  %6435 = vmatprep.subr.mxu1 %v5577_v27  ;;  %v638_v37 = vld [vmem:[%s10344_s21 + $0x870] sm:$0xff] }
 0x43b   : > { %v3115_v10 = vpop.f32.mrf.mxu0  ;;  %10075 = vmatmul.mubr.msk.f32.gmra.mxu0 %vm721_vm1, %v634_v44  ;;  %6436 = vmatpush1.msra.mxu1 %v4220_v39 }
 0x43c   : > { %4945 = vst [vmem:[#allocation2 + $0xd90] sm:$0xff] %v4268_v6  ;;  %v4269_v57 = vmax.f32 %v3112_v24, 0.0  ;;  %v13260_v46 = vadd.f32 %v3115_v10, %v10503_v56  ;;  %6437 = vmatprep.subr.mxu1 %v5575_v61  ;;  %3407 = vmatprep.mubr.f32.mxu0 %v10266_v2 }
 0x43d   : > { %v3117_v54 = vpop.f32.mrf.mxu0  ;;  %6438 = vmatpush1.msra.mxu1 %v4218_v5 }
 0x43e   : > { %4946 = vst.msk [vmem:[#allocation2 + $0xd98] sm:$0xff] %vm4511_vm2, %v4269_v57  ;;  %v4270_v28 = vmax.f32 %v13260_v46, 0.0  ;;  %v3118_v39 = vadd.f32 %v3117_v54, %v10507_v58  ;;  %v639_v57 = vld [vmem:[%s10344_s21 + $0x878] sm:$0xff] }
 0x43f   : > { %v3121_v35 = vpop.f32.mrf.mxu0  ;;  %10076 = vmatmul.mubr.msk.f32.gmra.mxu0 %vm721_vm1, %v635_v14 }
 0x440   : > { %4947 = vst [vmem:[#allocation2 + $0xda0] sm:$0xff] %v4270_v28  ;;  %v4271_v36 = vmax.f32 %v3118_v39, 0.0  ;;  %v13273_v63 = vadd.f32 %v3121_v35, %v10503_v56  ;;  %3413 = vmatprep.mubr.f32.mxu0 %v10266_v2 }
 0x441   : > { %v3123_v5 = vpop.f32.mrf.mxu0 }
 0x442   : > { %4948 = vst.msk [vmem:[#allocation2 + $0xda8] sm:$0xff] %vm4511_vm2, %v4271_v36  ;;  %v4272_v19 = vmax.f32 %v13273_v63, 0.0  ;;  %v3124_v33 = vadd.f32 %v3123_v5, %v10507_v58  ;;  %v640_v5 = vld [vmem:[%s10344_s21 + $0x880] sm:$0xff] }
 0x443   : > { %v3127_v42 = vpop.f32.mrf.mxu0  ;;  %10077 = vmatmul.mubr.msk.f32.gmra.mxu0 %vm721_vm1, %v636_v52 }
 0x444   : > { %4949 = vst [vmem:[#allocation2 + $0xdb0] sm:$0xff] %v4272_v19  ;;  %v4273_v31 = vmax.f32 %v3124_v33, 0.0  ;;  %v13284_v3 = vadd.f32 %v3127_v42, %v10503_v56  ;;  %3419 = vmatprep.mubr.f32.mxu0 %v10266_v2 }
 0x445   : > { %v3129_v43 = vpop.f32.mrf.mxu0 }
 0x446   : > { %4950 = vst.msk [vmem:[#allocation2 + $0xdb8] sm:$0xff] %vm4511_vm2, %v4273_v31  ;;  %v4274_v30 = vmax.f32 %v13284_v3, 0.0  ;;  %v3130_v17 = vadd.f32 %v3129_v43, %v10507_v58 }
 0x447   : > { %v3133_v48 = vpop.f32.mrf.mxu0  ;;  %10078 = vmatmul.mubr.msk.f32.gmra.mxu0 %vm721_vm1, %v637_v41 }
 0x448   : > { %4951 = vst [vmem:[#allocation2 + $0xdc0] sm:$0xff] %v4274_v30  ;;  %v4275_v38 = vmax.f32 %v3130_v17, 0.0  ;;  %v13295_v21 = vadd.f32 %v3133_v48, %v10503_v56  ;;  %3425 = vmatprep.mubr.f32.mxu0 %v10266_v2  ;;  %v641_v48 = vld [vmem:[%s10344_s21 + $0x888] sm:$0xff] }
 0x449   : > { %v3135_v44 = vpop.f32.mrf.mxu0 }
 0x44a   : > { %4952 = vst.msk [vmem:[#allocation2 + $0xdc8] sm:$0xff] %vm4511_vm2, %v4275_v38  ;;  %v4276_v32 = vmax.f32 %v13295_v21, 0.0  ;;  %v3136_v27 = vadd.f32 %v3135_v44, %v10507_v58 }
 0x44b   : > { %v3139_v24 = vpop.f32.mrf.mxu0  ;;  %10079 = vmatmul.mubr.msk.f32.gmra.mxu0 %vm721_vm1, %v638_v37 }
 0x44c   : > { %4953 = vst [vmem:[#allocation2 + $0xdd0] sm:$0xff] %v4276_v32  ;;  %v4277_v10 = vmax.f32 %v3136_v27, 0.0  ;;  %v13306_v61 = vadd.f32 %v3139_v24, %v10503_v56  ;;  %3431 = vmatprep.mubr.f32.mxu0 %v10266_v2 }
 0x44d   : > { %v3141_v14 = vpop.f32.mrf.mxu0 }
 0x44e   : > { %4954 = vst.msk [vmem:[#allocation2 + $0xdd8] sm:$0xff] %vm4511_vm2, %v4277_v10  ;;  %v4278_v54 = vmax.f32 %v13306_v61, 0.0  ;;  %v3142_v39 = vadd.f32 %v3141_v14, %v10507_v58  ;;  %v642_v61 = vld [vmem:[%s10344_s21 + $0x890] sm:$0xff] }
 0x44f   : > { %v3145_v35 = vpop.f32.mrf.mxu0  ;;  %10080 = vmatmul.mubr.msk.f32.gmra.mxu0 %vm721_vm1, %v639_v57  ;;  %v8721_v57 = vld [vmem:[%s16313_s6 + $0x4e8] sm:$0xff] }
 0x450   : > { %4955 = vst [vmem:[#allocation2 + $0xde0] sm:$0xff] %v4278_v54  ;;  %v4279_v36 = vmax.f32 %v3142_v39, 0.0  ;;  %v3146_v52 = vadd.f32 %v3145_v35, %v10503_v56  ;;  %3437 = vmatprep.mubr.f32.mxu0 %v10266_v2  ;;  %8932 = vmatprep.subr.mxu0 %v8721_v57  ;;  %v644_v57 = vld [vmem:[%s10344_s21 + $0x8a0] sm:$0xff] }
 0x451   : > { %v3147_v33 = vpop.f32.mrf.mxu0 }
 0x452   : > { %4956 = vst.msk [vmem:[#allocation2 + $0xde8] sm:$0xff] %vm4511_vm2, %v4279_v36  ;;  %v4280_v42 = vmax.f32 %v3146_v52, 0.0  ;;  %v3148_v31 = vadd.f32 %v3147_v33, %v10507_v58  ;;  %v8720_v36 = vld [vmem:[%s16313_s6 + $0x4e0] sm:$0xff] }
 0x453   : > { %v3151_v41 = vpop.f32.mrf.mxu0  ;;  %10081 = vmatmul.mubr.msk.f32.gmra.mxu0 %vm721_vm1, %v640_v5 }
 0x454   : > { %4957 = vst [vmem:[#allocation2 + $0xdf0] sm:$0xff] %v4280_v42  ;;  %v4281_v43 = vmax.f32 %v3148_v31, 0.0  ;;  %v13321_v17 = vadd.f32 %v3151_v41, %v10503_v56  ;;  %3443 = vmatprep.mubr.f32.mxu0 %v10266_v2  ;;  %v643_v31 = vld [vmem:[%s10344_s21 + $0x898] sm:$0xff]  ;;  %8933 = vmatpush1.msra.mxu0 %v8720_v36 }
 0x455   : > { %v3153_v38 = vpop.f32.mrf.mxu0 }
 0x456   : > { %4958 = vst.msk [vmem:[#allocation2 + $0xdf8] sm:$0xff] %vm4511_vm2, %v4281_v43  ;;  %v4282_v37 = vmax.f32 %v13321_v17, 0.0  ;;  %v3154_v44 = vadd.f32 %v3153_v38, %v10507_v58  ;;  %v668_v17 = vld [vmem:[%s10344_s21 + $0x960] sm:$0xff] }
 0x457   : > { %v3157_v27 = vpop.f32.mrf.mxu0  ;;  %10082 = vmatmul.mubr.msk.f32.gmra.mxu0 %vm721_vm1, %v641_v48 }
 0x458   : > { %4959 = vst [vmem:[#allocation2 + $0xe00] sm:$0xff] %v4282_v37  ;;  %v4283_v24 = vmax.f32 %v3154_v44, 0.0  ;;  %v13332_v10 = vadd.f32 %v3157_v27, %v10503_v56  ;;  %3449 = vmatprep.mubr.f32.mxu0 %v10266_v2 }
 0x459   : > { %v3159_v14 = vpop.f32.mrf.mxu0  ;;  %v5635_v27 = vld [vmem:[#allocation2 + $0xde8] sm:$0xff] }
 0x45a   : > { %4960 = vst.msk [vmem:[#allocation2 + $0xe08] sm:$0xff] %vm4511_vm2, %v4283_v24  ;;  %v4284_v39 = vmax.f32 %v13332_v10, 0.0  ;;  %v3160_v35 = vadd.f32 %v3159_v14, %v10507_v58 }
 0x45b   : > { %v3163_v52 = vpop.f32.mrf.mxu0  ;;  %10083 = vmatmul.mubr.msk.f32.gmra.mxu0 %vm721_vm1, %v642_v61 }
 0x45c   : > { %4961 = vst [vmem:[#allocation2 + $0xe10] sm:$0xff] %v4284_v39  ;;  %v4285_v5 = vmax.f32 %v3160_v35, 0.0  ;;  %v13349_v33 = vadd.f32 %v3163_v52, %v10503_v56  ;;  %3455 = vmatprep.mubr.f32.mxu0 %v10266_v2  ;;  %v5633_v35 = vld [vmem:[#allocation2 + $0xdd8] sm:$0xff] }
 0x45d   : > { %v3165_v41 = vpop.f32.mrf.mxu0  ;;  %v5637_v43 = vld [vmem:[#allocation2 + $0xdf8] sm:$0xff] }
 0x45e   : > { %4962 = vst.msk [vmem:[#allocation2 + $0xe18] sm:$0xff] %vm4511_vm2, %v4285_v5  ;;  %v4286_v48 = vmax.f32 %v13349_v33, 0.0  ;;  %v3166_v38 = vadd.f32 %v3165_v41, %v10507_v58  ;;  %6439 = vmatprep.subr.mxu1 %v5637_v43  ;;  %v5631_v5 = vld [vmem:[#allocation2 + $0xdc8] sm:$0xff] }
 0x45f   : > { %v3169_v44 = vpop.f32.mrf.mxu0  ;;  %10084 = vmatmul.mubr.msk.f32.gmra.mxu0 %vm721_vm1, %v643_v31  ;;  %6440 = vmatpush2.msra.mxu1 %v4280_v42  ;;  %v645_v41 = vld [vmem:[%s10344_s21 + $0x8a8] sm:$0xff] }
 0x460   : > { %4963 = vst [vmem:[#allocation2 + $0xe20] sm:$0xff] %v4286_v48  ;;  %v4287_v24 = vmax.f32 %v3166_v38, 0.0  ;;  %v13360_v61 = vadd.f32 %v3169_v44, %v10503_v56  ;;  %6441 = vmatprep.subr.mxu1 %v5635_v27  ;;  %3461 = vmatprep.mubr.f32.mxu0 %v10266_v2  ;;  %v5629_v38 = vld [vmem:[#allocation2 + $0xdb8] sm:$0xff]  ;;  %v5627_v27 = vld [vmem:[#allocation2 + $0xda8] sm:$0xff] }
 0x461   : > { %v3171_v14 = vpop.f32.mrf.mxu0  ;;  %6442 = vmatpush2.msra.mxu1 %v4278_v54 }
 0x462   : > { %4964 = vst.msk [vmem:[#allocation2 + $0xe28] sm:$0xff] %vm4511_vm2, %v4287_v24  ;;  %v4288_v42 = vmax.f32 %v13360_v61, 0.0  ;;  %v3172_v36 = vadd.f32 %v3171_v14, %v10507_v58  ;;  %6443 = vmatprep.subr.mxu1 %v5633_v35  ;;  %v646_v24 = vld [vmem:[%s10344_s21 + $0x8b0] sm:$0xff]  ;;  %v5625_v14 = vld [vmem:[#allocation2 + $0xd98] sm:$0xff] }
 0x463   : > { %v3175_v52 = vpop.f32.mrf.mxu0  ;;  %10085 = vmatmul.mubr.msk.f32.gmra.mxu0 %vm721_vm1, %v644_v57  ;;  %6444 = vmatpush2.msra.mxu1 %v4276_v32 }
 0x464   : > { %4965 = vst [vmem:[#allocation2 + $0xe30] sm:$0xff] %v4288_v42  ;;  %v4289_v31 = vmax.f32 %v3172_v36, 0.0  ;;  %v13373_v54 = vadd.f32 %v3175_v52, %v10503_v56  ;;  %6445 = vmatprep.subr.mxu1 %v5631_v5  ;;  %3467 = vmatprep.mubr.f32.mxu0 %v10266_v2  ;;  %v5623_v36 = vld [vmem:[#allocation2 + $0xd88] sm:$0xff]  ;;  %v647_v52 = vld [vmem:[%s10344_s21 + $0x8b8] sm:$0xff] }
 0x465   : > { %v3177_v43 = vpop.f32.mrf.mxu0  ;;  %6446 = vmatpush2.msra.mxu1 %v4274_v30 }
 0x466   : > { %4966 = vst.msk [vmem:[#allocation2 + $0xe38] sm:$0xff] %vm4511_vm2, %v4289_v31  ;;  %v4290_v21 = vmax.f32 %v13373_v54, 0.0  ;;  %v3178_v32 = vadd.f32 %v3177_v43, %v10507_v58  ;;  %6447 = vmatprep.subr.mxu1 %v5629_v38  ;;  %v5621_v31 = vld [vmem:[#allocation2 + $0xd78] sm:$0xff]  ;;  %v5619_v43 = vld [vmem:[#allocation2 + $0xd68] sm:$0xff]  ;;  %v648_v38 = vld [vmem:[%s10344_s21 + $0x8c0] sm:$0xff] }
 0x467   : > { %v3181_v44 = vpop.f32.mrf.mxu0  ;;  %10086 = vmatmul.mubr.msk.f32.gmra.mxu0 %vm721_vm1, %v645_v41  ;;  %6448 = vmatpush2.msra.mxu1 %v4272_v19 }
 0x468   : > { %4967 = vst [vmem:[#allocation2 + $0xe40] sm:$0xff] %v4290_v21  ;;  %v4291_v3 = vmax.f32 %v3178_v32, 0.0  ;;  %v13388_v30 = vadd.f32 %v3181_v44, %v10503_v56  ;;  %6449 = vmatprep.subr.mxu1 %v5627_v27  ;;  %3473 = vmatprep.mubr.f32.mxu0 %v10266_v2  ;;  %v5617_v44 = vld [vmem:[#allocation2 + $0xd58] sm:$0xff] }
 0x469   : > { %v3183_v57 = vpop.f32.mrf.mxu0  ;;  %6450 = vmatpush2.msra.mxu1 %v4270_v28 }
 0x46a   : > { %4968 = vst.msk [vmem:[#allocation2 + $0xe48] sm:$0xff] %vm4511_vm2, %v4291_v3  ;;  %v4292_v63 = vmax.f32 %v13388_v30, 0.0  ;;  %v3184_v19 = vadd.f32 %v3183_v57, %v10507_v58  ;;  %6451 = vmatprep.subr.mxu1 %v5625_v14  ;;  %v5615_v3 = vld [vmem:[#allocation2 + $0xd48] sm:$0xff]  ;;  %v5613_v14 = vld [vmem:[#allocation2 + $0xd38] sm:$0xff] }
 0x46b   : > { %v3187_v35 = vpop.f32.mrf.mxu0  ;;  %10087 = vmatmul.mubr.msk.f32.gmra.mxu0 %vm721_vm1, %v646_v24  ;;  %6452 = vmatpush2.msra.mxu1 %v4268_v6  ;;  %v649_v24 = vld [vmem:[%s10344_s21 + $0x8c8] sm:$0xff] }
 0x46c   : > { %4969 = vst [vmem:[#allocation2 + $0xe50] sm:$0xff] %v4292_v63  ;;  %v4293_v46 = vmax.f32 %v3184_v19, 0.0  ;;  %v13403_v28 = vadd.f32 %v3187_v35, %v10503_v56  ;;  %6453 = vmatprep.subr.mxu1 %v5623_v36  ;;  %3479 = vmatprep.mubr.f32.mxu0 %v10266_v2  ;;  %v5611_v35 = vld [vmem:[#allocation2 + $0xd28] sm:$0xff]  ;;  %v650_v36 = vld [vmem:[%s10344_s21 + $0x8d0] sm:$0xff] }
 0x46d   : > { %v3189_v5 = vpop.f32.mrf.mxu0  ;;  %6454 = vmatpush2.msra.mxu1 %v4266_v25 }
 0x46e   : > { %4970 = vst.msk [vmem:[#allocation2 + $0xe58] sm:$0xff] %vm4511_vm2, %v4293_v46  ;;  %v4294_v26 = vmax.f32 %v13403_v28, 0.0  ;;  %v3190_v6 = vadd.f32 %v3189_v5, %v10507_v58  ;;  %6455 = vmatprep.subr.mxu1 %v5621_v31  ;;  %v5920_v5 = vrot.slane %v13045_v16, %v11809_v15 }
 0x46f   : > { %v3193_v41 = vpop.f32.mrf.mxu0  ;;  %10088 = vmatmul.mubr.msk.f32.gmra.mxu0 %vm721_vm1, %v647_v52  ;;  %6456 = vmatpush2.msra.mxu1 %v4264_v8  ;;  %v5609_v52 = vld [vmem:[#allocation2 + $0xd18] sm:$0xff] }
 0x470   : > { %4971 = vst [vmem:[#allocation2 + $0xe60] sm:$0xff] %v4294_v26  ;;  %v4295_v34 = vmax.f32 %v3190_v6, 0.0  ;;  %v13418_v25 = vadd.f32 %v3193_v41, %v10503_v56  ;;  %6457 = vmatprep.subr.mxu1 %v5619_v43  ;;  %3485 = vmatprep.mubr.f32.mxu0 %v10266_v2  ;;  %v651_v43 = vld [vmem:[%s10344_s21 + $0x8d8] sm:$0xff] }
 0x471   : > { %v3195_v32 = vpop.f32.mrf.mxu0  ;;  %6458 = vmatpush2.msra.mxu1 %v4262_v23 }
 0x472   : > { %4972 = vst.msk [vmem:[#allocation2 + $0xe68] sm:$0xff] %vm4511_vm2, %v4295_v34  ;;  %v4296_v22 = vmax.f32 %v13418_v25, 0.0  ;;  %v3196_v8 = vadd.f32 %v3195_v32, %v10507_v58  ;;  %6459 = vmatprep.subr.mxu1 %v5617_v44 }
 0x473   : > { %v3199_v27 = vpop.f32.mrf.mxu0  ;;  %10089 = vmatmul.mubr.msk.f32.gmra.mxu0 %vm721_vm1, %v648_v38  ;;  %6460 = vmatpush2.msra.mxu1 %v4260_v29 }
 0x474   : > { %4973 = vst [vmem:[#allocation2 + $0xe70] sm:$0xff] %v4296_v22  ;;  %v4297_v45 = vmax.f32 %v3196_v8, 0.0  ;;  %v13433_v23 = vadd.f32 %v3199_v27, %v10503_v56  ;;  %6461 = vmatprep.subr.mxu1 %v5615_v3  ;;  %3491 = vmatprep.mubr.f32.mxu0 %v10266_v2 }
 0x475   : > { %v3201_v57 = vpop.f32.mrf.mxu0  ;;  %6462 = vmatpush2.msra.mxu1 %v4258_v4 }
 0x476   : > { %4974 = vst.msk [vmem:[#allocation2 + $0xe78] sm:$0xff] %vm4511_vm2, %v4297_v45  ;;  %v4298_v40 = vmax.f32 %v13433_v23, 0.0  ;;  %v3202_v29 = vadd.f32 %v3201_v57, %v10507_v58  ;;  %6463 = vmatprep.subr.mxu1 %v5613_v14 }
 0x477   : > { %v3205_v19 = vpop.f32.mrf.mxu0  ;;  %10090 = vmatmul.mubr.msk.f32.gmra.mxu0 %vm721_vm1, %v649_v24  ;;  %6464 = vmatpush2.msra.mxu1 %v4256_v18  ;;  %v653_v24 = vld [vmem:[%s10344_s21 + $0x8e8] sm:$0xff] }
 0x478   : > { %4975 = vst [vmem:[#allocation2 + $0xe80] sm:$0xff] %v4298_v40  ;;  %v4299_v60 = vmax.f32 %v3202_v29, 0.0  ;;  %v13448_v4 = vadd.f32 %v3205_v19, %v10503_v56  ;;  %6465 = vmatprep.subr.mxu1 %v5611_v35  ;;  %3497 = vmatprep.mubr.f32.mxu0 %v10266_v2 }
 0x479   : > { %v3207_v46 = vpop.f32.mrf.mxu0  ;;  %6466 = vmatpush2.msra.mxu1 %v4254_v47  ;;  %v5932_v47 = vrot.slane %v13045_v16, %v11914_v62  ;;  %v8777_v62 = vld [vmem:[%s16313_s6 + $0x6a8] sm:$0xff] }
 0x47a   : > { %4976 = vst.msk [vmem:[#allocation2 + $0xe88] sm:$0xff] %vm4511_vm2, %v4299_v60  ;;  %v4300_v12 = vmax.f32 %v13448_v4, 0.0  ;;  %v3208_v18 = vadd.f32 %v3207_v46, %v10507_v58  ;;  %6467 = vmatprep.subr.mxu1 %v5609_v52 }
 0x47b   : > { %v3211_v31 = vpop.f32.mrf.mxu0  ;;  %10091 = vmatmul.mubr.msk.f32.gmra.mxu0 %vm721_vm1, %v650_v36  ;;  %6468 = vmatpush2.msra.mxu1 %v4252_v13  ;;  %v654_v36 = vld [vmem:[%s10344_s21 + $0x8f0] sm:$0xff] }
 0x47c   : > { %4977 = vst [vmem:[#allocation2 + $0xe90] sm:$0xff] %v4300_v12  ;;  %v4301_v6 = vmax.f32 %v3208_v18, 0.0  ;;  %v13467_v41 = vadd.f32 %v3211_v31, %v10503_v56  ;;  %6469 = vmatprep.subr.mxu1 %v5607_v0  ;;  %3503 = vmatprep.mubr.f32.mxu0 %v10266_v2 }
 0x47d   : > { %v3213_v34 = vpop.f32.mrf.mxu0  ;;  %6470 = vmatpush2.msra.mxu1 %v4250_v20 }
 0x47e   : > { %4978 = vst.msk [vmem:[#allocation2 + $0xe98] sm:$0xff] %vm4511_vm2, %v4301_v6  ;;  %v4302_v16 = vmax.f32 %v13467_v41, 0.0  ;;  %v3214_v11 = vadd.f32 %v3213_v34, %v10507_v58  ;;  %6472 = vmatmul.mubr.f32.vlgmr.msra.gmra.mxu1 %v5920_v5 }
 0x47f   : > { %v3217_v13 = vpop.f32.mrf.mxu0  ;;  %10092 = vmatmul.mubr.msk.f32.gmra.mxu0 %vm721_vm1, %v651_v43  ;;  %6542 = vmatprep.mubr.f32.mxu1 %v5932_v47  ;;  %v655_v47 = vld [vmem:[%s10344_s21 + $0x8f8] sm:$0xff] }
 0x480   : > { %4979 = vst [vmem:[#allocation2 + $0xea0] sm:$0xff] %v4302_v16  ;;  %v4303_v38 = vmax.f32 %v3214_v11, 0.0  ;;  %v13480_v32 = vadd.f32 %v3217_v13, %v10503_v56  ;;  %3509 = vmatprep.mubr.f32.mxu0 %v10266_v2 }
 0x481   : > { %v3219_v20 = vpop.f32.mrf.mxu0 }
 0x482   : > { %4980 = vst.msk [vmem:[#allocation2 + $0xea8] sm:$0xff] %vm4511_vm2, %v4303_v38  ;;  %v4304_v44 = vmax.f32 %v13480_v32, 0.0  ;;  %v3220_v8 = vadd.f32 %v3219_v20, %v10507_v58  ;;  %v8709_v20 = vld [vmem:[%s16313_s6 + $0x488] sm:$0xff] }
 0x483   : > { %v3223_v27 = vpop.f32.mrf.mxu0  ;;  %10093 = vmatmul.mubr.msk.f32.gmra.mxu0 %vm721_vm1, %v652_v50  ;;  %v656_v50 = vld [vmem:[%s10344_s21 + $0x900] sm:$0xff]  ;;  %8934 = vmatprep.subr.mxu0 %v8709_v20  ;;  %v659_v20 = vld [vmem:[%s10344_s21 + $0x918] sm:$0xff] }
 0x484   : > { %4981 = vst [vmem:[#allocation2 + $0xeb0] sm:$0xff] %v4304_v44  ;;  %v4305_v3 = vmax.f32 %v3220_v8, 0.0  ;;  %v13491_v45 = vadd.f32 %v3223_v27, %v10503_v56  ;;  %3515 = vmatprep.mubr.f32.mxu0 %v10266_v2 }
 0x485   : > { %v3225_v57 = vpop.f32.mrf.mxu0 }
 0x486   : > { %4982 = vst.msk [vmem:[#allocation2 + $0xeb8] sm:$0xff] %vm4511_vm2, %v4305_v3  ;;  %v4306_v14 = vmax.f32 %v13491_v45, 0.0  ;;  %v3226_v29 = vadd.f32 %v3225_v57, %v10507_v58 }
 0x487   : > { %v3229_v19 = vpop.f32.mrf.mxu0  ;;  %10094 = vmatmul.mubr.msk.f32.gmra.mxu0 %vm721_vm1, %v653_v24  ;;  %v8708_v24 = vld [vmem:[%s16313_s6 + $0x480] sm:$0xff] }
 0x488   : > { %4983 = vst [vmem:[#allocation2 + $0xec0] sm:$0xff] %v4306_v14  ;;  %v4307_v35 = vmax.f32 %v3226_v29, 0.0  ;;  %v13502_v60 = vadd.f32 %v3229_v19, %v10503_v56  ;;  %3521 = vmatprep.mubr.f32.mxu0 %v10266_v2  ;;  %8935 = vmatpush1.msra.mxu0 %v8708_v24 }
 0x489   : > { %v3231_v46 = vpop.f32.mrf.mxu0 }
 0x48a   : > { %4984 = vst.msk [vmem:[#allocation2 + $0xec8] sm:$0xff] %vm4511_vm2, %v4307_v35  ;;  %v4308_v52 = vmax.f32 %v13502_v60, 0.0  ;;  %v3232_v18 = vadd.f32 %v3231_v46, %v10507_v58  ;;  %v657_v35 = vld [vmem:[%s10344_s21 + $0x908] sm:$0xff] }
 0x48b   : > { %v3235_v5 = vpop.f32.mrf.mxu0  ;;  %10095 = vmatmul.mubr.msk.f32.gmra.mxu0 %vm721_vm1, %v654_v36 }
 0x48c   : > { %4985 = vst [vmem:[#allocation2 + $0xed0] sm:$0xff] %v4308_v52  ;;  %v4309_v31 = vmax.f32 %v3232_v18, 0.0  ;;  %v13513_v0 = vadd.f32 %v3235_v5, %v10503_v56  ;;  %3527 = vmatprep.mubr.f32.mxu0 %v10266_v2 }
 0x48d   : > { %v3237_v6 = vpop.f32.mrf.mxu0 }
 0x48e   : > { %4986 = vst.msk [vmem:[#allocation2 + $0xed8] sm:$0xff] %vm4511_vm2, %v4309_v31  ;;  %v4310_v43 = vmax.f32 %v13513_v0, 0.0  ;;  %v3238_v34 = vadd.f32 %v3237_v6, %v10507_v58 }
 0x48f   : > { %v3241_v11 = vpop.f32.mrf.mxu0  ;;  %10096 = vmatmul.mubr.msk.f32.gmra.mxu0 %vm721_vm1, %v655_v47  ;;  %v658_v47 = vld [vmem:[%s10344_s21 + $0x910] sm:$0xff] }
 0x490   : > { %4987 = vst [vmem:[#allocation2 + $0xee0] sm:$0xff] %v4310_v43  ;;  %v4311_v13 = vmax.f32 %v3238_v34, 0.0  ;;  %v3242_v38 = vadd.f32 %v3241_v11, %v10503_v56  ;;  %3533 = vmatprep.mubr.f32.mxu0 %v10266_v2 }
 0x491   : > { %v3243_v8 = vpop.f32.mrf.mxu0 }
 0x492   : > { %4988 = vst.msk [vmem:[#allocation2 + $0xee8] sm:$0xff] %vm4511_vm2, %v4311_v13  ;;  %v4312_v27 = vmax.f32 %v3242_v38, 0.0  ;;  %v3244_v3 = vadd.f32 %v3243_v8, %v10507_v58 }
 0x493   : > { %v3247_v57 = vpop.f32.mrf.mxu0  ;;  %10097 = vmatmul.mubr.msk.f32.gmra.mxu0 %vm721_vm1, %v656_v50 }
 0x494   : > { %4989 = vst [vmem:[#allocation2 + $0xef0] sm:$0xff] %v4312_v27  ;;  %v4313_v29 = vmax.f32 %v3244_v3, 0.0  ;;  %v13534_v19 = vadd.f32 %v3247_v57, %v10503_v56  ;;  %3539 = vmatprep.mubr.f32.mxu0 %v10266_v2 }
 0x495   : > { %v3249_v36 = vpop.f32.mrf.mxu0 }
 0x496   : > { %4990 = vst.msk [vmem:[#allocation2 + $0xef8] sm:$0xff] %vm4511_vm2, %v4313_v29  ;;  %v4314_v46 = vmax.f32 %v13534_v19, 0.0  ;;  %v3250_v18 = vadd.f32 %v3249_v36, %v10507_v58  ;;  %v684_v19 = vld [vmem:[%s10344_s21 + $0x9e0] sm:$0xff] }
 0x497   : > { %v3253_v5 = vpop.f32.mrf.mxu0  ;;  %10098 = vmatmul.mubr.msk.f32.gmra.mxu0 %vm721_vm1, %v657_v35 }
 0x498   : > { %4991 = vst [vmem:[#allocation2 + $0xf00] sm:$0xff] %v4314_v46  ;;  %v4315_v31 = vmax.f32 %v3250_v18, 0.0  ;;  %v13545_v0 = vadd.f32 %v3253_v5, %v10503_v56  ;;  %3545 = vmatprep.mubr.f32.mxu0 %v10266_v2  ;;  %v660_v5 = vld [vmem:[%s10344_s21 + $0x920] sm:$0xff] }
 0x499   : > { %v3255_v6 = vpop.f32.mrf.mxu0  ;;  %v5667_v35 = vld [vmem:[#allocation2 + $0xee8] sm:$0xff] }
 0x49a   : > { %4992 = vst.msk [vmem:[#allocation2 + $0xf08] sm:$0xff] %vm4511_vm2, %v4315_v31  ;;  %v4316_v34 = vmax.f32 %v13545_v0, 0.0  ;;  %v3256_v11 = vadd.f32 %v3255_v6, %v10507_v58 }
 0x49b   : > { %v3259_v13 = vpop.f32.mrf.mxu0  ;;  %10099 = vmatmul.mubr.msk.f32.gmra.mxu0 %vm721_vm1, %v658_v47  ;;  %v5665_v47 = vld [vmem:[#allocation2 + $0xed8] sm:$0xff] }
 0x49c   : > { %4993 = vst [vmem:[#allocation2 + $0xf10] sm:$0xff] %v4316_v34  ;;  %v4317_v38 = vmax.f32 %v3256_v11, 0.0  ;;  %v13556_v50 = vadd.f32 %v3259_v13, %v10503_v56  ;;  %3551 = vmatprep.mubr.f32.mxu0 %v10266_v2  ;;  %v5663_v13 = vld [vmem:[#allocation2 + $0xec8] sm:$0xff] }
 0x49d   : > { %v3261_v8 = vpop.f32.mrf.mxu0  ;;  %v5669_v3 = vld [vmem:[#allocation2 + $0xef8] sm:$0xff] }
 0x49e   : > { %4994 = vst.msk [vmem:[#allocation2 + $0xf18] sm:$0xff] %vm4511_vm2, %v4317_v38  ;;  %v4318_v24 = vmax.f32 %v13556_v50, 0.0  ;;  %v3262_v57 = vadd.f32 %v3261_v8, %v10507_v58  ;;  %6478 = vmatprep.subr.mxu1 %v5669_v3  ;;  %v5661_v3 = vld [vmem:[#allocation2 + $0xeb8] sm:$0xff]  ;;  %v13874_v50 = vld [vmem:[%s16311_s4 + $0x10] sm:$0x3f] }
 0x49f   : > { %v3265_v29 = vpop.f32.mrf.mxu0  ;;  %10100 = vmatmul.mubr.msk.f32.gmra.mxu0 %vm721_vm1, %v659_v20  ;;  %6479 = vmatpush1.msra.mxu1 %v4312_v27  ;;  %v661_v20 = vld [vmem:[%s10344_s21 + $0x928] sm:$0xff] }
 0x4a0   : > { %4995 = vst [vmem:[#allocation2 + $0xf20] sm:$0xff] %v4318_v24  ;;  %v4319_v36 = vmax.f32 %v3262_v57, 0.0  ;;  %v13567_v18 = vadd.f32 %v3265_v29, %v10503_v56  ;;  %6480 = vmatprep.subr.mxu1 %v5667_v35  ;;  %3557 = vmatprep.mubr.f32.mxu0 %v10266_v2  ;;  %v5659_v29 = vld [vmem:[#allocation2 + $0xea8] sm:$0xff]  ;;  %v662_v35 = vld [vmem:[%s10344_s21 + $0x930] sm:$0xff] }
 0x4a1   : > { %v3267_v31 = vpop.f32.mrf.mxu0  ;;  %6481 = vmatpush1.msra.mxu1 %v4310_v43 }
 0x4a2   : > { %4996 = vst.msk [vmem:[#allocation2 + $0xf28] sm:$0xff] %vm4511_vm2, %v4319_v36  ;;  %v4320_v27 = vmax.f32 %v13567_v18, 0.0  ;;  %v3268_v6 = vadd.f32 %v3267_v31, %v10507_v58  ;;  %6482 = vmatprep.subr.mxu1 %v5665_v47  ;;  %v5655_v47 = vld [vmem:[#allocation2 + $0xe88] sm:$0xff] }
 0x4a3   : > { %v3271_v11 = vpop.f32.mrf.mxu0  ;;  %10101 = vmatmul.mubr.msk.f32.gmra.mxu0 %vm721_vm1, %v660_v5  ;;  %6483 = vmatpush1.msra.mxu1 %v4308_v52  ;;  %v5657_v5 = vld [vmem:[#allocation2 + $0xe98] sm:$0xff] }
 0x4a4   : > { %4997 = vst [vmem:[#allocation2 + $0xf30] sm:$0xff] %v4320_v27  ;;  %v4321_v38 = vmax.f32 %v3268_v6, 0.0  ;;  %v13580_v43 = vadd.f32 %v3271_v11, %v10503_v56  ;;  %6484 = vmatprep.subr.mxu1 %v5663_v13  ;;  %3563 = vmatprep.mubr.f32.mxu0 %v10266_v2  ;;  %v663_v6 = vld [vmem:[%s10344_s21 + $0x938] sm:$0xff] }
 0x4a5   : > { %v3273_v8 = vpop.f32.mrf.mxu0  ;;  %6485 = vmatpush1.msra.mxu1 %v4306_v14  ;;  %v5653_v13 = vld [vmem:[#allocation2 + $0xe78] sm:$0xff] }
 0x4a6   : > { %4998 = vst.msk [vmem:[#allocation2 + $0xf38] sm:$0xff] %vm4511_vm2, %v4321_v38  ;;  %v4322_v60 = vmax.f32 %v13580_v43, 0.0  ;;  %v3274_v52 = vadd.f32 %v3273_v8, %v10507_v58  ;;  %6486 = vmatprep.subr.mxu1 %v5661_v3  ;;  %v664_v8 = vld [vmem:[%s10344_s21 + $0x940] sm:$0xff] }
 0x4a7   : > { %v3277_v57 = vpop.f32.mrf.mxu0  ;;  %10102 = vmatmul.mubr.msk.f32.gmra.mxu0 %vm721_vm1, %v661_v20  ;;  %6487 = vmatpush1.msra.mxu1 %v4304_v44  ;;  %v5651_v20 = vld [vmem:[#allocation2 + $0xe68] sm:$0xff] }
 0x4a8   : > { %4999 = vst [vmem:[#allocation2 + $0xf40] sm:$0xff] %v4322_v60  ;;  %v4323_v45 = vmax.f32 %v3274_v52, 0.0  ;;  %v13595_v14 = vadd.f32 %v3277_v57, %v10503_v56  ;;  %6488 = vmatprep.subr.mxu1 %v5659_v29  ;;  %3569 = vmatprep.mubr.f32.mxu0 %v10266_v2  ;;  %v5649_v52 = vld [vmem:[#allocation2 + $0xe58] sm:$0xff]  ;;  %v5647_v29 = vld [vmem:[#allocation2 + $0xe48] sm:$0xff] }
 0x4a9   : > { %v3279_v36 = vpop.f32.mrf.mxu0  ;;  %6489 = vmatpush1.msra.mxu1 %v4302_v16 }
 0x4aa   : > { %5000 = vst.msk [vmem:[#allocation2 + $0xf48] sm:$0xff] %vm4511_vm2, %v4323_v45  ;;  %v4324_v32 = vmax.f32 %v13595_v14, 0.0  ;;  %v3280_v44 = vadd.f32 %v3279_v36, %v10507_v58  ;;  %6490 = vmatprep.subr.mxu1 %v5657_v5  ;;  %v665_v45 = vld [vmem:[%s10344_s21 + $0x948] sm:$0xff]  ;;  %v5645_v36 = vld [vmem:[#allocation2 + $0xe38] sm:$0xff] }
 0x4ab   : > { %v3283_v31 = vpop.f32.mrf.mxu0  ;;  %10103 = vmatmul.mubr.msk.f32.gmra.mxu0 %vm721_vm1, %v662_v35  ;;  %6491 = vmatpush1.msra.mxu1 %v4300_v12 }
 0x4ac   : > { %5001 = vst [vmem:[#allocation2 + $0xf50] sm:$0xff] %v4324_v32  ;;  %v4325_v41 = vmax.f32 %v3280_v44, 0.0  ;;  %v13610_v16 = vadd.f32 %v3283_v31, %v10503_v56  ;;  %6492 = vmatprep.subr.mxu1 %v5655_v47  ;;  %3575 = vmatprep.mubr.f32.mxu0 %v10266_v2  ;;  %v5643_v44 = vld [vmem:[#allocation2 + $0xe28] sm:$0xff]  ;;  %v666_v31 = vld [vmem:[%s10344_s21 + $0x950] sm:$0xff] }
 0x4ad   : > { %v3285_v11 = vpop.f32.mrf.mxu0  ;;  %6493 = vmatpush1.msra.mxu1 %v4298_v40 }
 0x4ae   : > { %5002 = vst.msk [vmem:[#allocation2 + $0xf58] sm:$0xff] %vm4511_vm2, %v4325_v41  ;;  %v4326_v4 = vmax.f32 %v13610_v16, 0.0  ;;  %v3286_v12 = vadd.f32 %v3285_v11, %v10507_v58  ;;  %6494 = vmatprep.subr.mxu1 %v5653_v13  ;;  %v5641_v41 = vld [vmem:[#allocation2 + $0xe18] sm:$0xff]  ;;  %v5639_v11 = vld [vmem:[#allocation2 + $0xe08] sm:$0xff] }
 0x4af   : > { %v3289_v38 = vpop.f32.mrf.mxu0  ;;  %10104 = vmatmul.mubr.msk.f32.gmra.mxu0 %vm721_vm1, %v663_v6  ;;  %6495 = vmatpush1.msra.mxu1 %v4296_v22  ;;  %v667_v13 = vld [vmem:[%s10344_s21 + $0x958] sm:$0xff] }
 0x4b0   : > { %5003 = vst [vmem:[#allocation2 + $0xf60] sm:$0xff] %v4326_v4  ;;  %v4327_v23 = vmax.f32 %v3286_v12, 0.0  ;;  %v13625_v40 = vadd.f32 %v3289_v38, %v10503_v56  ;;  %6496 = vmatprep.subr.mxu1 %v5651_v20  ;;  %3581 = vmatprep.mubr.f32.mxu0 %v10266_v2 }
 0x4b1   : > { %v3291_v3 = vpop.f32.mrf.mxu0  ;;  %6497 = vmatpush1.msra.mxu1 %v4294_v26 }
 0x4b2   : > { %5004 = vst.msk [vmem:[#allocation2 + $0xf68] sm:$0xff] %vm4511_vm2, %v4327_v23  ;;  %v4328_v25 = vmax.f32 %v13625_v40, 0.0  ;;  %v3292_v22 = vadd.f32 %v3291_v3, %v10507_v58  ;;  %6498 = vmatprep.subr.mxu1 %v5649_v52 }
 0x4b3   : > { %v3295_v57 = vpop.f32.mrf.mxu0  ;;  %10105 = vmatmul.mubr.msk.f32.gmra.mxu0 %vm721_vm1, %v664_v8  ;;  %6499 = vmatpush1.msra.mxu1 %v4292_v63 }
 0x4b4   : > { %5005 = vst [vmem:[#allocation2 + $0xf70] sm:$0xff] %v4328_v25  ;;  %v4329_v28 = vmax.f32 %v3292_v22, 0.0  ;;  %v13640_v26 = vadd.f32 %v3295_v57, %v10503_v56  ;;  %6500 = vmatprep.subr.mxu1 %v5647_v29  ;;  %3587 = vmatprep.mubr.f32.mxu0 %v10266_v2  ;;  %v669_v29 = vld [vmem:[%s10344_s21 + $0x968] sm:$0xff] }
 0x4b5   : > { %v3297_v35 = vpop.f32.mrf.mxu0  ;;  %6501 = vmatpush1.msra.mxu1 %v4290_v21 }
 0x4b6   : > { %5006 = vst.msk [vmem:[#allocation2 + $0xf78] sm:$0xff] %vm4511_vm2, %v4329_v28  ;;  %v4330_v30 = vmax.f32 %v13640_v26, 0.0  ;;  %v3298_v63 = vadd.f32 %v3297_v35, %v10507_v58  ;;  %6502 = vmatprep.subr.mxu1 %v5645_v36 }
 0x4b7   : > { %v3301_v5 = vpop.f32.mrf.mxu0  ;;  %10106 = vmatmul.mubr.msk.f32.gmra.mxu0 %vm721_vm1, %v665_v45  ;;  %6503 = vmatpush1.msra.mxu1 %v4288_v42 }
 0x4b8   : > { %5007 = vst [vmem:[#allocation2 + $0xf80] sm:$0xff] %v4330_v30  ;;  %v4331_v54 = vmax.f32 %v3298_v63, 0.0  ;;  %v13655_v21 = vadd.f32 %v3301_v5, %v10503_v56  ;;  %6504 = vmatprep.subr.mxu1 %v5643_v44  ;;  %3593 = vmatprep.mubr.f32.mxu0 %v10266_v2  ;;  %v670_v44 = vld [vmem:[%s10344_s21 + $0x970] sm:$0xff] }
 0x4b9   : > { %v3303_v47 = vpop.f32.mrf.mxu0  ;;  %6505 = vmatpush1.msra.mxu1 %v4286_v48 }
 0x4ba   : > { %5008 = vst.msk [vmem:[#allocation2 + $0xf88] sm:$0xff] %vm4511_vm2, %v4331_v54  ;;  %v4332_v61 = vmax.f32 %v13655_v21, 0.0  ;;  %v3304_v42 = vadd.f32 %v3303_v47, %v10507_v58  ;;  %6506 = vmatprep.subr.mxu1 %v5641_v41  ;;  %v8697_v41 = vld [vmem:[%s16313_s6 + $0x428] sm:$0xff] }
 0x4bb   : > { %v3307_v6 = vpop.f32.mrf.mxu0  ;;  %10107 = vmatmul.mubr.msk.f32.gmra.mxu0 %vm721_vm1, %v666_v31  ;;  %6507 = vmatpush1.msra.mxu1 %v4284_v39 }
 0x4bc   : > { %5009 = vst [vmem:[#allocation2 + $0xf90] sm:$0xff] %v4332_v61  ;;  %v4333_v33 = vmax.f32 %v3304_v42, 0.0  ;;  %v13670_v48 = vadd.f32 %v3307_v6, %v10503_v56  ;;  %6508 = vmatprep.subr.mxu1 %v5639_v11  ;;  %3599 = vmatprep.mubr.f32.mxu0 %v10266_v2  ;;  %v8696_v42 = vld [vmem:[%s16313_s6 + $0x420] sm:$0xff] }
 0x4bd   : > { %v3309_v12 = vpop.f32.mrf.mxu0  ;;  %6509 = vmatpush1.msra.mxu1 %v4282_v37  ;;  %8936 = vmatprep.subr.mxu0 %v8697_v41 }
 0x4be   : > { %5010 = vst.msk [vmem:[#allocation2 + $0xf98] sm:$0xff] %vm4511_vm2, %v4333_v33  ;;  %v4334_v10 = vmax.f32 %v13670_v48, 0.0  ;;  %v3310_v39 = vadd.f32 %v3309_v12, %v10507_v58  ;;  %8937 = vmatpush1.msra.mxu0 %v8696_v42 }
 0x4bf   : > { %v3313_v38 = vpop.f32.mrf.mxu0  ;;  %10108 = vmatmul.mubr.msk.f32.gmra.mxu0 %vm721_vm1, %v667_v13  ;;  %v671_v13 = vld [vmem:[%s10344_s21 + $0x978] sm:$0xff] }
 0x4c0   : > { %5011 = vst [vmem:[#allocation2 + $0xfa0] sm:$0xff] %v4334_v10  ;;  %v4335_v20 = vmax.f32 %v3310_v39, 0.0  ;;  %v13683_v23 = vadd.f32 %v3313_v38, %v10503_v56  ;;  %3605 = vmatprep.mubr.f32.mxu0 %v10266_v2 }
 0x4c1   : > { %v3315_v37 = vpop.f32.mrf.mxu0 }
 0x4c2   : > { %5012 = vst.msk [vmem:[#allocation2 + $0xfa8] sm:$0xff] %vm4511_vm2, %v4335_v20  ;;  %v4336_v8 = vmax.f32 %v13683_v23, 0.0  ;;  %v3316_v3 = vadd.f32 %v3315_v37, %v10507_v58 }
 0x4c3   : > { %v3319_v52 = vpop.f32.mrf.mxu0  ;;  %10109 = vmatmul.mubr.msk.f32.gmra.mxu0 %vm721_vm1, %v668_v17 }
 0x4c4   : > { %5013 = vst [vmem:[#allocation2 + $0xfb0] sm:$0xff] %v4336_v8  ;;  %v4337_v22 = vmax.f32 %v3316_v3, 0.0  ;;  %v13694_v57 = vadd.f32 %v3319_v52, %v10503_v56  ;;  %3611 = vmatprep.mubr.f32.mxu0 %v10266_v2  ;;  %v672_v3 = vld [vmem:[%s10344_s21 + $0x980] sm:$0xff] }
 0x4c5   : > { %v3321_v28 = vpop.f32.mrf.mxu0 }
 0x4c6   : > { %5014 = vst.msk [vmem:[#allocation2 + $0xfb8] sm:$0xff] %vm4511_vm2, %v4337_v22  ;;  %v4338_v45 = vmax.f32 %v13694_v57, 0.0  ;;  %v3322_v35 = vadd.f32 %v3321_v28, %v10507_v58 }
 0x4c7   : > { %v3325_v36 = vpop.f32.mrf.mxu0  ;;  %10110 = vmatmul.mubr.msk.f32.gmra.mxu0 %vm721_vm1, %v669_v29 }
 0x4c8   : > { %5015 = vst [vmem:[#allocation2 + $0xfc0] sm:$0xff] %v4338_v45  ;;  %v4339_v63 = vmax.f32 %v3322_v35, 0.0  ;;  %v13705_v5 = vadd.f32 %v3325_v36, %v10503_v56  ;;  %3617 = vmatprep.mubr.f32.mxu0 %v10266_v2 }
 0x4c9   : > { %v3327_v54 = vpop.f32.mrf.mxu0 }
 0x4ca   : > { %5016 = vst.msk [vmem:[#allocation2 + $0xfc8] sm:$0xff] %vm4511_vm2, %v4339_v63  ;;  %v4340_v31 = vmax.f32 %v13705_v5, 0.0  ;;  %v3328_v47 = vadd.f32 %v3327_v54, %v10507_v58  ;;  %v673_v63 = vld [vmem:[%s10344_s21 + $0x988] sm:$0xff] }
 0x4cb   : > { %v3331_v6 = vpop.f32.mrf.mxu0  ;;  %10111 = vmatmul.mubr.msk.f32.gmra.mxu0 %vm721_vm1, %v670_v44 }
 0x4cc   : > { %5017 = vst [vmem:[#allocation2 + $0xfd0] sm:$0xff] %v4340_v31  ;;  %v4341_v11 = vmax.f32 %v3328_v47, 0.0  ;;  %v13722_v33 = vadd.f32 %v3331_v6, %v10503_v56  ;;  %3623 = vmatprep.mubr.f32.mxu0 %v10266_v2 }
 0x4cd   : > { %v3333_v12 = vpop.f32.mrf.mxu0 }
 0x4ce   : > { %5018 = vst.msk [vmem:[#allocation2 + $0xfd8] sm:$0xff] %vm4511_vm2, %v4341_v11  ;;  %v4342_v39 = vmax.f32 %v13722_v33, 0.0  ;;  %v3334_v38 = vadd.f32 %v3333_v12, %v10507_v58  ;;  %v674_v11 = vld [vmem:[%s10344_s21 + $0x990] sm:$0xff] }
 0x4cf   : > { %v3337_v20 = vpop.f32.mrf.mxu0  ;;  %10112 = vmatmul.mubr.msk.f32.gmra.mxu0 %vm721_vm1, %v671_v13 }
 0x4d0   : > { %5019 = vst [vmem:[#allocation2 + $0xfe0] sm:$0xff] %v4342_v39  ;;  %v4343_v17 = vmax.f32 %v3334_v38, 0.0  ;;  %v3338_v37 = vadd.f32 %v3337_v20, %v10503_v56  ;;  %3629 = vmatprep.mubr.f32.mxu0 %v10266_v2 }
 0x4d1   : > { %v3339_v52 = vpop.f32.mrf.mxu0 }
 0x4d2   : > { %5020 = vst.msk [vmem:[#allocation2 + $0xfe8] sm:$0xff] %vm4511_vm2, %v4343_v17  ;;  %v4344_v22 = vmax.f32 %v3338_v37, 0.0  ;;  %v3340_v29 = vadd.f32 %v3339_v52, %v10507_v58  ;;  %v675_v37 = vld [vmem:[%s10344_s21 + $0x998] sm:$0xff] }
 0x4d3   : > { %v3343_v28 = vpop.f32.mrf.mxu0  ;;  %10113 = vmatmul.mubr.msk.f32.gmra.mxu0 %vm721_vm1, %v672_v3 }
 0x4d4   : > { %5021 = vst [vmem:[#allocation2 + $0xff0] sm:$0xff] %v4344_v22  ;;  %v4345_v35 = vmax.f32 %v3340_v29, 0.0  ;;  %v13737_v36 = vadd.f32 %v3343_v28, %v10503_v56  ;;  %3635 = vmatprep.mubr.f32.mxu0 %v10266_v2 }
 0x4d5   : > { %v3345_v44 = vpop.f32.mrf.mxu0 }
 0x4d6   : > { %5022 = vst.msk [vmem:[#allocation2 + $0xff8] sm:$0xff] %vm4511_vm2, %v4345_v35  ;;  %v4346_v54 = vmax.f32 %v13737_v36, 0.0  ;;  %v3346_v47 = vadd.f32 %v3345_v44, %v10507_v58  ;;  %v700_v36 = vld [vmem:[%s10344_s21 + $0xa60] sm:$0xff] }
 0x4d7   : > { %v3349_v41 = vpop.f32.mrf.mxu0  ;;  %10114 = vmatmul.mubr.msk.f32.gmra.mxu0 %vm721_vm1, %v673_v63 }
 0x4d8   : > { %5023 = vst [vmem:[#allocation2 + $0x1000] sm:$0xff] %v4346_v54  ;;  %v4347_v42 = vmax.f32 %v3346_v47, 0.0  ;;  %v13748_v6 = vadd.f32 %v3349_v41, %v10503_v56  ;;  %3641 = vmatprep.mubr.f32.mxu0 %v10266_v2  ;;  %v676_v41 = vld [vmem:[%s10344_s21 + $0x9a0] sm:$0xff] }
 0x4d9   : > { %v3351_v33 = vpop.f32.mrf.mxu0  ;;  %v5699_v63 = vld [vmem:[#allocation2 + $0xfe8] sm:$0xff] }
 0x4da   : > { %5024 = vst.msk [vmem:[#allocation2 + $0x1008] sm:$0xff] %vm4511_vm2, %v4347_v42  ;;  %v4348_v13 = vmax.f32 %v13748_v6, 0.0  ;;  %v3352_v12 = vadd.f32 %v3351_v33, %v10507_v58 }
 0x4db   : > { %v3355_v38 = vpop.f32.mrf.mxu0  ;;  %10115 = vmatmul.mubr.msk.f32.gmra.mxu0 %vm721_vm1, %v674_v11  ;;  %v5697_v11 = vld [vmem:[#allocation2 + $0xfd8] sm:$0xff] }
 0x4dc   : > { %5025 = vst [vmem:[#allocation2 + $0x1010] sm:$0xff] %v4348_v13  ;;  %v4349_v20 = vmax.f32 %v3352_v12, 0.0  ;;  %v13759_v17 = vadd.f32 %v3355_v38, %v10503_v56  ;;  %3647 = vmatprep.mubr.f32.mxu0 %v10266_v2  ;;  %v5695_v38 = vld [vmem:[#allocation2 + $0xfc8] sm:$0xff] }
 0x4dd   : > { %v3357_v3 = vpop.f32.mrf.mxu0  ;;  %v5701_v52 = vld [vmem:[#allocation2 + $0xff8] sm:$0xff] }
 0x4de   : > { %5026 = vst.msk [vmem:[#allocation2 + $0x1018] sm:$0xff] %vm4511_vm2, %v4349_v20  ;;  %v4350_v29 = vmax.f32 %v13759_v17, 0.0  ;;  %v3358_v28 = vadd.f32 %v3357_v3, %v10507_v58  ;;  %6510 = vmatprep.subr.mxu1 %v5701_v52  ;;  %v5693_v52 = vld [vmem:[#allocation2 + $0xfb8] sm:$0xff] }
 0x4df   : > { %v3361_v35 = vpop.f32.mrf.mxu0  ;;  %10116 = vmatmul.mubr.msk.f32.gmra.mxu0 %vm721_vm1, %v675_v37  ;;  %6511 = vmatpush2.msra.mxu1 %v4344_v22  ;;  %v677_v37 = vld [vmem:[%s10344_s21 + $0x9a8] sm:$0xff] }
 0x4e0   : > { %5027 = vst [vmem:[#allocation2 + $0x1020] sm:$0xff] %v4350_v29  ;;  %v4351_v44 = vmax.f32 %v3358_v28, 0.0  ;;  %v13770_v47 = vadd.f32 %v3361_v35, %v10503_v56  ;;  %6512 = vmatprep.subr.mxu1 %v5699_v63  ;;  %3653 = vmatprep.mubr.f32.mxu0 %v10266_v2  ;;  %v5691_v35 = vld [vmem:[#allocation2 + $0xfa8] sm:$0xff]  ;;  %v678_v63 = vld [vmem:[%s10344_s21 + $0x9b0] sm:$0xff] }
 0x4e1   : > { %v3363_v42 = vpop.f32.mrf.mxu0  ;;  %6513 = vmatpush2.msra.mxu1 %v4342_v39  ;;  %v5703_v17 = vld [vmem:[#allocation2 + $0x1008] sm:$0xff] }
 0x4e2   : > { %5028 = vst.msk [vmem:[#allocation2 + $0x1028] sm:$0xff] %vm4511_vm2, %v4351_v44  ;;  %v4352_v22 = vmax.f32 %v13770_v47, 0.0  ;;  %v3364_v33 = vadd.f32 %v3363_v42, %v10507_v58  ;;  %6514 = vmatprep.subr.mxu1 %v5697_v11  ;;  %v5687_v11 = vld [vmem:[#allocation2 + $0xf88] sm:$0xff] }
 0x4e3   : > { %v3367_v12 = vpop.f32.mrf.mxu0  ;;  %10117 = vmatmul.mubr.msk.f32.gmra.mxu0 %vm721_vm1, %v676_v41  ;;  %6515 = vmatpush2.msra.mxu1 %v4340_v31  ;;  %v5689_v41 = vld [vmem:[#allocation2 + $0xf98] sm:$0xff] }
 0x4e4   : > { %5029 = vst [vmem:[#allocation2 + $0x1030] sm:$0xff] %v4352_v22  ;;  %v4353_v20 = vmax.f32 %v3364_v33, 0.0  ;;  %v13783_v39 = vadd.f32 %v3367_v12, %v10503_v56  ;;  %6516 = vmatprep.subr.mxu1 %v5695_v38  ;;  %3659 = vmatprep.mubr.f32.mxu0 %v10266_v2  ;;  %v679_v33 = vld [vmem:[%s10344_s21 + $0x9b8] sm:$0xff] }
 0x4e5   : > { %v3369_v3 = vpop.f32.mrf.mxu0  ;;  %6517 = vmatpush2.msra.mxu1 %v4338_v45  ;;  %v5685_v38 = vld [vmem:[#allocation2 + $0xf78] sm:$0xff] }
 0x4e6   : > { %5030 = vst.msk [vmem:[#allocation2 + $0x1038] sm:$0xff] %vm4511_vm2, %v4353_v20  ;;  %v4354_v5 = vmax.f32 %v13783_v39, 0.0  ;;  %v3370_v31 = vadd.f32 %v3369_v3, %v10507_v58  ;;  %6518 = vmatprep.subr.mxu1 %v5693_v52  ;;  %v680_v3 = vld [vmem:[%s10344_s21 + $0x9c0] sm:$0xff] }
 0x4e7   : > { %v3373_v28 = vpop.f32.mrf.mxu0  ;;  %10118 = vmatmul.mubr.msk.f32.gmra.mxu0 %vm721_vm1, %v677_v37  ;;  %6519 = vmatpush2.msra.mxu1 %v4336_v8  ;;  %v5683_v37 = vld [vmem:[#allocation2 + $0xf68] sm:$0xff] }
 0x4e8   : > { %5031 = vst [vmem:[#allocation2 + $0x1040] sm:$0xff] %v4354_v5  ;;  %v4355_v57 = vmax.f32 %v3370_v31, 0.0  ;;  %v13798_v45 = vadd.f32 %v3373_v28, %v10503_v56  ;;  %6520 = vmatprep.subr.mxu1 %v5691_v35  ;;  %3665 = vmatprep.mubr.f32.mxu0 %v10266_v2  ;;  %v5681_v31 = vld [vmem:[#allocation2 + $0xf58] sm:$0xff]  ;;  %v5679_v35 = vld [vmem:[#allocation2 + $0xf48] sm:$0xff] }
 0x4e9   : > { %v3375_v44 = vpop.f32.mrf.mxu0  ;;  %6521 = vmatpush2.msra.mxu1 %v4334_v10 }
 0x4ea   : > { %5032 = vst.msk [vmem:[#allocation2 + $0x1048] sm:$0xff] %vm4511_vm2, %v4355_v57  ;;  %v4356_v23 = vmax.f32 %v13798_v45, 0.0  ;;  %v3376_v8 = vadd.f32 %v3375_v44, %v10507_v58  ;;  %6522 = vmatprep.subr.mxu1 %v5689_v41  ;;  %v681_v57 = vld [vmem:[%s10344_s21 + $0x9c8] sm:$0xff]  ;;  %v5677_v44 = vld [vmem:[#allocation2 + $0xf38] sm:$0xff] }
 0x4eb   : > { %v3379_v42 = vpop.f32.mrf.mxu0  ;;  %10119 = vmatmul.mubr.msk.f32.gmra.mxu0 %vm721_vm1, %v678_v63  ;;  %6523 = vmatpush2.msra.mxu1 %v4332_v61 }
 0x4ec   : > { %5033 = vst [vmem:[#allocation2 + $0x1050] sm:$0xff] %v4356_v23  ;;  %v4357_v48 = vmax.f32 %v3376_v8, 0.0  ;;  %v13813_v10 = vadd.f32 %v3379_v42, %v10503_v56  ;;  %6524 = vmatprep.subr.mxu1 %v5687_v11  ;;  %3671 = vmatprep.mubr.f32.mxu0 %v10266_v2  ;;  %v5675_v8 = vld [vmem:[#allocation2 + $0xf28] sm:$0xff]  ;;  %v682_v42 = vld [vmem:[%s10344_s21 + $0x9d0] sm:$0xff] }
 0x4ed   : > { %v3381_v12 = vpop.f32.mrf.mxu0  ;;  %6525 = vmatpush2.msra.mxu1 %v4330_v30 }
 0x4ee   : > { %5034 = vst.msk [vmem:[#allocation2 + $0x1058] sm:$0xff] %vm4511_vm2, %v4357_v48  ;;  %v4358_v21 = vmax.f32 %v13813_v10, 0.0  ;;  %v3382_v61 = vadd.f32 %v3381_v12, %v10507_v58  ;;  %6526 = vmatprep.subr.mxu1 %v5685_v38  ;;  %v5673_v48 = vld [vmem:[#allocation2 + $0xf18] sm:$0xff]  ;;  %v5671_v38 = vld [vmem:[#allocation2 + $0xf08] sm:$0xff] }
 0x4ef   : > { %v3385_v20 = vpop.f32.mrf.mxu0  ;;  %10120 = vmatmul.mubr.msk.f32.gmra.mxu0 %vm721_vm1, %v679_v33  ;;  %6527 = vmatpush2.msra.mxu1 %v4328_v25  ;;  %v10256_v33 = vld [vmem:[%s16311_s4 + $0x8] sm:$0xff] }
 0x4f0   : > { %5035 = vst [vmem:[#allocation2 + $0x1060] sm:$0xff] %v4358_v21  ;;  %v4359_v26 = vmax.f32 %v3382_v61, 0.0  ;;  %v13828_v30 = vadd.f32 %v3385_v20, %v10503_v56  ;;  %6528 = vmatprep.subr.mxu1 %v5683_v37  ;;  %3677 = vmatprep.mubr.f32.mxu0 %v10266_v2  ;;  %v5928_v12 = vrot.slane %v10256_v33, %v12218_v9  ;;  %v686_v33 = vld [vmem:[%s10344_s21 + $0x9f0] sm:$0xff]  ;;  %v8765_v9 = vld [vmem:[%s16313_s6 + $0x648] sm:$0xff] }
 0x4f1   : > { %v3387_v52 = vpop.f32.mrf.mxu0  ;;  %6529 = vmatpush2.msra.mxu1 %v4326_v4  ;;  %v5940_v61 = vrot.slane %v13874_v50, %v10498_v55 }
 0x4f2   : > { %5036 = vst.msk [vmem:[#allocation2 + $0x1068] sm:$0xff] %vm4511_vm2, %v4359_v26  ;;  %v4360_v40 = vmax.f32 %v13828_v30, 0.0  ;;  %v3388_v25 = vadd.f32 %v3387_v52, %v10507_v58  ;;  %6530 = vmatprep.subr.mxu1 %v5681_v31  ;;  %v683_v26 = vld [vmem:[%s10344_s21 + $0x9d8] sm:$0xff] }
 0x4f3   : > { %v3391_v28 = vpop.f32.mrf.mxu0  ;;  %10121 = vmatmul.mubr.msk.f32.gmra.mxu0 %vm721_vm1, %v680_v3  ;;  %6531 = vmatpush2.msra.mxu1 %v4324_v32 }
 0x4f4   : > { %5037 = vst [vmem:[#allocation2 + $0x1070] sm:$0xff] %v4360_v40  ;;  %v4361_v16 = vmax.f32 %v3388_v25, 0.0  ;;  %v13843_v4 = vadd.f32 %v3391_v28, %v10503_v56  ;;  %6532 = vmatprep.subr.mxu1 %v5679_v35  ;;  %3683 = vmatprep.mubr.f32.mxu0 %v10266_v2 }
 0x4f5   : > { %v3393_v63 = vpop.f32.mrf.mxu0  ;;  %6533 = vmatpush2.msra.mxu1 %v4322_v60 }
 0x4f6   : > { %5038 = vst.msk [vmem:[#allocation2 + $0x1078] sm:$0xff] %vm4511_vm2, %v4361_v16  ;;  %v4362_v14 = vmax.f32 %v13843_v4, 0.0  ;;  %v3394_v32 = vadd.f32 %v3393_v63, %v10507_v58  ;;  %6534 = vmatprep.subr.mxu1 %v5677_v44  ;;  %v8685_v16 = vld [vmem:[%s16313_s6 + $0x3c8] sm:$0xff] }
 0x4f7   : > { %v3397_v41 = vpop.f32.mrf.mxu0  ;;  %10122 = vmatmul.mubr.msk.f32.gmra.mxu0 %vm721_vm1, %v681_v57  ;;  %6535 = vmatpush2.msra.mxu1 %v4320_v27  ;;  %v8684_v57 = vld [vmem:[%s16313_s6 + $0x3c0] sm:$0xff] }
 0x4f8   : > { %5039 = vst [vmem:[#allocation2 + $0x1080] sm:$0xff] %v4362_v14  ;;  %v4363_v43 = vmax.f32 %v3394_v32, 0.0  ;;  %v13858_v60 = vadd.f32 %v3397_v41, %v10503_v56  ;;  %6536 = vmatprep.subr.mxu1 %v5675_v8  ;;  %3689 = vmatprep.mubr.f32.mxu0 %v10266_v2  ;;  %v685_v41 = vld [vmem:[%s10344_s21 + $0x9e8] sm:$0xff] }
 0x4f9   : > { %v3399_v11 = vpop.f32.mrf.mxu0  ;;  %6537 = vmatpush2.msra.mxu1 %v4318_v24  ;;  %8938 = vmatprep.subr.mxu0 %v8685_v16  ;;  %v688_v16 = vld [vmem:[%s10344_s21 + $0xa00] sm:$0xff] }
 0x4fa   : > { %5040 = vst.msk [vmem:[#allocation2 + $0x1088] sm:$0xff] %vm4511_vm2, %v4363_v43  ;;  %v4364_v18 = vmax.f32 %v13858_v60, 0.0  ;;  %v3400_v27 = vadd.f32 %v3399_v11, %v10507_v58  ;;  %6538 = vmatprep.subr.mxu1 %v5673_v48  ;;  %8939 = vmatpush1.msra.mxu0 %v8684_v57 }
 0x4fb   : > { %v3403_v24 = vpop.f32.mrf.mxu0  ;;  %10123 = vmatmul.mubr.msk.f32.gmra.mxu0 %vm721_vm1, %v682_v42  ;;  %6539 = vmatpush2.msra.mxu1 %v4316_v34 }
 0x4fc   : > { %5041 = vst [vmem:[#allocation2 + $0x1090] sm:$0xff] %v4364_v18  ;;  %v4365_v20 = vmax.f32 %v3400_v27, 0.0  ;;  %v13884_v37 = vadd.f32 %v3403_v24, %v10503_v56  ;;  %6540 = vmatprep.subr.mxu1 %v5671_v38  ;;  %3695 = vmatprep.mubr.f32.mxu0 %v10266_v2 }
 0x4fd   : > { %v3405_v3 = vpop.f32.mrf.mxu0  ;;  %6541 = vmatpush2.msra.mxu1 %v4314_v46 }
 0x4fe   : > { %5042 = vst.msk [vmem:[#allocation2 + $0x1098] sm:$0xff] %vm4511_vm2, %v4365_v20  ;;  %v4366_v0 = vmax.f32 %v13884_v37, 0.0  ;;  %v3406_v34 = vadd.f32 %v3405_v3, %v10507_v58  ;;  %6543 = vmatmul.mubr.f32.vlgmr.msra.gmra.mxu1 %v5928_v12  ;;  %v687_v3 = vld [vmem:[%s10344_s21 + $0x9f8] sm:$0xff] }
 0x4ff   : > { %v3409_v52 = vpop.f32.mrf.mxu0  ;;  %10124 = vmatmul.mubr.msk.f32.gmra.mxu0 %vm721_vm1, %v683_v26  ;;  %6613 = vmatprep.mubr.f32.mxu1 %v5940_v61 }
 0x500   : > { %5043 = vst [vmem:[#allocation2 + $0x10a0] sm:$0xff] %v4366_v0  ;;  %v4367_v31 = vmax.f32 %v3406_v34, 0.0  ;;  %v13897_v25 = vadd.f32 %v3409_v52, %v10503_v56  ;;  %3701 = vmatprep.mubr.f32.mxu0 %v10266_v2 }
 0x501   : > { %v3411_v46 = vpop.f32.mrf.mxu0 }
 0x502   : > { %5044 = vst.msk [vmem:[#allocation2 + $0x10a8] sm:$0xff] %vm4511_vm2, %v4367_v31  ;;  %v4368_v28 = vmax.f32 %v13897_v25, 0.0  ;;  %v3412_v35 = vadd.f32 %v3411_v46, %v10507_v58 }
 0x503   : > { %v3415_v63 = vpop.f32.mrf.mxu0  ;;  %10125 = vmatmul.mubr.msk.f32.gmra.mxu0 %vm721_vm1, %v684_v19 }
 0x504   : > { %5045 = vst [vmem:[#allocation2 + $0x10b0] sm:$0xff] %v4368_v28  ;;  %v4369_v44 = vmax.f32 %v3412_v35, 0.0  ;;  %v13914_v32 = vadd.f32 %v3415_v63, %v10503_v56  ;;  %3707 = vmatprep.mubr.f32.mxu0 %v10266_v2 }
 0x505   : > { %v3417_v8 = vpop.f32.mrf.mxu0 }
 0x506   : > { %5046 = vst.msk [vmem:[#allocation2 + $0x10b8] sm:$0xff] %vm4511_vm2, %v4369_v44  ;;  %v4370_v43 = vmax.f32 %v13914_v32, 0.0  ;;  %v3418_v42 = vadd.f32 %v3417_v8, %v10507_v58 }
 0x507   : > { %v3421_v11 = vpop.f32.mrf.mxu0  ;;  %10126 = vmatmul.mubr.msk.f32.gmra.mxu0 %vm721_vm1, %v685_v41 }
 0x508   : > { %5047 = vst [vmem:[#allocation2 + $0x10c0] sm:$0xff] %v4370_v43  ;;  %v4371_v48 = vmax.f32 %v3418_v42, 0.0  ;;  %v13925_v27 = vadd.f32 %v3421_v11, %v10503_v56  ;;  %3713 = vmatprep.mubr.f32.mxu0 %v10266_v2  ;;  %v689_v11 = vld [vmem:[%s10344_s21 + $0xa08] sm:$0xff] }
 0x509   : > { %v3423_v12 = vpop.f32.mrf.mxu0 }
 0x50a   : > { %5048 = vst.msk [vmem:[#allocation2 + $0x10c8] sm:$0xff] %vm4511_vm2, %v4371_v48  ;;  %v4372_v24 = vmax.f32 %v13925_v27, 0.0  ;;  %v3424_v38 = vadd.f32 %v3423_v12, %v10507_v58 }
 0x50b   : > { %v3427_v61 = vpop.f32.mrf.mxu0  ;;  %10127 = vmatmul.mubr.msk.f32.gmra.mxu0 %vm721_vm1, %v686_v33 }
 0x50c   : > { %5049 = vst [vmem:[#allocation2 + $0x10d0] sm:$0xff] %v4372_v24  ;;  %v4373_v20 = vmax.f32 %v3424_v38, 0.0  ;;  %v13936_v26 = vadd.f32 %v3427_v61, %v10503_v56  ;;  %3719 = vmatprep.mubr.f32.mxu0 %v10266_v2 }
 0x50d   : > { %v3429_v34 = vpop.f32.mrf.mxu0 }
 0x50e   : > { %5050 = vst.msk [vmem:[#allocation2 + $0x10d8] sm:$0xff] %vm4511_vm2, %v4373_v20  ;;  %v4374_v52 = vmax.f32 %v13936_v26, 0.0  ;;  %v3430_v31 = vadd.f32 %v3429_v34, %v10507_v58  ;;  %v690_v26 = vld [vmem:[%s10344_s21 + $0xa10] sm:$0xff] }
 0x50f   : > { %v3433_v19 = vpop.f32.mrf.mxu0  ;;  %10128 = vmatmul.mubr.msk.f32.gmra.mxu0 %vm721_vm1, %v687_v3 }
 0x510   : > { %5051 = vst [vmem:[#allocation2 + $0x10e0] sm:$0xff] %v4374_v52  ;;  %v4375_v46 = vmax.f32 %v3430_v31, 0.0  ;;  %v3434_v35 = vadd.f32 %v3433_v19, %v10503_v56  ;;  %3725 = vmatprep.mubr.f32.mxu0 %v10266_v2 }
 0x511   : > { %v3435_v57 = vpop.f32.mrf.mxu0 }
 0x512   : > { %5052 = vst.msk [vmem:[#allocation2 + $0x10e8] sm:$0xff] %vm4511_vm2, %v4375_v46  ;;  %v4376_v63 = vmax.f32 %v3434_v35, 0.0  ;;  %v3436_v44 = vadd.f32 %v3435_v57, %v10507_v58 }
 0x513   : > { %v3439_v41 = vpop.f32.mrf.mxu0  ;;  %10129 = vmatmul.mubr.msk.f32.gmra.mxu0 %vm721_vm1, %v688_v16  ;;  %v691_v16 = vld [vmem:[%s10344_s21 + $0xa18] sm:$0xff] }
 0x514   : > { %5053 = vst [vmem:[#allocation2 + $0x10f0] sm:$0xff] %v4376_v63  ;;  %v4377_v8 = vmax.f32 %v3436_v44, 0.0  ;;  %v13951_v42 = vadd.f32 %v3439_v41, %v10503_v56  ;;  %3731 = vmatprep.mubr.f32.mxu0 %v10266_v2 }
 0x515   : > { %v3441_v48 = vpop.f32.mrf.mxu0 }
 0x516   : > { %5054 = vst.msk [vmem:[#allocation2 + $0x10f8] sm:$0xff] %vm4511_vm2, %v4377_v8  ;;  %v4378_v33 = vmax.f32 %v13951_v42, 0.0  ;;  %v3442_v12 = vadd.f32 %v3441_v48, %v10507_v58 }
 0x517   : > { %v3445_v38 = vpop.f32.mrf.mxu0  ;;  %10130 = vmatmul.mubr.msk.f32.gmra.mxu0 %vm721_vm1, %v689_v11 }
 0x518   : > { %5055 = vst [vmem:[#allocation2 + $0x1100] sm:$0xff] %v4378_v33  ;;  %v4379_v61 = vmax.f32 %v3442_v12, 0.0  ;;  %v13962_v20 = vadd.f32 %v3445_v38, %v10503_v56  ;;  %3737 = vmatprep.mubr.f32.mxu0 %v10266_v2 }
 0x519   : > { %v3447_v3 = vpop.f32.mrf.mxu0  ;;  %v5731_v48 = vld [vmem:[#allocation2 + $0x10e8] sm:$0xff] }
 0x51a   : > { %5056 = vst.msk [vmem:[#allocation2 + $0x1108] sm:$0xff] %vm4511_vm2, %v4379_v61  ;;  %v4380_v34 = vmax.f32 %v13962_v20, 0.0  ;;  %v3448_v31 = vadd.f32 %v3447_v3, %v10507_v58  ;;  %v692_v61 = vld [vmem:[%s10344_s21 + $0xa20] sm:$0xff]  ;;  %v5729_v3 = vld [vmem:[#allocation2 + $0x10d8] sm:$0xff] }
 0x51b   : > { %v3451_v19 = vpop.f32.mrf.mxu0  ;;  %10131 = vmatmul.mubr.msk.f32.gmra.mxu0 %vm721_vm1, %v690_v26 }
 0x51c   : > { %5057 = vst [vmem:[#allocation2 + $0x1110] sm:$0xff] %v4380_v34  ;;  %v4381_v46 = vmax.f32 %v3448_v31, 0.0  ;;  %v13973_v35 = vadd.f32 %v3451_v19, %v10503_v56  ;;  %3743 = vmatprep.mubr.f32.mxu0 %v10266_v2 }
 0x51d   : > { %v3453_v57 = vpop.f32.mrf.mxu0  ;;  %v5733_v44 = vld [vmem:[#allocation2 + $0x10f8] sm:$0xff] }
 0x51e   : > { %5058 = vst.msk [vmem:[#allocation2 + $0x1118] sm:$0xff] %vm4511_vm2, %v4381_v46  ;;  %v4382_v41 = vmax.f32 %v13973_v35, 0.0  ;;  %v3454_v8 = vadd.f32 %v3453_v57, %v10507_v58  ;;  %6549 = vmatprep.subr.mxu1 %v5733_v44  ;;  %v5727_v46 = vld [vmem:[#allocation2 + $0x10c8] sm:$0xff]  ;;  %v5948_v35 = vrot.slane %v13874_v50, %v11101_v1 }
 0x51f   : > { %v3457_v11 = vpop.f32.mrf.mxu0  ;;  %10132 = vmatmul.mubr.msk.f32.gmra.mxu0 %vm721_vm1, %v691_v16  ;;  %6550 = vmatpush1.msra.mxu1 %v4376_v63  ;;  %v693_v57 = vld [vmem:[%s10344_s21 + $0xa28] sm:$0xff] }
 0x520   : > { %5059 = vst [vmem:[#allocation2 + $0x1120] sm:$0xff] %v4382_v41  ;;  %v4383_v12 = vmax.f32 %v3454_v8, 0.0  ;;  %v13984_v38 = vadd.f32 %v3457_v11, %v10503_v56  ;;  %6551 = vmatprep.subr.mxu1 %v5731_v48  ;;  %3749 = vmatprep.mubr.f32.mxu0 %v10266_v2  ;;  %v5725_v8 = vld [vmem:[#allocation2 + $0x10b8] sm:$0xff]  ;;  %v5723_v48 = vld [vmem:[#allocation2 + $0x10a8] sm:$0xff] }
 0x521   : > { %v3459_v26 = vpop.f32.mrf.mxu0  ;;  %6552 = vmatpush1.msra.mxu1 %v4374_v52 }
 0x522   : > { %5060 = vst.msk [vmem:[#allocation2 + $0x1128] sm:$0xff] %vm4511_vm2, %v4383_v12  ;;  %v4384_v63 = vmax.f32 %v13984_v38, 0.0  ;;  %v3460_v31 = vadd.f32 %v3459_v26, %v10507_v58  ;;  %6553 = vmatprep.subr.mxu1 %v5729_v3  ;;  %v694_v12 = vld [vmem:[%s10344_s21 + $0xa30] sm:$0xff]  ;;  %v5721_v26 = vld [vmem:[#allocation2 + $0x1098] sm:$0xff] }
 0x523   : > { %v3463_v19 = vpop.f32.mrf.mxu0  ;;  %10133 = vmatmul.mubr.msk.f32.gmra.mxu0 %vm721_vm1, %v692_v61  ;;  %6554 = vmatpush1.msra.mxu1 %v4372_v24 }
 0x524   : > { %5061 = vst [vmem:[#allocation2 + $0x1130] sm:$0xff] %v4384_v63  ;;  %v4385_v16 = vmax.f32 %v3460_v31, 0.0  ;;  %v13997_v52 = vadd.f32 %v3463_v19, %v10503_v56  ;;  %6555 = vmatprep.subr.mxu1 %v5727_v46  ;;  %3755 = vmatprep.mubr.f32.mxu0 %v10266_v2  ;;  %v5719_v31 = vld [vmem:[#allocation2 + $0x1088] sm:$0xff]  ;;  %v695_v19 = vld [vmem:[%s10344_s21 + $0xa38] sm:$0xff] }
 0x525   : > { %v3465_v44 = vpop.f32.mrf.mxu0  ;;  %6556 = vmatpush1.msra.mxu1 %v4370_v43 }
 0x526   : > { %5062 = vst.msk [vmem:[#allocation2 + $0x1138] sm:$0xff] %vm4511_vm2, %v4385_v16  ;;  %v4386_v27 = vmax.f32 %v13997_v52, 0.0  ;;  %v3466_v24 = vadd.f32 %v3465_v44, %v10507_v58  ;;  %6557 = vmatprep.subr.mxu1 %v5725_v8  ;;  %v5717_v16 = vld [vmem:[#allocation2 + $0x1078] sm:$0xff]  ;;  %v5715_v44 = vld [vmem:[#allocation2 + $0x1068] sm:$0xff]  ;;  %v696_v8 = vld [vmem:[%s10344_s21 + $0xa40] sm:$0xff] }
 0x527   : > { %v3469_v11 = vpop.f32.mrf.mxu0  ;;  %10134 = vmatmul.mubr.msk.f32.gmra.mxu0 %vm721_vm1, %v693_v57  ;;  %6558 = vmatpush1.msra.mxu1 %v4368_v28 }
 0x528   : > { %5063 = vst [vmem:[#allocation2 + $0x1140] sm:$0xff] %v4386_v27  ;;  %v4387_v32 = vmax.f32 %v3466_v24, 0.0  ;;  %v14012_v43 = vadd.f32 %v3469_v11, %v10503_v56  ;;  %6559 = vmatprep.subr.mxu1 %v5723_v48  ;;  %3761 = vmatprep.mubr.f32.mxu0 %v10266_v2  ;;  %v5713_v11 = vld [vmem:[#allocation2 + $0x1058] sm:$0xff] }
 0x529   : > { %v3471_v61 = vpop.f32.mrf.mxu0  ;;  %6560 = vmatpush1.msra.mxu1 %v4366_v0 }
 0x52a   : > { %5064 = vst.msk [vmem:[#allocation2 + $0x1148] sm:$0xff] %vm4511_vm2, %v4387_v32  ;;  %v4388_v25 = vmax.f32 %v14012_v43, 0.0  ;;  %v3472_v28 = vadd.f32 %v3471_v61, %v10507_v58  ;;  %6561 = vmatprep.subr.mxu1 %v5721_v26  ;;  %v5711_v32 = vld [vmem:[#allocation2 + $0x1048] sm:$0xff]  ;;  %v5709_v26 = vld [vmem:[#allocation2 + $0x1038] sm:$0xff] }
 0x52b   : > { %v3475_v3 = vpop.f32.mrf.mxu0  ;;  %10135 = vmatmul.mubr.msk.f32.gmra.mxu0 %vm721_vm1, %v694_v12  ;;  %6562 = vmatpush1.msra.mxu1 %v4364_v18  ;;  %v697_v12 = vld [vmem:[%s10344_s21 + $0xa48] sm:$0xff] }
 0x52c   : > { %5065 = vst [vmem:[#allocation2 + $0x1150] sm:$0xff] %v4388_v25  ;;  %v4389_v37 = vmax.f32 %v3472_v28, 0.0  ;;  %v14027_v0 = vadd.f32 %v3475_v3, %v10503_v56  ;;  %6563 = vmatprep.subr.mxu1 %v5719_v31  ;;  %3767 = vmatprep.mubr.f32.mxu0 %v10266_v2  ;;  %v5707_v3 = vld [vmem:[#allocation2 + $0x1028] sm:$0xff]  ;;  %v698_v31 = vld [vmem:[%s10344_s21 + $0xa50] sm:$0xff] }
 0x52d   : > { %v3477_v46 = vpop.f32.mrf.mxu0  ;;  %6564 = vmatpush1.msra.mxu1 %v4362_v14  ;;  %v5741_v43 = vld [vmem:[#allocation2 + $0x1138] sm:$0xff] }
 0x52e   : > { %5066 = vst.msk [vmem:[#allocation2 + $0x1158] sm:$0xff] %vm4511_vm2, %v4389_v37  ;;  %v4390_v60 = vmax.f32 %v14027_v0, 0.0  ;;  %v3478_v18 = vadd.f32 %v3477_v46, %v10507_v58  ;;  %6565 = vmatprep.subr.mxu1 %v5717_v16  ;;  %v8673_v46 = vld [vmem:[%s16313_s6 + $0x368] sm:$0xff] }
 0x52f   : > { %v3481_v57 = vpop.f32.mrf.mxu0  ;;  %10136 = vmatmul.mubr.msk.f32.gmra.mxu0 %vm721_vm1, %v695_v19  ;;  %6566 = vmatpush1.msra.mxu1 %v4360_v40  ;;  %v5705_v19 = vld [vmem:[#allocation2 + $0x1018] sm:$0xff] }
 0x530   : > { %5067 = vst [vmem:[#allocation2 + $0x1160] sm:$0xff] %v4390_v60  ;;  %v4391_v4 = vmax.f32 %v3478_v18, 0.0  ;;  %v14042_v14 = vadd.f32 %v3481_v57, %v10503_v56  ;;  %6567 = vmatprep.subr.mxu1 %v5715_v44  ;;  %3773 = vmatprep.mubr.f32.mxu0 %v10266_v2  ;;  %v699_v44 = vld [vmem:[%s10344_s21 + $0xa58] sm:$0xff] }
 0x531   : > { %v3483_v24 = vpop.f32.mrf.mxu0  ;;  %6568 = vmatpush1.msra.mxu1 %v4358_v21  ;;  %8940 = vmatprep.subr.mxu0 %v8673_v46 }
 0x532   : > { %5068 = vst.msk [vmem:[#allocation2 + $0x1168] sm:$0xff] %vm4511_vm2, %v4391_v4  ;;  %v4392_v30 = vmax.f32 %v14042_v14, 0.0  ;;  %v3484_v40 = vadd.f32 %v3483_v24, %v10507_v58  ;;  %6569 = vmatprep.subr.mxu1 %v5713_v11 }
 0x533   : > { %v3487_v48 = vpop.f32.mrf.mxu0  ;;  %10137 = vmatmul.mubr.msk.f32.gmra.mxu0 %vm721_vm1, %v696_v8  ;;  %6570 = vmatpush1.msra.mxu1 %v4356_v23 }
 0x534   : > { %5069 = vst [vmem:[#allocation2 + $0x1170] sm:$0xff] %v4392_v30  ;;  %v4393_v10 = vmax.f32 %v3484_v40, 0.0  ;;  %v14057_v21 = vadd.f32 %v3487_v48, %v10503_v56  ;;  %6571 = vmatprep.subr.mxu1 %v5711_v32  ;;  %3779 = vmatprep.mubr.f32.mxu0 %v10266_v2 }
 0x535   : > { %v3489_v61 = vpop.f32.mrf.mxu0  ;;  %6572 = vmatpush1.msra.mxu1 %v4354_v5 }
 0x536   : > { %5070 = vst.msk [vmem:[#allocation2 + $0x1178] sm:$0xff] %vm4511_vm2, %v4393_v10  ;;  %v4394_v45 = vmax.f32 %v14057_v21, 0.0  ;;  %v3490_v23 = vadd.f32 %v3489_v61, %v10507_v58  ;;  %6573 = vmatprep.subr.mxu1 %v5709_v26  ;;  %v701_v61 = vld [vmem:[%s10344_s21 + $0xa68] sm:$0xff] }
 0x537   : > { %v3493_v28 = vpop.f32.mrf.mxu0  ;;  %10138 = vmatmul.mubr.msk.f32.gmra.mxu0 %vm721_vm1, %v697_v12  ;;  %6574 = vmatpush1.msra.mxu1 %v4352_v22 }
 0x538   : > { %5071 = vst [vmem:[#allocation2 + $0x1180] sm:$0xff] %v4394_v45  ;;  %v4395_v39 = vmax.f32 %v3490_v23, 0.0  ;;  %v14072_v5 = vadd.f32 %v3493_v28, %v10503_v56  ;;  %6575 = vmatprep.subr.mxu1 %v5707_v3  ;;  %3785 = vmatprep.mubr.f32.mxu0 %v10266_v2 }
 0x539   : > { %v3495_v37 = vpop.f32.mrf.mxu0  ;;  %6576 = vmatpush1.msra.mxu1 %v4350_v29  ;;  %v8672_v29 = vld [vmem:[%s16313_s6 + $0x360] sm:$0xff] }
 0x53a   : > { %5072 = vst.msk [vmem:[#allocation2 + $0x1188] sm:$0xff] %vm4511_vm2, %v4395_v39  ;;  %v4396_v47 = vmax.f32 %v14072_v5, 0.0  ;;  %v3496_v22 = vadd.f32 %v3495_v37, %v10507_v58  ;;  %6577 = vmatprep.subr.mxu1 %v5705_v19  ;;  %8941 = vmatpush1.msra.mxu0 %v8672_v29  ;;  %v702_v37 = vld [vmem:[%s10344_s21 + $0xa70] sm:$0xff] }
 0x53b   : > { %v3499_v16 = vpop.f32.mrf.mxu0  ;;  %10139 = vmatmul.mubr.msk.f32.gmra.mxu0 %vm721_vm1, %v698_v31  ;;  %6578 = vmatpush1.msra.mxu1 %v4348_v13 }
 0x53c   : > { %5073 = vst [vmem:[#allocation2 + $0x1190] sm:$0xff] %v4396_v47  ;;  %v4397_v18 = vmax.f32 %v3496_v22, 0.0  ;;  %v14093_v57 = vadd.f32 %v3499_v16, %v10503_v56  ;;  %6579 = vmatprep.subr.mxu1 %v5703_v17  ;;  %3791 = vmatprep.mubr.f32.mxu0 %v10266_v2 }
 0x53d   : > { %v3501_v4 = vpop.f32.mrf.mxu0  ;;  %6580 = vmatpush1.msra.mxu1 %v4346_v54 }
 0x53e   : > { %5074 = vst.msk [vmem:[#allocation2 + $0x1198] sm:$0xff] %vm4511_vm2, %v4397_v18  ;;  %v4398_v6 = vmax.f32 %v14093_v57, 0.0  ;;  %v3502_v13 = vadd.f32 %v3501_v4, %v10507_v58  ;;  %v703_v18 = vld [vmem:[%s10344_s21 + $0xa78] sm:$0xff] }
 0x53f   : > { %v3505_v8 = vpop.f32.mrf.mxu0  ;;  %10140 = vmatmul.mubr.msk.f32.gmra.mxu0 %vm721_vm1, %v699_v44 }
 0x540   : > { %5075 = vst [vmem:[#allocation2 + $0x11a0] sm:$0xff] %v4398_v6  ;;  %v4399_v24 = vmax.f32 %v3502_v13, 0.0  ;;  %v14106_v11 = vadd.f32 %v3505_v8, %v10503_v56  ;;  %3797 = vmatprep.mubr.f32.mxu0 %v10266_v2 }
 0x541   : > { %v3507_v54 = vpop.f32.mrf.mxu0 }
 0x542   : > { %5076 = vst.msk [vmem:[#allocation2 + $0x11a8] sm:$0xff] %vm4511_vm2, %v4399_v24  ;;  %v4400_v40 = vmax.f32 %v14106_v11, 0.0  ;;  %v3508_v48 = vadd.f32 %v3507_v54, %v10507_v58  ;;  %v704_v54 = vld [vmem:[%s10344_s21 + $0xa80] sm:$0xff] }
 0x543   : > { %v3511_v32 = vpop.f32.mrf.mxu0  ;;  %10141 = vmatmul.mubr.msk.f32.gmra.mxu0 %vm721_vm1, %v700_v36 }
 0x544   : > { %5077 = vst [vmem:[#allocation2 + $0x11b0] sm:$0xff] %v4400_v40  ;;  %v4401_v10 = vmax.f32 %v3508_v48, 0.0  ;;  %v14117_v12 = vadd.f32 %v3511_v32, %v10503_v56  ;;  %3803 = vmatprep.mubr.f32.mxu0 %v10266_v2 }
 0x545   : > { %v3513_v26 = vpop.f32.mrf.mxu0 }
 0x546   : > { %5078 = vst.msk [vmem:[#allocation2 + $0x11b8] sm:$0xff] %vm4511_vm2, %v4401_v10  ;;  %v4402_v23 = vmax.f32 %v14117_v12, 0.0  ;;  %v3514_v28 = vadd.f32 %v3513_v26, %v10507_v58 }
 0x547   : > { %v3517_v3 = vpop.f32.mrf.mxu0  ;;  %10142 = vmatmul.mubr.msk.f32.gmra.mxu0 %vm721_vm1, %v701_v61 }
 0x548   : > { %5079 = vst [vmem:[#allocation2 + $0x11c0] sm:$0xff] %v4402_v23  ;;  %v4403_v39 = vmax.f32 %v3514_v28, 0.0  ;;  %v14128_v31 = vadd.f32 %v3517_v3, %v10503_v56  ;;  %3809 = vmatprep.mubr.f32.mxu0 %v10266_v2  ;;  %v705_v3 = vld [vmem:[%s10344_s21 + $0xa88] sm:$0xff] }
 0x549   : > { %v3519_v19 = vpop.f32.mrf.mxu0 }
 0x54a   : > { %5080 = vst.msk [vmem:[#allocation2 + $0x11c8] sm:$0xff] %vm4511_vm2, %v4403_v39  ;;  %v4404_v22 = vmax.f32 %v14128_v31, 0.0  ;;  %v3520_v46 = vadd.f32 %v3519_v19, %v10507_v58 }
 0x54b   : > { %v3523_v16 = vpop.f32.mrf.mxu0  ;;  %10143 = vmatmul.mubr.msk.f32.gmra.mxu0 %vm721_vm1, %v702_v37 }
 0x54c   : > { %5081 = vst [vmem:[#allocation2 + $0x11d0] sm:$0xff] %v4404_v22  ;;  %v4405_v17 = vmax.f32 %v3520_v46, 0.0  ;;  %v3524_v29 = vadd.f32 %v3523_v16, %v10503_v56  ;;  %3815 = vmatprep.mubr.f32.mxu0 %v10266_v2 }
 0x54d   : > { %v3525_v44 = vpop.f32.mrf.mxu0 }
 0x54e   : > { %5082 = vst.msk [vmem:[#allocation2 + $0x11d8] sm:$0xff] %vm4511_vm2, %v4405_v17  ;;  %v4406_v4 = vmax.f32 %v3524_v29, 0.0  ;;  %v3526_v13 = vadd.f32 %v3525_v44, %v10507_v58 }
 0x54f   : > { %v3529_v8 = vpop.f32.mrf.mxu0  ;;  %10144 = vmatmul.mubr.msk.f32.gmra.mxu0 %vm721_vm1, %v703_v18 }
 0x550   : > { %5083 = vst [vmem:[#allocation2 + $0x11e0] sm:$0xff] %v4406_v4  ;;  %v4407_v24 = vmax.f32 %v3526_v13, 0.0  ;;  %v3530_v36 = vadd.f32 %v3529_v8, %v10503_v56  ;;  %3821 = vmatprep.mubr.f32.mxu0 %v10266_v2 }
 0x551   : > { %v3531_v48 = vpop.f32.mrf.mxu0 }
 0x552   : > { %5084 = vst.msk [vmem:[#allocation2 + $0x11e8] sm:$0xff] %vm4511_vm2, %v4407_v24  ;;  %v4408_v32 = vmax.f32 %v3530_v36, 0.0  ;;  %v3532_v10 = vadd.f32 %v3531_v48, %v10507_v58 }
 0x553   : > { %v3535_v61 = vpop.f32.mrf.mxu0  ;;  %10145 = vmatmul.mubr.msk.f32.gmra.mxu0 %vm721_vm1, %v704_v54 }
 0x554   : > { %5085 = vst [vmem:[#allocation2 + $0x11f0] sm:$0xff] %v4408_v32  ;;  %v4409_v26 = vmax.f32 %v3532_v10, 0.0  ;;  %v14151_v28 = vadd.f32 %v3535_v61, %v10503_v56  ;;  %3827 = vmatprep.mubr.f32.mxu0 %v10266_v2 }
 0x555   : > { %v3537_v39 = vpop.f32.mrf.mxu0 }
 0x556   : > { %5086 = vst.msk [vmem:[#allocation2 + $0x11f8] sm:$0xff] %vm4511_vm2, %v4409_v26  ;;  %v4410_v37 = vmax.f32 %v14151_v28, 0.0  ;;  %v3538_v19 = vadd.f32 %v3537_v39, %v10507_v58 }
 0x557   : > { %v3541_v46 = vpop.f32.mrf.mxu0  ;;  %10146 = vmatmul.mubr.msk.f32.gmra.mxu0 %vm721_vm1, %v705_v3 }
 0x558   : > { %5087 = vst [vmem:[#allocation2 + $0x1200] sm:$0xff] %v4410_v37  ;;  %v4411_v16 = vmax.f32 %v3538_v19, 0.0  ;;  %v14162_v17 = vadd.f32 %v3541_v46, %v10503_v56  ;;  %v5761_v19 = vld [vmem:[#allocation2 + $0x11d8] sm:$0xff] }
 0x559   : > { %v3543_v29 = vpop.f32.mrf.mxu0  ;;  %v5763_v61 = vld [vmem:[#allocation2 + $0x11e8] sm:$0xff] }
 0x55a   : > { %5088 = vst.msk [vmem:[#allocation2 + $0x1208] sm:$0xff] %vm4511_vm2, %v4411_v16  ;;  %v4412_v2 = vmax.f32 %v14162_v17, 0.0  ;;  %v3544_v18 = vadd.f32 %v3543_v29, %v10507_v58  ;;  %v5759_v29 = vld [vmem:[#allocation2 + $0x11c8] sm:$0xff] }
 0x55b   : > { %v3547_v44 = vpop.f32.mrf.mxu0 }
 0x55c   : > { %5089 = vst [vmem:[#allocation2 + $0x1210] sm:$0xff] %v4412_v2  ;;  %v4413_v13 = vmax.f32 %v3544_v18, 0.0  ;;  %v14170_v8 = vadd.f32 %v3547_v44, %v10503_v56 }
 0x55d   : > { %v3549_v24 = vpop.f32.mrf.mxu0  ;;  %v5765_v36 = vld [vmem:[#allocation2 + $0x11f8] sm:$0xff] }
 0x55e   : > { %5090 = vst.msk [vmem:[#allocation2 + $0x1218] sm:$0xff] %vm4511_vm2, %v4413_v13  ;;  %v4414_v54 = vmax.f32 %v14170_v8, 0.0  ;;  %v3550_v48 = vadd.f32 %v3549_v24, %v10507_v58  ;;  %6581 = vmatprep.subr.mxu1 %v5765_v36  ;;  %v5757_v13 = vld [vmem:[#allocation2 + $0x11b8] sm:$0xff]  ;;  %v5755_v36 = vld [vmem:[#allocation2 + $0x11a8] sm:$0xff] }
 0x55f   : > { %v3553_v10 = vpop.f32.mrf.mxu0  ;;  %6582 = vmatpush2.msra.mxu1 %v4408_v32 }
 0x560   : > { %5091 = vst [vmem:[#allocation2 + $0x1220] sm:$0xff] %v4414_v54  ;;  %v4415_v26 = vmax.f32 %v3550_v48, 0.0  ;;  %v14178_v3 = vadd.f32 %v3553_v10, %v10503_v56  ;;  %6583 = vmatprep.subr.mxu1 %v5763_v61  ;;  %v5753_v10 = vld [vmem:[#allocation2 + $0x1198] sm:$0xff] }
 0x561   : > { %v3555_v39 = vpop.f32.mrf.mxu0  ;;  %6584 = vmatpush2.msra.mxu1 %v4406_v4 }
 0x562   : > { %5092 = vst.msk [vmem:[#allocation2 + $0x1228] sm:$0xff] %vm4511_vm2, %v4415_v26  ;;  %v4416_v46 = vmax.f32 %v14178_v3, 0.0  ;;  %v3556_v16 = vadd.f32 %v3555_v39, %v10507_v58  ;;  %6585 = vmatprep.subr.mxu1 %v5761_v19  ;;  %v5751_v26 = vld [vmem:[#allocation2 + $0x1188] sm:$0xff]  ;;  %v5749_v19 = vld [vmem:[#allocation2 + $0x1178] sm:$0xff] }
 0x563   : > { %v3559_v32 = vpop.f32.mrf.mxu0  ;;  %6586 = vmatpush2.msra.mxu1 %v4404_v22 }
 0x564   : > { %5093 = vst [vmem:[#allocation2 + $0x1230] sm:$0xff] %v4416_v46  ;;  %v4417_v18 = vmax.f32 %v3556_v16, 0.0  ;;  %v14188_v44 = vadd.f32 %v3559_v32, %v10503_v56  ;;  %6587 = vmatprep.subr.mxu1 %v5759_v29  ;;  %v5747_v32 = vld [vmem:[#allocation2 + $0x1168] sm:$0xff] }
 0x565   : > { %v3561_v4 = vpop.f32.mrf.mxu0  ;;  %6588 = vmatpush2.msra.mxu1 %v4402_v23 }
 0x566   : > { %5094 = vst.msk [vmem:[#allocation2 + $0x1238] sm:$0xff] %vm4511_vm2, %v4417_v18  ;;  %v4418_v24 = vmax.f32 %v14188_v44, 0.0  ;;  %v3562_v31 = vadd.f32 %v3561_v4, %v10507_v58  ;;  %6589 = vmatprep.subr.mxu1 %v5757_v13  ;;  %v5745_v18 = vld [vmem:[#allocation2 + $0x1158] sm:$0xff] }
 0x567   : > { %v3565_v22 = vpop.f32.mrf.mxu0  ;;  %6590 = vmatpush2.msra.mxu1 %v4400_v40 }
 0x568   : > { %5095 = vst [vmem:[#allocation2 + $0x1240] sm:$0xff] %v4418_v24  ;;  %v4419_v48 = vmax.f32 %v3562_v31, 0.0  ;;  %v14200_v12 = vadd.f32 %v3565_v22, %v10503_v56  ;;  %6591 = vmatprep.subr.mxu1 %v5755_v36  ;;  %v5743_v31 = vld [vmem:[#allocation2 + $0x1148] sm:$0xff]  ;;  %v8660_v22 = vld [vmem:[%s16313_s6 + $0x300] sm:$0xff] }
 0x569   : > { %v3567_v23 = vpop.f32.mrf.mxu0  ;;  %6592 = vmatpush2.msra.mxu1 %v4398_v6 }
 0x56a   : > { %5096 = vst.msk [vmem:[#allocation2 + $0x1248] sm:$0xff] %vm4511_vm2, %v4419_v48  ;;  %v4420_v61 = vmax.f32 %v14200_v12, 0.0  ;;  %v3568_v11 = vadd.f32 %v3567_v23, %v10507_v58  ;;  %6593 = vmatprep.subr.mxu1 %v5753_v10  ;;  %v5739_v10 = vld [vmem:[#allocation2 + $0x1128] sm:$0xff] }
 0x56b   : > { %v3571_v40 = vpop.f32.mrf.mxu0  ;;  %6594 = vmatpush2.msra.mxu1 %v4396_v47 }
 0x56c   : > { %5097 = vst [vmem:[#allocation2 + $0x1250] sm:$0xff] %v4420_v61  ;;  %v4421_v39 = vmax.f32 %v3568_v11, 0.0  ;;  %v14212_v57 = vadd.f32 %v3571_v40, %v10503_v56  ;;  %6595 = vmatprep.subr.mxu1 %v5751_v26  ;;  %v5737_v40 = vld [vmem:[#allocation2 + $0x1118] sm:$0xff] }
 0x56d   : > { %v3573_v6 = vpop.f32.mrf.mxu0  ;;  %6596 = vmatpush2.msra.mxu1 %v4394_v45 }
 0x56e   : > { %5098 = vst.msk [vmem:[#allocation2 + $0x1258] sm:$0xff] %vm4511_vm2, %v4421_v39  ;;  %v4422_v16 = vmax.f32 %v14212_v57, 0.0  ;;  %v3574_v5 = vadd.f32 %v3573_v6, %v10507_v58  ;;  %6597 = vmatprep.subr.mxu1 %v5749_v19  ;;  %v5735_v6 = vld [vmem:[#allocation2 + $0x1108] sm:$0xff] }
 0x56f   : > { %v3577_v47 = vpop.f32.mrf.mxu0  ;;  %6598 = vmatpush2.msra.mxu1 %v4392_v30  ;;  %v8661_v30 = vld [vmem:[%s16313_s6 + $0x308] sm:$0xff] }
 0x570   : > { %5099 = vst [vmem:[#allocation2 + $0x1260] sm:$0xff] %v4422_v16  ;;  %v4423_v29 = vmax.f32 %v3574_v5, 0.0  ;;  %v14224_v21 = vadd.f32 %v3577_v47, %v10503_v56  ;;  %6599 = vmatprep.subr.mxu1 %v5747_v32  ;;  %8942 = vmatprep.subr.mxu0 %v8661_v30 }
 0x571   : > { %v3579_v45 = vpop.f32.mrf.mxu0  ;;  %6600 = vmatpush2.msra.mxu1 %v4390_v60  ;;  %8943 = vmatpush1.msra.mxu0 %v8660_v22 }
 0x572   : > { %5100 = vst.msk [vmem:[#allocation2 + $0x1268] sm:$0xff] %vm4511_vm2, %v4423_v29  ;;  %v4424_v4 = vmax.f32 %v14224_v21, 0.0  ;;  %v3580_v14 = vadd.f32 %v3579_v45, %v10507_v58  ;;  %6601 = vmatprep.subr.mxu1 %v5745_v18 }
 0x573   : > { %v3583_v13 = vpop.f32.mrf.mxu0  ;;  %6602 = vmatpush2.msra.mxu1 %v4388_v25 }
 0x574   : > { %5101 = vst [vmem:[#allocation2 + $0x1270] sm:$0xff] %v4424_v4  ;;  %v4425_v0 = vmax.f32 %v3580_v14, 0.0  ;;  %v14239_v60 = vadd.f32 %v3583_v13, %v10503_v56  ;;  %6603 = vmatprep.subr.mxu1 %v5743_v31 }
 0x575   : > { %v3585_v36 = vpop.f32.mrf.mxu0  ;;  %6604 = vmatpush2.msra.mxu1 %v4386_v27 }
 0x576   : > { %5102 = vst.msk [vmem:[#allocation2 + $0x1278] sm:$0xff] %vm4511_vm2, %v4425_v0  ;;  %v4426_v25 = vmax.f32 %v14239_v60, 0.0  ;;  %v3586_v48 = vadd.f32 %v3585_v36, %v10507_v58  ;;  %6605 = vmatprep.subr.mxu1 %v5741_v43 }
 0x577   : > { %v3589_v23 = vpop.f32.mrf.mxu0  ;;  %6606 = vmatpush2.msra.mxu1 %v4384_v63  ;;  %v5936_v63 = vrot.slane %v13874_v50, %v10492_v53 }
 0x578   : > { %5103 = vst [vmem:[#allocation2 + $0x1280] sm:$0xff] %v4426_v25  ;;  %v4427_v11 = vmax.f32 %v3586_v48, 0.0  ;;  %v14254_v52 = vadd.f32 %v3589_v23, %v10503_v56  ;;  %6607 = vmatprep.subr.mxu1 %v5739_v10 }
 0x579   : > { %v3591_v27 = vpop.f32.mrf.mxu0  ;;  %6608 = vmatpush2.msra.mxu1 %v4382_v41 }
 0x57a   : > { %5104 = vst.msk [vmem:[#allocation2 + $0x1288] sm:$0xff] %vm4511_vm2, %v4427_v11  ;;  %v4428_v26 = vmax.f32 %v14254_v52, 0.0  ;;  %v3592_v38 = vadd.f32 %v3591_v27, %v10507_v58  ;;  %6609 = vmatprep.subr.mxu1 %v5737_v40 }
 0x57b   : > { %v3595_v39 = vpop.f32.mrf.mxu0  ;;  %6610 = vmatpush2.msra.mxu1 %v4380_v34 }
 0x57c   : > { %5105 = vst [vmem:[#allocation2 + $0x1290] sm:$0xff] %v4428_v26  ;;  %v4429_v41 = vmax.f32 %v3592_v38, 0.0  ;;  %v14270_v19 = vadd.f32 %v3595_v39, %v10503_v56  ;;  %6611 = vmatprep.subr.mxu1 %v5735_v6 }
 0x57d   : > { %v3597_v5 = vpop.f32.mrf.mxu0  ;;  %6612 = vmatpush2.msra.mxu1 %v4378_v33 }
 0x57e   : > { %5106 = vst.msk [vmem:[#allocation2 + $0x1298] sm:$0xff] %vm4511_vm2, %v4429_v41  ;;  %v4430_v20 = vmax.f32 %v14270_v19, 0.0  ;;  %v3598_v34 = vadd.f32 %v3597_v5, %v10507_v58  ;;  %6614 = vmatmul.mubr.f32.vlgmr.msra.gmra.mxu1 %v5936_v63 }
 0x57f   : > { %v3601_v50 = vpop.f32.mrf.mxu0  ;;  %6684 = vmatprep.mubr.f32.mxu1 %v5948_v35 }
 0x580   : > { %5107 = vst [vmem:[#allocation2 + $0x12a0] sm:$0xff] %v4430_v20  ;;  %v4431_v47 = vmax.f32 %v3598_v34, 0.0  ;;  %v14280_v32 = vadd.f32 %v3601_v50, %v10503_v56 }
 0x581   : > { %v3603_v29 = vpop.f32.mrf.mxu0 }
 0x582   : > { %5108 = vst.msk [vmem:[#allocation2 + $0x12a8] sm:$0xff] %vm4511_vm2, %v4431_v47  ;;  %v4432_v42 = vmax.f32 %v14280_v32, 0.0  ;;  %v3604_v33 = vadd.f32 %v3603_v29, %v10507_v58 }
 0x583   : > { %v3607_v45 = vpop.f32.mrf.mxu0 }
 0x584   : > { %5109 = vst [vmem:[#allocation2 + $0x12b0] sm:$0xff] %v4432_v42  ;;  %v4433_v18 = vmax.f32 %v3604_v33, 0.0  ;;  %v14288_v14 = vadd.f32 %v3607_v45, %v10503_v56 }
 0x585   : > { %v3609_v30 = vpop.f32.mrf.mxu0  ;;  %v5785_v32 = vld [vmem:[#allocation2 + $0x1298] sm:$0xff] }
 0x586   : > { %5110 = vst.msk [vmem:[#allocation2 + $0x12b8] sm:$0xff] %vm4511_vm2, %v4433_v18  ;;  %v4434_v13 = vmax.f32 %v14288_v14, 0.0  ;;  %v3610_v31 = vadd.f32 %v3609_v30, %v10507_v58  ;;  %v8648_v14 = vld [vmem:[%s16313_s6 + $0x2a0] sm:$0xff] }
 0x587   : > { %v3613_v0 = vpop.f32.mrf.mxu0 }
 0x588   : > { %5111 = vst [vmem:[#allocation2 + $0x12c0] sm:$0xff] %v4434_v13  ;;  %v4435_v22 = vmax.f32 %v3610_v31, 0.0  ;;  %v3614_v36 = vadd.f32 %v3613_v0, %v10503_v56 }
 0x589   : > { %v3615_v43 = vpop.f32.mrf.mxu0 }
 0x58a   : > { %5112 = vst.msk [vmem:[#allocation2 + $0x12c8] sm:$0xff] %vm4511_vm2, %v4435_v22  ;;  %v4436_v48 = vmax.f32 %v3614_v36, 0.0  ;;  %v3616_v23 = vadd.f32 %v3615_v43, %v10507_v58 }
 0x58b   : > { %v3619_v10 = vpop.f32.mrf.mxu0 }
 0x58c   : > { %5113 = vst [vmem:[#allocation2 + $0x12d0] sm:$0xff] %v4436_v48  ;;  %v4437_v11 = vmax.f32 %v3616_v23, 0.0  ;;  %v3620_v27 = vadd.f32 %v3619_v10, %v10503_v56 }
 0x58d   : > { %v3621_v40 = vpop.f32.mrf.mxu0 }
 0x58e   : > { %5114 = vst.msk [vmem:[#allocation2 + $0x12d8] sm:$0xff] %vm4511_vm2, %v4437_v11  ;;  %v4438_v38 = vmax.f32 %v3620_v27, 0.0  ;;  %v3622_v63 = vadd.f32 %v3621_v40, %v10507_v58 }
 0x58f   : > { %v3625_v39 = vpop.f32.mrf.mxu0 }
 0x590   : > { %5115 = vst [vmem:[#allocation2 + $0x12e0] sm:$0xff] %v4438_v38  ;;  %v4439_v6 = vmax.f32 %v3622_v63, 0.0  ;;  %v3626_v35 = vadd.f32 %v3625_v39, %v10503_v56 }
 0x591   : > { %v3627_v41 = vpop.f32.mrf.mxu0 }
 0x592   : > { %5116 = vst.msk [vmem:[#allocation2 + $0x12e8] sm:$0xff] %vm4511_vm2, %v4439_v6  ;;  %v4440_v5 = vmax.f32 %v3626_v35, 0.0  ;;  %v3628_v34 = vadd.f32 %v3627_v41, %v10507_v58 }
 0x593   : > { %v3631_v50 = vpop.f32.mrf.mxu0 }
 0x594   : > { %5117 = vst [vmem:[#allocation2 + $0x12f0] sm:$0xff] %v4440_v5  ;;  %v4441_v47 = vmax.f32 %v3628_v34, 0.0  ;;  %v14305_v29 = vadd.f32 %v3631_v50, %v10503_v56 }
 0x595   : > { %v3633_v33 = vpop.f32.mrf.mxu0 }
 0x596   : > { %5118 = vst.msk [vmem:[#allocation2 + $0x12f8] sm:$0xff] %vm4511_vm2, %v4441_v47  ;;  %v4442_v45 = vmax.f32 %v14305_v29, 0.0  ;;  %v3634_v18 = vadd.f32 %v3633_v33, %v10507_v58  ;;  %v5793_v47 = vld [vmem:[#allocation2 + $0x12d8] sm:$0xff] }
 0x597   : > { %v3637_v30 = vpop.f32.mrf.mxu0 }
 0x598   : > { %5119 = vst [vmem:[#allocation2 + $0x1300] sm:$0xff] %v4442_v45  ;;  %v4443_v31 = vmax.f32 %v3634_v18, 0.0  ;;  %v14313_v0 = vadd.f32 %v3637_v30, %v10503_v56  ;;  %v5791_v30 = vld [vmem:[#allocation2 + $0x12c8] sm:$0xff] }
 0x599   : > { %v3639_v22 = vpop.f32.mrf.mxu0  ;;  %v5795_v35 = vld [vmem:[#allocation2 + $0x12e8] sm:$0xff] }
 0x59a   : > { %5120 = vst.msk [vmem:[#allocation2 + $0x1308] sm:$0xff] %vm4511_vm2, %v4443_v31  ;;  %v4444_v36 = vmax.f32 %v14313_v0, 0.0  ;;  %v3640_v43 = vadd.f32 %v3639_v22, %v10507_v58 }
 0x59b   : > { %v3643_v23 = vpop.f32.mrf.mxu0 }
 0x59c   : > { %5121 = vst [vmem:[#allocation2 + $0x1310] sm:$0xff] %v4444_v36  ;;  %v4445_v10 = vmax.f32 %v3640_v43, 0.0  ;;  %v14321_v11 = vadd.f32 %v3643_v23, %v10503_v56  ;;  %v5789_v43 = vld [vmem:[#allocation2 + $0x12b8] sm:$0xff] }
 0x59d   : > { %v3645_v27 = vpop.f32.mrf.mxu0  ;;  %v5797_v40 = vld [vmem:[#allocation2 + $0x12f8] sm:$0xff] }
 0x59e   : > { %5122 = vst.msk [vmem:[#allocation2 + $0x1318] sm:$0xff] %vm4511_vm2, %v4445_v10  ;;  %v4446_v63 = vmax.f32 %v14321_v11, 0.0  ;;  %v3646_v39 = vadd.f32 %v3645_v27, %v10507_v58  ;;  %6620 = vmatprep.subr.mxu1 %v5797_v40  ;;  %v8649_v10 = vld [vmem:[%s16313_s6 + $0x2a8] sm:$0xff] }
 0x59f   : > { %v3649_v6 = vpop.f32.mrf.mxu0  ;;  %6621 = vmatpush1.msra.mxu1 %v4440_v5  ;;  %v5787_v40 = vld [vmem:[#allocation2 + $0x12a8] sm:$0xff]  ;;  %8944 = vmatprep.subr.mxu0 %v8649_v10 }
 0x5a0   : > { %5123 = vst [vmem:[#allocation2 + $0x1320] sm:$0xff] %v4446_v63  ;;  %v4447_v41 = vmax.f32 %v3646_v39, 0.0  ;;  %v14329_v34 = vadd.f32 %v3649_v6, %v10503_v56  ;;  %6622 = vmatprep.subr.mxu1 %v5795_v35  ;;  %8945 = vmatpush1.msra.mxu0 %v8648_v14  ;;  %v5771_v14 = vld [vmem:[#allocation2 + $0x1228] sm:$0xff] }
 0x5a1   : > { %v3651_v50 = vpop.f32.mrf.mxu0  ;;  %6623 = vmatpush1.msra.mxu1 %v4438_v38  ;;  %v5799_v11 = vld [vmem:[#allocation2 + $0x1308] sm:$0xff] }
 0x5a2   : > { %5124 = vst.msk [vmem:[#allocation2 + $0x1328] sm:$0xff] %vm4511_vm2, %v4447_v41  ;;  %v4448_v33 = vmax.f32 %v14329_v34, 0.0  ;;  %v3652_v18 = vadd.f32 %v3651_v50, %v10507_v58  ;;  %6624 = vmatprep.subr.mxu1 %v5793_v47  ;;  %v5783_v50 = vld [vmem:[#allocation2 + $0x1288] sm:$0xff] }
 0x5a3   : > { %v3655_v5 = vpop.f32.mrf.mxu0  ;;  %6625 = vmatpush1.msra.mxu1 %v4436_v48 }
 0x5a4   : > { %5125 = vst [vmem:[#allocation2 + $0x1330] sm:$0xff] %v4448_v33  ;;  %v4449_v31 = vmax.f32 %v3652_v18, 0.0  ;;  %v14337_v22 = vadd.f32 %v3655_v5, %v10503_v56  ;;  %6626 = vmatprep.subr.mxu1 %v5791_v30  ;;  %v5781_v18 = vld [vmem:[#allocation2 + $0x1278] sm:$0xff]  ;;  %v5779_v30 = vld [vmem:[#allocation2 + $0x1268] sm:$0xff] }
 0x5a5   : > { %v3657_v38 = vpop.f32.mrf.mxu0  ;;  %6627 = vmatpush1.msra.mxu1 %v4434_v13 }
 0x5a6   : > { %5126 = vst.msk [vmem:[#allocation2 + $0x1338] sm:$0xff] %vm4511_vm2, %v4449_v31  ;;  %v4450_v23 = vmax.f32 %v14337_v22, 0.0  ;;  %v3658_v48 = vadd.f32 %v3657_v38, %v10507_v58  ;;  %6628 = vmatprep.subr.mxu1 %v5789_v43  ;;  %v5777_v38 = vld [vmem:[#allocation2 + $0x1258] sm:$0xff] }
 0x5a7   : > { %v3661_v27 = vpop.f32.mrf.mxu0  ;;  %6629 = vmatpush1.msra.mxu1 %v4432_v42 }
 0x5a8   : > { %5127 = vst [vmem:[#allocation2 + $0x1340] sm:$0xff] %v4450_v23  ;;  %v4451_v13 = vmax.f32 %v3658_v48, 0.0  ;;  %v14355_v39 = vadd.f32 %v3661_v27, %v10503_v56  ;;  %6630 = vmatprep.subr.mxu1 %v5787_v40  ;;  %v5775_v48 = vld [vmem:[#allocation2 + $0x1248] sm:$0xff]  ;;  %v5773_v27 = vld [vmem:[#allocation2 + $0x1238] sm:$0xff] }
 0x5a9   : > { %v3663_v6 = vpop.f32.mrf.mxu0  ;;  %6631 = vmatpush1.msra.mxu1 %v4430_v20 }
 0x5aa   : > { %5128 = vst.msk [vmem:[#allocation2 + $0x1348] sm:$0xff] %vm4511_vm2, %v4451_v13  ;;  %v4452_v42 = vmax.f32 %v14355_v39, 0.0  ;;  %v3664_v35 = vadd.f32 %v3663_v6, %v10507_v58  ;;  %6632 = vmatprep.subr.mxu1 %v5785_v32  ;;  %v5769_v6 = vld [vmem:[#allocation2 + $0x1218] sm:$0xff] }
 0x5ab   : > { %v3667_v41 = vpop.f32.mrf.mxu0  ;;  %6633 = vmatpush1.msra.mxu1 %v4428_v26 }
 0x5ac   : > { %5129 = vst [vmem:[#allocation2 + $0x1350] sm:$0xff] %v4452_v42  ;;  %v4453_v47 = vmax.f32 %v3664_v35, 0.0  ;;  %v14367_v19 = vadd.f32 %v3667_v41, %v10503_v56  ;;  %6634 = vmatprep.subr.mxu1 %v5783_v50  ;;  %v5767_v35 = vld [vmem:[#allocation2 + $0x1208] sm:$0xff] }
 0x5ad   : > { %v3669_v20 = vpop.f32.mrf.mxu0  ;;  %6635 = vmatpush1.msra.mxu1 %v4426_v25 }
 0x5ae   : > { %5130 = vst.msk [vmem:[#allocation2 + $0x1358] sm:$0xff] %vm4511_vm2, %v4453_v47  ;;  %v4454_v5 = vmax.f32 %v14367_v19, 0.0  ;;  %v3670_v52 = vadd.f32 %v3669_v20, %v10507_v58  ;;  %6636 = vmatprep.subr.mxu1 %v5781_v18 }
 0x5af   : > { %v3673_v26 = vpop.f32.mrf.mxu0  ;;  %6637 = vmatpush1.msra.mxu1 %v4424_v4 }
 0x5b0   : > { %5131 = vst [vmem:[#allocation2 + $0x1360] sm:$0xff] %v4454_v5  ;;  %v4455_v31 = vmax.f32 %v3670_v52, 0.0  ;;  %v14379_v60 = vadd.f32 %v3673_v26, %v10503_v56  ;;  %6638 = vmatprep.subr.mxu1 %v5779_v30 }
 0x5b1   : > { %v3675_v25 = vpop.f32.mrf.mxu0  ;;  %6639 = vmatpush1.msra.mxu1 %v4422_v16 }
 0x5b2   : > { %5132 = vst.msk [vmem:[#allocation2 + $0x1368] sm:$0xff] %vm4511_vm2, %v4455_v31  ;;  %v4456_v43 = vmax.f32 %v14379_v60, 0.0  ;;  %v3676_v21 = vadd.f32 %v3675_v25, %v10507_v58  ;;  %6640 = vmatprep.subr.mxu1 %v5777_v38 }
 0x5b3   : > { %v3679_v4 = vpop.f32.mrf.mxu0  ;;  %6641 = vmatpush1.msra.mxu1 %v4420_v61 }
 0x5b4   : > { %5133 = vst [vmem:[#allocation2 + $0x1370] sm:$0xff] %v4456_v43  ;;  %v4457_v10 = vmax.f32 %v3676_v21, 0.0  ;;  %v14391_v57 = vadd.f32 %v3679_v4, %v10503_v56  ;;  %6642 = vmatprep.subr.mxu1 %v5775_v48 }
 0x5b5   : > { %v3681_v16 = vpop.f32.mrf.mxu0  ;;  %6643 = vmatpush1.msra.mxu1 %v4418_v24 }
 0x5b6   : > { %5134 = vst.msk [vmem:[#allocation2 + $0x1378] sm:$0xff] %vm4511_vm2, %v4457_v10  ;;  %v4458_v40 = vmax.f32 %v14391_v57, 0.0  ;;  %v3682_v12 = vadd.f32 %v3681_v16, %v10507_v58  ;;  %6644 = vmatprep.subr.mxu1 %v5773_v27 }
 0x5b7   : > { %v3685_v61 = vpop.f32.mrf.mxu0  ;;  %6645 = vmatpush1.msra.mxu1 %v4416_v46 }
 0x5b8   : > { %5135 = vst [vmem:[#allocation2 + $0x1380] sm:$0xff] %v4458_v40  ;;  %v4459_v13 = vmax.f32 %v3682_v12, 0.0  ;;  %v14403_v44 = vadd.f32 %v3685_v61, %v10503_v56  ;;  %6646 = vmatprep.subr.mxu1 %v5771_v14 }
 0x5b9   : > { %v3687_v24 = vpop.f32.mrf.mxu0  ;;  %6647 = vmatpush1.msra.mxu1 %v4414_v54 }
 0x5ba   : > { %5136 = vst.msk [vmem:[#allocation2 + $0x1388] sm:$0xff] %vm4511_vm2, %v4459_v13  ;;  %v4460_v32 = vmax.f32 %v14403_v44, 0.0  ;;  %v3688_v3 = vadd.f32 %v3687_v24, %v10507_v58  ;;  %6648 = vmatprep.subr.mxu1 %v5769_v6 }
 0x5bb   : > { %v3691_v46 = vpop.f32.mrf.mxu0  ;;  %6649 = vmatpush1.msra.mxu1 %v4412_v2 }
 0x5bc   : > { %5137 = vst [vmem:[#allocation2 + $0x1390] sm:$0xff] %v4460_v32  ;;  %v4461_v41 = vmax.f32 %v3688_v3, 0.0  ;;  %v14415_v8 = vadd.f32 %v3691_v46, %v10503_v56  ;;  %6650 = vmatprep.subr.mxu1 %v5767_v35 }
 0x5bd   : > { %v3693_v54 = vpop.f32.mrf.mxu0  ;;  %6651 = vmatpush1.msra.mxu1 %v4410_v37 }
 0x5be   : > { %5138 = vst.msk [vmem:[#allocation2 + $0x1398] sm:$0xff] %vm4511_vm2, %v4461_v41  ;;  %v4462_v50 = vmax.f32 %v14415_v8, 0.0  ;;  %v3694_v17 = vadd.f32 %v3693_v54, %v10507_v58 }
 0x5bf   : > { %v3697_v2 = vpop.f32.mrf.mxu0 }
 0x5c0   : > { %5139 = vst [vmem:[#allocation2 + $0x13a0] sm:$0xff] %v4462_v50  ;;  %v4463_v47 = vmax.f32 %v3694_v17, 0.0  ;;  %v14425_v20 = vadd.f32 %v3697_v2, %v10503_v56 }
 0x5c1   : > { %v3699_v18 = vpop.f32.mrf.mxu0 }
 0x5c2   : > { %5140 = vst.msk [vmem:[#allocation2 + $0x13a8] sm:$0xff] %vm4511_vm2, %v4463_v47  ;;  %v4464_v28 = vmax.f32 %v14425_v20, 0.0  ;;  %v3700_v37 = vadd.f32 %v3699_v18, %v10507_v58 }
 0x5c3   : > { %v3703_v52 = vpop.f32.mrf.mxu0 }
 0x5c4   : > { %5141 = vst [vmem:[#allocation2 + $0x13b0] sm:$0xff] %v4464_v28  ;;  %v4465_v26 = vmax.f32 %v3700_v37, 0.0  ;;  %v14433_v30 = vadd.f32 %v3703_v52, %v10503_v56 }
 0x5c5   : > { %v3705_v31 = vpop.f32.mrf.mxu0 }
 0x5c6   : > { %5142 = vst.msk [vmem:[#allocation2 + $0x13b8] sm:$0xff] %vm4511_vm2, %v4465_v26  ;;  %v4466_v25 = vmax.f32 %v14433_v30, 0.0  ;;  %v3706_v38 = vadd.f32 %v3705_v31, %v10507_v58 }
 0x5c7   : > { %v3709_v21 = vpop.f32.mrf.mxu0 }
 0x5c8   : > { %5143 = vst [vmem:[#allocation2 + $0x13c0] sm:$0xff] %v4466_v25  ;;  %v4467_v4 = vmax.f32 %v3706_v38, 0.0  ;;  %v14441_v48 = vadd.f32 %v3709_v21, %v10503_v56 }
 0x5c9   : > { %v3711_v10 = vpop.f32.mrf.mxu0 }
 0x5ca   : > { %5144 = vst.msk [vmem:[#allocation2 + $0x13c8] sm:$0xff] %vm4511_vm2, %v4467_v4  ;;  %v4468_v16 = vmax.f32 %v14441_v48, 0.0  ;;  %v3712_v27 = vadd.f32 %v3711_v10, %v10507_v58 }
 0x5cb   : > { %v3715_v12 = vpop.f32.mrf.mxu0 }
 0x5cc   : > { %5145 = vst [vmem:[#allocation2 + $0x13d0] sm:$0xff] %v4468_v16  ;;  %v4469_v61 = vmax.f32 %v3712_v27, 0.0  ;;  %v3716_v14 = vadd.f32 %v3715_v12, %v10503_v56 }
 0x5cd   : > { %v3717_v13 = vpop.f32.mrf.mxu0 }
 0x5ce   : > { %5146 = vst.msk [vmem:[#allocation2 + $0x13d8] sm:$0xff] %vm4511_vm2, %v4469_v61  ;;  %v4470_v24 = vmax.f32 %v3716_v14, 0.0  ;;  %v3718_v6 = vadd.f32 %v3717_v13, %v10507_v58 }
 0x5cf   : > { %v3721_v3 = vpop.f32.mrf.mxu0 }
 0x5d0   : > { %5147 = vst [vmem:[#allocation2 + $0x13e0] sm:$0xff] %v4470_v24  ;;  %v4471_v46 = vmax.f32 %v3718_v6, 0.0  ;;  %v3722_v35 = vadd.f32 %v3721_v3, %v10503_v56 }
 0x5d1   : > { %v3723_v41 = vpop.f32.mrf.mxu0 }
 0x5d2   : > { %5148 = vst.msk [vmem:[#allocation2 + $0x13e8] sm:$0xff] %vm4511_vm2, %v4471_v46  ;;  %v4472_v54 = vmax.f32 %v3722_v35, 0.0  ;;  %v3724_v17 = vadd.f32 %v3723_v41, %v10507_v58  ;;  %v8637_v46 = vld [vmem:[%s16313_s6 + $0x248] sm:$0xff] }
 0x5d3   : > { %v3727_v2 = vpop.f32.mrf.mxu0  ;;  %8946 = vmatprep.subr.mxu0 %v8637_v46 }
 0x5d4   : > { %5149 = vst [vmem:[#allocation2 + $0x13f0] sm:$0xff] %v4472_v54  ;;  %v4473_v47 = vmax.f32 %v3724_v17, 0.0  ;;  %v14453_v18 = vadd.f32 %v3727_v2, %v10503_v56  ;;  %v8636_v17 = vld [vmem:[%s16313_s6 + $0x240] sm:$0xff] }
 0x5d5   : > { %v3729_v37 = vpop.f32.mrf.mxu0  ;;  %8947 = vmatpush1.msra.mxu0 %v8636_v17  ;;  %v5815_v17 = vld [vmem:[#allocation2 + $0x1388] sm:$0xff] }
 0x5d6   : > { %5150 = vst.msk [vmem:[#allocation2 + $0x13f8] sm:$0xff] %vm4511_vm2, %v4473_v47  ;;  %v4474_v52 = vmax.f32 %v14453_v18, 0.0  ;;  %v3730_v26 = vadd.f32 %v3729_v37, %v10507_v58  ;;  %v6927_v18 = vld [vmem:[#allocation2 + $0xf0] sm:$0xff] }
 0x5d7   : > { %v3733_v31 = vpop.f32.mrf.mxu0 }
 0x5d8   : > { %5151 = vst [vmem:[#allocation2 + $0x1400] sm:$0xff] %v4474_v52  ;;  %v4475_v38 = vmax.f32 %v3730_v26, 0.0  ;;  %v14461_v21 = vadd.f32 %v3733_v31, %v10503_v56  ;;  %v5825_v26 = vld [vmem:[#allocation2 + $0x13d8] sm:$0xff] }
 0x5d9   : > { %v3735_v4 = vpop.f32.mrf.mxu0  ;;  %v5827_v41 = vld [vmem:[#allocation2 + $0x13e8] sm:$0xff] }
 0x5da   : > { %5152 = vst.msk [vmem:[#allocation2 + $0x1408] sm:$0xff] %vm4511_vm2, %v4475_v38  ;;  %v4476_v48 = vmax.f32 %v14461_v21, 0.0  ;;  %v3736_v10 = vadd.f32 %v3735_v4, %v10507_v58  ;;  %v5823_v4 = vld [vmem:[#allocation2 + $0x13c8] sm:$0xff]  ;;  %v6928_v21 = vld [vmem:[#allocation2 + $0xf8] sm:$0xff] }
 0x5db   : > { %v3739_v27 = vpop.f32.mrf.mxu0 }
 0x5dc   : > { %5153 = vst [vmem:[#allocation2 + $0x1410] sm:$0xff] %v4476_v48  ;;  %v4477_v12 = vmax.f32 %v3736_v10, 0.0  ;;  %v14469_v61 = vadd.f32 %v3739_v27, %v10503_v56 }
 0x5dd   : > { %v3741_v14 = vpop.f32.mrf.mxu0  ;;  %v5829_v13 = vld [vmem:[#allocation2 + $0x13f8] sm:$0xff] }
 0x5de   : > { %5154 = vst.msk [vmem:[#allocation2 + $0x1418] sm:$0xff] %vm4511_vm2, %v4477_v12  ;;  %v4478_v6 = vmax.f32 %v14469_v61, 0.0  ;;  %v3742_v3 = vadd.f32 %v3741_v14, %v10507_v58  ;;  %6652 = vmatprep.subr.mxu1 %v5829_v13  ;;  %v5821_v12 = vld [vmem:[#allocation2 + $0x13b8] sm:$0xff]  ;;  %v6810_v61 = vld [vmem:[%s16312_s5 + $0x8] sm:$0xff] }
 0x5df   : > { %v3745_v35 = vpop.f32.mrf.mxu0  ;;  %6653 = vmatpush2.msra.mxu1 %v4472_v54 }
 0x5e0   : > { %5155 = vst [vmem:[#allocation2 + $0x1420] sm:$0xff] %v4478_v6  ;;  %v4479_v2 = vmax.f32 %v3742_v3, 0.0  ;;  %v14483_v47 = vadd.f32 %v3745_v35, %v10503_v56  ;;  %6654 = vmatprep.subr.mxu1 %v5827_v41  ;;  %v5819_v3 = vld [vmem:[#allocation2 + $0x13a8] sm:$0xff]  ;;  %v5817_v35 = vld [vmem:[#allocation2 + $0x1398] sm:$0xff] }
 0x5e1   : > { %v3747_v37 = vpop.f32.mrf.mxu0  ;;  %6655 = vmatpush2.msra.mxu1 %v4470_v24 }
 0x5e2   : > { %5156 = vst.msk [vmem:[#allocation2 + $0x1428] sm:$0xff] %vm4511_vm2, %v4479_v2  ;;  %v4480_v54 = vmax.f32 %v14483_v47, 0.0  ;;  %v3748_v31 = vadd.f32 %v3747_v37, %v10507_v58  ;;  %6656 = vmatprep.subr.mxu1 %v5825_v26  ;;  %v5813_v37 = vld [vmem:[#allocation2 + $0x1378] sm:$0xff] }
 0x5e3   : > { %v3751_v38 = vpop.f32.mrf.mxu0  ;;  %6657 = vmatpush2.msra.mxu1 %v4468_v16 }
 0x5e4   : > { %5157 = vst [vmem:[#allocation2 + $0x1430] sm:$0xff] %v4480_v54  ;;  %v4481_v10 = vmax.f32 %v3748_v31, 0.0  ;;  %v14491_v27 = vadd.f32 %v3751_v38, %v10503_v56  ;;  %6658 = vmatprep.subr.mxu1 %v5823_v4  ;;  %v5811_v31 = vld [vmem:[#allocation2 + $0x1368] sm:$0xff]  ;;  %v5809_v4 = vld [vmem:[#allocation2 + $0x1358] sm:$0xff] }
 0x5e5   : > { %v3753_v24 = vpop.f32.mrf.mxu0  ;;  %6659 = vmatpush2.msra.mxu1 %v4466_v25 }
 0x5e6   : > { %5158 = vst.msk [vmem:[#allocation2 + $0x1438] sm:$0xff] %vm4511_vm2, %v4481_v10  ;;  %v4482_v14 = vmax.f32 %v14491_v27, 0.0  ;;  %v3754_v16 = vadd.f32 %v3753_v24, %v10507_v58  ;;  %6660 = vmatprep.subr.mxu1 %v5821_v12  ;;  %v5807_v24 = vld [vmem:[#allocation2 + $0x1348] sm:$0xff] }
 0x5e7   : > { %v3757_v13 = vpop.f32.mrf.mxu0  ;;  %6661 = vmatpush2.msra.mxu1 %v4464_v28 }
 0x5e8   : > { %5159 = vst [vmem:[#allocation2 + $0x1440] sm:$0xff] %v4482_v14  ;;  %v4483_v46 = vmax.f32 %v3754_v16, 0.0  ;;  %v14503_v30 = vadd.f32 %v3757_v13, %v10503_v56  ;;  %6662 = vmatprep.subr.mxu1 %v5819_v3  ;;  %v5805_v16 = vld [vmem:[#allocation2 + $0x1338] sm:$0xff]  ;;  %v5803_v3 = vld [vmem:[#allocation2 + $0x1328] sm:$0xff] }
 0x5e9   : > { %v3759_v25 = vpop.f32.mrf.mxu0  ;;  %6663 = vmatpush2.msra.mxu1 %v4462_v50 }
 0x5ea   : > { %5160 = vst.msk [vmem:[#allocation2 + $0x1448] sm:$0xff] %vm4511_vm2, %v4483_v46  ;;  %v4484_v41 = vmax.f32 %v14503_v30, 0.0  ;;  %v3760_v20 = vadd.f32 %v3759_v25, %v10507_v58  ;;  %6664 = vmatprep.subr.mxu1 %v5817_v35  ;;  %v5801_v25 = vld [vmem:[#allocation2 + $0x1318] sm:$0xff]  ;;  %v5831_v30 = vld [vmem:[#allocation2 + $0x1408] sm:$0xff] }
 0x5eb   : > { %v3763_v28 = vpop.f32.mrf.mxu0  ;;  %6665 = vmatpush2.msra.mxu1 %v4460_v32 }
 0x5ec   : > { %5161 = vst [vmem:[#allocation2 + $0x1450] sm:$0xff] %v4484_v41  ;;  %v4485_v2 = vmax.f32 %v3760_v20, 0.0  ;;  %v14515_v8 = vadd.f32 %v3763_v28, %v10503_v56  ;;  %6666 = vmatprep.subr.mxu1 %v5815_v17 }
 0x5ed   : > { %v3765_v50 = vpop.f32.mrf.mxu0  ;;  %6667 = vmatpush2.msra.mxu1 %v4458_v40 }
 0x5ee   : > { %5162 = vst.msk [vmem:[#allocation2 + $0x1458] sm:$0xff] %vm4511_vm2, %v4485_v2  ;;  %v4486_v26 = vmax.f32 %v14515_v8, 0.0  ;;  %v3766_v44 = vadd.f32 %v3765_v50, %v10507_v58  ;;  %6668 = vmatprep.subr.mxu1 %v5813_v37  ;;  %v5833_v8 = vld [vmem:[#allocation2 + $0x1418] sm:$0xff] }
 0x5ef   : > { %v3769_v32 = vpop.f32.mrf.mxu0  ;;  %6669 = vmatpush2.msra.mxu1 %v4456_v43 }
 0x5f0   : > { %5163 = vst [vmem:[#allocation2 + $0x1460] sm:$0xff] %v4486_v26  ;;  %v4487_v38 = vmax.f32 %v3766_v44, 0.0  ;;  %v14527_v57 = vadd.f32 %v3769_v32, %v10503_v56  ;;  %6670 = vmatprep.subr.mxu1 %v5811_v31 }
 0x5f1   : > { %v3771_v40 = vpop.f32.mrf.mxu0  ;;  %6671 = vmatpush2.msra.mxu1 %v4454_v5 }
 0x5f2   : > { %5164 = vst.msk [vmem:[#allocation2 + $0x1468] sm:$0xff] %vm4511_vm2, %v4487_v38  ;;  %v4488_v10 = vmax.f32 %v14527_v57, 0.0  ;;  %v3772_v60 = vadd.f32 %v3771_v40, %v10507_v58  ;;  %6672 = vmatprep.subr.mxu1 %v5809_v4  ;;  %v5835_v57 = vld [vmem:[#allocation2 + $0x1428] sm:$0xff] }
 0x5f3   : > { %v3775_v43 = vpop.f32.mrf.mxu0  ;;  %6673 = vmatpush2.msra.mxu1 %v4452_v42 }
 0x5f4   : > { %5165 = vst [vmem:[#allocation2 + $0x1470] sm:$0xff] %v4488_v10  ;;  %v4489_v12 = vmax.f32 %v3772_v60, 0.0  ;;  %v14539_v19 = vadd.f32 %v3775_v43, %v10503_v56  ;;  %6674 = vmatprep.subr.mxu1 %v5807_v24 }
 0x5f5   : > { %v3777_v5 = vpop.f32.mrf.mxu0  ;;  %6675 = vmatpush2.msra.mxu1 %v4450_v23 }
 0x5f6   : > { %5166 = vst.msk [vmem:[#allocation2 + $0x1478] sm:$0xff] %vm4511_vm2, %v4489_v12  ;;  %v4490_v13 = vmax.f32 %v14539_v19, 0.0  ;;  %v3778_v39 = vadd.f32 %v3777_v5, %v10507_v58  ;;  %6676 = vmatprep.subr.mxu1 %v5805_v16  ;;  %v5837_v19 = vld [vmem:[#allocation2 + $0x1438] sm:$0xff] }
 0x5f7   : > { %v3781_v42 = vpop.f32.mrf.mxu0  ;;  %6677 = vmatpush2.msra.mxu1 %v4448_v33  ;;  %v14561_v33 = vld [vmem:[%s16311_s4 + $0x10] sm:$0x3f] }
 0x5f8   : > { %5167 = vst [vmem:[#allocation2 + $0x1480] sm:$0xff] %v4490_v13  ;;  %v4491_v46 = vmax.f32 %v3778_v39, 0.0  ;;  %v14551_v22 = vadd.f32 %v3781_v42, %v10503_v56  ;;  %6678 = vmatprep.subr.mxu1 %v5803_v3  ;;  %v5944_v20 = vrot.slane %v14561_v33, %v11400_v59  ;;  %v5952_v47 = vrot.slane %v14561_v33, %v11809_v15  ;;  %v8764_v15 = vld [vmem:[%s16313_s6 + $0x640] sm:$0xff] }
 0x5f9   : > { %v3783_v23 = vpop.f32.mrf.mxu0  ;;  %6679 = vmatpush2.msra.mxu1 %v4446_v63  ;;  %v5956_v63 = vrot.slane %v14561_v33, %v11510_v7  ;;  %v6917_v33 = vld [vmem:[#allocation2 + $0xa0] sm:$0xff] }
 0x5fa   : > { %5168 = vst.msk [vmem:[#allocation2 + $0x1488] sm:$0xff] %vm4511_vm2, %v4491_v46  ;;  %v4492_v35 = vmax.f32 %v14551_v22, 0.0  ;;  %v3784_v34 = vadd.f32 %v3783_v23, %v10507_v58  ;;  %6680 = vmatprep.subr.mxu1 %v5801_v25  ;;  %v5839_v22 = vld [vmem:[#allocation2 + $0x1448] sm:$0xff]  ;;  %v8776_v7 = vld [vmem:[%s16313_s6 + $0x6a0] sm:$0xff] }
 0x5fb   : > { %v3787_v28 = vpop.f32.mrf.mxu0  ;;  %6681 = vmatpush2.msra.mxu1 %v4444_v36 }
 0x5fc   : > { %5169 = vst [vmem:[#allocation2 + $0x1490] sm:$0xff] %v4492_v35  ;;  %v4493_v17 = vmax.f32 %v3784_v34, 0.0  ;;  %v14572_v2 = vadd.f32 %v3787_v28, %v10503_v56  ;;  %6682 = vmatprep.subr.mxu1 %v5799_v11 }
 0x5fd   : > { %v3789_v50 = vpop.f32.mrf.mxu0  ;;  %6683 = vmatpush2.msra.mxu1 %v4442_v45 }
 0x5fe   : > { %5170 = vst.msk [vmem:[#allocation2 + $0x1498] sm:$0xff] %vm4511_vm2, %v4493_v17  ;;  %v4494_v0 = vmax.f32 %v14572_v2, 0.0  ;;  %v3790_v36 = vadd.f32 %v3789_v50, %v10507_v58  ;;  %6685 = vmatmul.mubr.f32.vlgmr.msra.gmra.mxu1 %v5944_v20  ;;  %v5841_v2 = vld [vmem:[#allocation2 + $0x1458] sm:$0xff] }
 0x5ff   : > { %v3793_v37 = vpop.f32.mrf.mxu0  ;;  %10147 = vmatprep.mubr.msk.f32.mxu1 %vm5978_vm3, %v5956_v63 }
 0x600   : > { %5171 = vst [vmem:[#allocation2 + $0x14a0] sm:$0xff] %v4494_v0  ;;  %v4495_v44 = vmax.f32 %v3790_v36, 0.0  ;;  %v14583_v32 = vadd.f32 %v3793_v37, %v10503_v56 }
 0x601   : > { %v3795_v31 = vpop.f32.mrf.mxu0 }
 0x602   : > { %5172 = vst.msk [vmem:[#allocation2 + $0x14a8] sm:$0xff] %vm4511_vm2, %v4495_v44  ;;  %v4496_v29 = vmax.f32 %v14583_v32, 0.0  ;;  %v3796_v45 = vadd.f32 %v3795_v31, %v10507_v58  ;;  %v5843_v32 = vld [vmem:[#allocation2 + $0x1468] sm:$0xff] }
 0x603   : > { %v3799_v38 = vpop.f32.mrf.mxu0 }
 0x604   : > { %5173 = vst [vmem:[#allocation2 + $0x14b0] sm:$0xff] %v4496_v29  ;;  %v4497_v40 = vmax.f32 %v3796_v45, 0.0  ;;  %v14591_v4 = vadd.f32 %v3799_v38, %v10503_v56 }
 0x605   : > { %v3801_v60 = vpop.f32.mrf.mxu0 }
 0x606   : > { %5174 = vst.msk [vmem:[#allocation2 + $0x14b8] sm:$0xff] %vm4511_vm2, %v4497_v40  ;;  %v4498_v43 = vmax.f32 %v14591_v4, 0.0  ;;  %v3802_v24 = vadd.f32 %v3801_v60, %v10507_v58 }
 0x607   : > { %v3805_v12 = vpop.f32.mrf.mxu0 }
 0x608   : > { %5175 = vst [vmem:[#allocation2 + $0x14c0] sm:$0xff] %v4498_v43  ;;  %v4499_v5 = vmax.f32 %v3802_v24, 0.0  ;;  %v3806_v16 = vadd.f32 %v3805_v12, %v10503_v56  ;;  %v8625_v24 = vld [vmem:[%s16313_s6 + $0x1e8] sm:$0xff] }
 0x609   : > { %v3807_v39 = vpop.f32.mrf.mxu0  ;;  %8948 = vmatprep.subr.mxu0 %v8625_v24  ;;  %v6904_v24 = vld [vmem:[#allocation2 + $0x38] sm:$0xff] }
 0x60a   : > { %5176 = vst.msk [vmem:[#allocation2 + $0x14c8] sm:$0xff] %vm4511_vm2, %v4499_v5  ;;  %v4500_v42 = vmax.f32 %v3806_v16, 0.0  ;;  %v3808_v3 = vadd.f32 %v3807_v39, %v10507_v58  ;;  %v8624_v16 = vld [vmem:[%s16313_s6 + $0x1e0] sm:$0xff] }
 0x60b   : > { %v3811_v46 = vpop.f32.mrf.mxu0  ;;  %8949 = vmatpush1.msra.mxu0 %v8624_v16  ;;  %v6901_v16 = vld [vmem:[#allocation2 + $0x20] sm:$0xff] }
 0x60c   : > { %5177 = vst [vmem:[#allocation2 + $0x14d0] sm:$0xff] %v4500_v42  ;;  %v4501_v23 = vmax.f32 %v3808_v3, 0.0  ;;  %v3812_v25 = vadd.f32 %v3811_v46, %v10503_v56 }
 0x60d   : > { %v3813_v34 = vpop.f32.mrf.mxu0 }
 0x60e   : > { %5178 = vst.msk [vmem:[#allocation2 + $0x14d8] sm:$0xff] %vm4511_vm2, %v4501_v23  ;;  %v4502_v20 = vmax.f32 %v3812_v25, 0.0  ;;  %v3814_v28 = vadd.f32 %v3813_v34, %v10507_v58 }
 0x60f   : > { %v3817_v11 = vpop.f32.mrf.mxu0 }
 0x610   : > { %5179 = vst [vmem:[#allocation2 + $0x14e0] sm:$0xff] %v4502_v20  ;;  %v4503_v63 = vmax.f32 %v3814_v28, 0.0  ;;  %v3818_v17 = vadd.f32 %v3817_v11, %v10503_v56  ;;  %v5853_v11 = vld [vmem:[#allocation2 + $0x14b8] sm:$0xff] }
 0x611   : > { %v3819_v50 = vpop.f32.mrf.mxu0  ;;  %v5855_v28 = vld [vmem:[#allocation2 + $0x14c8] sm:$0xff] }
 0x612   : > { %5180 = vst.msk [vmem:[#allocation2 + $0x14e8] sm:$0xff] %vm4511_vm2, %v4503_v63  ;;  %v4504_v36 = vmax.f32 %v3818_v17, 0.0  ;;  %v3820_v37 = vadd.f32 %v3819_v50, %v10507_v58  ;;  %v5849_v63 = vld [vmem:[#allocation2 + $0x1498] sm:$0xff]  ;;  %v8613_v17 = vld [vmem:[%s16313_s6 + $0x188] sm:$0xff]  ;;  %v6913_v50 = vld [vmem:[#allocation2 + $0x80] sm:$0xff] }
 0x613   : > { %v3823_v44 = vpop.f32.mrf.mxu0  ;;  %8950 = vmatprep.subr.mxu0 %v8613_v17  ;;  %v6991_v17 = vld [vmem:[#allocation2 + $0x2f0] sm:$0xff] }
 0x614   : > { %5181 = vst [vmem:[#allocation2 + $0x14f0] sm:$0xff] %v4504_v36  ;;  %v4505_v31 = vmax.f32 %v3820_v37, 0.0  ;;  %v14606_v45 = vadd.f32 %v3823_v44, %v10503_v56  ;;  %v6912_v37 = vld [vmem:[#allocation2 + $0x78] sm:$0xff]  ;;  %v6911_v44 = vld [vmem:[#allocation2 + $0x70] sm:$0xff] }
 0x615   : > { %v3825_v38 = vpop.f32.mrf.mxu0  ;;  %v5857_v34 = vld [vmem:[#allocation2 + $0x14d8] sm:$0xff] }
 0x616   : > { %5182 = vst.msk [vmem:[#allocation2 + $0x14f8] sm:$0xff] %vm4511_vm2, %v4505_v31  ;;  %v4506_v40 = vmax.f32 %v14606_v45, 0.0  ;;  %v3826_v4 = vadd.f32 %v3825_v38, %v10507_v58  ;;  %v6910_v31 = vld [vmem:[#allocation2 + $0x68] sm:$0xff]  ;;  %v6909_v45 = vld [vmem:[#allocation2 + $0x60] sm:$0xff]  ;;  %v6908_v38 = vld [vmem:[#allocation2 + $0x58] sm:$0xff] }
 0x617   : > { %v3829_v60 = vpop.f32.mrf.mxu0 }
 0x618   : > { %5183 = vst [vmem:[#allocation2 + $0x1500] sm:$0xff] %v4506_v40  ;;  %v4507_v12 = vmax.f32 %v3826_v4, 0.0  ;;  %v3830_v5 = vadd.f32 %v3829_v60, %v10503_v56  ;;  %v6906_v4 = vld [vmem:[#allocation2 + $0x48] sm:$0xff]  ;;  %v6905_v60 = vld [vmem:[#allocation2 + $0x40] sm:$0xff] }
 0x619   : > { %v3831_v39 = vpop.f32.mrf.mxu0  ;;  %v5859_v56 = vld [vmem:[#allocation2 + $0x14e8] sm:$0xff] }
 0x61a   : > { %5184 = vst.msk [vmem:[#allocation2 + $0x1508] sm:$0xff] %vm4511_vm2, %v4507_v12  ;;  %v4508_v3 = vmax.f32 %v3830_v5, 0.0  ;;  %v3832_v46 = vadd.f32 %v3831_v39, %v10507_v58  ;;  %v5851_v58 = vld [vmem:[#allocation2 + $0x14a8] sm:$0xff]  ;;  %v6903_v12 = vld [vmem:[#allocation2 + $0x30] sm:$0xff]  ;;  %v6900_v39 = vld [vmem:[#allocation2 + $0x18] sm:$0xff] }
 0x61b   : > { %v6902_v5 = vld [vmem:[#allocation2 + $0x28] sm:$0xff] }
 0x61c   : > { %5185 = vst [vmem:[#allocation2 + $0x1510] sm:$0xff] %v4508_v3  ;;  %v4509_v23 = vmax.f32 %v3832_v46, 0.0  ;;  %v6898_v46 = vld [vmem:[#allocation2 + $0x8] sm:$0xff] }
 0x61d   : > { %v5861_v25 = vld [vmem:[#allocation2 + $0x14f8] sm:$0xff] }
 0x61e   : > { %6691 = vmatprep.subr.mxu1 %v5861_v25  ;;  %5186 = vst.msk [vmem:[#allocation2 + $0x1518] sm:$0xff] %vm4511_vm2, %v4509_v23  ;;  %v6897_v23 = vld [vmem:[#allocation2] sm:$0xff]  ;;  %v6960_v25 = vld [vmem:[#allocation2 + $0x1f8] sm:$0xff] }
 0x61f   : > { %6692 = vmatpush1.msra.mxu1 %v4504_v36  ;;  %v8612_v36 = vld [vmem:[%s16313_s6 + $0x180] sm:$0xff] }
 0x620   : > { %6693 = vmatprep.subr.mxu1 %v5859_v56  ;;  %8951 = vmatpush1.msra.mxu0 %v8612_v36  ;;  %v6959_v56 = vld [vmem:[#allocation2 + $0x1f0] sm:$0xff] }
 0x621   : > { %6694 = vmatpush1.msra.mxu1 %v4502_v20  ;;  %v5847_v20 = vld [vmem:[#allocation2 + $0x1488] sm:$0xff]  ;;  %v6831_v36 = vld [vmem:[%s16312_s5 + $0xb0] sm:$0xff] }
 0x622   : > { %6695 = vmatprep.subr.mxu1 %v5857_v34  ;;  %v6958_v34 = vld [vmem:[#allocation2 + $0x1e8] sm:$0xff] }
 0x623   : > { %6696 = vmatpush1.msra.mxu1 %v4500_v42  ;;  %v6914_v42 = vld [vmem:[#allocation2 + $0x88] sm:$0xff] }
 0x624   : > { %6697 = vmatprep.subr.mxu1 %v5855_v28  ;;  %v6957_v28 = vld [vmem:[#allocation2 + $0x1e0] sm:$0xff] }
 0x625   : > { %6698 = vmatpush1.msra.mxu1 %v4498_v43  ;;  %v5845_v43 = vld [vmem:[#allocation2 + $0x1478] sm:$0xff] }
 0x626   : > { %6699 = vmatprep.subr.mxu1 %v5853_v11  ;;  %v5865_v27 = vld [vmem:[#allocation2 + $0x1518] sm:$0xff] }
 0x627   : > { %6700 = vmatpush1.msra.mxu1 %v4496_v29  ;;  %v6915_v29 = vld [vmem:[#allocation2 + $0x90] sm:$0xff]  ;;  %v6956_v11 = vld [vmem:[#allocation2 + $0x1d8] sm:$0xff] }
 0x628   : > { %6701 = vmatprep.subr.mxu1 %v5851_v58  ;;  %v6955_v58 = vld [vmem:[#allocation2 + $0x1d0] sm:$0xff] }
 0x629   : > { %6702 = vmatpush1.msra.mxu1 %v4494_v0  ;;  %v6916_v0 = vld [vmem:[#allocation2 + $0x98] sm:$0xff] }
 0x62a   : > { %6703 = vmatprep.subr.mxu1 %v5849_v63  ;;  %v6954_v63 = vld [vmem:[#allocation2 + $0x1c8] sm:$0xff] }
 0x62b   : > { %6704 = vmatpush1.msra.mxu1 %v4492_v35  ;;  %v6918_v35 = vld [vmem:[#allocation2 + $0xa8] sm:$0xff] }
 0x62c   : > { %6705 = vmatprep.subr.mxu1 %v5847_v20  ;;  %v6953_v20 = vld [vmem:[#allocation2 + $0x1c0] sm:$0xff] }
 0x62d   : > { %6706 = vmatpush1.msra.mxu1 %v4490_v13  ;;  %v6919_v13 = vld [vmem:[#allocation2 + $0xb0] sm:$0xff] }
 0x62e   : > { %6707 = vmatprep.subr.mxu1 %v5845_v43  ;;  %v6952_v43 = vld [vmem:[#allocation2 + $0x1b8] sm:$0xff] }
 0x62f   : > { %6708 = vmatpush1.msra.mxu1 %v4488_v10  ;;  %v6920_v10 = vld [vmem:[#allocation2 + $0xb8] sm:$0xff] }
 0x630   : > { %6709 = vmatprep.subr.mxu1 %v5843_v32  ;;  %v6951_v32 = vld [vmem:[#allocation2 + $0x1b0] sm:$0xff] }
 0x631   : > { %6710 = vmatpush1.msra.mxu1 %v4486_v26  ;;  %v6921_v26 = vld [vmem:[#allocation2 + $0xc0] sm:$0xff] }
 0x632   : > { %6711 = vmatprep.subr.mxu1 %v5841_v2  ;;  %v6950_v2 = vld [vmem:[#allocation2 + $0x1a8] sm:$0xff] }
 0x633   : > { %6712 = vmatpush1.msra.mxu1 %v4484_v41  ;;  %v6922_v41 = vld [vmem:[#allocation2 + $0xc8] sm:$0xff] }
 0x634   : > { %6713 = vmatprep.subr.mxu1 %v5839_v22  ;;  %v6949_v22 = vld [vmem:[#allocation2 + $0x1a0] sm:$0xff] }
 0x635   : > { %6714 = vmatpush1.msra.mxu1 %v4482_v14  ;;  %v6923_v14 = vld [vmem:[#allocation2 + $0xd0] sm:$0xff] }
 0x636   : > { %6715 = vmatprep.subr.mxu1 %v5837_v19  ;;  %v6948_v19 = vld [vmem:[#allocation2 + $0x198] sm:$0xff] }
 0x637   : > { %6716 = vmatpush1.msra.mxu1 %v4480_v54  ;;  %v5863_v54 = vld [vmem:[#allocation2 + $0x1508] sm:$0xff] }
 0x638   : > { %6717 = vmatprep.subr.mxu1 %v5835_v57  ;;  %v6947_v57 = vld [vmem:[#allocation2 + $0x190] sm:$0xff] }
 0x639   : > { %6718 = vmatpush1.msra.mxu1 %v4478_v6  ;;  %v6924_v6 = vld [vmem:[#allocation2 + $0xd8] sm:$0xff] }
 0x63a   : > { %6719 = vmatprep.subr.mxu1 %v5833_v8  ;;  %v6946_v8 = vld [vmem:[#allocation2 + $0x188] sm:$0xff] }
 0x63b   : > { %6720 = vmatpush1.msra.mxu1 %v4476_v48  ;;  %v6925_v48 = vld [vmem:[#allocation2 + $0xe0] sm:$0xff] }
 0x63c   : > { %6721 = vmatprep.subr.mxu1 %v5831_v30  ;;  %v6945_v30 = vld [vmem:[#allocation2 + $0x180] sm:$0xff] }
 0x63d   : > { %6722 = vmatpush1.msra.mxu1 %v4474_v52  ;;  %v6926_v52 = vld [vmem:[#allocation2 + $0xe8] sm:$0xff] }
 0x63e   : > { %6751 = vmatprep.subr.mxu1 %v5865_v27  ;;  %v6944_v27 = vld [vmem:[#allocation2 + $0x178] sm:$0xff] }
 0x63f   : > { %6752 = vmatpush2.msra.mxu1 %v4508_v3  ;;  %v6899_v3 = vld [vmem:[#allocation2 + $0x10] sm:$0xff] }
 0x640   : > { %6753 = vmatprep.subr.mxu1 %v5863_v54  ;;  %v6942_v54 = vld [vmem:[#allocation2 + $0x168] sm:$0xff] }
 0x641   : > { %6754 = vmatpush2.msra.mxu1 %v4506_v40  ;;  %v6907_v40 = vld [vmem:[#allocation2 + $0x50] sm:$0xff] }
 0x642   : > { %6756 = vmatmul.mubr.f32.vlgmr.msra.gmra.mxu1 %v5952_v47  ;;  %7585 = vmatprep.subr.mxu1 %v6928_v21  ;;  %v6943_v47 = vld [vmem:[#allocation2 + $0x170] sm:$0xff]  ;;  %v6940_v21 = vld [vmem:[#allocation2 + $0x158] sm:$0xff] }
 0x643   : > { %7586 = vmatpush1.msra.mxu1 %v6927_v18  ;;  %7649 = vmatprep.mubr.f32.mxu1 %v6810_v61  ;;  %v6941_v61 = vld [vmem:[#allocation2 + $0x160] sm:$0xff]  ;;  %v6939_v18 = vld [vmem:[#allocation2 + $0x150] sm:$0xff] }
 0x644   : > { %7587 = vmatprep.subr.mxu1 %v6926_v52  ;;  %v6938_v52 = vld [vmem:[#allocation2 + $0x148] sm:$0xff] }
 0x645   : > { %7588 = vmatpush1.msra.mxu1 %v6925_v48  ;;  %v6937_v48 = vld [vmem:[#allocation2 + $0x140] sm:$0xff] }
 0x646   : > { %7589 = vmatprep.subr.mxu1 %v6924_v6  ;;  %v6936_v6 = vld [vmem:[#allocation2 + $0x138] sm:$0xff] }
 0x647   : > { %7590 = vmatpush1.msra.mxu1 %v6923_v14  ;;  %v6935_v14 = vld [vmem:[#allocation2 + $0x130] sm:$0xff] }
 0x648   : > { %7591 = vmatprep.subr.mxu1 %v6922_v41  ;;  %v6934_v41 = vld [vmem:[#allocation2 + $0x128] sm:$0xff] }
 0x649   : > { %7592 = vmatpush1.msra.mxu1 %v6921_v26  ;;  %v6933_v26 = vld [vmem:[#allocation2 + $0x120] sm:$0xff] }
 0x64a   : > { %7593 = vmatprep.subr.mxu1 %v6920_v10  ;;  %v6932_v10 = vld [vmem:[#allocation2 + $0x118] sm:$0xff] }
 0x64b   : > { %7594 = vmatpush1.msra.mxu1 %v6919_v13  ;;  %v6931_v13 = vld [vmem:[#allocation2 + $0x110] sm:$0xff] }
 0x64c   : > { %7595 = vmatprep.subr.mxu1 %v6918_v35  ;;  %v6930_v35 = vld [vmem:[#allocation2 + $0x108] sm:$0xff] }
 0x64d   : > { %7596 = vmatpush1.msra.mxu1 %v6917_v33  ;;  %v6809_v33 = vld [vmem:[%s16312_s5] sm:$0xff] }
 0x64e   : > { %7597 = vmatprep.subr.mxu1 %v6916_v0  ;;  %v6929_v0 = vld [vmem:[#allocation2 + $0x100] sm:$0xff] }
 0x64f   : > { %7598 = vmatpush1.msra.mxu1 %v6915_v29  ;;  %v6832_v29 = vld [vmem:[%s16312_s5 + $0xb8] sm:$0xff] }
 0x650   : > { %7599 = vmatprep.subr.mxu1 %v6914_v42  ;;  %v6992_v42 = vld [vmem:[#allocation2 + $0x2f8] sm:$0xff] }
 0x651   : > { %7600 = vmatpush1.msra.mxu1 %v6913_v50  ;;  %v6990_v50 = vld [vmem:[#allocation2 + $0x2e8] sm:$0xff] }
 0x652   : > { %7601 = vmatprep.subr.mxu1 %v6912_v37  ;;  %v6989_v37 = vld [vmem:[#allocation2 + $0x2e0] sm:$0xff] }
 0x653   : > { %7602 = vmatpush1.msra.mxu1 %v6911_v44  ;;  %v6854_v44 = vld [vmem:[%s16312_s5 + $0x168] sm:$0xff] }
 0x654   : > { %7603 = vmatprep.subr.mxu1 %v6910_v31  ;;  %v6988_v31 = vld [vmem:[#allocation2 + $0x2d8] sm:$0xff] }
 0x655   : > { %7604 = vmatpush1.msra.mxu1 %v6909_v45  ;;  %v6987_v45 = vld [vmem:[#allocation2 + $0x2d0] sm:$0xff] }
 0x656   : > { %7605 = vmatprep.subr.mxu1 %v6908_v38  ;;  %v6986_v38 = vld [vmem:[#allocation2 + $0x2c8] sm:$0xff] }
 0x657   : > { %7606 = vmatpush1.msra.mxu1 %v6907_v40  ;;  %v6853_v40 = vld [vmem:[%s16312_s5 + $0x160] sm:$0xff] }
 0x658   : > { %7607 = vmatprep.subr.mxu1 %v6906_v4  ;;  %v8601_v4 = vld [vmem:[%s16313_s6 + $0x128] sm:$0xff] }
 0x659   : > { %7608 = vmatpush1.msra.mxu1 %v6905_v60  ;;  %v6985_v60 = vld [vmem:[#allocation2 + $0x2c0] sm:$0xff]  ;;  %8952 = vmatprep.subr.mxu0 %v8601_v4  ;;  %v7000_v4 = vld [vmem:[#allocation2 + $0x338] sm:$0xff] }
 0x65a   : > { %7609 = vmatprep.subr.mxu1 %v6904_v24  ;;  %v6876_v24 = vld [vmem:[%s16312_s5 + $0x218] sm:$0x1] }
 0x65b   : > { %7610 = vmatpush1.msra.mxu1 %v6903_v12  ;;  %v8600_v12 = vld [vmem:[%s16313_s6 + $0x120] sm:$0xff] }
 0x65c   : > { %7611 = vmatprep.subr.mxu1 %v6902_v5  ;;  %v6984_v5 = vld [vmem:[#allocation2 + $0x2b8] sm:$0xff]  ;;  %8953 = vmatpush1.msra.mxu0 %v8600_v12  ;;  %v6997_v12 = vld [vmem:[#allocation2 + $0x320] sm:$0xff] }
 0x65d   : > { %7612 = vmatpush1.msra.mxu1 %v6901_v16  ;;  %v6983_v16 = vld [vmem:[#allocation2 + $0x2b0] sm:$0xff] }
 0x65e   : > { %7613 = vmatprep.subr.mxu1 %v6900_v39  ;;  %v6982_v39 = vld [vmem:[#allocation2 + $0x2a8] sm:$0xff] }
 0x65f   : > { %7614 = vmatpush1.msra.mxu1 %v6899_v3  ;;  %v6875_v3 = vld [vmem:[%s16312_s5 + $0x210] sm:$0x1] }
 0x660   : > { %7615 = vmatprep.subr.mxu1 %v6898_v46  ;;  %v6981_v46 = vld [vmem:[#allocation2 + $0x2a0] sm:$0xff] }
 0x661   : > { %7616 = vmatpush1.msra.mxu1 %v6897_v23  ;;  %v6812_v23 = vld [vmem:[%s16312_s5 + $0x18] sm:$0xff] }
 0x662   : > { %7617 = vmatprep.subr.mxu1 %v6960_v25  ;;  %v6980_v25 = vld [vmem:[#allocation2 + $0x298] sm:$0xff] }
 0x663   : > { %7618 = vmatpush2.msra.mxu1 %v6959_v56  ;;  %v6979_v56 = vld [vmem:[#allocation2 + $0x290] sm:$0xff] }
 0x664   : > { %7619 = vmatprep.subr.mxu1 %v6958_v34  ;;  %v6978_v34 = vld [vmem:[#allocation2 + $0x288] sm:$0xff] }
 0x665   : > { %7620 = vmatpush2.msra.mxu1 %v6957_v28  ;;  %v6977_v28 = vld [vmem:[#allocation2 + $0x280] sm:$0xff] }
 0x666   : > { %7621 = vmatprep.subr.mxu1 %v6956_v11  ;;  %v6976_v11 = vld [vmem:[#allocation2 + $0x278] sm:$0xff] }
 0x667   : > { %7622 = vmatpush2.msra.mxu1 %v6955_v58  ;;  %v6975_v58 = vld [vmem:[#allocation2 + $0x270] sm:$0xff] }
 0x668   : > { %7623 = vmatprep.subr.mxu1 %v6954_v63  ;;  %v6974_v63 = vld [vmem:[#allocation2 + $0x268] sm:$0xff] }
 0x669   : > { %7624 = vmatpush2.msra.mxu1 %v6953_v20  ;;  %v6973_v20 = vld [vmem:[#allocation2 + $0x260] sm:$0xff] }
 0x66a   : > { %7625 = vmatprep.subr.mxu1 %v6952_v43  ;;  %v6972_v43 = vld [vmem:[#allocation2 + $0x258] sm:$0xff] }
 0x66b   : > { %7626 = vmatpush2.msra.mxu1 %v6951_v32  ;;  %v6971_v32 = vld [vmem:[#allocation2 + $0x250] sm:$0xff] }
 0x66c   : > { %7627 = vmatprep.subr.mxu1 %v6950_v2  ;;  %v6970_v2 = vld [vmem:[#allocation2 + $0x248] sm:$0xff] }
 0x66d   : > { %7628 = vmatpush2.msra.mxu1 %v6949_v22  ;;  %v6969_v22 = vld [vmem:[#allocation2 + $0x240] sm:$0xff] }
 0x66e   : > { %7629 = vmatprep.subr.mxu1 %v6948_v19  ;;  %v6968_v19 = vld [vmem:[#allocation2 + $0x238] sm:$0xff] }
 0x66f   : > { %7630 = vmatpush2.msra.mxu1 %v6947_v57  ;;  %v6967_v57 = vld [vmem:[#allocation2 + $0x230] sm:$0xff] }
 0x670   : > { %7631 = vmatprep.subr.mxu1 %v6946_v8  ;;  %v6966_v8 = vld [vmem:[#allocation2 + $0x228] sm:$0xff] }
 0x671   : > { %7632 = vmatpush2.msra.mxu1 %v6945_v30  ;;  %v6965_v30 = vld [vmem:[#allocation2 + $0x220] sm:$0xff] }
 0x672   : > { %7633 = vmatprep.subr.mxu1 %v6944_v27  ;;  %v6964_v27 = vld [vmem:[#allocation2 + $0x218] sm:$0xff] }
 0x673   : > { %7634 = vmatpush2.msra.mxu1 %v6943_v47  ;;  %v6963_v47 = vld [vmem:[#allocation2 + $0x210] sm:$0xff] }
 0x674   : > { %7635 = vmatprep.subr.mxu1 %v6942_v54  ;;  %v6962_v54 = vld [vmem:[#allocation2 + $0x208] sm:$0xff] }
 0x675   : > { %7636 = vmatpush2.msra.mxu1 %v6941_v61  ;;  %v6961_v61 = vld [vmem:[#allocation2 + $0x200] sm:$0xff] }
 0x676   : > { %7637 = vmatprep.subr.mxu1 %v6940_v21  ;;  %v7024_v21 = vld [vmem:[#allocation2 + $0x3f8] sm:$0xff] }
 0x677   : > { %7638 = vmatpush2.msra.mxu1 %v6939_v18  ;;  %v7023_v18 = vld [vmem:[#allocation2 + $0x3f0] sm:$0xff] }
 0x678   : > { %7639 = vmatprep.subr.mxu1 %v6938_v52  ;;  %v7022_v52 = vld [vmem:[#allocation2 + $0x3e8] sm:$0xff] }
 0x679   : > { %7640 = vmatpush2.msra.mxu1 %v6937_v48  ;;  %v7021_v48 = vld [vmem:[#allocation2 + $0x3e0] sm:$0xff] }
 0x67a   : > { %7641 = vmatprep.subr.mxu1 %v6936_v6  ;;  %v7020_v6 = vld [vmem:[#allocation2 + $0x3d8] sm:$0xff] }
 0x67b   : > { %7642 = vmatpush2.msra.mxu1 %v6935_v14  ;;  %v7019_v14 = vld [vmem:[#allocation2 + $0x3d0] sm:$0xff] }
 0x67c   : > { %7643 = vmatprep.subr.mxu1 %v6934_v41  ;;  %v7018_v41 = vld [vmem:[#allocation2 + $0x3c8] sm:$0xff] }
 0x67d   : > { %7644 = vmatpush2.msra.mxu1 %v6933_v26  ;;  %v7017_v26 = vld [vmem:[#allocation2 + $0x3c0] sm:$0xff] }
 0x67e   : > { %7645 = vmatprep.subr.mxu1 %v6932_v10  ;;  %v7016_v10 = vld [vmem:[#allocation2 + $0x3b8] sm:$0xff] }
 0x67f   : > { %7646 = vmatpush2.msra.mxu1 %v6931_v13  ;;  %v7015_v13 = vld [vmem:[#allocation2 + $0x3b0] sm:$0xff] }
 0x680   : > { %7647 = vmatprep.subr.mxu1 %v6930_v35  ;;  %v7014_v35 = vld [vmem:[#allocation2 + $0x3a8] sm:$0xff] }
 0x681   : > { %7648 = vmatpush2.msra.mxu1 %v6929_v0  ;;  %v7012_v0 = vld [vmem:[#allocation2 + $0x398] sm:$0xff] }
 0x682   : > { %7650 = vmatmul.mubr.f32.vlgmr.msra.gmra.mxu1 %v6809_v33  ;;  %7674 = vmatprep.subr.mxu1 %v6992_v42  ;;  %v7013_v33 = vld [vmem:[#allocation2 + $0x3a0] sm:$0xff]  ;;  %v7010_v42 = vld [vmem:[#allocation2 + $0x388] sm:$0xff] }
 0x683   : > { %7675 = vmatpush1.msra.mxu1 %v6991_v17  ;;  %7655 = vmatprep.mubr.f32.mxu1 %v6832_v29  ;;  %v7011_v29 = vld [vmem:[#allocation2 + $0x390] sm:$0xff]  ;;  %v7009_v17 = vld [vmem:[#allocation2 + $0x380] sm:$0xff] }
 0x684   : > { %7676 = vmatprep.subr.mxu1 %v6990_v50  ;;  %v7008_v50 = vld [vmem:[#allocation2 + $0x378] sm:$0xff] }
 0x685   : > { %7677 = vmatpush1.msra.mxu1 %v6989_v37  ;;  %v7006_v37 = vld [vmem:[#allocation2 + $0x368] sm:$0xff] }
 0x686   : > { %7678 = vmatprep.subr.mxu1 %v6988_v31  ;;  %7656 = vmatmul.mubr.f32.gmra.mxu1 %v6831_v36  ;;  %v7007_v36 = vld [vmem:[#allocation2 + $0x370] sm:$0xff]  ;;  %v7004_v31 = vld [vmem:[#allocation2 + $0x358] sm:$0xff] }
 0x687   : > { %7679 = vmatpush1.msra.mxu1 %v6987_v45  ;;  %7661 = vmatprep.mubr.f32.mxu1 %v6854_v44  ;;  %v7005_v44 = vld [vmem:[#allocation2 + $0x360] sm:$0xff]  ;;  %v7003_v45 = vld [vmem:[#allocation2 + $0x350] sm:$0xff] }
 0x688   : > { %7680 = vmatprep.subr.mxu1 %v6986_v38  ;;  %v7002_v38 = vld [vmem:[#allocation2 + $0x348] sm:$0xff] }
 0x689   : > { %7681 = vmatpush1.msra.mxu1 %v6985_v60  ;;  %v6999_v60 = vld [vmem:[#allocation2 + $0x330] sm:$0xff] }
 0x68a   : > { %7682 = vmatprep.subr.mxu1 %v6984_v5  ;;  %7662 = vmatmul.mubr.f32.gmra.mxu1 %v6853_v40  ;;  %v7001_v40 = vld [vmem:[#allocation2 + $0x340] sm:$0xff]  ;;  %v6996_v5 = vld [vmem:[#allocation2 + $0x318] sm:$0xff] }
 0x68b   : > { %7683 = vmatpush1.msra.mxu1 %v6983_v16  ;;  %7667 = vmatprep.mubr.f32.mxu1 %v6876_v24  ;;  %v6998_v24 = vld [vmem:[#allocation2 + $0x328] sm:$0xff]  ;;  %v14690_v16 = vpop.f32.mrf.mxu1 }
 0x68c   : > { %7684 = vmatprep.subr.mxu1 %v6982_v39  ;;  %v6995_v39 = vld [vmem:[#allocation2 + $0x310] sm:$0xff] }
 0x68d   : > { %7685 = vmatpush1.msra.mxu1 %v6981_v46  ;;  %v6811_v46 = vld [vmem:[%s16312_s5 + $0x10] sm:$0xff] }
 0x68e   : > { %7686 = vmatprep.subr.mxu1 %v6980_v25  ;;  %7668 = vmatmul.mubr.f32.gmra.mxu1 %v6875_v3  ;;  %v6994_v3 = vld [vmem:[#allocation2 + $0x308] sm:$0xff] }
 0x68f   : > { %7687 = vmatpush1.msra.mxu1 %v6979_v56  ;;  %7738 = vmatprep.mubr.f32.mxu1 %v6812_v23  ;;  %v6993_v23 = vld [vmem:[#allocation2 + $0x300] sm:$0xff]  ;;  %v6834_v25 = vld [vmem:[%s16312_s5 + $0xc8] sm:$0xff] }
 0x690   : > { %7688 = vmatprep.subr.mxu1 %v6978_v34  ;;  %v8589_v56 = vld [vmem:[%s16313_s6 + $0xc8] sm:$0xff]  ;;  %v7056_v34 = vld [vmem:[#allocation2 + $0x4f8] sm:$0xff] }
 0x691   : > { %7689 = vmatpush1.msra.mxu1 %v6977_v28  ;;  %8954 = vmatprep.subr.mxu0 %v8589_v56  ;;  %v8588_v28 = vld [vmem:[%s16313_s6 + $0xc0] sm:$0xff] }
 0x692   : > { %7690 = vmatprep.subr.mxu1 %v6976_v11  ;;  %v14704_v11 = vpop.f32.mrf.mxu1  ;;  %8955 = vmatpush1.msra.mxu0 %v8588_v28  ;;  %v7085_v56 = vld [vmem:[#allocation2 + $0x5e0] sm:$0xff]  ;;  %v7083_v28 = vld [vmem:[#allocation2 + $0x5d0] sm:$0xff] }
 0x693   : > { %7691 = vmatpush1.msra.mxu1 %v6975_v58  ;;  %v7055_v58 = vld [vmem:[#allocation2 + $0x4f0] sm:$0xff] }
 0x694   : > { %7692 = vmatprep.subr.mxu1 %v6974_v63  ;;  %v7054_v63 = vld [vmem:[#allocation2 + $0x4e8] sm:$0xff] }
 0x695   : > { %7693 = vmatpush1.msra.mxu1 %v6973_v20  ;;  %v6833_v20 = vld [vmem:[%s16312_s5 + $0xc0] sm:$0xff] }
 0x696   : > { %7694 = vmatprep.subr.mxu1 %v6972_v43  ;;  %v7053_v43 = vld [vmem:[#allocation2 + $0x4e0] sm:$0xff] }
 0x697   : > { %7695 = vmatpush1.msra.mxu1 %v6971_v32  ;;  %v6856_v32 = vld [vmem:[%s16312_s5 + $0x178] sm:$0xff] }
 0x698   : > { %7696 = vmatprep.subr.mxu1 %v6970_v2  ;;  %v7052_v2 = vld [vmem:[#allocation2 + $0x4d8] sm:$0xff] }
 0x699   : > { %7697 = vmatpush1.msra.mxu1 %v6969_v22  ;;  %v14712_v22 = vpop.f32.mrf.mxu1 }
 0x69a   : > { %7698 = vmatprep.subr.mxu1 %v6968_v19  ;;  %v7051_v19 = vld [vmem:[#allocation2 + $0x4d0] sm:$0xff] }
 0x69b   : > { %7699 = vmatpush1.msra.mxu1 %v6967_v57  ;;  %v7050_v57 = vld [vmem:[#allocation2 + $0x4c8] sm:$0xff] }
 0x69c   : > { %7700 = vmatprep.subr.mxu1 %v6966_v8  ;;  %v6855_v8 = vld [vmem:[%s16312_s5 + $0x170] sm:$0xff] }
 0x69d   : > { %7701 = vmatpush1.msra.mxu1 %v6965_v30  ;;  %v7049_v30 = vld [vmem:[#allocation2 + $0x4c0] sm:$0xff] }
 0x69e   : > { %7702 = vmatprep.subr.mxu1 %v6964_v27  ;;  %v6878_v27 = vld [vmem:[%s16312_s5 + $0x228] sm:$0x1] }
 0x69f   : > { %7703 = vmatpush1.msra.mxu1 %v6963_v47  ;;  %v7048_v47 = vld [vmem:[#allocation2 + $0x4b8] sm:$0xff] }
 0x6a0   : > { %7704 = vmatprep.subr.mxu1 %v6962_v54  ;;  %v14720_v54 = vpop.f32.mrf.mxu1 }
 0x6a1   : > { %7705 = vmatpush1.msra.mxu1 %v6961_v61  ;;  %v7047_v61 = vld [vmem:[#allocation2 + $0x4b0] sm:$0xff] }
 0x6a2   : > { %7706 = vmatprep.subr.mxu1 %v7024_v21  ;;  %v7046_v21 = vld [vmem:[#allocation2 + $0x4a8] sm:$0xff] }
 0x6a3   : > { %7707 = vmatpush2.msra.mxu1 %v7023_v18  ;;  %v6877_v18 = vld [vmem:[%s16312_s5 + $0x220] sm:$0x1] }
 0x6a4   : > { %7708 = vmatprep.subr.mxu1 %v7022_v52  ;;  %v7045_v52 = vld [vmem:[#allocation2 + $0x4a0] sm:$0xff] }
 0x6a5   : > { %7709 = vmatpush2.msra.mxu1 %v7021_v48  ;;  %v6814_v48 = vld [vmem:[%s16312_s5 + $0x28] sm:$0xff] }
 0x6a6   : > { %7710 = vmatprep.subr.mxu1 %v7020_v6  ;;  %v7044_v6 = vld [vmem:[#allocation2 + $0x498] sm:$0xff] }
 0x6a7   : > { %7711 = vmatpush2.msra.mxu1 %v7019_v14  ;;  %v14728_v14 = vpop.f32.mrf.mxu1 }
 0x6a8   : > { %7712 = vmatprep.subr.mxu1 %v7018_v41  ;;  %v7043_v41 = vld [vmem:[#allocation2 + $0x490] sm:$0xff] }
 0x6a9   : > { %7713 = vmatpush2.msra.mxu1 %v7017_v26  ;;  %v7042_v26 = vld [vmem:[#allocation2 + $0x488] sm:$0xff] }
 0x6aa   : > { %7714 = vmatprep.subr.mxu1 %v7016_v10  ;;  %v7041_v10 = vld [vmem:[#allocation2 + $0x480] sm:$0xff] }
 0x6ab   : > { %7715 = vmatpush2.msra.mxu1 %v7015_v13  ;;  %v7040_v13 = vld [vmem:[#allocation2 + $0x478] sm:$0xff] }
 0x6ac   : > { %7716 = vmatprep.subr.mxu1 %v7014_v35  ;;  %v14730_v35 = vpop.f32.mrf.mxu1 }
 0x6ad   : > { %7717 = vmatpush2.msra.mxu1 %v7013_v33  ;;  %v7039_v33 = vld [vmem:[#allocation2 + $0x470] sm:$0xff] }
 0x6ae   : > { %7718 = vmatprep.subr.mxu1 %v7012_v0  ;;  %v7038_v0 = vld [vmem:[#allocation2 + $0x468] sm:$0xff] }
 0x6af   : > { %7719 = vmatpush2.msra.mxu1 %v7011_v29  ;;  %v7037_v29 = vld [vmem:[#allocation2 + $0x460] sm:$0xff] }
 0x6b0   : > { %7720 = vmatprep.subr.mxu1 %v7010_v42  ;;  %v7036_v42 = vld [vmem:[#allocation2 + $0x458] sm:$0xff] }
 0x6b1   : > { %7721 = vmatpush2.msra.mxu1 %v7009_v17  ;;  %v14732_v17 = vpop.f32.mrf.mxu1 }
 0x6b2   : > { %7722 = vmatprep.subr.mxu1 %v7008_v50  ;;  %v7035_v50 = vld [vmem:[#allocation2 + $0x450] sm:$0xff] }
 0x6b3   : > { %7723 = vmatpush2.msra.mxu1 %v7007_v36  ;;  %v7034_v36 = vld [vmem:[#allocation2 + $0x448] sm:$0xff] }
 0x6b4   : > { %7724 = vmatprep.subr.mxu1 %v7006_v37  ;;  %v7033_v37 = vld [vmem:[#allocation2 + $0x440] sm:$0xff] }
 0x6b5   : > { %7725 = vmatpush2.msra.mxu1 %v7005_v44  ;;  %v7032_v44 = vld [vmem:[#allocation2 + $0x438] sm:$0xff] }
 0x6b6   : > { %7726 = vmatprep.subr.mxu1 %v7004_v31  ;;  %v14734_v31 = vpop.f32.mrf.mxu1 }
 0x6b7   : > { %7727 = vmatpush2.msra.mxu1 %v7003_v45  ;;  %v7031_v45 = vld [vmem:[#allocation2 + $0x430] sm:$0xff] }
 0x6b8   : > { %7728 = vmatprep.subr.mxu1 %v7002_v38  ;;  %v7030_v38 = vld [vmem:[#allocation2 + $0x428] sm:$0xff] }
 0x6b9   : > { %7729 = vmatpush2.msra.mxu1 %v7001_v40  ;;  %v7029_v40 = vld [vmem:[#allocation2 + $0x420] sm:$0xff] }
 0x6ba   : > { %7730 = vmatprep.subr.mxu1 %v7000_v4  ;;  %v7028_v4 = vld [vmem:[#allocation2 + $0x418] sm:$0xff] }
 0x6bb   : > { %7731 = vmatpush2.msra.mxu1 %v6999_v60  ;;  %v14736_v60 = vpop.f32.mrf.mxu1 }
 0x6bc   : > { %7732 = vmatprep.subr.mxu1 %v6998_v24  ;;  %v7027_v24 = vld [vmem:[#allocation2 + $0x410] sm:$0xff] }
 0x6bd   : > { %7733 = vmatpush2.msra.mxu1 %v6997_v12  ;;  %v7026_v12 = vld [vmem:[#allocation2 + $0x408] sm:$0xff] }
 0x6be   : > { %7734 = vmatprep.subr.mxu1 %v6996_v5  ;;  %v7025_v5 = vld [vmem:[#allocation2 + $0x400] sm:$0xff] }
 0x6bf   : > { %7735 = vmatpush2.msra.mxu1 %v6995_v39  ;;  %v7088_v39 = vld [vmem:[#allocation2 + $0x5f8] sm:$0xff] }
 0x6c0   : > { %7736 = vmatprep.subr.mxu1 %v6994_v3  ;;  %v6333_v3 = vpop.f32.mrf.mxu1 }
 0x6c1   : > { %7737 = vmatpush2.msra.mxu1 %v6993_v23  ;;  %v7086_v23 = vld [vmem:[#allocation2 + $0x5e8] sm:$0xff] }
 0x6c2   : > { %7739 = vmatmul.mubr.f32.vlgmr.msra.gmra.mxu1 %v6811_v46  ;;  %7763 = vmatprep.subr.mxu1 %v7056_v34  ;;  %v7087_v46 = vld [vmem:[#allocation2 + $0x5f0] sm:$0xff]  ;;  %v7084_v34 = vld [vmem:[#allocation2 + $0x5d8] sm:$0xff] }
 0x6c3   : > { %7764 = vmatpush1.msra.mxu1 %v7055_v58  ;;  %7744 = vmatprep.mubr.f32.mxu1 %v6834_v25  ;;  %v6402_v25 = vpop.f32.mrf.mxu1  ;;  %v7082_v58 = vld [vmem:[#allocation2 + $0x5c8] sm:$0xff] }
 0x6c4   : > { %7765 = vmatprep.subr.mxu1 %v7054_v63 }
 0x6c5   : > { %7766 = vmatpush1.msra.mxu1 %v7053_v43  ;;  %v6404_v63 = vpop.f32.mrf.mxu1  ;;  %v7080_v43 = vld [vmem:[#allocation2 + $0x5b8] sm:$0xff] }
 0x6c6   : > { %7745 = vmatmul.mubr.f32.gmra.mxu1 %v6833_v20  ;;  %7767 = vmatprep.subr.mxu1 %v7052_v2  ;;  %v7081_v20 = vld [vmem:[#allocation2 + $0x5c0] sm:$0xff]  ;;  %v7079_v2 = vld [vmem:[#allocation2 + $0x5b0] sm:$0xff] }
 0x6c7   : > { %7768 = vmatpush1.msra.mxu1 %v7051_v19  ;;  %7750 = vmatprep.mubr.f32.mxu1 %v6856_v32  ;;  %v6473_v32 = vpop.f32.mrf.mxu1  ;;  %v6119_v19 = vadd.f32 %v14712_v22, %v14690_v16  ;;  %v7072_v22 = vld [vmem:[#allocation2 + $0x578] sm:$0xff] }
 0x6c8   : > { %7769 = vmatprep.subr.mxu1 %v7050_v57  ;;  %v7078_v57 = vld [vmem:[#allocation2 + $0x5a8] sm:$0xff] }
 0x6c9   : > { %7770 = vmatpush1.msra.mxu1 %v7049_v30  ;;  %v6121_v30 = vadd.f32 %v14720_v54, %v14704_v11  ;;  %v7070_v54 = vld [vmem:[#allocation2 + $0x568] sm:$0xff] }
 0x6ca   : > { %7751 = vmatmul.mubr.f32.gmra.mxu1 %v6855_v8  ;;  %7771 = vmatprep.subr.mxu1 %v7048_v47  ;;  %v7077_v8 = vld [vmem:[#allocation2 + $0x5a0] sm:$0xff]  ;;  %v6475_v47 = vpop.f32.mrf.mxu1 }
 0x6cb   : > { %7772 = vmatpush1.msra.mxu1 %v7047_v61  ;;  %7756 = vmatprep.mubr.f32.mxu1 %v6878_v27  ;;  %v7076_v27 = vld [vmem:[#allocation2 + $0x598] sm:$0xff]  ;;  %v7075_v61 = vld [vmem:[#allocation2 + $0x590] sm:$0xff]  ;;  %v6192_v16 = vadd.f32 %v14730_v35, %v6121_v30 }
 0x6cc   : > { %7773 = vmatprep.subr.mxu1 %v7046_v21  ;;  %v6190_v21 = vadd.f32 %v14728_v14, %v6119_v19  ;;  %v7119_v19 = vld [vmem:[#allocation2 + $0x6f0] sm:$0xff] }
 0x6cd   : > { %7774 = vmatpush1.msra.mxu1 %v7045_v52  ;;  %v6544_v52 = vpop.f32.mrf.mxu1  ;;  %v6263_v14 = vadd.f32 %v14734_v31, %v6192_v16  ;;  %v7063_v31 = vld [vmem:[#allocation2 + $0x530] sm:$0xff]  ;;  %v7116_v16 = vld [vmem:[#allocation2 + $0x6d8] sm:$0xff] }
 0x6ce   : > { %7757 = vmatmul.mubr.f32.gmra.mxu1 %v6877_v18  ;;  %7775 = vmatprep.subr.mxu1 %v7044_v6  ;;  %v7074_v18 = vld [vmem:[#allocation2 + $0x588] sm:$0xff]  ;;  %v7071_v6 = vld [vmem:[#allocation2 + $0x570] sm:$0xff]  ;;  %v6261_v11 = vadd.f32 %v14732_v17, %v6190_v21  ;;  %v7117_v21 = vld [vmem:[#allocation2 + $0x6e0] sm:$0xff] }
 0x6cf   : > { %7776 = vmatpush1.msra.mxu1 %v7043_v41  ;;  %7827 = vmatprep.mubr.f32.mxu1 %v6814_v48  ;;  %v7073_v48 = vld [vmem:[#allocation2 + $0x580] sm:$0xff]  ;;  %v6546_v41 = vpop.f32.mrf.mxu1  ;;  %v6334_v17 = vadd.f32 %v6333_v3, %v6263_v14  ;;  %v7112_v14 = vld [vmem:[#allocation2 + $0x6b8] sm:$0xff] }
 0x6d0   : > { %7777 = vmatprep.subr.mxu1 %v7042_v26  ;;  %v7069_v26 = vld [vmem:[#allocation2 + $0x560] sm:$0xff]  ;;  %v6332_v35 = vadd.f32 %v14736_v60, %v6261_v11  ;;  %v7114_v11 = vld [vmem:[#allocation2 + $0x6c8] sm:$0xff] }
 0x6d1   : > { %7778 = vmatpush1.msra.mxu1 %v7041_v10  ;;  %v7068_v10 = vld [vmem:[#allocation2 + $0x558] sm:$0xff]  ;;  %v7061_v60 = vld [vmem:[#allocation2 + $0x520] sm:$0xff] }
 0x6d2   : > { %7779 = vmatprep.subr.mxu1 %v7040_v13  ;;  %v6615_v13 = vpop.f32.mrf.mxu1  ;;  %v6762_v3 = vld [vmem:[%s16310_s3] sm:$0x3] }
 0x6d3   : > { %7780 = vmatpush1.msra.mxu1 %v7039_v33  ;;  %v7067_v33 = vld [vmem:[#allocation2 + $0x550] sm:$0xff]  ;;  %v6771_v30 = vrot.slane %v6762_v3, %v10498_v55 }
 0x6d4   : > { %7781 = vmatprep.subr.mxu1 %v7038_v0  ;;  %v7066_v0 = vld [vmem:[#allocation2 + $0x548] sm:$0xff] }
 0x6d5   : > { %7782 = vmatpush1.msra.mxu1 %v7037_v29  ;;  %v7065_v29 = vld [vmem:[#allocation2 + $0x540] sm:$0xff] }
 0x6d6   : > { %7783 = vmatprep.subr.mxu1 %v7036_v42  ;;  %v8577_v42 = vld [vmem:[%s16313_s6 + $0x68] sm:$0xff] }
 0x6d7   : > { %7784 = vmatpush1.msra.mxu1 %v7035_v50  ;;  %v6403_v50 = vadd.f32 %v6402_v25, %v6332_v35  ;;  %8956 = vmatprep.subr.mxu0 %v8577_v42  ;;  %v7058_v25 = vld [vmem:[#allocation2 + $0x508] sm:$0xff]  ;;  %v7109_v42 = vld [vmem:[#allocation2 + $0x6a0] sm:$0xff] }
 0x6d8   : > { %7785 = vmatprep.subr.mxu1 %v7034_v36  ;;  %v7064_v36 = vld [vmem:[#allocation2 + $0x538] sm:$0xff] }
 0x6d9   : > { %7786 = vmatpush1.msra.mxu1 %v7033_v37  ;;  %v8576_v37 = vld [vmem:[%s16313_s6 + $0x60] sm:$0xff] }
 0x6da   : > { %7787 = vmatprep.subr.mxu1 %v7032_v44  ;;  %v6617_v44 = vpop.f32.mrf.mxu1  ;;  %8957 = vmatpush1.msra.mxu0 %v8576_v37  ;;  %v7106_v37 = vld [vmem:[#allocation2 + $0x688] sm:$0xff] }
 0x6db   : > { %7788 = vmatpush1.msra.mxu1 %v7031_v45  ;;  %v6405_v45 = vadd.f32 %v6404_v63, %v6334_v17  ;;  %v6816_v17 = vld [vmem:[%s16312_s5 + $0x38] sm:$0xff] }
 0x6dc   : > { %7789 = vmatprep.subr.mxu1 %v7030_v38  ;;  %v6474_v38 = vadd.f32 %v6473_v32, %v6403_v50  ;;  %v7120_v32 = vld [vmem:[#allocation2 + $0x6f8] sm:$0xff] }
 0x6dd   : > { %7790 = vmatpush1.msra.mxu1 %v7029_v40  ;;  %v7062_v40 = vld [vmem:[#allocation2 + $0x528] sm:$0xff]  ;;  %v7108_v50 = vld [vmem:[#allocation2 + $0x698] sm:$0xff] }
 0x6de   : > { %7791 = vmatprep.subr.mxu1 %v7028_v4  ;;  %v6686_v4 = vpop.f32.mrf.mxu1 }
 0x6df   : > { %7792 = vmatpush1.msra.mxu1 %v7027_v24  ;;  %v6476_v24 = vadd.f32 %v6475_v47, %v6405_v45  ;;  %v6835_v47 = vld [vmem:[%s16312_s5 + $0xd0] sm:$0xff] }
 0x6e0   : > { %7793 = vmatprep.subr.mxu1 %v7026_v12  ;;  %v6545_v12 = vadd.f32 %v6544_v52, %v6474_v38  ;;  %v7103_v45 = vld [vmem:[#allocation2 + $0x670] sm:$0xff]  ;;  %v7102_v38 = vld [vmem:[#allocation2 + $0x668] sm:$0xff] }
 0x6e1   : > { %7794 = vmatpush1.msra.mxu1 %v7025_v5  ;;  %v7060_v5 = vld [vmem:[#allocation2 + $0x518] sm:$0xff] }
 0x6e2   : > { %7795 = vmatprep.subr.mxu1 %v7088_v39  ;;  %v7059_v39 = vld [vmem:[#allocation2 + $0x510] sm:$0xff] }
 0x6e3   : > { %7796 = vmatpush2.msra.mxu1 %v7087_v46  ;;  %v6547_v46 = vadd.f32 %v6546_v41, %v6476_v24  ;;  %v7113_v41 = vld [vmem:[#allocation2 + $0x6c0] sm:$0xff]  ;;  %v7098_v24 = vld [vmem:[#allocation2 + $0x648] sm:$0xff] }
 0x6e4   : > { %7797 = vmatprep.subr.mxu1 %v7086_v23  ;;  %v6616_v23 = vadd.f32 %v6615_v13, %v6545_v12  ;;  %v7097_v12 = vld [vmem:[#allocation2 + $0x640] sm:$0xff] }
 0x6e5   : > { %7798 = vmatpush2.msra.mxu1 %v7085_v56  ;;  %v6813_v56 = vld [vmem:[%s16312_s5 + $0x20] sm:$0xff]  ;;  %v6618_v63 = vadd.f32 %v6617_v44, %v6547_v46 }
 0x6e6   : > { %7799 = vmatprep.subr.mxu1 %v7084_v34  ;;  %v6688_v34 = vpop.f32.mrf.mxu1  ;;  %v7105_v44 = vld [vmem:[#allocation2 + $0x680] sm:$0xff] }
 0x6e7   : > { %7800 = vmatpush2.msra.mxu1 %v7083_v28  ;;  %v7057_v28 = vld [vmem:[#allocation2 + $0x500] sm:$0xff] }
 0x6e8   : > { %7801 = vmatprep.subr.mxu1 %v7082_v58  ;;  %v6836_v58 = vld [vmem:[%s16312_s5 + $0xd8] sm:$0xff]  ;;  %v7093_v46 = vld [vmem:[#allocation2 + $0x620] sm:$0xff] }
 0x6e9   : > { %7802 = vmatpush2.msra.mxu1 %v7081_v20  ;;  %v6687_v20 = vadd.f32 %v6686_v4, %v6616_v23  ;;  %v7100_v4 = vld [vmem:[#allocation2 + $0x658] sm:$0xff] }
 0x6ea   : > { %7803 = vmatprep.subr.mxu1 %v7080_v43  ;;  %v6767_v43 = vrot.slane %v6762_v3, %v10492_v53  ;;  %v7094_v3 = vld [vmem:[#allocation2 + $0x628] sm:$0xff]  ;;  %v7092_v23 = vld [vmem:[#allocation2 + $0x618] sm:$0xff] }
 0x6eb   : > { %7804 = vmatpush2.msra.mxu1 %v7079_v2 }
 0x6ec   : > { %7805 = vmatprep.subr.mxu1 %v7078_v57  ;;  %v6689_v57 = vadd.f32 %v6688_v34, %v6618_v63  ;;  %v7089_v34 = vld [vmem:[#allocation2 + $0x600] sm:$0xff]  ;;  %v7150_v63 = vld [vmem:[#allocation2 + $0x7e8] sm:$0xff] }
 0x6ed   : > { %7806 = vmatpush2.msra.mxu1 %v7077_v8 }
 0x6ee   : > { %7807 = vmatprep.subr.mxu1 %v7076_v27  ;;  %v7118_v27 = vld [vmem:[#allocation2 + $0x6e8] sm:$0xff] }
 0x6ef   : > { %7808 = vmatpush2.msra.mxu1 %v7075_v61 }
 0x6f0   : > { %7809 = vmatprep.subr.mxu1 %v7074_v18  ;;  %v6858_v18 = vld [vmem:[%s16312_s5 + $0x188] sm:$0xff] }
 0x6f1   : > { %7810 = vmatpush2.msra.mxu1 %v7073_v48 }
 0x6f2   : > { %7811 = vmatprep.subr.mxu1 %v7072_v22  ;;  %v7115_v22 = vld [vmem:[#allocation2 + $0x6d0] sm:$0xff] }
 0x6f3   : > { %7812 = vmatpush2.msra.mxu1 %v7071_v6 }
 0x6f4   : > { %7813 = vmatprep.subr.mxu1 %v7070_v54  ;;  %v6857_v54 = vld [vmem:[%s16312_s5 + $0x180] sm:$0xff] }
 0x6f5   : > { %7814 = vmatpush2.msra.mxu1 %v7069_v26  ;;  %v6880_v26 = vld [vmem:[%s16312_s5 + $0x238] sm:$0x1] }
 0x6f6   : > { %7815 = vmatprep.subr.mxu1 %v7068_v10 }
 0x6f7   : > { %7816 = vmatpush2.msra.mxu1 %v7067_v33  ;;  %v7111_v33 = vld [vmem:[#allocation2 + $0x6b0] sm:$0xff] }
 0x6f8   : > { %7817 = vmatprep.subr.mxu1 %v7066_v0  ;;  %v7110_v0 = vld [vmem:[#allocation2 + $0x6a8] sm:$0xff] }
 0x6f9   : > { %7818 = vmatpush2.msra.mxu1 %v7065_v29  ;;  %v6879_v29 = vld [vmem:[%s16312_s5 + $0x230] sm:$0x1] }
 0x6fa   : > { %7819 = vmatprep.subr.mxu1 %v7064_v36  ;;  %v7107_v36 = vld [vmem:[#allocation2 + $0x690] sm:$0xff] }
 0x6fb   : > { %7820 = vmatpush2.msra.mxu1 %v7063_v31  ;;  %v7104_v31 = vld [vmem:[#allocation2 + $0x678] sm:$0xff] }
 0x6fc   : > { %7821 = vmatprep.subr.mxu1 %v7062_v40  ;;  %v7101_v40 = vld [vmem:[#allocation2 + $0x660] sm:$0xff] }
 0x6fd   : > { %7822 = vmatpush2.msra.mxu1 %v7061_v60  ;;  %v7099_v60 = vld [vmem:[#allocation2 + $0x650] sm:$0xff] }
 0x6fe   : > { %7823 = vmatprep.subr.mxu1 %v7060_v5  ;;  %v7096_v5 = vld [vmem:[#allocation2 + $0x638] sm:$0xff] }
 0x6ff   : > { %7824 = vmatpush2.msra.mxu1 %v7059_v39  ;;  %v7095_v39 = vld [vmem:[#allocation2 + $0x630] sm:$0xff] }
 0x700   : > { %7825 = vmatprep.subr.mxu1 %v7058_v25  ;;  %v7091_v25 = vld [vmem:[#allocation2 + $0x610] sm:$0xff] }
 0x701   : > { %7826 = vmatpush2.msra.mxu1 %v7057_v28  ;;  %v7152_v28 = vld [vmem:[#allocation2 + $0x7f8] sm:$0xff] }
 0x702   : > { %v6757_v2 = vpop.f32.mrf.mxu1  ;;  %7828 = vmatmul.mubr.f32.vlgmr.msra.gmra.mxu1 %v6813_v56  ;;  %7852 = vmatprep.subr.mxu1 %v7120_v32  ;;  %v7090_v56 = vld [vmem:[#allocation2 + $0x608] sm:$0xff]  ;;  %v7147_v32 = vld [vmem:[#allocation2 + $0x7d0] sm:$0xff] }
 0x703   : > { %v6758_v8 = vadd.f32 %v6757_v2, %v6687_v20  ;;  %7853 = vmatpush1.msra.mxu1 %v7119_v19  ;;  %7833 = vmatprep.mubr.f32.mxu1 %v6836_v58  ;;  %v7151_v58 = vld [vmem:[#allocation2 + $0x7f0] sm:$0xff]  ;;  %v7149_v20 = vld [vmem:[#allocation2 + $0x7e0] sm:$0xff]  ;;  %v7146_v2 = vld [vmem:[#allocation2 + $0x7c8] sm:$0xff] }
 0x704   : > { %v6759_v61 = vpop.f32.mrf.mxu1  ;;  %7854 = vmatprep.subr.mxu1 %v7118_v27  ;;  %v7145_v19 = vld [vmem:[#allocation2 + $0x7c0] sm:$0xff] }
 0x705   : > { %v6774_v52 = vmul.f32 %v6767_v43, %v6758_v8  ;;  %v6760_v48 = vadd.f32 %v6759_v61, %v6689_v57  ;;  %7855 = vmatpush1.msra.mxu1 %v7117_v21  ;;  %v7148_v43 = vld [vmem:[#allocation2 + $0x7d8] sm:$0xff]  ;;  %v7143_v8 = vld [vmem:[#allocation2 + $0x7b0] sm:$0xff]  ;;  %v7141_v27 = vld [vmem:[#allocation2 + $0x7a0] sm:$0xff] }
 0x706   : > { %7834 = vmatmul.mubr.f32.gmra.mxu1 %v6835_v47  ;;  %7856 = vmatprep.subr.mxu1 %v7116_v16  ;;  %v7144_v57 = vld [vmem:[#allocation2 + $0x7b8] sm:$0xff]  ;;  %v7139_v61 = vld [vmem:[#allocation2 + $0x790] sm:$0xff]  ;;  %v7138_v21 = vld [vmem:[#allocation2 + $0x788] sm:$0xff] }
 0x707   : > { %v6775_v6 = vmul.f32 %v6771_v30, %v6760_v48  ;;  %7857 = vmatpush1.msra.mxu1 %v7115_v22  ;;  %7839 = vmatprep.mubr.f32.mxu1 %v6858_v18  ;;  %v6777_v10 = vsel %vm6776_vm4, %v6774_v52, 0.0  ;;  %v7142_v30 = vld [vmem:[#allocation2 + $0x7a8] sm:$0xff]  ;;  %v7140_v47 = vld [vmem:[#allocation2 + $0x798] sm:$0xff]  ;;  %v7137_v18 = vld [vmem:[#allocation2 + $0x780] sm:$0xff] }
 0x708   : > { %7858 = vmatprep.subr.mxu1 %v7114_v11  ;;  %v8565_v52 = vld [vmem:[%s16313_s6 + $0x8] sm:$0xff]  ;;  %v7136_v48 = vld [vmem:[#allocation2 + $0x778] sm:$0xff]  ;;  %v8564_v16 = vld [vmem:[%s16313_s6] sm:$0xff] }
 0x709   : > { %7859 = vmatpush1.msra.mxu1 %v7113_v41  ;;  %v6779_v13 = vsel %vm6778_vm5, %v6775_v6, 0.0  ;;  %8958 = vmatprep.subr.mxu0 %v8565_v52  ;;  %v7135_v22 = vld [vmem:[#allocation2 + $0x770] sm:$0xff]  ;;  %v7134_v6 = vld [vmem:[#allocation2 + $0x768] sm:$0xff]  ;;  %v7133_v11 = vld [vmem:[#allocation2 + $0x760] sm:$0xff] }
 0x70a   : > { %7840 = vmatmul.mubr.f32.gmra.mxu1 %v6857_v54  ;;  %7860 = vmatprep.subr.mxu1 %v7112_v14  ;;  %v6780_v35 = vadd.f32 %v6779_v13, %v6777_v10  ;;  %v7132_v54 = vld [vmem:[#allocation2 + $0x758] sm:$0xff]  ;;  %v7131_v41 = vld [vmem:[#allocation2 + $0x750] sm:$0xff]  ;;  %v7129_v14 = vld [vmem:[#allocation2 + $0x740] sm:$0xff] }
 0x70b   : > { %7861 = vmatpush1.msra.mxu1 %v7111_v33  ;;  %7845 = vmatprep.mubr.f32.mxu1 %v6880_v26  ;;  %v7130_v26 = vld [vmem:[#allocation2 + $0x748] sm:$0xff]  ;;  %v7128_v10 = vld [vmem:[#allocation2 + $0x738] sm:$0xff]  ;;  %v7127_v13 = vld [vmem:[#allocation2 + $0x730] sm:$0xff] }
 0x70c   : > { %6781 = vadd.xlane.f32.xlu0 %v6780_v35  ;;  %7862 = vmatprep.subr.mxu1 %v7110_v0  ;;  %v7126_v33 = vld [vmem:[#allocation2 + $0x728] sm:$0xff]  ;;  %v7125_v35 = vld [vmem:[#allocation2 + $0x720] sm:$0xff]  ;;  %v7124_v0 = vld [vmem:[#allocation2 + $0x718] sm:$0xff] }
 0x70d   : > { %7863 = vmatpush1.msra.mxu1 %v7109_v42  ;;  %8959 = vmatpush1.msra.mxu0 %v8564_v16  ;;  %v7122_v42 = vld [vmem:[#allocation2 + $0x708] sm:$0xff]  ;;  %v7156_v52 = vld [vmem:[#allocation2 + $0x818] sm:$0xff] }
 0x70e   : > { %7846 = vmatmul.mubr.f32.gmra.mxu1 %v6879_v29  ;;  %7864 = vmatprep.subr.mxu1 %v7108_v50  ;;  %v7123_v29 = vld [vmem:[#allocation2 + $0x710] sm:$0xff]  ;;  %v7121_v50 = vld [vmem:[#allocation2 + $0x700] sm:$0xff]  ;;  %v7154_v16 = vld [vmem:[#allocation2 + $0x808] sm:$0xff] }
 0x70f   : > { %7865 = vmatpush1.msra.mxu1 %v7107_v36  ;;  %7916 = vmatprep.mubr.f32.mxu1 %v6816_v17  ;;  %v6815_v17 = vld [vmem:[%s16312_s5 + $0x30] sm:$0xff]  ;;  %v6838_v36 = vld [vmem:[%s16312_s5 + $0xe8] sm:$0xff] }
 0x710   : > { %7866 = vmatprep.subr.mxu1 %v7106_v37  ;;  %v7184_v37 = vld [vmem:[#allocation2 + $0x8f8] sm:$0xff] }
 0x711   : > { %7867 = vmatpush1.msra.mxu1 %v7105_v44  ;;  %v7183_v44 = vld [vmem:[#allocation2 + $0x8f0] sm:$0xff] }
 0x712   : > { %7868 = vmatprep.subr.mxu1 %v7104_v31  ;;  %v7182_v31 = vld [vmem:[#allocation2 + $0x8e8] sm:$0xff] }
 0x713   : > { %7869 = vmatpush1.msra.mxu1 %v7103_v45  ;;  %v6837_v45 = vld [vmem:[%s16312_s5 + $0xe0] sm:$0xff] }
 0x714   : > { %7870 = vmatprep.subr.mxu1 %v7102_v38  ;;  %v7181_v38 = vld [vmem:[#allocation2 + $0x8e0] sm:$0xff] }
 0x715   : > { %7871 = vmatpush1.msra.mxu1 %v7101_v40  ;;  %v6860_v40 = vld [vmem:[%s16312_s5 + $0x198] sm:$0xff] }
 0x716   : > { %7872 = vmatprep.subr.mxu1 %v7100_v4  ;;  %v7180_v4 = vld [vmem:[#allocation2 + $0x8d8] sm:$0xff] }
 0x717   : > { %7873 = vmatpush1.msra.mxu1 %v7099_v60  ;;  %v7179_v60 = vld [vmem:[#allocation2 + $0x8d0] sm:$0xff] }
 0x718   : > { %7874 = vmatprep.subr.mxu1 %v7098_v24  ;;  %v7178_v24 = vld [vmem:[#allocation2 + $0x8c8] sm:$0xff] }
 0x719   : > { %7875 = vmatpush1.msra.mxu1 %v7097_v12  ;;  %v6859_v12 = vld [vmem:[%s16312_s5 + $0x190] sm:$0xff] }
 0x71a   : > { %7876 = vmatprep.subr.mxu1 %v7096_v5  ;;  %v7177_v5 = vld [vmem:[#allocation2 + $0x8c0] sm:$0xff] }
 0x71b   : > { %7877 = vmatpush1.msra.mxu1 %v7095_v39  ;;  %v6882_v39 = vld [vmem:[%s16312_s5 + $0x248] sm:$0x1] }
 0x71c   : > { %7878 = vmatprep.subr.mxu1 %v7094_v3  ;;  %v7176_v3 = vld [vmem:[#allocation2 + $0x8b8] sm:$0xff] }
 0x71d   : > { %7879 = vmatpush1.msra.mxu1 %v7093_v46  ;;  %v7175_v46 = vld [vmem:[#allocation2 + $0x8b0] sm:$0xff] }
 0x71e   : > { %7880 = vmatprep.subr.mxu1 %v7092_v23  ;;  %v7174_v23 = vld [vmem:[#allocation2 + $0x8a8] sm:$0xff] }
 0x71f   : > { %7881 = vmatpush1.msra.mxu1 %v7091_v25  ;;  %v6881_v25 = vld [vmem:[%s16312_s5 + $0x240] sm:$0x1] }
 0x720   : > { %7882 = vmatprep.subr.mxu1 %v7090_v56  ;;  %v7173_v56 = vld [vmem:[#allocation2 + $0x8a0] sm:$0xff] }
 0x721   : > { %7883 = vmatpush1.msra.mxu1 %v7089_v34  ;;  %v6818_v34 = vld [vmem:[%s16312_s5 + $0x48] sm:$0xff] }
 0x722   : > { %7884 = vmatprep.subr.mxu1 %v7152_v28  ;;  %v7172_v28 = vld [vmem:[#allocation2 + $0x898] sm:$0xff] }
 0x723   : > { %7885 = vmatpush2.msra.mxu1 %v7151_v58  ;;  %v7171_v58 = vld [vmem:[#allocation2 + $0x890] sm:$0xff] }
 0x724   : > { %7886 = vmatprep.subr.mxu1 %v7150_v63  ;;  %v7170_v63 = vld [vmem:[#allocation2 + $0x888] sm:$0xff] }
 0x725   : > { %7887 = vmatpush2.msra.mxu1 %v7149_v20  ;;  %v7169_v20 = vld [vmem:[#allocation2 + $0x880] sm:$0xff] }
 0x726   : > { %7888 = vmatprep.subr.mxu1 %v7148_v43  ;;  %v7168_v43 = vld [vmem:[#allocation2 + $0x878] sm:$0xff] }
 0x727   : > { %7889 = vmatpush2.msra.mxu1 %v7147_v32  ;;  %v7167_v32 = vld [vmem:[#allocation2 + $0x870] sm:$0xff] }
 0x728   : > { %7890 = vmatprep.subr.mxu1 %v7146_v2  ;;  %v7166_v2 = vld [vmem:[#allocation2 + $0x868] sm:$0xff] }
 0x729   : > { %7891 = vmatpush2.msra.mxu1 %v7145_v19  ;;  %v7165_v19 = vld [vmem:[#allocation2 + $0x860] sm:$0xff] }
 0x72a   : > { %7892 = vmatprep.subr.mxu1 %v7144_v57  ;;  %v7164_v57 = vld [vmem:[#allocation2 + $0x858] sm:$0xff] }
 0x72b   : > { %7893 = vmatpush2.msra.mxu1 %v7143_v8  ;;  %v7163_v8 = vld [vmem:[#allocation2 + $0x850] sm:$0xff] }
 0x72c   : > { %7894 = vmatprep.subr.mxu1 %v7142_v30  ;;  %v7162_v30 = vld [vmem:[#allocation2 + $0x848] sm:$0xff] }
 0x72d   : > { %7895 = vmatpush2.msra.mxu1 %v7141_v27  ;;  %v7161_v27 = vld [vmem:[#allocation2 + $0x840] sm:$0xff] }
 0x72e   : > { %7896 = vmatprep.subr.mxu1 %v7140_v47  ;;  %v7160_v47 = vld [vmem:[#allocation2 + $0x838] sm:$0xff] }
 0x72f   : > { %7897 = vmatpush2.msra.mxu1 %v7139_v61  ;;  %v7159_v61 = vld [vmem:[#allocation2 + $0x830] sm:$0xff] }
 0x730   : > { %7898 = vmatprep.subr.mxu1 %v7138_v21  ;;  %v7158_v21 = vld [vmem:[#allocation2 + $0x828] sm:$0xff] }
 0x731   : > { %7899 = vmatpush2.msra.mxu1 %v7137_v18  ;;  %v7157_v18 = vld [vmem:[#allocation2 + $0x820] sm:$0xff] }
 0x732   : > { %7900 = vmatprep.subr.mxu1 %v7136_v48  ;;  %v7155_v48 = vld [vmem:[#allocation2 + $0x810] sm:$0xff] }
 0x733   : > { %7901 = vmatpush2.msra.mxu1 %v7135_v22  ;;  %v7153_v22 = vld [vmem:[#allocation2 + $0x800] sm:$0xff] }
 0x734   : > { %7902 = vmatprep.subr.mxu1 %v7134_v6  ;;  %v7216_v6 = vld [vmem:[#allocation2 + $0x9f8] sm:$0xff] }
 0x735   : > { %7903 = vmatpush2.msra.mxu1 %v7133_v11  ;;  %v7215_v11 = vld [vmem:[#allocation2 + $0x9f0] sm:$0xff] }
 0x736   : > { %7904 = vmatprep.subr.mxu1 %v7132_v54  ;;  %v7214_v54 = vld [vmem:[#allocation2 + $0x9e8] sm:$0xff] }
 0x737   : > { %7905 = vmatpush2.msra.mxu1 %v7131_v41 }
 0x738   : > { %7906 = vmatprep.subr.mxu1 %v7130_v26  ;;  %v7213_v26 = vld [vmem:[#allocation2 + $0x9e0] sm:$0xff] }
 0x739   : > { %7907 = vmatpush2.msra.mxu1 %v7129_v14  ;;  %v7212_v14 = vld [vmem:[#allocation2 + $0x9d8] sm:$0xff] }
 0x73a   : > { %7908 = vmatprep.subr.mxu1 %v7128_v10  ;;  %v7211_v10 = vld [vmem:[#allocation2 + $0x9d0] sm:$0xff] }
 0x73b   : > { %7909 = vmatpush2.msra.mxu1 %v7127_v13  ;;  %v7210_v13 = vld [vmem:[#allocation2 + $0x9c8] sm:$0xff] }
 0x73c   : > { %7910 = vmatprep.subr.mxu1 %v7126_v33 }
 0x73d   : > { %7911 = vmatpush2.msra.mxu1 %v7125_v35  ;;  %v7209_v35 = vld [vmem:[#allocation2 + $0x9c0] sm:$0xff] }
 0x73e   : > { %7912 = vmatprep.subr.mxu1 %v7124_v0  ;;  %v7208_v0 = vld [vmem:[#allocation2 + $0x9b8] sm:$0xff] }
 0x73f   : > { %7913 = vmatpush2.msra.mxu1 %v7123_v29  ;;  %v8841_v29 = vld [vmem:[%s16313_s6 + $0x8a8] sm:$0xff] }
 0x740   : > { %7914 = vmatprep.subr.mxu1 %v7122_v42  ;;  %v7207_v42 = vld [vmem:[#allocation2 + $0x9b0] sm:$0xff]  ;;  %8976 = vmatprep.subr.mxu0 %v8841_v29 }
 0x741   : > { %7915 = vmatpush2.msra.mxu1 %v7121_v50  ;;  %v8840_v50 = vld [vmem:[%s16313_s6 + $0x8a0] sm:$0xff] }
 0x742   : > { %7917 = vmatmul.mubr.f32.vlgmr.msra.gmra.mxu1 %v6815_v17  ;;  %7941 = vmatprep.subr.mxu1 %v7184_v37  ;;  %v14813_v41 = vpop.f32.mrf.mxu1  ;;  %v7205_v37 = vld [vmem:[#allocation2 + $0x9a0] sm:$0xff] }
 0x743   : > { %7942 = vmatpush1.msra.mxu1 %v7183_v44  ;;  %7922 = vmatprep.mubr.f32.mxu1 %v6838_v36  ;;  %v7206_v36 = vld [vmem:[#allocation2 + $0x9a8] sm:$0xff]  ;;  %v7204_v44 = vld [vmem:[#allocation2 + $0x998] sm:$0xff] }
 0x744   : > { %7943 = vmatprep.subr.mxu1 %v7182_v31  ;;  %v14815_v33 = vpop.f32.mrf.mxu1  ;;  %8977 = vmatpush2.msra.mxu0 %v8840_v50  ;;  %v7203_v31 = vld [vmem:[#allocation2 + $0x990] sm:$0xff]  ;;  %v7238_v50 = vld [vmem:[#allocation2 + $0xaa8] sm:$0xff] }
 0x745   : > { %7944 = vmatpush1.msra.mxu1 %v7181_v38  ;;  %v7202_v38 = vld [vmem:[#allocation2 + $0x988] sm:$0xff] }
 0x746   : > { %7923 = vmatmul.mubr.f32.gmra.mxu1 %v6837_v45  ;;  %7945 = vmatprep.subr.mxu1 %v7180_v4  ;;  %v14820_v17 = vpop.f32.mrf.mxu1  ;;  %v7200_v4 = vld [vmem:[#allocation2 + $0x978] sm:$0xff] }
 0x747   : > { %7946 = vmatpush1.msra.mxu1 %v7179_v60  ;;  %7928 = vmatprep.mubr.f32.mxu1 %v6860_v40  ;;  %v7201_v40 = vld [vmem:[#allocation2 + $0x980] sm:$0xff]  ;;  %v7199_v60 = vld [vmem:[#allocation2 + $0x970] sm:$0xff] }
 0x748   : > { %7947 = vmatprep.subr.mxu1 %v7178_v24  ;;  %v14825_v45 = vpop.f32.mrf.mxu1 }
 0x749   : > { %7948 = vmatpush1.msra.mxu1 %v7177_v5  ;;  %v7197_v5 = vld [vmem:[#allocation2 + $0x960] sm:$0xff] }
 0x74a   : > { %7929 = vmatmul.mubr.f32.gmra.mxu1 %v6859_v12  ;;  %7949 = vmatprep.subr.mxu1 %v7176_v3  ;;  %v14827_v24 = vpop.f32.mrf.mxu1  ;;  %v7198_v12 = vld [vmem:[#allocation2 + $0x968] sm:$0xff]  ;;  %v7195_v3 = vld [vmem:[#allocation2 + $0x950] sm:$0xff] }
 0x74b   : > { %7950 = vmatpush1.msra.mxu1 %v7175_v46  ;;  %7934 = vmatprep.mubr.f32.mxu1 %v6882_v39  ;;  %v7196_v39 = vld [vmem:[#allocation2 + $0x958] sm:$0xff] }
 0x74c   : > { %7951 = vmatprep.subr.mxu1 %v7174_v23  ;;  %v14829_v46 = vpop.f32.mrf.mxu1  ;;  %v7194_v23 = vld [vmem:[#allocation2 + $0x948] sm:$0xff] }
 0x74d   : > { %7952 = vmatpush1.msra.mxu1 %v7173_v56  ;;  %v7192_v56 = vld [vmem:[#allocation2 + $0x938] sm:$0xff] }
 0x74e   : > { %7935 = vmatmul.mubr.f32.gmra.mxu1 %v6881_v25  ;;  %7953 = vmatprep.subr.mxu1 %v7172_v28  ;;  %v7193_v25 = vld [vmem:[#allocation2 + $0x940] sm:$0xff]  ;;  %v14831_v28 = vpop.f32.mrf.mxu1 }
 0x74f   : > { %7954 = vmatpush1.msra.mxu1 %v7171_v58  ;;  %8005 = vmatprep.mubr.f32.mxu1 %v6818_v34  ;;  %v7191_v34 = vld [vmem:[#allocation2 + $0x930] sm:$0xff]  ;;  %v7190_v58 = vld [vmem:[#allocation2 + $0x928] sm:$0xff] }
 0x750   : > { %7955 = vmatprep.subr.mxu1 %v7170_v63  ;;  %v7189_v63 = vld [vmem:[#allocation2 + $0x920] sm:$0xff] }
 0x751   : > { %7956 = vmatpush1.msra.mxu1 %v7169_v20  ;;  %v7188_v20 = vld [vmem:[#allocation2 + $0x918] sm:$0xff] }
 0x752   : > { %7957 = vmatprep.subr.mxu1 %v7168_v43  ;;  %v14833_v43 = vpop.f32.mrf.mxu1 }
 0x753   : > { %7958 = vmatpush1.msra.mxu1 %v7167_v32  ;;  %v7187_v32 = vld [vmem:[#allocation2 + $0x910] sm:$0xff] }
 0x754   : > { %7959 = vmatprep.subr.mxu1 %v7166_v2  ;;  %v7186_v2 = vld [vmem:[#allocation2 + $0x908] sm:$0xff] }
 0x755   : > { %7960 = vmatpush1.msra.mxu1 %v7165_v19  ;;  %v6817_v19 = vld [vmem:[%s16312_s5 + $0x40] sm:$0xff] }
 0x756   : > { %7961 = vmatprep.subr.mxu1 %v7164_v57  ;;  %v7185_v57 = vld [vmem:[#allocation2 + $0x900] sm:$0xff] }
 0x757   : > { %7962 = vmatpush1.msra.mxu1 %v7163_v8  ;;  %v6840_v8 = vld [vmem:[%s16312_s5 + $0xf8] sm:$0xff] }
 0x758   : > { %7963 = vmatprep.subr.mxu1 %v7162_v30  ;;  %v7248_v30 = vld [vmem:[#allocation2 + $0xaf8] sm:$0xff] }
 0x759   : > { %7964 = vmatpush1.msra.mxu1 %v7161_v27 }
 0x75a   : > { %7965 = vmatprep.subr.mxu1 %v7160_v47  ;;  %v7247_v47 = vld [vmem:[#allocation2 + $0xaf0] sm:$0xff] }
 0x75b   : > { %7966 = vmatpush1.msra.mxu1 %v7159_v61 }
 0x75c   : > { %7967 = vmatprep.subr.mxu1 %v7158_v21  ;;  %v7246_v21 = vld [vmem:[#allocation2 + $0xae8] sm:$0xff] }
 0x75d   : > { %7968 = vmatpush1.msra.mxu1 %v7157_v18  ;;  %v6839_v18 = vld [vmem:[%s16312_s5 + $0xf0] sm:$0xff] }
 0x75e   : > { %7969 = vmatprep.subr.mxu1 %v7156_v52 }
 0x75f   : > { %7970 = vmatpush1.msra.mxu1 %v7155_v48  ;;  %v7245_v48 = vld [vmem:[#allocation2 + $0xae0] sm:$0xff] }
 0x760   : > { %7971 = vmatprep.subr.mxu1 %v7154_v16  ;;  %v6862_v16 = vld [vmem:[%s16312_s5 + $0x1a8] sm:$0xff] }
 0x761   : > { %7972 = vmatpush1.msra.mxu1 %v7153_v22 }
 0x762   : > { %7973 = vmatprep.subr.mxu1 %v7216_v6  ;;  %v7244_v6 = vld [vmem:[#allocation2 + $0xad8] sm:$0xff] }
 0x763   : > { %7974 = vmatpush2.msra.mxu1 %v7215_v11 }
 0x764   : > { %7975 = vmatprep.subr.mxu1 %v7214_v54  ;;  %v7243_v54 = vld [vmem:[#allocation2 + $0xad0] sm:$0xff] }
 0x765   : > { %7976 = vmatpush2.msra.mxu1 %v7213_v26  ;;  %v7242_v26 = vld [vmem:[#allocation2 + $0xac8] sm:$0xff] }
 0x766   : > { %7977 = vmatprep.subr.mxu1 %v7212_v14  ;;  %v6861_v14 = vld [vmem:[%s16312_s5 + $0x1a0] sm:$0xff] }
 0x767   : > { %7978 = vmatpush2.msra.mxu1 %v7211_v10 }
 0x768   : > { %7979 = vmatprep.subr.mxu1 %v7210_v13  ;;  %v7241_v13 = vld [vmem:[#allocation2 + $0xac0] sm:$0xff] }
 0x769   : > { %7980 = vmatpush2.msra.mxu1 %v7209_v35 }
 0x76a   : > { %7981 = vmatprep.subr.mxu1 %v7208_v0  ;;  %v7240_v0 = vld [vmem:[#allocation2 + $0xab8] sm:$0xff] }
 0x76b   : > { %7982 = vmatpush2.msra.mxu1 %v7207_v42  ;;  %v7239_v42 = vld [vmem:[#allocation2 + $0xab0] sm:$0xff] }
 0x76c   : > { %7983 = vmatprep.subr.mxu1 %v7206_v36  ;;  %v6883_v36 = vld [vmem:[%s16312_s5 + $0x250] sm:$0x1] }
 0x76d   : > { %7984 = vmatpush2.msra.mxu1 %v7205_v37 }
 0x76e   : > { %7985 = vmatprep.subr.mxu1 %v7204_v44  ;;  %v7237_v44 = vld [vmem:[#allocation2 + $0xaa0] sm:$0xff] }
 0x76f   : > { %7986 = vmatpush2.msra.mxu1 %v7203_v31  ;;  %v6820_v31 = vld [vmem:[%s16312_s5 + $0x58] sm:$0xff] }
 0x770   : > { %7987 = vmatprep.subr.mxu1 %v7202_v38  ;;  %v7236_v38 = vld [vmem:[#allocation2 + $0xa98] sm:$0xff] }
 0x771   : > { %7988 = vmatpush2.msra.mxu1 %v7201_v40 }
 0x772   : > { %7989 = vmatprep.subr.mxu1 %v7200_v4  ;;  %v7235_v4 = vld [vmem:[#allocation2 + $0xa90] sm:$0xff] }
 0x773   : > { %7990 = vmatpush2.msra.mxu1 %v7199_v60 }
 0x774   : > { %7991 = vmatprep.subr.mxu1 %v7198_v12 }
 0x775   : > { %7992 = vmatpush2.msra.mxu1 %v7197_v5  ;;  %v7233_v5 = vld [vmem:[#allocation2 + $0xa80] sm:$0xff] }
 0x776   : > { %7993 = vmatprep.subr.mxu1 %v7196_v39 }
 0x777   : > { %7994 = vmatpush2.msra.mxu1 %v7195_v3  ;;  %v7232_v3 = vld [vmem:[#allocation2 + $0xa78] sm:$0xff] }
 0x778   : > { %7995 = vmatprep.subr.mxu1 %v7194_v23  ;;  %v7230_v23 = vld [vmem:[#allocation2 + $0xa68] sm:$0xff] }
 0x779   : > { %7996 = vmatpush2.msra.mxu1 %v7193_v25  ;;  %v7229_v25 = vld [vmem:[#allocation2 + $0xa60] sm:$0xff] }
 0x77a   : > { %7997 = vmatprep.subr.mxu1 %v7192_v56 }
 0x77b   : > { %7998 = vmatpush2.msra.mxu1 %v7191_v34  ;;  %v7228_v34 = vld [vmem:[#allocation2 + $0xa58] sm:$0xff] }
 0x77c   : > { %7999 = vmatprep.subr.mxu1 %v7190_v58  ;;  %v7227_v58 = vld [vmem:[#allocation2 + $0xa50] sm:$0xff] }
 0x77d   : > { %8000 = vmatpush2.msra.mxu1 %v7189_v63  ;;  %v7226_v63 = vld [vmem:[#allocation2 + $0xa48] sm:$0xff] }
 0x77e   : > { %8001 = vmatprep.subr.mxu1 %v7188_v20 }
 0x77f   : > { %8002 = vmatpush2.msra.mxu1 %v7187_v32  ;;  %v7224_v32 = vld [vmem:[#allocation2 + $0xa38] sm:$0xff] }
 0x780   : > { %8003 = vmatprep.subr.mxu1 %v7186_v2 }
 0x781   : > { %8004 = vmatpush2.msra.mxu1 %v7185_v57  ;;  %v7222_v57 = vld [vmem:[#allocation2 + $0xa28] sm:$0xff] }
 0x782   : > { %v7740_v27 = vpop.f32.mrf.mxu1  ;;  %8006 = vmatmul.mubr.f32.vlgmr.msra.gmra.mxu1 %v6817_v19  ;;  %8030 = vmatprep.subr.mxu1 %v7248_v30  ;;  %v7223_v19 = vld [vmem:[#allocation2 + $0xa30] sm:$0xff] }
 0x783   : > { %v14842_v61 = vadd.f32 %v7740_v27, %v14813_v41  ;;  %8031 = vmatpush1.msra.mxu1 %v7247_v47  ;;  %8011 = vmatprep.mubr.f32.mxu1 %v6840_v8  ;;  %v7221_v8 = vld [vmem:[#allocation2 + $0xa20] sm:$0xff]  ;;  %v7220_v27 = vld [vmem:[#allocation2 + $0xa18] sm:$0xff]  ;;  %v7219_v47 = vld [vmem:[#allocation2 + $0xa10] sm:$0xff] }
 0x784   : > { %v7742_v52 = vpop.f32.mrf.mxu1  ;;  %8032 = vmatprep.subr.mxu1 %v7246_v21 }
 0x785   : > { %v14851_v22 = vadd.f32 %v7742_v52, %v14815_v33  ;;  %8033 = vmatpush1.msra.mxu1 %v7245_v48  ;;  %v6884_v33 = vld [vmem:[%s16312_s5 + $0x258] sm:$0x1]  ;;  %v7217_v52 = vld [vmem:[#allocation2 + $0xa00] sm:$0xff] }
 0x786   : > { %v7746_v11 = vpop.f32.mrf.mxu1  ;;  %8012 = vmatmul.mubr.f32.gmra.mxu1 %v6839_v18  ;;  %8034 = vmatprep.subr.mxu1 %v7244_v6  ;;  %v7218_v18 = vld [vmem:[#allocation2 + $0xa08] sm:$0xff] }
 0x787   : > { %v14854_v41 = vadd.f32 %v7746_v11, %v14820_v17  ;;  %8035 = vmatpush1.msra.mxu1 %v7243_v54  ;;  %8017 = vmatprep.mubr.f32.mxu1 %v6862_v16  ;;  %v7280_v16 = vld [vmem:[#allocation2 + $0xbf8] sm:$0xff]  ;;  %v8829_v6 = vld [vmem:[%s16313_s6 + $0x848] sm:$0xff]  ;;  %v7279_v11 = vld [vmem:[#allocation2 + $0xbf0] sm:$0xff] }
 0x788   : > { %v7748_v10 = vpop.f32.mrf.mxu1  ;;  %8036 = vmatprep.subr.mxu1 %v7242_v26  ;;  %8978 = vmatprep.subr.mxu0 %v8829_v6  ;;  %v8828_v54 = vld [vmem:[%s16313_s6 + $0x840] sm:$0xff]  ;;  %v7278_v26 = vld [vmem:[#allocation2 + $0xbe8] sm:$0xff]  ;;  %v7307_v6 = vld [vmem:[#allocation2 + $0xcd0] sm:$0xff] }
 0x789   : > { %v14863_v35 = vadd.f32 %v7748_v10, %v14825_v45  ;;  %8037 = vmatpush1.msra.mxu1 %v7241_v13  ;;  %8979 = vmatpush2.msra.mxu0 %v8828_v54  ;;  %v7276_v10 = vld [vmem:[#allocation2 + $0xbd8] sm:$0xff]  ;;  %v7275_v13 = vld [vmem:[#allocation2 + $0xbd0] sm:$0xff]  ;;  %v7306_v54 = vld [vmem:[#allocation2 + $0xcc8] sm:$0xff] }
 0x78a   : > { %v7752_v29 = vpop.f32.mrf.mxu1  ;;  %8018 = vmatmul.mubr.f32.gmra.mxu1 %v6861_v14  ;;  %8038 = vmatprep.subr.mxu1 %v7240_v0  ;;  %v7277_v14 = vld [vmem:[#allocation2 + $0xbe0] sm:$0xff] }
 0x78b   : > { %v14866_v17 = vadd.f32 %v7752_v29, %v14827_v24  ;;  %8039 = vmatpush1.msra.mxu1 %v7239_v42  ;;  %8023 = vmatprep.mubr.f32.mxu1 %v6884_v33  ;;  %v7234_v24 = vld [vmem:[#allocation2 + $0xa88] sm:$0xff]  ;;  %v7273_v0 = vld [vmem:[#allocation2 + $0xbc0] sm:$0xff]  ;;  %v7272_v29 = vld [vmem:[#allocation2 + $0xbb8] sm:$0xff] }
 0x78c   : > { %v7754_v37 = vpop.f32.mrf.mxu1  ;;  %8040 = vmatprep.subr.mxu1 %v7238_v50  ;;  %v7274_v33 = vld [vmem:[#allocation2 + $0xbc8] sm:$0xff]  ;;  %v7271_v42 = vld [vmem:[#allocation2 + $0xbb0] sm:$0xff] }
 0x78d   : > { %v14875_v45 = vadd.f32 %v7754_v37, %v14829_v46  ;;  %8041 = vmatpush1.msra.mxu1 %v7237_v44  ;;  %v7231_v46 = vld [vmem:[#allocation2 + $0xa70] sm:$0xff]  ;;  %v7270_v50 = vld [vmem:[#allocation2 + $0xba8] sm:$0xff]  ;;  %v7268_v37 = vld [vmem:[#allocation2 + $0xb98] sm:$0xff] }
 0x78e   : > { %v7758_v40 = vpop.f32.mrf.mxu1  ;;  %8024 = vmatmul.mubr.f32.gmra.mxu1 %v6883_v36  ;;  %8042 = vmatprep.subr.mxu1 %v7236_v38  ;;  %v7269_v36 = vld [vmem:[#allocation2 + $0xba0] sm:$0xff]  ;;  %v7267_v44 = vld [vmem:[#allocation2 + $0xb90] sm:$0xff] }
 0x78f   : > { %v14878_v60 = vadd.f32 %v7758_v40, %v14831_v28  ;;  %8043 = vmatpush1.msra.mxu1 %v7235_v4  ;;  %8094 = vmatprep.mubr.f32.mxu1 %v6820_v31  ;;  %v7266_v31 = vld [vmem:[#allocation2 + $0xb88] sm:$0xff]  ;;  %v7265_v38 = vld [vmem:[#allocation2 + $0xb80] sm:$0xff]  ;;  %v7264_v40 = vld [vmem:[#allocation2 + $0xb78] sm:$0xff] }
 0x790   : > { %v7760_v12 = vpop.f32.mrf.mxu1  ;;  %8044 = vmatprep.subr.mxu1 %v7234_v24  ;;  %v7263_v4 = vld [vmem:[#allocation2 + $0xb70] sm:$0xff]  ;;  %v7262_v24 = vld [vmem:[#allocation2 + $0xb68] sm:$0xff] }
 0x791   : > { %v14881_v39 = vadd.f32 %v7760_v12, %v14833_v43  ;;  %8045 = vmatpush1.msra.mxu1 %v7233_v5  ;;  %v7225_v43 = vld [vmem:[#allocation2 + $0xa40] sm:$0xff]  ;;  %v7260_v5 = vld [vmem:[#allocation2 + $0xb58] sm:$0xff] }
 0x792   : > { %8046 = vmatprep.subr.mxu1 %v7232_v3  ;;  %v7261_v12 = vld [vmem:[#allocation2 + $0xb60] sm:$0xff]  ;;  %v7259_v3 = vld [vmem:[#allocation2 + $0xb50] sm:$0xff] }
 0x793   : > { %8047 = vmatpush1.msra.mxu1 %v7231_v46  ;;  %v7258_v46 = vld [vmem:[#allocation2 + $0xb48] sm:$0xff] }
 0x794   : > { %8048 = vmatprep.subr.mxu1 %v7230_v23  ;;  %v7257_v23 = vld [vmem:[#allocation2 + $0xb40] sm:$0xff] }
 0x795   : > { %v6782_v56 = vpop.xlane.xlu0 %6781  ;;  %8049 = vmatpush1.msra.mxu1 %v7229_v25  ;;  %v7256_v25 = vld [vmem:[#allocation2 + $0xb38] sm:$0xff] }
 0x796   : > { %v6783_v28 = vrot.slane %v6782_v56, 4  ;;  %8050 = vmatprep.subr.mxu1 %v7228_v34  ;;  %v7254_v34 = vld [vmem:[#allocation2 + $0xb28] sm:$0xff] }
 0x797   : > { %8051 = vmatpush1.msra.mxu1 %v7227_v58  ;;  %v7252_v58 = vld [vmem:[#allocation2 + $0xb18] sm:$0xff] }
 0x798   : > { %v6784_v20 = vadd.f32 %v6783_v28, %v6782_v56  ;;  %8052 = vmatprep.subr.mxu1 %v7226_v63  ;;  %v7255_v56 = vld [vmem:[#allocation2 + $0xb30] sm:$0xff]  ;;  %v7253_v28 = vld [vmem:[#allocation2 + $0xb20] sm:$0xff] }
 0x799   : > { %8053 = vmatpush1.msra.mxu1 %v7225_v43  ;;  %v7251_v63 = vld [vmem:[#allocation2 + $0xb10] sm:$0xff] }
 0x79a   : > { %v6785_v2 = vrot.slane %v6784_v20, 2  ;;  %8054 = vmatprep.subr.mxu1 %v7224_v32  ;;  %v6819_v43 = vld [vmem:[%s16312_s5 + $0x50] sm:$0xff]  ;;  %v7249_v32 = vld [vmem:[#allocation2 + $0xb00] sm:$0xff] }
 0x79b   : > { %8055 = vmatpush1.msra.mxu1 %v7223_v19  ;;  %v7312_v19 = vld [vmem:[#allocation2 + $0xcf8] sm:$0xff] }
 0x79c   : > { %8056 = vmatprep.subr.mxu1 %v7222_v57  ;;  %v6786_v30 = vadd.f32 %v6785_v2, %v6784_v20  ;;  %v7250_v20 = vld [vmem:[#allocation2 + $0xb08] sm:$0xff] }
 0x79d   : > { %8057 = vmatpush1.msra.mxu1 %v7221_v8  ;;  %v6842_v2 = vld [vmem:[%s16312_s5 + $0x108] sm:$0xff]  ;;  %v7311_v8 = vld [vmem:[#allocation2 + $0xcf0] sm:$0xff] }
 0x79e   : > { %8058 = vmatprep.subr.mxu1 %v7220_v27  ;;  %v6787_v21 = vrot.slane %v6786_v30, 1  ;;  %v7310_v27 = vld [vmem:[#allocation2 + $0xce8] sm:$0xff] }
 0x79f   : > { %8059 = vmatpush1.msra.mxu1 %v7219_v47  ;;  %v6841_v47 = vld [vmem:[%s16312_s5 + $0x100] sm:$0xff] }
 0x7a0   : > { %8060 = vmatprep.subr.mxu1 %v7218_v18  ;;  %v6788_v48 = vadd.f32 %v6787_v21, %v6786_v30  ;;  %v7309_v18 = vld [vmem:[#allocation2 + $0xce0] sm:$0xff] }
 0x7a1   : > { %8061 = vmatpush1.msra.mxu1 %v7217_v52  ;;  %v6864_v52 = vld [vmem:[%s16312_s5 + $0x1b8] sm:$0xff] }
 0x7a2   : > { %10228 = vpush %v6788_v48  ;;  %8062 = vmatprep.subr.mxu1 %v7280_v16 }
 0x7a3   : > { %8063 = vmatpush2.msra.mxu1 %v7279_v11 }
 0x7a4   : > { %8064 = vmatprep.subr.mxu1 %v7278_v26  ;;  %v6863_v26 = vld [vmem:[%s16312_s5 + $0x1b0] sm:$0xff] }
 0x7a5   : > { %8065 = vmatpush2.msra.mxu1 %v7277_v14 }
 0x7a6   : > { %8066 = vmatprep.subr.mxu1 %v7276_v10  ;;  %v6886_v10 = vld [vmem:[%s16312_s5 + $0x268] sm:$0x1] }
 0x7a7   : > { %8067 = vmatpush2.msra.mxu1 %v7275_v13 }
 0x7a8   : > { %8068 = vmatprep.subr.mxu1 %v7274_v33 }
 0x7a9   : > { %8069 = vmatpush2.msra.mxu1 %v7273_v0  ;;  %v7303_v0 = vld [vmem:[#allocation2 + $0xcb0] sm:$0xff] }
 0x7aa   : > { %8070 = vmatprep.subr.mxu1 %v7272_v29 }
 0x7ab   : > { %8071 = vmatpush2.msra.mxu1 %v7271_v42  ;;  %v7302_v42 = vld [vmem:[#allocation2 + $0xca8] sm:$0xff] }
 0x7ac   : > { %8072 = vmatprep.subr.mxu1 %v7270_v50  ;;  %v6885_v50 = vld [vmem:[%s16312_s5 + $0x260] sm:$0x1] }
 0x7ad   : > { %8073 = vmatpush2.msra.mxu1 %v7269_v36 }
 0x7ae   : > { %8074 = vmatprep.subr.mxu1 %v7268_v37  ;;  %v6822_v37 = vld [vmem:[%s16312_s5 + $0x68] sm:$0xff] }
 0x7af   : > { %8075 = vmatpush2.msra.mxu1 %v7267_v44 }
 0x7b0   : > { %8076 = vmatprep.subr.mxu1 %v7266_v31 }
 0x7b1   : > { %8077 = vmatpush2.msra.mxu1 %v7265_v38  ;;  %v7299_v38 = vld [vmem:[#allocation2 + $0xc90] sm:$0xff] }
 0x7b2   : > { %8078 = vmatprep.subr.mxu1 %v7264_v40 }
 0x7b3   : > { %8079 = vmatpush2.msra.mxu1 %v7263_v4  ;;  %v7298_v4 = vld [vmem:[#allocation2 + $0xc88] sm:$0xff] }
 0x7b4   : > { %8080 = vmatprep.subr.mxu1 %v7262_v24 }
 0x7b5   : > { %8081 = vmatpush2.msra.mxu1 %v7261_v12  ;;  %v7297_v12 = vld [vmem:[#allocation2 + $0xc80] sm:$0xff] }
 0x7b6   : > { %8082 = vmatprep.subr.mxu1 %v7260_v5 }
 0x7b7   : > { %8083 = vmatpush2.msra.mxu1 %v7259_v3  ;;  %v7295_v3 = vld [vmem:[#allocation2 + $0xc70] sm:$0xff] }
 0x7b8   : > { %8084 = vmatprep.subr.mxu1 %v7258_v46  ;;  %v7294_v46 = vld [vmem:[#allocation2 + $0xc68] sm:$0xff] }
 0x7b9   : > { %8085 = vmatpush2.msra.mxu1 %v7257_v23  ;;  %v7292_v23 = vld [vmem:[#allocation2 + $0xc58] sm:$0xff] }
 0x7ba   : > { %8086 = vmatprep.subr.mxu1 %v7256_v25  ;;  %v7291_v25 = vld [vmem:[#allocation2 + $0xc50] sm:$0xff] }
 0x7bb   : > { %8087 = vmatpush2.msra.mxu1 %v7255_v56 }
 0x7bc   : > { %8088 = vmatprep.subr.mxu1 %v7254_v34  ;;  %v7290_v34 = vld [vmem:[#allocation2 + $0xc48] sm:$0xff] }
 0x7bd   : > { %8089 = vmatpush2.msra.mxu1 %v7253_v28  ;;  %v7288_v28 = vld [vmem:[#allocation2 + $0xc38] sm:$0xff] }
 0x7be   : > { %8090 = vmatprep.subr.mxu1 %v7252_v58  ;;  %v8817_v58 = vld [vmem:[%s16313_s6 + $0x7e8] sm:$0xff] }
 0x7bf   : > { %8091 = vmatpush2.msra.mxu1 %v7251_v63  ;;  %v7287_v63 = vld [vmem:[#allocation2 + $0xc30] sm:$0xff]  ;;  %8980 = vmatprep.subr.mxu0 %v8817_v58 }
 0x7c0   : > { %8092 = vmatprep.subr.mxu1 %v7250_v20  ;;  %v8816_v20 = vld [vmem:[%s16313_s6 + $0x7e0] sm:$0xff] }
 0x7c1   : > { %8093 = vmatpush2.msra.mxu1 %v7249_v32  ;;  %8981 = vmatpush2.msra.mxu0 %v8816_v20  ;;  %v7285_v32 = vld [vmem:[#allocation2 + $0xc20] sm:$0xff] }
 0x7c2   : > { %v7829_v57 = vpop.f32.mrf.mxu1  ;;  %8095 = vmatmul.mubr.f32.vlgmr.msra.gmra.mxu1 %v6819_v43  ;;  %8119 = vmatprep.subr.mxu1 %v7312_v19  ;;  %v7286_v43 = vld [vmem:[#allocation2 + $0xc28] sm:$0xff]  ;;  %v7283_v19 = vld [vmem:[#allocation2 + $0xc10] sm:$0xff] }
 0x7c3   : > { %v14896_v30 = vadd.f32 %v7829_v57, %v14842_v61  ;;  %8120 = vmatpush1.msra.mxu1 %v7311_v8  ;;  %8100 = vmatprep.mubr.f32.mxu1 %v6842_v2  ;;  %v7308_v61 = vld [vmem:[#allocation2 + $0xcd8] sm:$0xff]  ;;  %v7282_v57 = vld [vmem:[#allocation2 + $0xc08] sm:$0xff]  ;;  %v7281_v8 = vld [vmem:[#allocation2 + $0xc00] sm:$0xff] }
 0x7c4   : > { %v7831_v21 = vpop.f32.mrf.mxu1  ;;  %8121 = vmatprep.subr.mxu1 %v7310_v27  ;;  %v7284_v2 = vld [vmem:[#allocation2 + $0xc18] sm:$0xff] }
 0x7c5   : > { %v14905_v48 = vadd.f32 %v7831_v21, %v14851_v22  ;;  %8122 = vmatpush1.msra.mxu1 %v7309_v18  ;;  %v7305_v22 = vld [vmem:[#allocation2 + $0xcc0] sm:$0xff]  ;;  %v7344_v27 = vld [vmem:[#allocation2 + $0xdf8] sm:$0xff]  ;;  %v7342_v21 = vld [vmem:[#allocation2 + $0xde8] sm:$0xff] }
 0x7c6   : > { %v7835_v16 = vpop.f32.mrf.mxu1  ;;  %8101 = vmatmul.mubr.f32.gmra.mxu1 %v6841_v47  ;;  %8123 = vmatprep.subr.mxu1 %v7308_v61  ;;  %v7343_v47 = vld [vmem:[#allocation2 + $0xdf0] sm:$0xff]  ;;  %v7341_v18 = vld [vmem:[#allocation2 + $0xde0] sm:$0xff]  ;;  %v7340_v61 = vld [vmem:[#allocation2 + $0xdd8] sm:$0xff] }
 0x7c7   : > { %v14908_v11 = vadd.f32 %v7835_v16, %v14854_v41  ;;  %8124 = vmatpush1.msra.mxu1 %v7307_v6  ;;  %8106 = vmatprep.mubr.f32.mxu1 %v6864_v52  ;;  %v7304_v41 = vld [vmem:[#allocation2 + $0xcb8] sm:$0xff]  ;;  %v7339_v16 = vld [vmem:[#allocation2 + $0xdd0] sm:$0xff] }
 0x7c8   : > { %v7837_v14 = vpop.f32.mrf.mxu1  ;;  %8125 = vmatprep.subr.mxu1 %v7306_v54  ;;  %v7338_v54 = vld [vmem:[#allocation2 + $0xdc8] sm:$0xff] }
 0x7c9   : > { %v14917_v13 = vadd.f32 %v7837_v14, %v14863_v35  ;;  %8126 = vmatpush1.msra.mxu1 %v7305_v22  ;;  %v7301_v35 = vld [vmem:[#allocation2 + $0xca0] sm:$0xff]  ;;  %v7336_v14 = vld [vmem:[#allocation2 + $0xdb8] sm:$0xff]  ;;  %v7335_v22 = vld [vmem:[#allocation2 + $0xdb0] sm:$0xff] }
 0x7ca   : > { %v7841_v33 = vpop.f32.mrf.mxu1  ;;  %8107 = vmatmul.mubr.f32.gmra.mxu1 %v6863_v26  ;;  %8127 = vmatprep.subr.mxu1 %v7304_v41  ;;  %v7337_v26 = vld [vmem:[#allocation2 + $0xdc0] sm:$0xff] }
 0x7cb   : > { %v14920_v29 = vadd.f32 %v7841_v33, %v14866_v17  ;;  %8128 = vmatpush1.msra.mxu1 %v7303_v0  ;;  %8112 = vmatprep.mubr.f32.mxu1 %v6886_v10  ;;  %v7300_v17 = vld [vmem:[#allocation2 + $0xc98] sm:$0xff]  ;;  %v7334_v10 = vld [vmem:[#allocation2 + $0xda8] sm:$0xff]  ;;  %v7333_v41 = vld [vmem:[#allocation2 + $0xda0] sm:$0xff] }
 0x7cc   : > { %v7843_v36 = vpop.f32.mrf.mxu1  ;;  %8129 = vmatprep.subr.mxu1 %v7302_v42  ;;  %v7332_v33 = vld [vmem:[#allocation2 + $0xd98] sm:$0xff]  ;;  %v7331_v0 = vld [vmem:[#allocation2 + $0xd90] sm:$0xff]  ;;  %v7330_v42 = vld [vmem:[#allocation2 + $0xd88] sm:$0xff] }
 0x7cd   : > { %v14931_v44 = vadd.f32 %v7843_v36, %v14875_v45  ;;  %8130 = vmatpush1.msra.mxu1 %v7301_v35  ;;  %v7296_v45 = vld [vmem:[#allocation2 + $0xc78] sm:$0xff]  ;;  %v7327_v35 = vld [vmem:[#allocation2 + $0xd70] sm:$0xff] }
 0x7ce   : > { %v7847_v31 = vpop.f32.mrf.mxu1  ;;  %8113 = vmatmul.mubr.f32.gmra.mxu1 %v6885_v50  ;;  %8131 = vmatprep.subr.mxu1 %v7300_v17  ;;  %v7329_v50 = vld [vmem:[#allocation2 + $0xd80] sm:$0xff]  ;;  %v7328_v36 = vld [vmem:[#allocation2 + $0xd78] sm:$0xff] }
 0x7cf   : > { %v14934_v40 = vadd.f32 %v7847_v31, %v14878_v60  ;;  %8132 = vmatpush1.msra.mxu1 %v7299_v38  ;;  %8183 = vmatprep.mubr.f32.mxu1 %v6822_v37  ;;  %v7293_v60 = vld [vmem:[#allocation2 + $0xc60] sm:$0xff]  ;;  %v7326_v37 = vld [vmem:[#allocation2 + $0xd68] sm:$0xff]  ;;  %v7324_v31 = vld [vmem:[#allocation2 + $0xd58] sm:$0xff] }
 0x7d0   : > { %v7849_v24 = vpop.f32.mrf.mxu1  ;;  %8133 = vmatprep.subr.mxu1 %v7298_v4  ;;  %v7325_v17 = vld [vmem:[#allocation2 + $0xd60] sm:$0xff]  ;;  %v7323_v38 = vld [vmem:[#allocation2 + $0xd50] sm:$0xff]  ;;  %v7322_v4 = vld [vmem:[#allocation2 + $0xd48] sm:$0xff] }
 0x7d1   : > { %v14937_v5 = vadd.f32 %v7849_v24, %v14881_v39  ;;  %8134 = vmatpush1.msra.mxu1 %v7297_v12  ;;  %v7289_v39 = vld [vmem:[#allocation2 + $0xc40] sm:$0xff]  ;;  %v7320_v12 = vld [vmem:[#allocation2 + $0xd38] sm:$0xff] }
 0x7d2   : > { %8135 = vmatprep.subr.mxu1 %v7296_v45  ;;  %v7321_v24 = vld [vmem:[#allocation2 + $0xd40] sm:$0xff]  ;;  %v7319_v45 = vld [vmem:[#allocation2 + $0xd30] sm:$0xff] }
 0x7d3   : > { %s10229_s25 = spop %10228  ;;  %8136 = vmatpush1.msra.mxu1 %v7295_v3  ;;  %v7318_v3 = vld [vmem:[#allocation2 + $0xd28] sm:$0xff] }
 0x7d4   : > { %s6791_s26 = sadd.f32 %s10229_s25, %s14925_s22  ;;  %8137 = vmatprep.subr.mxu1 %v7294_v46  ;;  %v7317_v46 = vld [vmem:[#allocation2 + $0xd20] sm:$0xff] }
 0x7d5   : > { %8138 = vmatpush1.msra.mxu1 %v7293_v60  ;;  %v7316_v60 = vld [vmem:[#allocation2 + $0xd18] sm:$0xff] }
 0x7d6   : > { %s6792_s27 = sand.u32 2147483647, %s6791_s26  ;;  %8139 = vmatprep.subr.mxu1 %v7292_v23  ;;  %v7315_v23 = vld [vmem:[#allocation2 + $0xd10] sm:$0xff]  ;;  %s363_s26 = scalar_lea.vmem %s16316_s9, %s16336_s16 }
 0x7d7   : > { %v6793_v56 = vstv %s6792_s27  ;;  %8140 = vmatpush1.msra.mxu1 %v7291_v25  ;;  %v7314_v25 = vld [vmem:[#allocation2 + $0xd08] sm:$0xff] }
 0x7d8   : > { %10247 = vlog2.f32 %v6793_v56  ;;  %8141 = vmatprep.subr.mxu1 %v7290_v34  ;;  %v6821_v56 = vld [vmem:[%s16312_s5 + $0x60] sm:$0xff] }
 0x7d9   : > { %8142 = vmatpush1.msra.mxu1 %v7289_v39  ;;  %v7313_v34 = vld [vmem:[#allocation2 + $0xd00] sm:$0xff]  ;;  %v6844_v39 = vld [vmem:[%s16312_s5 + $0x118] sm:$0xff] }
 0x7da   : > { %8143 = vmatprep.subr.mxu1 %v7288_v28  ;;  %v7376_v28 = vld [vmem:[#allocation2 + $0xef8] sm:$0xff] }
 0x7db   : > { %8144 = vmatpush1.msra.mxu1 %v7287_v63  ;;  %v7375_v63 = vld [vmem:[#allocation2 + $0xef0] sm:$0xff] }
 0x7dc   : > { %8145 = vmatprep.subr.mxu1 %v7286_v43  ;;  %v7374_v43 = vld [vmem:[#allocation2 + $0xee8] sm:$0xff] }
 0x7dd   : > { %8146 = vmatpush1.msra.mxu1 %v7285_v32  ;;  %v6843_v32 = vld [vmem:[%s16312_s5 + $0x110] sm:$0xff] }
 0x7de   : > { %8147 = vmatprep.subr.mxu1 %v7284_v2 }
 0x7df   : > { %8148 = vmatpush1.msra.mxu1 %v7283_v19  ;;  %v7373_v19 = vld [vmem:[#allocation2 + $0xee0] sm:$0xff] }
 0x7e0   : > { %8149 = vmatprep.subr.mxu1 %v7282_v57  ;;  %v6866_v57 = vld [vmem:[%s16312_s5 + $0x1c8] sm:$0xff] }
 0x7e1   : > { %8150 = vmatpush1.msra.mxu1 %v7281_v8 }
 0x7e2   : > { %8151 = vmatprep.subr.mxu1 %v7344_v27 }
 0x7e3   : > { %8152 = vmatpush2.msra.mxu1 %v7343_v47  ;;  %v7371_v47 = vld [vmem:[#allocation2 + $0xed0] sm:$0xff] }
 0x7e4   : > { %8153 = vmatprep.subr.mxu1 %v7342_v21 }
 0x7e5   : > { %v10248_v52 = vpop.eup %10247  ;;  %8154 = vmatpush2.msra.mxu1 %v7341_v18  ;;  %v7370_v18 = vld [vmem:[#allocation2 + $0xec8] sm:$0xff] }
 0x7e6   : > { %8155 = vmatprep.subr.mxu1 %v7340_v61  ;;  %v6795_v6 = vmul.f32 0.6931472, %v10248_v52  ;;  %v6865_v52 = vld [vmem:[%s16312_s5 + $0x1c0] sm:$0xff] }
 0x7e7   : > { %8156 = vmatpush2.msra.mxu1 %v7339_v16  ;;  %v6888_v16 = vld [vmem:[%s16312_s5 + $0x278] sm:$0x1] }
 0x7e8   : > { %10230 = vpush %v6795_v6  ;;  %8157 = vmatprep.subr.mxu1 %v7338_v54 }
 0x7e9   : > { %8158 = vmatpush2.msra.mxu1 %v7337_v26  ;;  %v7367_v26 = vld [vmem:[#allocation2 + $0xeb0] sm:$0xff] }
 0x7ea   : > { %8159 = vmatprep.subr.mxu1 %v7336_v14 }
 0x7eb   : > { %8160 = vmatpush2.msra.mxu1 %v7335_v22  ;;  %v7366_v22 = vld [vmem:[#allocation2 + $0xea8] sm:$0xff] }
 0x7ec   : > { %8161 = vmatprep.subr.mxu1 %v7334_v10  ;;  %v6887_v10 = vld [vmem:[%s16312_s5 + $0x270] sm:$0x1] }
 0x7ed   : > { %8162 = vmatpush2.msra.mxu1 %v7333_v41 }
 0x7ee   : > { %8163 = vmatprep.subr.mxu1 %v7332_v33  ;;  %v6824_v33 = vld [vmem:[%s16312_s5 + $0x78] sm:$0xff] }
 0x7ef   : > { %8164 = vmatpush2.msra.mxu1 %v7331_v0 }
 0x7f0   : > { %8165 = vmatprep.subr.mxu1 %v7330_v42 }
 0x7f1   : > { %8166 = vmatpush2.msra.mxu1 %v7329_v50  ;;  %v7363_v50 = vld [vmem:[#allocation2 + $0xe90] sm:$0xff] }
 0x7f2   : > { %8167 = vmatprep.subr.mxu1 %v7328_v36 }
 0x7f3   : > { %8168 = vmatpush2.msra.mxu1 %v7327_v35  ;;  %v7362_v35 = vld [vmem:[#allocation2 + $0xe88] sm:$0xff] }
 0x7f4   : > { %8169 = vmatprep.subr.mxu1 %v7326_v37 }
 0x7f5   : > { %8170 = vmatpush2.msra.mxu1 %v7325_v17  ;;  %v7361_v17 = vld [vmem:[#allocation2 + $0xe80] sm:$0xff] }
 0x7f6   : > { %8171 = vmatprep.subr.mxu1 %v7324_v31 }
 0x7f7   : > { %8172 = vmatpush2.msra.mxu1 %v7323_v38  ;;  %v7359_v38 = vld [vmem:[#allocation2 + $0xe70] sm:$0xff] }
 0x7f8   : > { %8173 = vmatprep.subr.mxu1 %v7322_v4  ;;  %v8805_v4 = vld [vmem:[%s16313_s6 + $0x788] sm:$0xff] }
 0x7f9   : > { %8174 = vmatpush2.msra.mxu1 %v7321_v24  ;;  %8982 = vmatprep.subr.mxu0 %v8805_v4  ;;  %v8804_v24 = vld [vmem:[%s16313_s6 + $0x780] sm:$0xff] }
 0x7fa   : > { %8175 = vmatprep.subr.mxu1 %v7320_v12  ;;  %v7357_v12 = vld [vmem:[#allocation2 + $0xe60] sm:$0xff]  ;;  %8983 = vmatpush2.msra.mxu0 %v8804_v24  ;;  %v7379_v24 = vld [vmem:[#allocation2 + $0xf10] sm:$0xff] }
 0x7fb   : > { %8176 = vmatpush2.msra.mxu1 %v7319_v45  ;;  %v7355_v45 = vld [vmem:[#allocation2 + $0xe50] sm:$0xff]  ;;  %v7381_v4 = vld [vmem:[#allocation2 + $0xf20] sm:$0xff] }
 0x7fc   : > { %8177 = vmatprep.subr.mxu1 %v7318_v3  ;;  %v7354_v3 = vld [vmem:[#allocation2 + $0xe48] sm:$0xff] }
 0x7fd   : > { %8178 = vmatpush2.msra.mxu1 %v7317_v46  ;;  %v7353_v46 = vld [vmem:[#allocation2 + $0xe40] sm:$0xff] }
 0x7fe   : > { %8179 = vmatprep.subr.mxu1 %v7316_v60  ;;  %v7352_v60 = vld [vmem:[#allocation2 + $0xe38] sm:$0xff] }
 0x7ff   : > { %8180 = vmatpush2.msra.mxu1 %v7315_v23  ;;  %v7351_v23 = vld [vmem:[#allocation2 + $0xe30] sm:$0xff] }
 0x800   : > { %8181 = vmatprep.subr.mxu1 %v7314_v25 }
 0x801   : > { %8182 = vmatpush2.msra.mxu1 %v7313_v34 }
 0x802   : > { %v7918_v58 = vpop.f32.mrf.mxu1  ;;  %8184 = vmatmul.mubr.f32.vlgmr.msra.gmra.mxu1 %v6821_v56  ;;  %8208 = vmatprep.subr.mxu1 %v7376_v28  ;;  %v7350_v56 = vld [vmem:[#allocation2 + $0xe28] sm:$0xff]  ;;  %v7348_v28 = vld [vmem:[#allocation2 + $0xe18] sm:$0xff] }
 0x803   : > { %v14953_v20 = vadd.f32 %v7918_v58, %v14896_v30  ;;  %8209 = vmatpush1.msra.mxu1 %v7375_v63  ;;  %8189 = vmatprep.mubr.f32.mxu1 %v6844_v39  ;;  %v7372_v30 = vld [vmem:[#allocation2 + $0xed8] sm:$0xff]  ;;  %v7349_v39 = vld [vmem:[#allocation2 + $0xe20] sm:$0xff]  ;;  %v7347_v58 = vld [vmem:[#allocation2 + $0xe10] sm:$0xff] }
 0x804   : > { %v7920_v2 = vpop.f32.mrf.mxu1  ;;  %8210 = vmatprep.subr.mxu1 %v7374_v43  ;;  %v7346_v63 = vld [vmem:[#allocation2 + $0xe08] sm:$0xff]  ;;  %v7345_v43 = vld [vmem:[#allocation2 + $0xe00] sm:$0xff] }
 0x805   : > { %v14962_v8 = vadd.f32 %v7920_v2, %v14905_v48  ;;  %8211 = vmatpush1.msra.mxu1 %v7373_v19  ;;  %v7369_v48 = vld [vmem:[#allocation2 + $0xec0] sm:$0xff]  ;;  %v7407_v2 = vld [vmem:[#allocation2 + $0xff0] sm:$0xff]  ;;  %v7406_v19 = vld [vmem:[#allocation2 + $0xfe8] sm:$0xff] }
 0x806   : > { %v7924_v27 = vpop.f32.mrf.mxu1  ;;  %8190 = vmatmul.mubr.f32.gmra.mxu1 %v6843_v32  ;;  %8212 = vmatprep.subr.mxu1 %v7372_v30  ;;  %v7408_v32 = vld [vmem:[#allocation2 + $0xff8] sm:$0xff] }
 0x807   : > { %v14965_v21 = vadd.f32 %v7924_v27, %v14908_v11  ;;  %8213 = vmatpush1.msra.mxu1 %v7371_v47  ;;  %8195 = vmatprep.mubr.f32.mxu1 %v6866_v57  ;;  %v7368_v11 = vld [vmem:[#allocation2 + $0xeb8] sm:$0xff]  ;;  %v7405_v57 = vld [vmem:[#allocation2 + $0xfe0] sm:$0xff]  ;;  %v7403_v27 = vld [vmem:[#allocation2 + $0xfd0] sm:$0xff] }
 0x808   : > { %v7926_v61 = vpop.f32.mrf.mxu1  ;;  %8214 = vmatprep.subr.mxu1 %v7370_v18  ;;  %v7404_v30 = vld [vmem:[#allocation2 + $0xfd8] sm:$0xff]  ;;  %v7402_v47 = vld [vmem:[#allocation2 + $0xfc8] sm:$0xff]  ;;  %v7401_v18 = vld [vmem:[#allocation2 + $0xfc0] sm:$0xff] }
 0x809   : > { %v14974_v6 = vadd.f32 %v7926_v61, %v14917_v13  ;;  %8215 = vmatpush1.msra.mxu1 %v7369_v48  ;;  %v7365_v13 = vld [vmem:[#allocation2 + $0xea0] sm:$0xff]  ;;  %v7399_v61 = vld [vmem:[#allocation2 + $0xfb0] sm:$0xff] }
 0x80a   : > { %v7930_v54 = vpop.f32.mrf.mxu1  ;;  %8196 = vmatmul.mubr.f32.gmra.mxu1 %v6865_v52  ;;  %8216 = vmatprep.subr.mxu1 %v7368_v11  ;;  %v7400_v52 = vld [vmem:[#allocation2 + $0xfb8] sm:$0xff]  ;;  %v7397_v11 = vld [vmem:[#allocation2 + $0xfa0] sm:$0xff] }
 0x80b   : > { %v14977_v14 = vadd.f32 %v7930_v54, %v14920_v29  ;;  %8217 = vmatpush1.msra.mxu1 %v7367_v26  ;;  %8201 = vmatprep.mubr.f32.mxu1 %v6888_v16  ;;  %v7364_v29 = vld [vmem:[#allocation2 + $0xe98] sm:$0xff]  ;;  %v7398_v16 = vld [vmem:[#allocation2 + $0xfa8] sm:$0xff]  ;;  %v7395_v26 = vld [vmem:[#allocation2 + $0xf90] sm:$0xff] }
 0x80c   : > { %v7932_v41 = vpop.f32.mrf.mxu1  ;;  %8218 = vmatprep.subr.mxu1 %v7366_v22  ;;  %v7396_v54 = vld [vmem:[#allocation2 + $0xf98] sm:$0xff]  ;;  %v7394_v22 = vld [vmem:[#allocation2 + $0xf88] sm:$0xff] }
 0x80d   : > { %v14986_v0 = vadd.f32 %v7932_v41, %v14931_v44  ;;  %8219 = vmatpush1.msra.mxu1 %v7365_v13  ;;  %v7360_v44 = vld [vmem:[#allocation2 + $0xe78] sm:$0xff]  ;;  %v7391_v13 = vld [vmem:[#allocation2 + $0xf70] sm:$0xff] }
 0x80e   : > { %v7936_v42 = vpop.f32.mrf.mxu1  ;;  %8202 = vmatmul.mubr.f32.gmra.mxu1 %v6887_v10  ;;  %8220 = vmatprep.subr.mxu1 %v7364_v29  ;;  %v7393_v10 = vld [vmem:[#allocation2 + $0xf80] sm:$0xff]  ;;  %v7392_v41 = vld [vmem:[#allocation2 + $0xf78] sm:$0xff] }
 0x80f   : > { %v14989_v36 = vadd.f32 %v7936_v42, %v14934_v40  ;;  %8221 = vmatpush1.msra.mxu1 %v7363_v50  ;;  %8272 = vmatprep.mubr.f32.mxu1 %v6824_v33  ;;  %v7358_v40 = vld [vmem:[#allocation2 + $0xe68] sm:$0xff]  ;;  %v7389_v29 = vld [vmem:[#allocation2 + $0xf60] sm:$0xff]  ;;  %v7388_v42 = vld [vmem:[#allocation2 + $0xf58] sm:$0xff] }
 0x810   : > { %v7938_v37 = vpop.f32.mrf.mxu1  ;;  %8222 = vmatprep.subr.mxu1 %v7362_v35  ;;  %v7390_v33 = vld [vmem:[#allocation2 + $0xf68] sm:$0xff]  ;;  %v7387_v50 = vld [vmem:[#allocation2 + $0xf50] sm:$0xff] }
 0x811   : > { %v14992_v31 = vadd.f32 %v7938_v37, %v14937_v5  ;;  %8223 = vmatpush1.msra.mxu1 %v7361_v17  ;;  %v7356_v5 = vld [vmem:[#allocation2 + $0xe58] sm:$0xff]  ;;  %v7386_v35 = vld [vmem:[#allocation2 + $0xf48] sm:$0xff]  ;;  %v7385_v37 = vld [vmem:[#allocation2 + $0xf40] sm:$0xff] }
 0x812   : > { %8224 = vmatprep.subr.mxu1 %v7360_v44  ;;  %v7384_v17 = vld [vmem:[#allocation2 + $0xf38] sm:$0xff]  ;;  %v7383_v44 = vld [vmem:[#allocation2 + $0xf30] sm:$0xff] }
 0x813   : > { %8225 = vmatpush1.msra.mxu1 %v7359_v38  ;;  %v7382_v38 = vld [vmem:[#allocation2 + $0xf28] sm:$0xff] }
 0x814   : > { %8226 = vmatprep.subr.mxu1 %v7358_v40  ;;  %v7380_v40 = vld [vmem:[#allocation2 + $0xf18] sm:$0xff] }
 0x815   : > { %8227 = vmatpush1.msra.mxu1 %v7357_v12  ;;  %v7378_v12 = vld [vmem:[#allocation2 + $0xf08] sm:$0xff] }
 0x816   : > { %8228 = vmatprep.subr.mxu1 %v7356_v5  ;;  %v6823_v5 = vld [vmem:[%s16312_s5 + $0x70] sm:$0xff] }
 0x817   : > { %8229 = vmatpush1.msra.mxu1 %v7355_v45  ;;  %v7377_v45 = vld [vmem:[#allocation2 + $0xf00] sm:$0xff] }
 0x818   : > { %8230 = vmatprep.subr.mxu1 %v7354_v3  ;;  %v6846_v3 = vld [vmem:[%s16312_s5 + $0x128] sm:$0xff] }
 0x819   : > { %s10231_s12 = spop %10230  ;;  %8231 = vmatpush1.msra.mxu1 %v7353_v46  ;;  %v7440_v46 = vld [vmem:[#allocation2 + $0x10f8] sm:$0xff] }
 0x81a   : > { %s6797_s13 = sxor.u32 2147483648, %s10231_s12  ;;  %8232 = vmatprep.subr.mxu1 %v7352_v60 }
 0x81b   : > { %v6798_v25 = vstv %s6797_s13  ;;  %8233 = vmatpush1.msra.mxu1 %v7351_v23  ;;  %v7439_v23 = vld [vmem:[#allocation2 + $0x10f0] sm:$0xff]  ;;  %s16285_s13 = scalar_lea.vmem %s16317_s10, %s10227_s30 }
 0x81c   : > { %v6799_v34 = vmul.f32 1.442695, %v6798_v25  ;;  %8234 = vmatprep.subr.mxu1 %v7350_v56  ;;  %v7438_v56 = vld [vmem:[#allocation2 + $0x10e8] sm:$0xff] }
 0x81d   : > { %8235 = vmatpush1.msra.mxu1 %v7349_v39 }
 0x81e   : > { %10249 = vpow2.f32 %v6799_v34  ;;  %8236 = vmatprep.subr.mxu1 %v7348_v28  ;;  %v6845_v34 = vld [vmem:[%s16312_s5 + $0x120] sm:$0xff] }
 0x81f   : > { %8237 = vmatpush1.msra.mxu1 %v7347_v58  ;;  %v7437_v28 = vld [vmem:[#allocation2 + $0x10e0] sm:$0xff]  ;;  %v6868_v58 = vld [vmem:[%s16312_s5 + $0x1d8] sm:$0xff] }
 0x820   : > { %8238 = vmatprep.subr.mxu1 %v7346_v63 }
 0x821   : > { %8239 = vmatpush1.msra.mxu1 %v7345_v43 }
 0x822   : > { %8240 = vmatprep.subr.mxu1 %v7408_v32  ;;  %v7435_v32 = vld [vmem:[#allocation2 + $0x10d0] sm:$0xff] }
 0x823   : > { %8241 = vmatpush2.msra.mxu1 %v7407_v2 }
 0x824   : > { %8242 = vmatprep.subr.mxu1 %v7406_v19  ;;  %v7434_v19 = vld [vmem:[#allocation2 + $0x10c8] sm:$0xff] }
 0x825   : > { %8243 = vmatpush2.msra.mxu1 %v7405_v57  ;;  %v6867_v57 = vld [vmem:[%s16312_s5 + $0x1d0] sm:$0xff] }
 0x826   : > { %8244 = vmatprep.subr.mxu1 %v7404_v30 }
 0x827   : > { %8245 = vmatpush2.msra.mxu1 %v7403_v27  ;;  %v6890_v27 = vld [vmem:[%s16312_s5 + $0x288] sm:$0x1] }
 0x828   : > { %8246 = vmatprep.subr.mxu1 %v7402_v47 }
 0x829   : > { %8247 = vmatpush2.msra.mxu1 %v7401_v18 }
 0x82a   : > { %8248 = vmatprep.subr.mxu1 %v7400_v52  ;;  %v7431_v52 = vld [vmem:[#allocation2 + $0x10b0] sm:$0xff] }
 0x82b   : > { %v10250_v48 = vpop.eup %10249  ;;  %8249 = vmatpush2.msra.mxu1 %v7399_v61  ;;  %v7430_v61 = vld [vmem:[#allocation2 + $0x10a8] sm:$0xff] }
 0x82c   : > { %10232 = vpush %v10250_v48  ;;  %8250 = vmatprep.subr.mxu1 %v7398_v16  ;;  %v6889_v16 = vld [vmem:[%s16312_s5 + $0x280] sm:$0x1] }
 0x82d   : > { %8251 = vmatpush2.msra.mxu1 %v7397_v11  ;;  %v8792_v11 = vld [vmem:[%s16313_s6 + $0x720] sm:$0xff] }
 0x82e   : > { %8252 = vmatprep.subr.mxu1 %v7396_v54 }
 0x82f   : > { %8253 = vmatpush2.msra.mxu1 %v7395_v26  ;;  %v7429_v26 = vld [vmem:[#allocation2 + $0x10a0] sm:$0xff] }
 0x830   : > { %8254 = vmatprep.subr.mxu1 %v7394_v22 }
 0x831   : > { %8255 = vmatpush2.msra.mxu1 %v7393_v10  ;;  %v7428_v10 = vld [vmem:[#allocation2 + $0x1098] sm:$0xff] }
 0x832   : > { %8256 = vmatprep.subr.mxu1 %v7392_v41 }
 0x833   : > { %8257 = vmatpush2.msra.mxu1 %v7391_v13  ;;  %v7427_v13 = vld [vmem:[#allocation2 + $0x1090] sm:$0xff] }
 0x834   : > { %8258 = vmatprep.subr.mxu1 %v7390_v33 }
 0x835   : > { %8259 = vmatpush2.msra.mxu1 %v7389_v29  ;;  %v7426_v29 = vld [vmem:[#allocation2 + $0x1088] sm:$0xff] }
 0x836   : > { %8260 = vmatprep.subr.mxu1 %v7388_v42 }
 0x837   : > { %8261 = vmatpush2.msra.mxu1 %v7387_v50  ;;  %v7425_v50 = vld [vmem:[#allocation2 + $0x1080] sm:$0xff] }
 0x838   : > { %8262 = vmatprep.subr.mxu1 %v7386_v35 }
 0x839   : > { %8263 = vmatpush2.msra.mxu1 %v7385_v37  ;;  %v7423_v37 = vld [vmem:[#allocation2 + $0x1070] sm:$0xff] }
 0x83a   : > { %8264 = vmatprep.subr.mxu1 %v7384_v17  ;;  %v7422_v17 = vld [vmem:[#allocation2 + $0x1068] sm:$0xff] }
 0x83b   : > { %8265 = vmatpush2.msra.mxu1 %v7383_v44  ;;  %v7421_v44 = vld [vmem:[#allocation2 + $0x1060] sm:$0xff] }
 0x83c   : > { %8266 = vmatprep.subr.mxu1 %v7382_v38  ;;  %v7419_v38 = vld [vmem:[#allocation2 + $0x1050] sm:$0xff] }
 0x83d   : > { %8267 = vmatpush2.msra.mxu1 %v7381_v4  ;;  %v7418_v4 = vld [vmem:[#allocation2 + $0x1048] sm:$0xff] }
 0x83e   : > { %8268 = vmatprep.subr.mxu1 %v7380_v40  ;;  %v7417_v40 = vld [vmem:[#allocation2 + $0x1040] sm:$0xff] }
 0x83f   : > { %8269 = vmatpush2.msra.mxu1 %v7379_v24  ;;  %v7416_v24 = vld [vmem:[#allocation2 + $0x1038] sm:$0xff] }
 0x840   : > { %8270 = vmatprep.subr.mxu1 %v7378_v12  ;;  %v7414_v12 = vld [vmem:[#allocation2 + $0x1028] sm:$0xff] }
 0x841   : > { %8271 = vmatpush2.msra.mxu1 %v7377_v45  ;;  %v7412_v45 = vld [vmem:[#allocation2 + $0x1018] sm:$0xff] }
 0x842   : > { %v8007_v60 = vpop.f32.mrf.mxu1  ;;  %8273 = vmatmul.mubr.f32.vlgmr.msra.gmra.mxu1 %v6823_v5  ;;  %8297 = vmatprep.subr.mxu1 %v7440_v46  ;;  %v7413_v5 = vld [vmem:[#allocation2 + $0x1020] sm:$0xff]  ;;  %v7410_v46 = vld [vmem:[#allocation2 + $0x1008] sm:$0xff] }
 0x843   : > { %v15007_v25 = vadd.f32 %v8007_v60, %v14953_v20  ;;  %8298 = vmatpush1.msra.mxu1 %v7439_v23  ;;  %8278 = vmatprep.mubr.f32.mxu1 %v6846_v3  ;;  %v7436_v20 = vld [vmem:[#allocation2 + $0x10d8] sm:$0xff]  ;;  %v7411_v3 = vld [vmem:[#allocation2 + $0x1010] sm:$0xff]  ;;  %v7409_v23 = vld [vmem:[#allocation2 + $0x1000] sm:$0xff] }
 0x844   : > { %v8009_v39 = vpop.f32.mrf.mxu1  ;;  %8299 = vmatprep.subr.mxu1 %v7438_v56  ;;  %v7472_v56 = vld [vmem:[#allocation2 + $0x11f8] sm:$0xff] }
 0x845   : > { %v15016_v63 = vadd.f32 %v8009_v39, %v14962_v8  ;;  %8300 = vmatpush1.msra.mxu1 %v7437_v28  ;;  %v7433_v8 = vld [vmem:[#allocation2 + $0x10c0] sm:$0xff]  ;;  %v7470_v39 = vld [vmem:[#allocation2 + $0x11e8] sm:$0xff] }
 0x846   : > { %v8013_v43 = vpop.f32.mrf.mxu1  ;;  %8279 = vmatmul.mubr.f32.gmra.mxu1 %v6845_v34  ;;  %8301 = vmatprep.subr.mxu1 %v7436_v20  ;;  %v7471_v34 = vld [vmem:[#allocation2 + $0x11f0] sm:$0xff]  ;;  %v7469_v28 = vld [vmem:[#allocation2 + $0x11e0] sm:$0xff] }
 0x847   : > { %v15019_v2 = vadd.f32 %v8013_v43, %v14965_v21  ;;  %8302 = vmatpush1.msra.mxu1 %v7435_v32  ;;  %8284 = vmatprep.mubr.f32.mxu1 %v6868_v58  ;;  %v7432_v21 = vld [vmem:[#allocation2 + $0x10b8] sm:$0xff]  ;;  %v7467_v20 = vld [vmem:[#allocation2 + $0x11d0] sm:$0xff]  ;;  %v7466_v43 = vld [vmem:[#allocation2 + $0x11c8] sm:$0xff] }
 0x848   : > { %v8015_v30 = vpop.f32.mrf.mxu1  ;;  %8303 = vmatprep.subr.mxu1 %v7434_v19  ;;  %v7468_v58 = vld [vmem:[#allocation2 + $0x11d8] sm:$0xff]  ;;  %v7465_v32 = vld [vmem:[#allocation2 + $0x11c0] sm:$0xff] }
 0x849   : > { %v15028_v47 = vadd.f32 %v8015_v30, %v14974_v6  ;;  %8304 = vmatpush1.msra.mxu1 %v7433_v8  ;;  %v8793_v6 = vld [vmem:[%s16313_s6 + $0x728] sm:$0xff]  ;;  %v7464_v19 = vld [vmem:[#allocation2 + $0x11b8] sm:$0xff]  ;;  %v7461_v8 = vld [vmem:[#allocation2 + $0x11a0] sm:$0xff] }
 0x84a   : > { %v8019_v18 = vpop.f32.mrf.mxu1  ;;  %8285 = vmatmul.mubr.f32.gmra.mxu1 %v6867_v57  ;;  %8305 = vmatprep.subr.mxu1 %v7432_v21  ;;  %v7463_v57 = vld [vmem:[#allocation2 + $0x11b0] sm:$0xff]  ;;  %v7462_v30 = vld [vmem:[#allocation2 + $0x11a8] sm:$0xff] }
 0x84b   : > { %v15031_v48 = vadd.f32 %v8019_v18, %v14977_v14  ;;  %8306 = vmatpush1.msra.mxu1 %v7431_v52  ;;  %8290 = vmatprep.mubr.f32.mxu1 %v6890_v27  ;;  %v6826_v14 = vld [vmem:[%s16312_s5 + $0x88] sm:$0xff]  ;;  %v7460_v27 = vld [vmem:[#allocation2 + $0x1198] sm:$0xff]  ;;  %v7459_v18 = vld [vmem:[#allocation2 + $0x1190] sm:$0xff] }
 0x84c   : > { %v8021_v54 = vpop.f32.mrf.mxu1  ;;  %8307 = vmatprep.subr.mxu1 %v7430_v61  ;;  %8984 = vmatprep.subr.mxu0 %v8793_v6  ;;  %v7458_v52 = vld [vmem:[#allocation2 + $0x1188] sm:$0xff]  ;;  %v7457_v61 = vld [vmem:[#allocation2 + $0x1180] sm:$0xff]  ;;  %v7455_v6 = vld [vmem:[#allocation2 + $0x1170] sm:$0xff] }
 0x84d   : > { %v15046_v22 = vadd.f32 %v8021_v54, %v14986_v0  ;;  %8308 = vmatpush1.msra.mxu1 %v7429_v26  ;;  %8985 = vmatpush2.msra.mxu0 %v8792_v11  ;;  %v7424_v0 = vld [vmem:[#allocation2 + $0x1078] sm:$0xff]  ;;  %v7454_v11 = vld [vmem:[#allocation2 + $0x1168] sm:$0xff]  ;;  %v7453_v54 = vld [vmem:[#allocation2 + $0x1160] sm:$0xff] }
 0x84e   : > { %v8025_v41 = vpop.f32.mrf.mxu1  ;;  %8291 = vmatmul.mubr.f32.gmra.mxu1 %v6889_v16  ;;  %8309 = vmatprep.subr.mxu1 %v7428_v10  ;;  %v7456_v16 = vld [vmem:[#allocation2 + $0x1178] sm:$0xff]  ;;  %v7450_v10 = vld [vmem:[#allocation2 + $0x1148] sm:$0xff] }
 0x84f   : > { %v15049_v33 = vadd.f32 %v8025_v41, %v14989_v36  ;;  %8310 = vmatpush1.msra.mxu1 %v7427_v13  ;;  %8361 = vmatprep.mubr.f32.mxu1 %v6826_v14  ;;  %v7420_v36 = vld [vmem:[#allocation2 + $0x1058] sm:$0xff]  ;;  %v7451_v14 = vld [vmem:[#allocation2 + $0x1150] sm:$0xff]  ;;  %v7449_v41 = vld [vmem:[#allocation2 + $0x1140] sm:$0xff] }
 0x850   : > { %v8027_v42 = vpop.f32.mrf.mxu1  ;;  %8311 = vmatprep.subr.mxu1 %v7426_v29  ;;  %v7452_v26 = vld [vmem:[#allocation2 + $0x1158] sm:$0xff]  ;;  %v7447_v29 = vld [vmem:[#allocation2 + $0x1130] sm:$0xff] }
 0x851   : > { %v15052_v35 = vadd.f32 %v8027_v42, %v14992_v31  ;;  %8312 = vmatpush1.msra.mxu1 %v7425_v50  ;;  %v7415_v31 = vld [vmem:[#allocation2 + $0x1030] sm:$0xff]  ;;  %v7448_v13 = vld [vmem:[#allocation2 + $0x1138] sm:$0xff]  ;;  %v7446_v42 = vld [vmem:[#allocation2 + $0x1128] sm:$0xff] }
 0x852   : > { %8313 = vmatprep.subr.mxu1 %v7424_v0  ;;  %v7445_v50 = vld [vmem:[#allocation2 + $0x1120] sm:$0xff]  ;;  %v7444_v0 = vld [vmem:[#allocation2 + $0x1118] sm:$0xff] }
 0x853   : > { %8314 = vmatpush1.msra.mxu1 %v7423_v37  ;;  %v7443_v37 = vld [vmem:[#allocation2 + $0x1110] sm:$0xff] }
 0x854   : > { %8315 = vmatprep.subr.mxu1 %v7422_v17  ;;  %v7442_v17 = vld [vmem:[#allocation2 + $0x1108] sm:$0xff] }
 0x855   : > { %8316 = vmatpush1.msra.mxu1 %v7421_v44  ;;  %v6825_v44 = vld [vmem:[%s16312_s5 + $0x80] sm:$0xff] }
 0x856   : > { %8317 = vmatprep.subr.mxu1 %v7420_v36  ;;  %v7441_v36 = vld [vmem:[#allocation2 + $0x1100] sm:$0xff] }
 0x857   : > { %8318 = vmatpush1.msra.mxu1 %v7419_v38  ;;  %v6848_v38 = vld [vmem:[%s16312_s5 + $0x138] sm:$0xff] }
 0x858   : > { %8319 = vmatprep.subr.mxu1 %v7418_v4  ;;  %v7504_v4 = vld [vmem:[#allocation2 + $0x12f8] sm:$0xff] }
 0x859   : > { %8320 = vmatpush1.msra.mxu1 %v7417_v40 }
 0x85a   : > { %8321 = vmatprep.subr.mxu1 %v7416_v24  ;;  %v7503_v24 = vld [vmem:[#allocation2 + $0x12f0] sm:$0xff] }
 0x85b   : > { %8322 = vmatpush1.msra.mxu1 %v7415_v31  ;;  %v7502_v31 = vld [vmem:[#allocation2 + $0x12e8] sm:$0xff] }
 0x85c   : > { %8323 = vmatprep.subr.mxu1 %v7414_v12 }
 0x85d   : > { %s10233_s17 = spop %10232  ;;  %8324 = vmatpush1.msra.mxu1 %v7413_v5  ;;  %v6847_v5 = vld [vmem:[%s16312_s5 + $0x130] sm:$0xff] }
 0x85e   : > { %s6802_s18 = sadd.f32 1.0, %s10233_s17  ;;  %8325 = vmatprep.subr.mxu1 %v7412_v45  ;;  %v8781_v45 = vld [vmem:[%s16313_s6 + $0x6c8] sm:$0xff] }
 0x85f   : > { %8326 = vmatpush1.msra.mxu1 %v7411_v3  ;;  %v8780_v3 = vld [vmem:[%s16313_s6 + $0x6c0] sm:$0xff]  ;;  %8986 = vmatprep.subr.mxu0 %v8781_v45  ;;  %v7536_v45 = vld [vmem:[#allocation2 + $0x13f8] sm:$0xff] }
 0x860   : > { %v6803_v60 = vstv %s6802_s18  ;;  %8327 = vmatprep.subr.mxu1 %v7410_v46  ;;  %8987 = vmatpush2.msra.mxu0 %v8780_v3  ;;  %v7535_v3 = vld [vmem:[#allocation2 + $0x13f0] sm:$0xff] }
 0x861   : > { %10251 = vrcp.f32 %v6803_v60  ;;  %8328 = vmatpush1.msra.mxu1 %v7409_v23  ;;  %v7501_v60 = vld [vmem:[#allocation2 + $0x12e0] sm:$0xff] }
 0x862   : > { %8329 = vmatprep.subr.mxu1 %v7472_v56  ;;  %v7500_v56 = vld [vmem:[#allocation2 + $0x12d8] sm:$0xff] }
 0x863   : > { %8330 = vmatpush2.msra.mxu1 %v7471_v34 }
 0x864   : > { %8331 = vmatprep.subr.mxu1 %v7470_v39  ;;  %v7499_v39 = vld [vmem:[#allocation2 + $0x12d0] sm:$0xff] }
 0x865   : > { %8332 = vmatpush2.msra.mxu1 %v7469_v28 }
 0x866   : > { %8333 = vmatprep.subr.mxu1 %v7468_v58  ;;  %v7498_v58 = vld [vmem:[#allocation2 + $0x12c8] sm:$0xff] }
 0x867   : > { %8334 = vmatpush2.msra.mxu1 %v7467_v20  ;;  %v6869_v20 = vld [vmem:[%s16312_s5 + $0x1e0] sm:$0xff] }
 0x868   : > { %8335 = vmatprep.subr.mxu1 %v7466_v43 }
 0x869   : > { %8336 = vmatpush2.msra.mxu1 %v7465_v32  ;;  %v6892_v32 = vld [vmem:[%s16312_s5 + $0x298] sm:$0x1] }
 0x86a   : > { %8337 = vmatprep.subr.mxu1 %v7464_v19 }
 0x86b   : > { %8338 = vmatpush2.msra.mxu1 %v7463_v57 }
 0x86c   : > { %8339 = vmatprep.subr.mxu1 %v7462_v30  ;;  %v7495_v30 = vld [vmem:[#allocation2 + $0x12b0] sm:$0xff] }
 0x86d   : > { %8340 = vmatpush2.msra.mxu1 %v7461_v8 }
 0x86e   : > { %v10252_v21 = vpop.eup %10251  ;;  %8341 = vmatprep.subr.mxu1 %v7460_v27  ;;  %v7494_v27 = vld [vmem:[#allocation2 + $0x12a8] sm:$0xff] }
 0x86f   : > { %10234 = vpush %v10252_v21  ;;  %8342 = vmatpush2.msra.mxu1 %v7459_v18  ;;  %v6891_v21 = vld [vmem:[%s16312_s5 + $0x290] sm:$0x1] }
 0x870   : > { %8343 = vmatprep.subr.mxu1 %v7458_v52  ;;  %v6828_v52 = vld [vmem:[%s16312_s5 + $0x98] sm:$0xff] }
 0x871   : > { %8344 = vmatpush2.msra.mxu1 %v7457_v61 }
 0x872   : > { %8345 = vmatprep.subr.mxu1 %v7456_v16 }
 0x873   : > { %8346 = vmatpush2.msra.mxu1 %v7455_v6  ;;  %v7491_v6 = vld [vmem:[#allocation2 + $0x1290] sm:$0xff] }
 0x874   : > { %8347 = vmatprep.subr.mxu1 %v7454_v11 }
 0x875   : > { %8348 = vmatpush2.msra.mxu1 %v7453_v54  ;;  %v7490_v54 = vld [vmem:[#allocation2 + $0x1288] sm:$0xff] }
 0x876   : > { %8349 = vmatprep.subr.mxu1 %v7452_v26 }
 0x877   : > { %8350 = vmatpush2.msra.mxu1 %v7451_v14  ;;  %v7489_v14 = vld [vmem:[#allocation2 + $0x1280] sm:$0xff] }
 0x878   : > { %8351 = vmatprep.subr.mxu1 %v7450_v10 }
 0x879   : > { %8352 = vmatpush2.msra.mxu1 %v7449_v41  ;;  %v8769_v41 = vld [vmem:[%s16313_s6 + $0x668] sm:$0xff] }
 0x87a   : > { %8353 = vmatprep.subr.mxu1 %v7448_v13  ;;  %v7487_v13 = vld [vmem:[#allocation2 + $0x1270] sm:$0xff]  ;;  %8988 = vmatprep.subr.mxu0 %v8769_v41  ;;  %v7508_v41 = vld [vmem:[#allocation2 + $0x1318] sm:$0xff] }
 0x87b   : > { %8354 = vmatpush2.msra.mxu1 %v7447_v29  ;;  %v7486_v29 = vld [vmem:[#allocation2 + $0x1268] sm:$0xff] }
 0x87c   : > { %8355 = vmatprep.subr.mxu1 %v7446_v42  ;;  %v7485_v42 = vld [vmem:[#allocation2 + $0x1260] sm:$0xff] }
 0x87d   : > { %8356 = vmatpush2.msra.mxu1 %v7445_v50  ;;  %v7483_v50 = vld [vmem:[#allocation2 + $0x1250] sm:$0xff] }
 0x87e   : > { %8357 = vmatprep.subr.mxu1 %v7444_v0  ;;  %v7482_v0 = vld [vmem:[#allocation2 + $0x1248] sm:$0xff] }
 0x87f   : > { %8358 = vmatpush2.msra.mxu1 %v7443_v37  ;;  %v7481_v37 = vld [vmem:[#allocation2 + $0x1240] sm:$0xff] }
 0x880   : > { %8359 = vmatprep.subr.mxu1 %v7442_v17  ;;  %v7480_v17 = vld [vmem:[#allocation2 + $0x1238] sm:$0xff] }
 0x881   : > { %8360 = vmatpush2.msra.mxu1 %v7441_v36  ;;  %v7478_v36 = vld [vmem:[#allocation2 + $0x1228] sm:$0xff] }
 0x882   : > { %v8096_v40 = vpop.f32.mrf.mxu1  ;;  %8362 = vmatmul.mubr.f32.vlgmr.msra.gmra.mxu1 %v6825_v44  ;;  %8386 = vmatprep.subr.mxu1 %v7504_v4  ;;  %v7479_v44 = vld [vmem:[#allocation2 + $0x1230] sm:$0xff]  ;;  %v7476_v4 = vld [vmem:[#allocation2 + $0x1218] sm:$0xff] }
 0x883   : > { %v15061_v12 = vadd.f32 %v8096_v40, %v15007_v25  ;;  %8387 = vmatpush1.msra.mxu1 %v7503_v24  ;;  %8367 = vmatprep.mubr.f32.mxu1 %v6848_v38  ;;  %v6870_v25 = vld [vmem:[%s16312_s5 + $0x1e8] sm:$0xff]  ;;  %v7477_v38 = vld [vmem:[#allocation2 + $0x1220] sm:$0xff]  ;;  %v7475_v40 = vld [vmem:[#allocation2 + $0x1210] sm:$0xff] }
 0x884   : > { %v8098_v46 = vpop.f32.mrf.mxu1  ;;  %8388 = vmatprep.subr.mxu1 %v7502_v31  ;;  %v7474_v24 = vld [vmem:[#allocation2 + $0x1208] sm:$0xff]  ;;  %v7473_v31 = vld [vmem:[#allocation2 + $0x1200] sm:$0xff] }
 0x885   : > { %v15076_v23 = vadd.f32 %v8098_v46, %v15016_v63  ;;  %8389 = vmatpush1.msra.mxu1 %v7501_v60  ;;  %v7497_v63 = vld [vmem:[#allocation2 + $0x12c0] sm:$0xff]  ;;  %v7534_v46 = vld [vmem:[#allocation2 + $0x13e8] sm:$0xff] }
 0x886   : > { %v8102_v34 = vpop.f32.mrf.mxu1  ;;  %8368 = vmatmul.mubr.f32.gmra.mxu1 %v6847_v5  ;;  %8390 = vmatprep.subr.mxu1 %v7500_v56  ;;  %v7533_v60 = vld [vmem:[#allocation2 + $0x13e0] sm:$0xff]  ;;  %v7531_v56 = vld [vmem:[#allocation2 + $0x13d0] sm:$0xff] }
 0x887   : > { %v15079_v28 = vadd.f32 %v8102_v34, %v15019_v2  ;;  %8391 = vmatpush1.msra.mxu1 %v7499_v39  ;;  %8373 = vmatprep.mubr.f32.mxu1 %v6870_v25  ;;  %v7496_v2 = vld [vmem:[#allocation2 + $0x12b8] sm:$0xff]  ;;  %v7530_v34 = vld [vmem:[#allocation2 + $0x13c8] sm:$0xff]  ;;  %v7529_v39 = vld [vmem:[#allocation2 + $0x13c0] sm:$0xff] }
 0x888   : > { %v8104_v43 = vpop.f32.mrf.mxu1  ;;  %8392 = vmatprep.subr.mxu1 %v7498_v58  ;;  %v7532_v25 = vld [vmem:[#allocation2 + $0x13d8] sm:$0xff] }
 0x889   : > { %v15088_v19 = vadd.f32 %v8104_v43, %v15028_v47  ;;  %8393 = vmatpush1.msra.mxu1 %v7497_v63  ;;  %v7493_v47 = vld [vmem:[#allocation2 + $0x12a0] sm:$0xff]  ;;  %v7528_v58 = vld [vmem:[#allocation2 + $0x13b8] sm:$0xff]  ;;  %v7526_v43 = vld [vmem:[#allocation2 + $0x13a8] sm:$0xff] }
 0x88a   : > { %v8108_v57 = vpop.f32.mrf.mxu1  ;;  %8374 = vmatmul.mubr.f32.gmra.mxu1 %v6869_v20  ;;  %8394 = vmatprep.subr.mxu1 %v7496_v2  ;;  %v7527_v20 = vld [vmem:[#allocation2 + $0x13b0] sm:$0xff]  ;;  %v7525_v63 = vld [vmem:[#allocation2 + $0x13a0] sm:$0xff] }
 0x88b   : > { %v15091_v8 = vadd.f32 %v8108_v57, %v15031_v48  ;;  %8395 = vmatpush1.msra.mxu1 %v7495_v30  ;;  %8379 = vmatprep.mubr.f32.mxu1 %v6892_v32  ;;  %v7492_v48 = vld [vmem:[#allocation2 + $0x1298] sm:$0xff]  ;;  %v7523_v2 = vld [vmem:[#allocation2 + $0x1390] sm:$0xff]  ;;  %v7522_v57 = vld [vmem:[#allocation2 + $0x1388] sm:$0xff] }
 0x88c   : > { %v8110_v18 = vpop.f32.mrf.mxu1  ;;  %8396 = vmatprep.subr.mxu1 %v7494_v27  ;;  %v7524_v32 = vld [vmem:[#allocation2 + $0x1398] sm:$0xff]  ;;  %v7521_v30 = vld [vmem:[#allocation2 + $0x1380] sm:$0xff] }
 0x88d   : > { %v15100_v61 = vadd.f32 %v8110_v18, %v15046_v22  ;;  %8397 = vmatpush1.msra.mxu1 %v7493_v47  ;;  %v7488_v22 = vld [vmem:[#allocation2 + $0x1278] sm:$0xff]  ;;  %v7518_v18 = vld [vmem:[#allocation2 + $0x1368] sm:$0xff]  ;;  %v7517_v47 = vld [vmem:[#allocation2 + $0x1360] sm:$0xff] }
 0x88e   : > { %v8114_v16 = vpop.f32.mrf.mxu1  ;;  %8380 = vmatmul.mubr.f32.gmra.mxu1 %v6891_v21  ;;  %8398 = vmatprep.subr.mxu1 %v7492_v48  ;;  %v7520_v27 = vld [vmem:[#allocation2 + $0x1378] sm:$0xff]  ;;  %v7519_v21 = vld [vmem:[#allocation2 + $0x1370] sm:$0xff] }
 0x88f   : > { %v15103_v11 = vadd.f32 %v8114_v16, %v15049_v33  ;;  %8399 = vmatpush1.msra.mxu1 %v7491_v6  ;;  %8450 = vmatprep.mubr.f32.mxu1 %v6828_v52  ;;  %v8768_v33 = vld [vmem:[%s16313_s6 + $0x660] sm:$0xff]  ;;  %v7516_v52 = vld [vmem:[#allocation2 + $0x1358] sm:$0xff]  ;;  %v7515_v48 = vld [vmem:[#allocation2 + $0x1350] sm:$0xff] }
 0x890   : > { %v8116_v26 = vpop.f32.mrf.mxu1  ;;  %8400 = vmatprep.subr.mxu1 %v7490_v54  ;;  %8989 = vmatpush2.msra.mxu0 %v8768_v33  ;;  %v7514_v16 = vld [vmem:[#allocation2 + $0x1348] sm:$0xff]  ;;  %v7513_v6 = vld [vmem:[#allocation2 + $0x1340] sm:$0xff]  ;;  %v7512_v54 = vld [vmem:[#allocation2 + $0x1338] sm:$0xff] }
 0x891   : > { %v15106_v10 = vadd.f32 %v8116_v26, %v15052_v35  ;;  %8401 = vmatpush1.msra.mxu1 %v7489_v14  ;;  %v7484_v35 = vld [vmem:[#allocation2 + $0x1258] sm:$0xff]  ;;  %v7511_v26 = vld [vmem:[#allocation2 + $0x1330] sm:$0xff]  ;;  %v7510_v14 = vld [vmem:[#allocation2 + $0x1328] sm:$0xff] }
 0x892   : > { %8402 = vmatprep.subr.mxu1 %v7488_v22  ;;  %v7509_v22 = vld [vmem:[#allocation2 + $0x1320] sm:$0xff]  ;;  %v7507_v33 = vld [vmem:[#allocation2 + $0x1310] sm:$0xff] }
 0x893   : > { %8403 = vmatpush1.msra.mxu1 %v7487_v13  ;;  %v7506_v13 = vld [vmem:[#allocation2 + $0x1308] sm:$0xff] }
 0x894   : > { %8404 = vmatprep.subr.mxu1 %v7486_v29  ;;  %v6827_v29 = vld [vmem:[%s16312_s5 + $0x90] sm:$0xff] }
 0x895   : > { %8405 = vmatpush1.msra.mxu1 %v7485_v42  ;;  %v7505_v42 = vld [vmem:[#allocation2 + $0x1300] sm:$0xff] }
 0x896   : > { %8406 = vmatprep.subr.mxu1 %v7484_v35  ;;  %v6850_v35 = vld [vmem:[%s16312_s5 + $0x148] sm:$0xff] }
 0x897   : > { %8407 = vmatpush1.msra.mxu1 %v7483_v50  ;;  %v7568_v50 = vld [vmem:[#allocation2 + $0x14f8] sm:$0xff] }
 0x898   : > { %8408 = vmatprep.subr.mxu1 %v7482_v0 }
 0x899   : > { %8409 = vmatpush1.msra.mxu1 %v7481_v37  ;;  %v7567_v37 = vld [vmem:[#allocation2 + $0x14f0] sm:$0xff] }
 0x89a   : > { %8410 = vmatprep.subr.mxu1 %v7480_v17  ;;  %v7566_v17 = vld [vmem:[#allocation2 + $0x14e8] sm:$0xff] }
 0x89b   : > { %8411 = vmatpush1.msra.mxu1 %v7479_v44  ;;  %v6849_v44 = vld [vmem:[%s16312_s5 + $0x140] sm:$0xff] }
 0x89c   : > { %8412 = vmatprep.subr.mxu1 %v7478_v36 }
 0x89d   : > { %8413 = vmatpush1.msra.mxu1 %v7477_v38  ;;  %v7565_v38 = vld [vmem:[#allocation2 + $0x14e0] sm:$0xff] }
 0x89e   : > { %8414 = vmatprep.subr.mxu1 %v7476_v4  ;;  %v6872_v4 = vld [vmem:[%s16312_s5 + $0x1f8] sm:$0xff] }
 0x89f   : > { %8415 = vmatpush1.msra.mxu1 %v7475_v40  ;;  %v7564_v40 = vld [vmem:[#allocation2 + $0x14d8] sm:$0xff] }
 0x8a0   : > { %s10235_s27 = spop %10234  ;;  %8416 = vmatprep.subr.mxu1 %v7474_v24 }
 0x8a1   : > { %v6806_v5 = vstv %s10235_s27  ;;  %8417 = vmatpush1.msra.mxu1 %v7473_v31  ;;  %v7563_v31 = vld [vmem:[#allocation2 + $0x14d0] sm:$0xff] }
 0x8a2   : > { %6808 = vst.msk [vmem:[%s363_s26] sm:$0x1] %vm6807_vm6, %v6806_v5  ;;  %8418 = vmatprep.subr.mxu1 %v7536_v45  ;;  %v7562_v5 = vld [vmem:[#allocation2 + $0x14c8] sm:$0xff]  ;;  %v6871_v45 = vld [vmem:[%s16312_s5 + $0x1f0] sm:$0xff] }
 0x8a3   : > { %8419 = vmatpush2.msra.mxu1 %v7535_v3 }
 0x8a4   : > { %8420 = vmatprep.subr.mxu1 %v7534_v46  ;;  %v7561_v46 = vld [vmem:[#allocation2 + $0x14c0] sm:$0xff] }
 0x8a5   : > { %8421 = vmatpush2.msra.mxu1 %v7533_v60  ;;  %v6894_v60 = vld [vmem:[%s16312_s5 + $0x2a8] sm:$0x1] }
 0x8a6   : > { %8422 = vmatprep.subr.mxu1 %v7532_v25  ;;  %v7560_v25 = vld [vmem:[#allocation2 + $0x14b8] sm:$0xff] }
 0x8a7   : > { %8423 = vmatpush2.msra.mxu1 %v7531_v56 }
 0x8a8   : > { %8424 = vmatprep.subr.mxu1 %v7530_v34  ;;  %v7559_v34 = vld [vmem:[#allocation2 + $0x14b0] sm:$0xff] }
 0x8a9   : > { %8425 = vmatpush2.msra.mxu1 %v7529_v39  ;;  %v7558_v39 = vld [vmem:[#allocation2 + $0x14a8] sm:$0xff] }
 0x8aa   : > { %8426 = vmatprep.subr.mxu1 %v7528_v58  ;;  %v6893_v58 = vld [vmem:[%s16312_s5 + $0x2a0] sm:$0x1] }
 0x8ab   : > { %8427 = vmatpush2.msra.mxu1 %v7527_v20 }
 0x8ac   : > { %8428 = vmatprep.subr.mxu1 %v7526_v43  ;;  %v7557_v43 = vld [vmem:[#allocation2 + $0x14a0] sm:$0xff] }
 0x8ad   : > { %8429 = vmatpush2.msra.mxu1 %v7525_v63  ;;  %v6830_v63 = vld [vmem:[%s16312_s5 + $0xa8] sm:$0xff] }
 0x8ae   : > { %8430 = vmatprep.subr.mxu1 %v7524_v32  ;;  %v7556_v32 = vld [vmem:[#allocation2 + $0x1498] sm:$0xff] }
 0x8af   : > { %8431 = vmatpush2.msra.mxu1 %v7523_v2 }
 0x8b0   : > { %8432 = vmatprep.subr.mxu1 %v7522_v57  ;;  %v7555_v57 = vld [vmem:[#allocation2 + $0x1490] sm:$0xff] }
 0x8b1   : > { %8433 = vmatpush2.msra.mxu1 %v7521_v30 }
 0x8b2   : > { %8434 = vmatprep.subr.mxu1 %v7520_v27  ;;  %v7554_v27 = vld [vmem:[#allocation2 + $0x1488] sm:$0xff] }
 0x8b3   : > { %8435 = vmatpush2.msra.mxu1 %v7519_v21  ;;  %v7553_v21 = vld [vmem:[#allocation2 + $0x1480] sm:$0xff] }
 0x8b4   : > { %8436 = vmatprep.subr.mxu1 %v7518_v18  ;;  %v7552_v18 = vld [vmem:[#allocation2 + $0x1478] sm:$0xff] }
 0x8b5   : > { %8437 = vmatpush2.msra.mxu1 %v7517_v47  ;;  %v8757_v47 = vld [vmem:[%s16313_s6 + $0x608] sm:$0xff] }
 0x8b6   : > { %8438 = vmatprep.subr.mxu1 %v7516_v52  ;;  %v8756_v52 = vld [vmem:[%s16313_s6 + $0x600] sm:$0xff]  ;;  %8990 = vmatprep.subr.mxu0 %v8757_v47  ;;  %v8675_v47 = vld [vmem:[%s16313_s6 + $0x378] sm:$0xff] }
 0x8b7   : > { %8439 = vmatpush2.msra.mxu1 %v7515_v48  ;;  %v7551_v48 = vld [vmem:[#allocation2 + $0x1470] sm:$0xff]  ;;  %8991 = vmatpush2.msra.mxu0 %v8756_v52 }
 0x8b8   : > { %8440 = vmatprep.subr.mxu1 %v7514_v16  ;;  %v7549_v16 = vld [vmem:[#allocation2 + $0x1460] sm:$0xff]  ;;  %v8674_v52 = vld [vmem:[%s16313_s6 + $0x370] sm:$0xff] }
 0x8b9   : > { %8441 = vmatpush2.msra.mxu1 %v7513_v6  ;;  %v7548_v6 = vld [vmem:[#allocation2 + $0x1458] sm:$0xff] }
 0x8ba   : > { %8442 = vmatprep.subr.mxu1 %v7512_v54  ;;  %v7547_v54 = vld [vmem:[#allocation2 + $0x1450] sm:$0xff] }
 0x8bb   : > { %8443 = vmatpush2.msra.mxu1 %v7511_v26  ;;  %v7546_v26 = vld [vmem:[#allocation2 + $0x1448] sm:$0xff] }
 0x8bc   : > { %8444 = vmatprep.subr.mxu1 %v7510_v14  ;;  %v7545_v14 = vld [vmem:[#allocation2 + $0x1440] sm:$0xff] }
 0x8bd   : > { %8445 = vmatpush2.msra.mxu1 %v7509_v22  ;;  %v7544_v22 = vld [vmem:[#allocation2 + $0x1438] sm:$0xff] }
 0x8be   : > { %8446 = vmatprep.subr.mxu1 %v7508_v41  ;;  %v7543_v41 = vld [vmem:[#allocation2 + $0x1430] sm:$0xff] }
 0x8bf   : > { %8447 = vmatpush2.msra.mxu1 %v7507_v33  ;;  %v7542_v33 = vld [vmem:[#allocation2 + $0x1428] sm:$0xff] }
 0x8c0   : > { %8448 = vmatprep.subr.mxu1 %v7506_v13  ;;  %v7541_v13 = vld [vmem:[#allocation2 + $0x1420] sm:$0xff] }
 0x8c1   : > { %8449 = vmatpush2.msra.mxu1 %v7505_v42  ;;  %v7539_v42 = vld [vmem:[#allocation2 + $0x1410] sm:$0xff] }
 0x8c2   : > { %v15124_v0 = vpop.f32.mrf.mxu1  ;;  %8451 = vmatmul.mubr.f32.vlgmr.msra.gmra.mxu1 %v6827_v29  ;;  %8475 = vmatprep.subr.mxu1 %v7568_v50  ;;  %v7540_v29 = vld [vmem:[#allocation2 + $0x1418] sm:$0xff]  ;;  %v7537_v50 = vld [vmem:[#allocation2 + $0x1400] sm:$0xff] }
 0x8c3   : > { %8476 = vmatpush1.msra.mxu1 %v7567_v37  ;;  %8456 = vmatprep.mubr.f32.mxu1 %v6850_v35  ;;  %v7538_v35 = vld [vmem:[#allocation2 + $0x1408] sm:$0xff]  ;;  %v7572_v37 = vld [vmem:[#allocation2 + $0x1518] sm:$0xff] }
 0x8c4   : > { %v15129_v36 = vpop.f32.mrf.mxu1  ;;  %8477 = vmatprep.subr.mxu1 %v7566_v17  ;;  %v7571_v17 = vld [vmem:[#allocation2 + $0x1510] sm:$0xff] }
 0x8c5   : > { %8478 = vmatpush1.msra.mxu1 %v7565_v38  ;;  %v6829_v38 = vld [vmem:[%s16312_s5 + $0xa0] sm:$0xff] }
 0x8c6   : > { %v15134_v24 = vpop.f32.mrf.mxu1  ;;  %8457 = vmatmul.mubr.f32.gmra.mxu1 %v6849_v44  ;;  %8479 = vmatprep.subr.mxu1 %v7564_v40  ;;  %v7570_v44 = vld [vmem:[#allocation2 + $0x1508] sm:$0xff]  ;;  %v7569_v40 = vld [vmem:[#allocation2 + $0x1500] sm:$0xff] }
 0x8c7   : > { %8480 = vmatpush1.msra.mxu1 %v7563_v31  ;;  %8462 = vmatprep.mubr.f32.mxu1 %v6872_v4  ;;  %v8747_v4 = vld [vmem:[%s16313_s6 + $0x5b8] sm:$0xff] }
 0x8c8   : > { %v15139_v3 = vpop.f32.mrf.mxu1  ;;  %8481 = vmatprep.subr.mxu1 %v7562_v5  ;;  %v6852_v31 = vld [vmem:[%s16312_s5 + $0x158] sm:$0xff]  ;;  %v8746_v5 = vld [vmem:[%s16313_s6 + $0x5b0] sm:$0xff] }
 0x8c9   : > { %8482 = vmatpush1.msra.mxu1 %v7561_v46  ;;  %v8734_v46 = vld [vmem:[%s16313_s6 + $0x550] sm:$0xff] }
 0x8ca   : > { %v15144_v56 = vpop.f32.mrf.mxu1  ;;  %8463 = vmatmul.mubr.f32.gmra.mxu1 %v6871_v45  ;;  %8483 = vmatprep.subr.mxu1 %v7560_v25  ;;  %v8735_v45 = vld [vmem:[%s16313_s6 + $0x558] sm:$0xff] }
 0x8cb   : > { %8484 = vmatpush1.msra.mxu1 %v7559_v34  ;;  %8468 = vmatprep.mubr.f32.mxu1 %v6894_v60  ;;  %v6851_v60 = vld [vmem:[%s16312_s5 + $0x150] sm:$0xff]  ;;  %v8723_v25 = vld [vmem:[%s16313_s6 + $0x4f8] sm:$0xff]  ;;  %v6874_v34 = vld [vmem:[%s16312_s5 + $0x208] sm:$0xff] }
 0x8cc   : > { %v15149_v20 = vpop.f32.mrf.mxu1  ;;  %8485 = vmatprep.subr.mxu1 %v7558_v39  ;;  %v8722_v39 = vld [vmem:[%s16313_s6 + $0x4f0] sm:$0xff] }
 0x8cd   : > { %8486 = vmatpush1.msra.mxu1 %v7557_v43  ;;  %v6873_v43 = vld [vmem:[%s16312_s5 + $0x200] sm:$0xff] }
 0x8ce   : > { %v8203_v2 = vpop.f32.mrf.mxu1  ;;  %8469 = vmatmul.mubr.f32.gmra.mxu1 %v6893_v58  ;;  %8487 = vmatprep.subr.mxu1 %v7556_v32  ;;  %v8711_v58 = vld [vmem:[%s16313_s6 + $0x498] sm:$0xff]  ;;  %v6895_v32 = vld [vmem:[%s16312_s5 + $0x2b0] sm:$0x1] }
 0x8cf   : > { %v15155_v30 = vadd.f32 %v8203_v2, %v15103_v11  ;;  %8488 = vmatpush1.msra.mxu1 %v7555_v57  ;;  %10148 = vmatprep.mubr.msk.f32.mxu1 %vm5978_vm3, %v6830_v63  ;;  %v7550_v11 = vld [vmem:[#allocation2 + $0x1468] sm:$0xff]  ;;  %v6896_v63 = vld [vmem:[%s16312_s5 + $0x2b8] sm:$0x1]  ;;  %v8710_v2 = vld [vmem:[%s16313_s6 + $0x490] sm:$0xff] }
 0x8d0   : > { %8489 = vmatprep.subr.mxu1 %v7554_v27  ;;  %v8699_v57 = vld [vmem:[%s16313_s6 + $0x438] sm:$0xff]  ;;  %v8698_v27 = vld [vmem:[%s16313_s6 + $0x430] sm:$0xff] }
 0x8d1   : > { %8490 = vmatpush1.msra.mxu1 %v7553_v21  ;;  %v8687_v21 = vld [vmem:[%s16313_s6 + $0x3d8] sm:$0xff] }
 0x8d2   : > { %8491 = vmatprep.subr.mxu1 %v7552_v18  ;;  %v8686_v18 = vld [vmem:[%s16313_s6 + $0x3d0] sm:$0xff] }
 0x8d3   : > { %8492 = vmatpush1.msra.mxu1 %v7551_v48  ;;  %v8663_v48 = vld [vmem:[%s16313_s6 + $0x318] sm:$0xff] }
 0x8d4   : > { %8493 = vmatprep.subr.mxu1 %v7550_v11  ;;  %v8662_v11 = vld [vmem:[%s16313_s6 + $0x310] sm:$0xff] }
 0x8d5   : > { %8494 = vmatpush1.msra.mxu1 %v7549_v16  ;;  %v8651_v16 = vld [vmem:[%s16313_s6 + $0x2b8] sm:$0xff] }
 0x8d6   : > { %8495 = vmatprep.subr.mxu1 %v7548_v6  ;;  %v8650_v6 = vld [vmem:[%s16313_s6 + $0x2b0] sm:$0xff] }
 0x8d7   : > { %8496 = vmatpush1.msra.mxu1 %v7547_v54  ;;  %v8639_v54 = vld [vmem:[%s16313_s6 + $0x258] sm:$0xff] }
 0x8d8   : > { %8497 = vmatprep.subr.mxu1 %v7546_v26  ;;  %v8638_v26 = vld [vmem:[%s16313_s6 + $0x250] sm:$0xff] }
 0x8d9   : > { %8498 = vmatpush1.msra.mxu1 %v7545_v14  ;;  %v8627_v14 = vld [vmem:[%s16313_s6 + $0x1f8] sm:$0xff] }
 0x8da   : > { %8499 = vmatprep.subr.mxu1 %v7544_v22  ;;  %v8626_v22 = vld [vmem:[%s16313_s6 + $0x1f0] sm:$0xff] }
 0x8db   : > { %8500 = vmatpush1.msra.mxu1 %v7543_v41  ;;  %v8615_v41 = vld [vmem:[%s16313_s6 + $0x198] sm:$0xff] }
 0x8dc   : > { %8501 = vmatprep.subr.mxu1 %v7542_v33  ;;  %v8614_v33 = vld [vmem:[%s16313_s6 + $0x190] sm:$0xff] }
 0x8dd   : > { %8502 = vmatpush1.msra.mxu1 %v7541_v13  ;;  %v8603_v13 = vld [vmem:[%s16313_s6 + $0x138] sm:$0xff] }
 0x8de   : > { %8503 = vmatprep.subr.mxu1 %v7540_v29  ;;  %v8602_v29 = vld [vmem:[%s16313_s6 + $0x130] sm:$0xff] }
 0x8df   : > { %8504 = vmatpush1.msra.mxu1 %v7539_v42  ;;  %v8591_v42 = vld [vmem:[%s16313_s6 + $0xd8] sm:$0xff] }
 0x8e0   : > { %8505 = vmatprep.subr.mxu1 %v7538_v35  ;;  %v8590_v35 = vld [vmem:[%s16313_s6 + $0xd0] sm:$0xff] }
 0x8e1   : > { %8506 = vmatpush1.msra.mxu1 %v7537_v50  ;;  %v8579_v50 = vld [vmem:[%s16313_s6 + $0x78] sm:$0xff] }
 0x8e2   : > { %8535 = vmatprep.subr.mxu1 %v7572_v37  ;;  %v8578_v37 = vld [vmem:[%s16313_s6 + $0x70] sm:$0xff] }
 0x8e3   : > { %8536 = vmatpush2.msra.mxu1 %v7571_v17  ;;  %v8567_v17 = vld [vmem:[%s16313_s6 + $0x18] sm:$0xff] }
 0x8e4   : > { %8537 = vmatprep.subr.mxu1 %v7570_v44  ;;  %v8566_v44 = vld [vmem:[%s16313_s6 + $0x10] sm:$0xff] }
 0x8e5   : > { %8538 = vmatpush2.msra.mxu1 %v7569_v40  ;;  %v8831_v40 = vld [vmem:[%s16313_s6 + $0x858] sm:$0xff] }
 0x8e6   : > { %8540 = vmatmul.mubr.f32.vlgmr.msra.gmra.mxu1 %v6829_v38  ;;  %9017 = vmatprep.subr.mxu1 %v8747_v4  ;;  %v8843_v38 = vld [vmem:[%s16313_s6 + $0x8b8] sm:$0xff]  ;;  %v8842_v4 = vld [vmem:[%s16313_s6 + $0x8b0] sm:$0xff] }
 0x8e7   : > { %10149 = vmatprep.mubr.msk.f32.mxu1 %vm5978_vm3, %v6852_v31  ;;  %9018 = vmatpush1.msra.mxu1 %v8746_v5  ;;  %v8830_v31 = vld [vmem:[%s16313_s6 + $0x850] sm:$0xff]  ;;  %v8819_v5 = vld [vmem:[%s16313_s6 + $0x7f8] sm:$0xff] }
 0x8e8   : > { %9019 = vmatprep.subr.mxu1 %v8735_v45  ;;  %v8818_v45 = vld [vmem:[%s16313_s6 + $0x7f0] sm:$0xff] }
 0x8e9   : > { %9020 = vmatpush1.msra.mxu1 %v8734_v46  ;;  %v8807_v46 = vld [vmem:[%s16313_s6 + $0x798] sm:$0xff] }
 0x8ea   : > { %8546 = vmatmul.mubr.f32.gmra.mxu1 %v6851_v60  ;;  %9021 = vmatprep.subr.mxu1 %v8723_v25  ;;  %v8806_v60 = vld [vmem:[%s16313_s6 + $0x790] sm:$0xff]  ;;  %v8795_v25 = vld [vmem:[%s16313_s6 + $0x738] sm:$0xff] }
 0x8eb   : > { %10150 = vmatprep.mubr.msk.f32.mxu1 %vm5978_vm3, %v6874_v34  ;;  %9022 = vmatpush1.msra.mxu1 %v8722_v39  ;;  %v8794_v34 = vld [vmem:[%s16313_s6 + $0x730] sm:$0xff]  ;;  %v8783_v39 = vld [vmem:[%s16313_s6 + $0x6d8] sm:$0xff] }
 0x8ec   : > { %9023 = vmatprep.subr.mxu1 %v8711_v58  ;;  %v8782_v58 = vld [vmem:[%s16313_s6 + $0x6d0] sm:$0xff] }
 0x8ed   : > { %9024 = vmatpush1.msra.mxu1 %v8710_v2  ;;  %v8758_v2 = vld [vmem:[%s16313_s6 + $0x610] sm:$0xff] }
 0x8ee   : > { %8552 = vmatmul.mubr.f32.gmra.mxu1 %v6873_v43  ;;  %9025 = vmatprep.subr.mxu1 %v8699_v57  ;;  %v8771_v43 = vld [vmem:[%s16313_s6 + $0x678] sm:$0xff]  ;;  %v8749_v57 = vld [vmem:[%s16313_s6 + $0x5c8] sm:$0xff] }
 0x8ef   : > { %10151 = vmatprep.mubr.msk.f32.mxu1 %vm5978_vm3, %v6896_v63  ;;  %9026 = vmatpush1.msra.mxu1 %v8698_v27  ;;  %v8770_v63 = vld [vmem:[%s16313_s6 + $0x670] sm:$0xff]  ;;  %v8751_v27 = vld [vmem:[%s16313_s6 + $0x5d8] sm:$0xff] }
 0x8f0   : > { %9027 = vmatprep.subr.mxu1 %v8687_v21  ;;  %9106 = vmatprep.subr.mxu0 %v8749_v57  ;;  %v15338_v21 = vpop.f32.mrf.mxu1 }
 0x8f1   : > { %9028 = vmatpush1.msra.mxu1 %v8686_v18 }
 0x8f2   : > { %8558 = vmatmul.mubr.f32.gmra.mxu1 %v6895_v32  ;;  %9029 = vmatprep.subr.mxu1 %v8675_v47  ;;  %v8759_v32 = vld [vmem:[%s16313_s6 + $0x618] sm:$0xff] }
 0x8f3   : > { %9030 = vmatpush1.msra.mxu1 %v8674_v52 }
 0x8f4   : > { %9031 = vmatprep.subr.mxu1 %v8663_v48 }
 0x8f5   : > { %9032 = vmatpush1.msra.mxu1 %v8662_v11 }
 0x8f6   : > { %9033 = vmatprep.subr.mxu1 %v8651_v16 }
 0x8f7   : > { %9034 = vmatpush1.msra.mxu1 %v8650_v6 }
 0x8f8   : > { %9035 = vmatprep.subr.mxu1 %v8639_v54 }
 0x8f9   : > { %9036 = vmatpush1.msra.mxu1 %v8638_v26 }
 0x8fa   : > { %9037 = vmatprep.subr.mxu1 %v8627_v14 }
 0x8fb   : > { %9038 = vmatpush1.msra.mxu1 %v8626_v22 }
 0x8fc   : > { %9039 = vmatprep.subr.mxu1 %v8615_v41 }
 0x8fd   : > { %9040 = vmatpush1.msra.mxu1 %v8614_v33 }
 0x8fe   : > { %9041 = vmatprep.subr.mxu1 %v8603_v13 }
 0x8ff   : > { %9042 = vmatpush1.msra.mxu1 %v8602_v29 }
 0x900   : > { %9043 = vmatprep.subr.mxu1 %v8591_v42 }
 0x901   : > { %9044 = vmatpush1.msra.mxu1 %v8590_v35 }
 0x902   : > { %9045 = vmatprep.subr.mxu1 %v8579_v50  ;;  %v8274_v18 = vpop.f32.mrf.mxu1 }
 0x903   : > { %9046 = vmatpush1.msra.mxu1 %v8578_v37 }
 0x904   : > { %9047 = vmatprep.subr.mxu1 %v8567_v17  ;;  %v8276_v47 = vpop.f32.mrf.mxu1 }
 0x905   : > { %9048 = vmatpush1.msra.mxu1 %v8566_v44 }
 0x906   : > { %9065 = vmatprep.subr.mxu1 %v8843_v38  ;;  %v8280_v52 = vpop.f32.mrf.mxu1 }
 0x907   : > { %9066 = vmatpush2.msra.mxu1 %v8842_v4 }
 0x908   : > { %9067 = vmatprep.subr.mxu1 %v8831_v40  ;;  %v8282_v48 = vpop.f32.mrf.mxu1  ;;  %v8188_v40 = vadd.f32 %v15129_v36, %v15076_v23 }
 0x909   : > { %9068 = vmatpush2.msra.mxu1 %v8830_v31  ;;  %v8186_v31 = vadd.f32 %v15124_v0, %v15061_v12  ;;  %v8200_v12 = vadd.f32 %v15149_v20, %v15100_v61  ;;  %v8737_v61 = vld [vmem:[%s16313_s6 + $0x568] sm:$0xff]  ;;  %v8739_v20 = vld [vmem:[%s16313_s6 + $0x578] sm:$0xff] }
 0x90a   : > { %9069 = vmatprep.subr.mxu1 %v8819_v5  ;;  %v15340_v11 = vpop.f32.mrf.mxu1  ;;  %v8277_v5 = vadd.f32 %v8276_v47, %v8188_v40  ;;  %v8724_v40 = vld [vmem:[%s16313_s6 + $0x500] sm:$0xff] }
 0x90b   : > { %9070 = vmatpush2.msra.mxu1 %v8818_v45  ;;  %v8275_v45 = vadd.f32 %v8274_v18, %v8186_v31 }
 0x90c   : > { %9071 = vmatprep.subr.mxu1 %v8807_v46  ;;  %v8288_v16 = vpop.f32.mrf.mxu1 }
 0x90d   : > { %9072 = vmatpush2.msra.mxu1 %v8806_v60  ;;  %v8194_v60 = vadd.f32 %v15139_v3, %v15088_v19  ;;  %v8748_v3 = vld [vmem:[%s16313_s6 + $0x5c0] sm:$0xff] }
 0x90e   : > { %9073 = vmatprep.subr.mxu1 %v8795_v25  ;;  %v15342_v6 = vpop.f32.mrf.mxu1 }
 0x90f   : > { %9074 = vmatpush2.msra.mxu1 %v8794_v34 }
 0x910   : > { %9075 = vmatprep.subr.mxu1 %v8783_v39  ;;  %v15344_v54 = vpop.f32.mrf.mxu1 }
 0x911   : > { %9076 = vmatpush2.msra.mxu1 %v8782_v58  ;;  %v8283_v58 = vadd.f32 %v8282_v48, %v8194_v60  ;;  %v8738_v48 = vld [vmem:[%s16313_s6 + $0x570] sm:$0xff]  ;;  %v8712_v60 = vld [vmem:[%s16313_s6 + $0x4a0] sm:$0xff] }
 0x912   : > { %9077 = vmatprep.subr.mxu1 %v8771_v43 }
 0x913   : > { %9078 = vmatpush2.msra.mxu1 %v8770_v63  ;;  %v8192_v63 = vadd.f32 %v15134_v24, %v15079_v28  ;;  %v8750_v28 = vld [vmem:[%s16313_s6 + $0x5d0] sm:$0xff] }
 0x914   : > { %9079 = vmatprep.subr.mxu1 %v8759_v32 }
 0x915   : > { %9080 = vmatpush2.msra.mxu1 %v8758_v2  ;;  %v8281_v0 = vadd.f32 %v8280_v52, %v8192_v63  ;;  %v8736_v52 = vld [vmem:[%s16313_s6 + $0x560] sm:$0xff] }
 0x916   : > { %9195 = vmatprep.subr.mxu1 %v8751_v27  ;;  %v8289_v27 = vadd.f32 %v8288_v16, %v8200_v12  ;;  %v8198_v16 = vadd.f32 %v15144_v56, %v15091_v8  ;;  %v8690_v12 = vld [vmem:[%s16313_s6 + $0x3f0] sm:$0xff] }
 0x918   : > { %v8287_v8 = vadd.f32 %v15340_v11, %v8198_v16  ;;  %v8715_v11 = vld [vmem:[%s16313_s6 + $0x4b8] sm:$0xff]  ;;  %v8641_v16 = vld [vmem:[%s16313_s6 + $0x268] sm:$0xff] }
 0x942   : > { %v8363_v26 = vpop.f32.mrf.mxu1 }
 0x943   : > { %v8364_v34 = vadd.f32 %v8363_v26, %v8275_v45 }
 0x944   : > { %v8365_v14 = vpop.f32.mrf.mxu1 }
 0x945   : > { %v8366_v25 = vadd.f32 %v8365_v14, %v8277_v5 }
 0x946   : > { %v8369_v22 = vpop.f32.mrf.mxu1 }
 0x947   : > { %v8370_v18 = vadd.f32 %v8369_v22, %v8281_v0 }
 0x948   : > { %v8371_v41 = vpop.f32.mrf.mxu1 }
 0x949   : > { %v8372_v36 = vadd.f32 %v8371_v41, %v8283_v58 }
 0x94a   : > { %v15346_v33 = vpop.f32.mrf.mxu1 }
 0x94b   : > { %v8376_v31 = vadd.f32 %v15346_v33, %v8287_v8  ;;  %v8630_v8 = vld [vmem:[%s16313_s6 + $0x210] sm:$0xff] }
 0x94c   : > { %v8377_v13 = vpop.f32.mrf.mxu1 }
 0x94d   : > { %v8378_v14 = vadd.f32 %v8377_v13, %v8289_v27  ;;  %v8666_v27 = vld [vmem:[%s16313_s6 + $0x330] sm:$0xff] }
 0x94e   : > { %v15348_v29 = vpop.f32.mrf.mxu1 }
 0x950   : > { %v15350_v42 = vpop.f32.mrf.mxu1 }
 0x982   : > { %v8452_v35 = vpop.f32.mrf.mxu1 }
 0x983   : > { %v8453_v32 = vadd.f32 %v8452_v35, %v8364_v34  ;;  %v8725_v35 = vld [vmem:[%s16313_s6 + $0x508] sm:$0xff] }
 0x984   : > { %v8454_v50 = vpop.f32.mrf.mxu1  ;;  %v8701_v34 = vld [vmem:[%s16313_s6 + $0x448] sm:$0xff] }
 0x985   : > { %v8455_v43 = vadd.f32 %v8454_v50, %v8366_v25  ;;  %v8727_v50 = vld [vmem:[%s16313_s6 + $0x518] sm:$0xff]  ;;  %v8714_v25 = vld [vmem:[%s16313_s6 + $0x4b0] sm:$0xff] }
 0x986   : > { %v8458_v37 = vpop.f32.mrf.mxu1 }
 0x987   : > { %v8459_v22 = vadd.f32 %v8458_v37, %v8370_v18  ;;  %v8653_v18 = vld [vmem:[%s16313_s6 + $0x2c8] sm:$0xff] }
 0x988   : > { %v8460_v17 = vpop.f32.mrf.mxu1 }
 0x989   : > { %v8461_v24 = vadd.f32 %v8460_v17, %v8372_v36  ;;  %v8206_v17 = vadd.f32 %v15338_v21, %v15106_v10  ;;  %v8726_v10 = vld [vmem:[%s16313_s6 + $0x510] sm:$0xff]  ;;  %v8713_v21 = vld [vmem:[%s16313_s6 + $0x4a8] sm:$0xff]  ;;  %v8688_v36 = vld [vmem:[%s16313_s6 + $0x3e0] sm:$0xff] }
 0x98a   : > { %v15352_v44 = vpop.f32.mrf.mxu1 }
 0x98b   : > { %v8465_v33 = vadd.f32 %v15352_v44, %v8376_v31  ;;  %v8700_v44 = vld [vmem:[%s16313_s6 + $0x440] sm:$0xff]  ;;  %v8606_v31 = vld [vmem:[%s16313_s6 + $0x150] sm:$0xff] }
 0x98c   : > { %v8466_v38 = vpop.f32.mrf.mxu1 }
 0x98d   : > { %v8467_v56 = vadd.f32 %v8466_v38, %v8378_v14  ;;  %v8295_v38 = vadd.f32 %v15344_v54, %v8206_v17  ;;  %v8643_v14 = vld [vmem:[%s16313_s6 + $0x278] sm:$0xff]  ;;  %v8628_v17 = vld [vmem:[%s16313_s6 + $0x200] sm:$0xff] }
 0x98e   : > { %v15354_v4 = vpop.f32.mrf.mxu1 }
 0x98f   : > { %v8384_v54 = vadd.f32 %v15350_v42, %v8295_v38  ;;  %v8604_v38 = vld [vmem:[%s16313_s6 + $0x140] sm:$0xff] }
 0x990   : > { %v15360_v46 = vpop.f32.mrf.mxu1 }
 0x991   : > { %v8473_v42 = vadd.f32 %v15360_v46, %v8384_v54  ;;  %v8594_v54 = vld [vmem:[%s16313_s6 + $0xf0] sm:$0xff] }
 0x9a6   : > { %v8541_v39 = vpop.f32.mrf.mxu1 }
 0x9a7   : > { %v15370_v57 = vadd.f32 %v8541_v39, %v8453_v32  ;;  %v8703_v39 = vld [vmem:[%s16313_s6 + $0x458] sm:$0xff]  ;;  %v8702_v32 = vld [vmem:[%s16313_s6 + $0x450] sm:$0xff] }
 0x9a8   : > { %v8543_v23 = vpop.f32.mrf.mxu1 }
 0x9a9   : > { %v15366_v2 = vadd.f32 %v8543_v23, %v8455_v43  ;;  %v8293_v43 = vadd.f32 %v15342_v6, %v15155_v30  ;;  %v8689_v30 = vld [vmem:[%s16313_s6 + $0x3e8] sm:$0xff]  ;;  %v8691_v6 = vld [vmem:[%s16313_s6 + $0x3f8] sm:$0xff] }
 0x9aa   : > { %v8547_v19 = vpop.f32.mrf.mxu1 }
 0x9ab   : > { %10152 = vmatprep.mubr.msk.f32.mxu0 %vm4511_vm2, %v15366_v2  ;;  %10156 = vmatprep.mubr.msk.f32.mxu1 %vm4511_vm2, %v15366_v2  ;;  %v15409_v13 = vadd.f32 %v8547_v19, %v8459_v22  ;;  %v8382_v46 = vadd.f32 %v15348_v29, %v8293_v43  ;;  %v8677_v29 = vld [vmem:[%s16313_s6 + $0x388] sm:$0xff]  ;;  %v8679_v19 = vld [vmem:[%s16313_s6 + $0x398] sm:$0xff]  ;;  %v8640_v22 = vld [vmem:[%s16313_s6 + $0x260] sm:$0xff] }
 0x9ac   : > { %v8549_v47 = vpop.f32.mrf.mxu1  ;;  %8993 = vmatmul.mubr.f32.vlgmr.msra.gmra.mxu0 %v15370_v57  ;;  %9082 = vmatmul.mubr.f32.vlgmr.msra.gmra.mxu1 %v15370_v57  ;;  %v8569_v43 = vld [vmem:[%s16313_s6 + $0x28] sm:$0xff] }
 0x9ad   : > { %v15396_v26 = vadd.f32 %v8549_v47, %v8461_v24  ;;  %9107 = vmatpush1.msra.mxu0 %v8748_v3  ;;  %9196 = vmatpush1.msra.mxu1 %v8750_v28  ;;  %v8471_v0 = vadd.f32 %v15354_v4, %v8382_v46  ;;  %v8676_v4 = vld [vmem:[%s16313_s6 + $0x380] sm:$0xff]  ;;  %v8678_v28 = vld [vmem:[%s16313_s6 + $0x390] sm:$0xff]  ;;  %v8665_v24 = vld [vmem:[%s16313_s6 + $0x328] sm:$0xff] }
 0x9ae   : > { %9108 = vmatprep.subr.mxu0 %v8737_v61  ;;  %9197 = vmatprep.subr.mxu1 %v8739_v20  ;;  %v8553_v41 = vpop.f32.mrf.mxu1  ;;  %v8667_v61 = vld [vmem:[%s16313_s6 + $0x338] sm:$0xff]  ;;  %v8664_v20 = vld [vmem:[%s16313_s6 + $0x320] sm:$0xff] }
 0x9af   : > { %9109 = vmatpush1.msra.mxu0 %v8736_v52  ;;  %9198 = vmatpush1.msra.mxu1 %v8738_v48  ;;  %v15450_v63 = vadd.f32 %v8553_v41, %v8465_v33  ;;  %v8655_v47 = vld [vmem:[%s16313_s6 + $0x2d8] sm:$0xff]  ;;  %v8652_v52 = vld [vmem:[%s16313_s6 + $0x2c0] sm:$0xff]  ;;  %v8654_v48 = vld [vmem:[%s16313_s6 + $0x2d0] sm:$0xff] }
 0x9b0   : > { %10153 = vmatprep.mubr.msk.f32.mxu0 %vm4511_vm2, %v15396_v26  ;;  %10157 = vmatprep.mubr.msk.f32.mxu1 %vm4511_vm2, %v15396_v26  ;;  %v8555_v37 = vpop.f32.mrf.mxu1  ;;  %v8642_v41 = vld [vmem:[%s16313_s6 + $0x270] sm:$0xff]  ;;  %v8581_v33 = vld [vmem:[%s16313_s6 + $0x88] sm:$0xff]  ;;  %v8844_v46 = vld [vmem:[%s16313_s6 + $0x8c0] sm:$0xff] }
 0x9b1   : > { %9110 = vmatprep.subr.mxu0 %v8725_v35  ;;  %9199 = vmatprep.subr.mxu1 %v8727_v50  ;;  %v15429_v5 = vadd.f32 %v8555_v37, %v8467_v56  ;;  %v8629_v35 = vld [vmem:[%s16313_s6 + $0x208] sm:$0xff]  ;;  %v8631_v50 = vld [vmem:[%s16313_s6 + $0x218] sm:$0xff] }
 0x9b2   : > { %8999 = vmatmul.mubr.f32.gmra.mxu0 %v15409_v13  ;;  %9088 = vmatmul.mubr.f32.gmra.mxu1 %v15409_v13  ;;  %v8559_v45 = vpop.f32.mrf.mxu1  ;;  %v8617_v56 = vld [vmem:[%s16313_s6 + $0x1a8] sm:$0xff]  ;;  %v8619_v37 = vld [vmem:[%s16313_s6 + $0x1b8] sm:$0xff] }
 0x9b3   : > { %9111 = vmatpush1.msra.mxu0 %v8724_v40  ;;  %9200 = vmatpush1.msra.mxu1 %v8726_v10  ;;  %v15486_v3 = vadd.f32 %v8559_v45, %v8471_v0  ;;  %v8616_v40 = vld [vmem:[%s16313_s6 + $0x1a0] sm:$0xff]  ;;  %v8618_v10 = vld [vmem:[%s16313_s6 + $0x1b0] sm:$0xff]  ;;  %v8593_v45 = vld [vmem:[%s16313_s6 + $0xe8] sm:$0xff] }
 0x9b4   : > { %9112 = vmatprep.subr.mxu0 %v8713_v21  ;;  %9201 = vmatprep.subr.mxu1 %v8715_v11  ;;  %v8561_v58 = vpop.f32.mrf.mxu1  ;;  %v8605_v21 = vld [vmem:[%s16313_s6 + $0x148] sm:$0xff]  ;;  %v8607_v11 = vld [vmem:[%s16313_s6 + $0x158] sm:$0xff] }
 0x9b5   : > { %9113 = vmatpush1.msra.mxu0 %v8712_v60  ;;  %9202 = vmatpush1.msra.mxu1 %v8714_v25  ;;  %v15469_v23 = vadd.f32 %v8561_v58, %v8473_v42  ;;  %v8595_v60 = vld [vmem:[%s16313_s6 + $0xf8] sm:$0xff]  ;;  %v8592_v25 = vld [vmem:[%s16313_s6 + $0xe0] sm:$0xff]  ;;  %v8582_v58 = vld [vmem:[%s16313_s6 + $0x90] sm:$0xff] }
 0x9b6   : > { %10154 = vmatprep.mubr.msk.f32.mxu0 %vm4511_vm2, %v15429_v5  ;;  %10158 = vmatprep.mubr.msk.f32.mxu1 %vm4511_vm2, %v15429_v5  ;;  %v8571_v42 = vld [vmem:[%s16313_s6 + $0x38] sm:$0xff] }
 0x9b7   : > { %9114 = vmatprep.subr.mxu0 %v8701_v34  ;;  %9203 = vmatprep.subr.mxu1 %v8703_v39  ;;  %v8583_v34 = vld [vmem:[%s16313_s6 + $0x98] sm:$0xff]  ;;  %v8580_v39 = vld [vmem:[%s16313_s6 + $0x80] sm:$0xff] }
 0x9b8   : > { %9005 = vmatmul.mubr.f32.gmra.mxu0 %v15450_v63  ;;  %9094 = vmatmul.mubr.f32.gmra.mxu1 %v15450_v63  ;;  %v8835_v0 = vld [vmem:[%s16313_s6 + $0x878] sm:$0xff] }
 0x9b9   : > { %9115 = vmatpush1.msra.mxu0 %v8700_v44  ;;  %9204 = vmatpush1.msra.mxu1 %v8702_v32  ;;  %v8568_v44 = vld [vmem:[%s16313_s6 + $0x20] sm:$0xff]  ;;  %v8570_v32 = vld [vmem:[%s16313_s6 + $0x30] sm:$0xff] }
 0x9ba   : > { %9116 = vmatprep.subr.mxu0 %v8689_v30  ;;  %9205 = vmatprep.subr.mxu1 %v8691_v6  ;;  %v8845_v30 = vld [vmem:[%s16313_s6 + $0x8c8] sm:$0xff]  ;;  %v8847_v6 = vld [vmem:[%s16313_s6 + $0x8d8] sm:$0xff] }
 0x9bb   : > { %9117 = vmatpush1.msra.mxu0 %v8688_v36  ;;  %9206 = vmatpush1.msra.mxu1 %v8690_v12  ;;  %v8846_v36 = vld [vmem:[%s16313_s6 + $0x8d0] sm:$0xff]  ;;  %v8833_v12 = vld [vmem:[%s16313_s6 + $0x868] sm:$0xff] }
 0x9bc   : > { %10155 = vmatprep.mubr.msk.f32.mxu0 %vm4511_vm2, %v15469_v23  ;;  %10159 = vmatprep.mubr.msk.f32.mxu1 %vm4511_vm2, %v15469_v23 }
 0x9bd   : > { %9118 = vmatprep.subr.mxu0 %v8677_v29  ;;  %9207 = vmatprep.subr.mxu1 %v8679_v19  ;;  %v8832_v29 = vld [vmem:[%s16313_s6 + $0x860] sm:$0xff]  ;;  %v8834_v19 = vld [vmem:[%s16313_s6 + $0x870] sm:$0xff] }
 0x9be   : > { %9011 = vmatmul.mubr.f32.gmra.mxu0 %v15486_v3  ;;  %9100 = vmatmul.mubr.f32.gmra.mxu1 %v15486_v3 }
 0x9bf   : > { %9119 = vmatpush1.msra.mxu0 %v8676_v4  ;;  %9208 = vmatpush1.msra.mxu1 %v8678_v28  ;;  %v8821_v4 = vld [vmem:[%s16313_s6 + $0x808] sm:$0xff]  ;;  %v8823_v28 = vld [vmem:[%s16313_s6 + $0x818] sm:$0xff] }
 0x9c0   : > { %9120 = vmatprep.subr.mxu0 %v8665_v24  ;;  %10160 = vmatprep.mubr.msk.f32.mxu0 %vm4511_vm2, %v15366_v2  ;;  %v8820_v24 = vld [vmem:[%s16313_s6 + $0x800] sm:$0xff] }
 0x9c1   : > { %9209 = vmatprep.subr.mxu1 %v8667_v61  ;;  %10164 = vmatprep.mubr.msk.f32.mxu1 %vm4511_vm2, %v15366_v2  ;;  %v8822_v61 = vld [vmem:[%s16313_s6 + $0x810] sm:$0xff] }
 0x9c2   : > { %9121 = vmatpush1.msra.mxu0 %v8664_v20  ;;  %9210 = vmatpush1.msra.mxu1 %v8666_v27  ;;  %v8809_v20 = vld [vmem:[%s16313_s6 + $0x7a8] sm:$0xff]  ;;  %v8811_v27 = vld [vmem:[%s16313_s6 + $0x7b8] sm:$0xff] }
 0x9c3   : > { %9122 = vmatprep.subr.mxu0 %v8653_v18  ;;  %9211 = vmatprep.subr.mxu1 %v8655_v47  ;;  %v8808_v18 = vld [vmem:[%s16313_s6 + $0x7a0] sm:$0xff]  ;;  %v8810_v47 = vld [vmem:[%s16313_s6 + $0x7b0] sm:$0xff] }
 0x9c4   : > { %9123 = vmatpush1.msra.mxu0 %v8652_v52  ;;  %9212 = vmatpush1.msra.mxu1 %v8654_v48  ;;  %v8797_v52 = vld [vmem:[%s16313_s6 + $0x748] sm:$0xff]  ;;  %v8799_v48 = vld [vmem:[%s16313_s6 + $0x758] sm:$0xff] }
 0x9c5   : > { %9124 = vmatprep.subr.mxu0 %v8641_v16  ;;  %9213 = vmatprep.subr.mxu1 %v8643_v14  ;;  %v8796_v16 = vld [vmem:[%s16313_s6 + $0x740] sm:$0xff]  ;;  %v8798_v14 = vld [vmem:[%s16313_s6 + $0x750] sm:$0xff] }
 0x9c6   : > { %9125 = vmatpush1.msra.mxu0 %v8640_v22  ;;  %9214 = vmatpush1.msra.mxu1 %v8642_v41  ;;  %v8785_v22 = vld [vmem:[%s16313_s6 + $0x6e8] sm:$0xff]  ;;  %v8787_v41 = vld [vmem:[%s16313_s6 + $0x6f8] sm:$0xff] }
 0x9c7   : > { %9126 = vmatprep.subr.mxu0 %v8629_v35  ;;  %9215 = vmatprep.subr.mxu1 %v8631_v50  ;;  %v8784_v35 = vld [vmem:[%s16313_s6 + $0x6e0] sm:$0xff]  ;;  %v8786_v50 = vld [vmem:[%s16313_s6 + $0x6f0] sm:$0xff] }
 0x9c8   : > { %9127 = vmatpush1.msra.mxu0 %v8628_v17  ;;  %9216 = vmatpush1.msra.mxu1 %v8630_v8  ;;  %v8773_v17 = vld [vmem:[%s16313_s6 + $0x688] sm:$0xff]  ;;  %v8775_v8 = vld [vmem:[%s16313_s6 + $0x698] sm:$0xff] }
 0x9c9   : > { %9128 = vmatprep.subr.mxu0 %v8617_v56  ;;  %9217 = vmatprep.subr.mxu1 %v8619_v37  ;;  %v8772_v56 = vld [vmem:[%s16313_s6 + $0x680] sm:$0xff]  ;;  %v8774_v37 = vld [vmem:[%s16313_s6 + $0x690] sm:$0xff] }
 0x9ca   : > { %9129 = vmatpush1.msra.mxu0 %v8616_v40  ;;  %9218 = vmatpush1.msra.mxu1 %v8618_v10  ;;  %v8761_v40 = vld [vmem:[%s16313_s6 + $0x628] sm:$0xff]  ;;  %v8763_v10 = vld [vmem:[%s16313_s6 + $0x638] sm:$0xff] }
 0x9cb   : > { %9130 = vmatprep.subr.mxu0 %v8605_v21  ;;  %9219 = vmatprep.subr.mxu1 %v8607_v11  ;;  %v8760_v21 = vld [vmem:[%s16313_s6 + $0x620] sm:$0xff]  ;;  %v8762_v11 = vld [vmem:[%s16313_s6 + $0x630] sm:$0xff] }
 0x9cc   : > { %9131 = vmatpush1.msra.mxu0 %v8604_v38  ;;  %9220 = vmatpush1.msra.mxu1 %v8606_v31  ;;  %v8753_v38 = vld [vmem:[%s16313_s6 + $0x5e8] sm:$0xff]  ;;  %v15714_v31 = vld [vmem:[%s16313_s6 + $0x5f8] sm:$0xff] }
 0x9cd   : > { %9132 = vmatprep.subr.mxu0 %v8593_v45  ;;  %9221 = vmatprep.subr.mxu1 %v8595_v60  ;;  %v8752_v45 = vld [vmem:[%s16313_s6 + $0x5e0] sm:$0xff]  ;;  %v15724_v60 = vld [vmem:[%s16313_s6 + $0x5f0] sm:$0xff] }
 0x9ce   : > { %9133 = vmatpush1.msra.mxu0 %v8592_v25  ;;  %9222 = vmatpush1.msra.mxu1 %v8594_v54  ;;  %v8741_v25 = vld [vmem:[%s16313_s6 + $0x588] sm:$0xff]  ;;  %v15733_v54 = vld [vmem:[%s16313_s6 + $0x598] sm:$0xff] }
 0x9cf   : > { %9134 = vmatprep.subr.mxu0 %v8581_v33  ;;  %9223 = vmatprep.subr.mxu1 %v8583_v34  ;;  %v8740_v33 = vld [vmem:[%s16313_s6 + $0x580] sm:$0xff]  ;;  %v15745_v34 = vld [vmem:[%s16313_s6 + $0x590] sm:$0xff] }
 0x9d0   : > { %9135 = vmatpush1.msra.mxu0 %v8580_v39  ;;  %9224 = vmatpush1.msra.mxu1 %v8582_v58  ;;  %v8729_v39 = vld [vmem:[%s16313_s6 + $0x528] sm:$0xff]  ;;  %v15755_v58 = vld [vmem:[%s16313_s6 + $0x538] sm:$0xff] }
 0x9d1   : > { %9136 = vmatprep.subr.mxu0 %v8569_v43  ;;  %9225 = vmatprep.subr.mxu1 %v8571_v42  ;;  %v8728_v43 = vld [vmem:[%s16313_s6 + $0x520] sm:$0xff]  ;;  %v15766_v42 = vld [vmem:[%s16313_s6 + $0x530] sm:$0xff] }
 0x9d2   : > { %9137 = vmatpush1.msra.mxu0 %v8568_v44  ;;  %9226 = vmatpush1.msra.mxu1 %v8570_v32  ;;  %v8717_v44 = vld [vmem:[%s16313_s6 + $0x4c8] sm:$0xff]  ;;  %v15775_v32 = vld [vmem:[%s16313_s6 + $0x4d8] sm:$0xff] }
 0x9d3   : > { %9154 = vmatprep.subr.mxu0 %v8845_v30  ;;  %9243 = vmatprep.subr.mxu1 %v8847_v6  ;;  %v8716_v30 = vld [vmem:[%s16313_s6 + $0x4c0] sm:$0xff]  ;;  %v15787_v6 = vld [vmem:[%s16313_s6 + $0x4d0] sm:$0xff] }
 0x9d4   : > { %9155 = vmatpush2.msra.mxu0 %v8844_v46  ;;  %9244 = vmatpush2.msra.mxu1 %v8846_v36  ;;  %v8705_v46 = vld [vmem:[%s16313_s6 + $0x468] sm:$0xff]  ;;  %v15797_v36 = vld [vmem:[%s16313_s6 + $0x478] sm:$0xff] }
 0x9d5   : > { %9156 = vmatprep.subr.mxu0 %v8833_v12  ;;  %9245 = vmatprep.subr.mxu1 %v8835_v0  ;;  %v8704_v12 = vld [vmem:[%s16313_s6 + $0x460] sm:$0xff]  ;;  %v15808_v0 = vld [vmem:[%s16313_s6 + $0x470] sm:$0xff] }
 0x9d6   : > { %9157 = vmatpush2.msra.mxu0 %v8832_v29  ;;  %9246 = vmatpush2.msra.mxu1 %v8834_v19  ;;  %v8693_v29 = vld [vmem:[%s16313_s6 + $0x408] sm:$0xff]  ;;  %v15817_v19 = vld [vmem:[%s16313_s6 + $0x418] sm:$0xff] }
 0x9d7   : > { %9158 = vmatprep.subr.mxu0 %v8821_v4  ;;  %9247 = vmatprep.subr.mxu1 %v8823_v28  ;;  %v8692_v4 = vld [vmem:[%s16313_s6 + $0x400] sm:$0xff]  ;;  %v15829_v28 = vld [vmem:[%s16313_s6 + $0x410] sm:$0xff] }
 0x9d8   : > { %9159 = vmatpush2.msra.mxu0 %v8820_v24  ;;  %9248 = vmatpush2.msra.mxu1 %v8822_v61  ;;  %v8681_v24 = vld [vmem:[%s16313_s6 + $0x3a8] sm:$0xff]  ;;  %v15839_v61 = vld [vmem:[%s16313_s6 + $0x3b8] sm:$0xff] }
 0x9d9   : > { %9160 = vmatprep.subr.mxu0 %v8809_v20  ;;  %9249 = vmatprep.subr.mxu1 %v8811_v27  ;;  %v8680_v20 = vld [vmem:[%s16313_s6 + $0x3a0] sm:$0xff]  ;;  %v15850_v27 = vld [vmem:[%s16313_s6 + $0x3b0] sm:$0xff] }
 0x9da   : > { %9161 = vmatpush2.msra.mxu0 %v8808_v18  ;;  %9250 = vmatpush2.msra.mxu1 %v8810_v47  ;;  %v8669_v18 = vld [vmem:[%s16313_s6 + $0x348] sm:$0xff]  ;;  %v15859_v47 = vld [vmem:[%s16313_s6 + $0x358] sm:$0xff] }
 0x9db   : > { %9162 = vmatprep.subr.mxu0 %v8797_v52  ;;  %9251 = vmatprep.subr.mxu1 %v8799_v48  ;;  %v8668_v52 = vld [vmem:[%s16313_s6 + $0x340] sm:$0xff]  ;;  %v15869_v48 = vld [vmem:[%s16313_s6 + $0x350] sm:$0xff] }
 0x9dc   : > { %9163 = vmatpush2.msra.mxu0 %v8796_v16  ;;  %9252 = vmatpush2.msra.mxu1 %v8798_v14  ;;  %v8657_v16 = vld [vmem:[%s16313_s6 + $0x2e8] sm:$0xff]  ;;  %v15880_v14 = vld [vmem:[%s16313_s6 + $0x2f8] sm:$0xff] }
 0x9dd   : > { %9164 = vmatprep.subr.mxu0 %v8785_v22  ;;  %9253 = vmatprep.subr.mxu1 %v8787_v41  ;;  %v8656_v22 = vld [vmem:[%s16313_s6 + $0x2e0] sm:$0xff]  ;;  %v15889_v41 = vld [vmem:[%s16313_s6 + $0x2f0] sm:$0xff] }
 0x9de   : > { %9165 = vmatpush2.msra.mxu0 %v8784_v35  ;;  %9254 = vmatpush2.msra.mxu1 %v8786_v50  ;;  %v8645_v35 = vld [vmem:[%s16313_s6 + $0x288] sm:$0xff]  ;;  %v15898_v50 = vld [vmem:[%s16313_s6 + $0x298] sm:$0xff] }
 0x9df   : > { %9166 = vmatprep.subr.mxu0 %v8773_v17  ;;  %9255 = vmatprep.subr.mxu1 %v8775_v8  ;;  %v8644_v17 = vld [vmem:[%s16313_s6 + $0x280] sm:$0xff]  ;;  %v15907_v8 = vld [vmem:[%s16313_s6 + $0x290] sm:$0xff] }
 0x9e0   : > { %9167 = vmatpush2.msra.mxu0 %v8772_v56  ;;  %9256 = vmatpush2.msra.mxu1 %v8774_v37  ;;  %v8633_v56 = vld [vmem:[%s16313_s6 + $0x228] sm:$0xff]  ;;  %v15916_v37 = vld [vmem:[%s16313_s6 + $0x238] sm:$0xff] }
 0x9e1   : > { %9168 = vmatprep.subr.mxu0 %v8761_v40  ;;  %9257 = vmatprep.subr.mxu1 %v8763_v10  ;;  %v8632_v40 = vld [vmem:[%s16313_s6 + $0x220] sm:$0xff]  ;;  %v15925_v10 = vld [vmem:[%s16313_s6 + $0x230] sm:$0xff] }
 0x9e2   : > { %9169 = vmatpush2.msra.mxu0 %v8760_v21  ;;  %9258 = vmatpush2.msra.mxu1 %v8762_v11  ;;  %v8621_v21 = vld [vmem:[%s16313_s6 + $0x1c8] sm:$0xff]  ;;  %v15934_v11 = vld [vmem:[%s16313_s6 + $0x1d8] sm:$0xff] }
 0x9e3   : > { %9171 = vmatmul.mubr.f32.vlgmr.msra.gmra.mxu0 %v15370_v57  ;;  %9260 = vmatmul.mubr.f32.vlgmr.msra.gmra.mxu1 %v15370_v57 }
 0x9e4   : > { %9284 = vmatprep.subr.mxu0 %v8753_v38  ;;  %10178 = vmatprep.subr.mxu1 %v15714_v31  ;;  %v8620_v38 = vld [vmem:[%s16313_s6 + $0x1c0] sm:$0xff] }
 0x9e5   : > { %10161 = vmatprep.mubr.msk.f32.mxu0 %vm4511_vm2, %v15396_v26  ;;  %10165 = vmatprep.mubr.msk.f32.mxu1 %vm4511_vm2, %v15396_v26 }
 0x9e6   : > { %9285 = vmatpush1.msra.mxu0 %v8752_v45  ;;  %10202 = vmatpush1.msra.mxu1 %v15724_v60  ;;  %v15943_v45 = vld [vmem:[%s16313_s6 + $0x1d0] sm:$0xff] }
 0x9e7   : > { %9286 = vmatprep.subr.mxu0 %v8741_v25  ;;  %10179 = vmatprep.subr.mxu1 %v15733_v54  ;;  %v8609_v25 = vld [vmem:[%s16313_s6 + $0x168] sm:$0xff] }
 0x9e8   : > { %9287 = vmatpush1.msra.mxu0 %v8740_v33  ;;  %10203 = vmatpush1.msra.mxu1 %v15745_v34  ;;  %v15952_v33 = vld [vmem:[%s16313_s6 + $0x178] sm:$0xff] }
 0x9e9   : > { %9177 = vmatmul.mubr.f32.gmra.mxu0 %v15409_v13  ;;  %9266 = vmatmul.mubr.f32.gmra.mxu1 %v15409_v13 }
 0x9ea   : > { %9288 = vmatprep.subr.mxu0 %v8729_v39  ;;  %10180 = vmatprep.subr.mxu1 %v15755_v58  ;;  %v8608_v39 = vld [vmem:[%s16313_s6 + $0x160] sm:$0xff] }
 0x9eb   : > { %10162 = vmatprep.mubr.msk.f32.mxu0 %vm4511_vm2, %v15429_v5  ;;  %10166 = vmatprep.mubr.msk.f32.mxu1 %vm4511_vm2, %v15429_v5 }
 0x9ec   : > { %9289 = vmatpush1.msra.mxu0 %v8728_v43  ;;  %10204 = vmatpush1.msra.mxu1 %v15766_v42  ;;  %v15961_v43 = vld [vmem:[%s16313_s6 + $0x170] sm:$0xff] }
 0x9ed   : > { %9290 = vmatprep.subr.mxu0 %v8717_v44  ;;  %10181 = vmatprep.subr.mxu1 %v15775_v32  ;;  %v8597_v44 = vld [vmem:[%s16313_s6 + $0x108] sm:$0xff] }
 0x9ee   : > { %9291 = vmatpush1.msra.mxu0 %v8716_v30  ;;  %10205 = vmatpush1.msra.mxu1 %v15787_v6  ;;  %v15970_v30 = vld [vmem:[%s16313_s6 + $0x118] sm:$0xff] }
 0x9ef   : > { %9183 = vmatmul.mubr.f32.gmra.mxu0 %v15450_v63  ;;  %9272 = vmatmul.mubr.f32.gmra.mxu1 %v15450_v63 }
 0x9f0   : > { %9292 = vmatprep.subr.mxu0 %v8705_v46  ;;  %10182 = vmatprep.subr.mxu1 %v15797_v36  ;;  %v8596_v46 = vld [vmem:[%s16313_s6 + $0x100] sm:$0xff] }
 0x9f1   : > { %10163 = vmatprep.mubr.msk.f32.mxu0 %vm4511_vm2, %v15469_v23  ;;  %10167 = vmatprep.mubr.msk.f32.mxu1 %vm4511_vm2, %v15469_v23 }
 0x9f2   : > { %9293 = vmatpush1.msra.mxu0 %v8704_v12  ;;  %10206 = vmatpush1.msra.mxu1 %v15808_v0  ;;  %v15979_v12 = vld [vmem:[%s16313_s6 + $0x110] sm:$0xff] }
 0x9f3   : > { %9294 = vmatprep.subr.mxu0 %v8693_v29  ;;  %10183 = vmatprep.subr.mxu1 %v15817_v19  ;;  %v8585_v29 = vld [vmem:[%s16313_s6 + $0xa8] sm:$0xff] }
 0x9f4   : > { %9295 = vmatpush1.msra.mxu0 %v8692_v4  ;;  %10207 = vmatpush1.msra.mxu1 %v15829_v28  ;;  %v15988_v4 = vld [vmem:[%s16313_s6 + $0xb8] sm:$0xff] }
 0x9f5   : > { %9189 = vmatmul.mubr.f32.gmra.mxu0 %v15486_v3  ;;  %9278 = vmatmul.mubr.f32.gmra.mxu1 %v15486_v3 }
 0x9f6   : > { %9296 = vmatprep.subr.mxu0 %v8681_v24  ;;  %10184 = vmatprep.subr.mxu1 %v15839_v61  ;;  %v8584_v24 = vld [vmem:[%s16313_s6 + $0xa0] sm:$0xff] }
 0x9f7   : > { %9297 = vmatpush1.msra.mxu0 %v8680_v20  ;;  %10168 = vmatprep.mubr.msk.f32.mxu0 %vm4511_vm2, %v15366_v2  ;;  %v15997_v20 = vld [vmem:[%s16313_s6 + $0xb0] sm:$0xff] }
 0x9f8   : > { %10208 = vmatpush1.msra.mxu1 %v15850_v27  ;;  %10173 = vmatprep.mubr.msk.f32.mxu1 %vm4511_vm2, %v15396_v26 }
 0x9f9   : > { %9298 = vmatprep.subr.mxu0 %v8669_v18  ;;  %10185 = vmatprep.subr.mxu1 %v15859_v47  ;;  %v8573_v18 = vld [vmem:[%s16313_s6 + $0x48] sm:$0xff] }
 0x9fa   : > { %9299 = vmatpush1.msra.mxu0 %v8668_v52  ;;  %10209 = vmatpush1.msra.mxu1 %v15869_v48  ;;  %v16006_v52 = vld [vmem:[%s16313_s6 + $0x58] sm:$0xff] }
 0x9fb   : > { %9300 = vmatprep.subr.mxu0 %v8657_v16  ;;  %10186 = vmatprep.subr.mxu1 %v15880_v14  ;;  %v8572_v16 = vld [vmem:[%s16313_s6 + $0x40] sm:$0xff] }
 0x9fc   : > { %9301 = vmatpush1.msra.mxu0 %v8656_v22  ;;  %10210 = vmatpush1.msra.mxu1 %v15889_v41  ;;  %v16015_v22 = vld [vmem:[%s16313_s6 + $0x50] sm:$0xff] }
 0x9fd   : > { %9302 = vmatprep.subr.mxu0 %v8645_v35  ;;  %10187 = vmatprep.subr.mxu1 %v15898_v50  ;;  %v8849_v35 = vld [vmem:[%s16313_s6 + $0x8e8] sm:$0xff] }
 0x9fe   : > { %9303 = vmatpush1.msra.mxu0 %v8644_v17  ;;  %10211 = vmatpush1.msra.mxu1 %v15907_v8  ;;  %v16024_v17 = vld [vmem:[%s16313_s6 + $0x8f8] sm:$0xff] }
 0x9ff   : > { %9304 = vmatprep.subr.mxu0 %v8633_v56  ;;  %10188 = vmatprep.subr.mxu1 %v15916_v37  ;;  %v8848_v56 = vld [vmem:[%s16313_s6 + $0x8e0] sm:$0xff] }
 0xa00   : > { %9305 = vmatpush1.msra.mxu0 %v8632_v40  ;;  %10212 = vmatpush1.msra.mxu1 %v15925_v10  ;;  %v16033_v40 = vld [vmem:[%s16313_s6 + $0x8f0] sm:$0xff] }
 0xa01   : > { %9306 = vmatprep.subr.mxu0 %v8621_v21  ;;  %10189 = vmatprep.subr.mxu1 %v15934_v11  ;;  %v8837_v21 = vld [vmem:[%s16313_s6 + $0x888] sm:$0xff] }
 0xa02   : > { %9307 = vmatpush1.msra.mxu0 %v8620_v38  ;;  %10213 = vmatpush1.msra.mxu1 %v15943_v45  ;;  %v16042_v38 = vld [vmem:[%s16313_s6 + $0x898] sm:$0xff] }
 0xa03   : > { %9308 = vmatprep.subr.mxu0 %v8609_v25  ;;  %10190 = vmatprep.subr.mxu1 %v15952_v33  ;;  %v8836_v25 = vld [vmem:[%s16313_s6 + $0x880] sm:$0xff] }
 0xa04   : > { %9309 = vmatpush1.msra.mxu0 %v8608_v39  ;;  %10214 = vmatpush1.msra.mxu1 %v15961_v43  ;;  %v16051_v39 = vld [vmem:[%s16313_s6 + $0x890] sm:$0xff] }
 0xa05   : > { %9310 = vmatprep.subr.mxu0 %v8597_v44  ;;  %10191 = vmatprep.subr.mxu1 %v15970_v30  ;;  %v8825_v44 = vld [vmem:[%s16313_s6 + $0x828] sm:$0xff] }
 0xa06   : > { %9311 = vmatpush1.msra.mxu0 %v8596_v46  ;;  %10215 = vmatpush1.msra.mxu1 %v15979_v12  ;;  %v16060_v46 = vld [vmem:[%s16313_s6 + $0x838] sm:$0xff] }
 0xa07   : > { %9312 = vmatprep.subr.mxu0 %v8585_v29  ;;  %10192 = vmatprep.subr.mxu1 %v15988_v4  ;;  %v8824_v29 = vld [vmem:[%s16313_s6 + $0x820] sm:$0xff] }
 0xa08   : > { %9313 = vmatpush1.msra.mxu0 %v8584_v24  ;;  %10216 = vmatpush1.msra.mxu1 %v15997_v20  ;;  %v16069_v24 = vld [vmem:[%s16313_s6 + $0x830] sm:$0xff] }
 0xa09   : > { %9314 = vmatprep.subr.mxu0 %v8573_v18  ;;  %10193 = vmatprep.subr.mxu1 %v16006_v52  ;;  %v8813_v18 = vld [vmem:[%s16313_s6 + $0x7c8] sm:$0xff] }
 0xa0a   : > { %9315 = vmatpush1.msra.mxu0 %v8572_v16  ;;  %10217 = vmatpush1.msra.mxu1 %v16015_v22  ;;  %v16078_v16 = vld [vmem:[%s16313_s6 + $0x7d8] sm:$0xff] }
 0xa0b   : > { %9332 = vmatprep.subr.mxu0 %v8849_v35  ;;  %10194 = vmatprep.subr.mxu1 %v16024_v17  ;;  %v8812_v35 = vld [vmem:[%s16313_s6 + $0x7c0] sm:$0xff] }
 0xa0c   : > { %9333 = vmatpush2.msra.mxu0 %v8848_v56  ;;  %10218 = vmatpush2.msra.mxu1 %v16033_v40  ;;  %v16087_v56 = vld [vmem:[%s16313_s6 + $0x7d0] sm:$0xff] }
 0xa0d   : > { %9334 = vmatprep.subr.mxu0 %v8837_v21  ;;  %10195 = vmatprep.subr.mxu1 %v16042_v38  ;;  %v8801_v21 = vld [vmem:[%s16313_s6 + $0x768] sm:$0xff] }
 0xa0e   : > { %9335 = vmatpush2.msra.mxu0 %v8836_v25  ;;  %10219 = vmatpush2.msra.mxu1 %v16051_v39  ;;  %v16096_v25 = vld [vmem:[%s16313_s6 + $0x778] sm:$0xff] }
 0xa0f   : > { %9336 = vmatprep.subr.mxu0 %v8825_v44  ;;  %10196 = vmatprep.subr.mxu1 %v16060_v46  ;;  %v8800_v44 = vld [vmem:[%s16313_s6 + $0x760] sm:$0xff] }
 0xa10   : > { %9337 = vmatpush2.msra.mxu0 %v8824_v29  ;;  %10220 = vmatpush2.msra.mxu1 %v16069_v24  ;;  %v16105_v29 = vld [vmem:[%s16313_s6 + $0x770] sm:$0xff] }
 0xa11   : > { %9338 = vmatprep.subr.mxu0 %v8813_v18  ;;  %10197 = vmatprep.subr.mxu1 %v16078_v16  ;;  %v16114_v18 = vld [vmem:[%s16313_s6 + $0x718] sm:$0xff] }
 0xa12   : > { %9339 = vmatpush2.msra.mxu0 %v8812_v35  ;;  %10221 = vmatpush2.msra.mxu1 %v16087_v56  ;;  %v16123_v35 = vld [vmem:[%s16313_s6 + $0x710] sm:$0xff] }
 0xa13   : > { %9340 = vmatprep.subr.mxu0 %v8801_v21  ;;  %10198 = vmatprep.subr.mxu1 %v16096_v25  ;;  %v16132_v21 = vld [vmem:[%s16313_s6 + $0x6b8] sm:$0xff] }
 0xa14   : > { %9341 = vmatpush2.msra.mxu0 %v8800_v44  ;;  %10222 = vmatpush2.msra.mxu1 %v16105_v29  ;;  %v16141_v44 = vld [vmem:[%s16313_s6 + $0x6b0] sm:$0xff] }
 0xa15   : > { %9342 = vmatprep.subr.mxu0 %v8789_v49  ;;  %10199 = vmatprep.subr.mxu1 %v16114_v18  ;;  %v16150_v49 = vld [vmem:[%s16313_s6 + $0x658] sm:$0xff] }
 0xa16   : > { %9343 = vmatpush2.msra.mxu0 %v8788_v51  ;;  %10223 = vmatpush2.msra.mxu1 %v16123_v35  ;;  %v16159_v51 = vld [vmem:[%s16313_s6 + $0x650] sm:$0xff] }
 0xa17   : > { %9344 = vmatprep.subr.mxu0 %v8777_v62  ;;  %10200 = vmatprep.subr.mxu1 %v16132_v21 }
 0xa18   : > { %9345 = vmatpush2.msra.mxu0 %v8776_v7  ;;  %10224 = vmatpush2.msra.mxu1 %v16141_v44 }
 0xa19   : > { %9346 = vmatprep.subr.mxu0 %v8765_v9  ;;  %10201 = vmatprep.subr.mxu1 %v16150_v49 }
 0xa1a   : > { %9347 = vmatpush2.msra.mxu0 %v8764_v15  ;;  %10225 = vmatpush2.msra.mxu1 %v16159_v51 }
 0xa1b   : > { %9349 = vmatmul.mubr.f32.vlgmr.msra.gmra.mxu0 %v15370_v57  ;;  %9373 = vmatprep.subr.mxu0 %v15714_v31 }
 0xa1c   : > { %9444 = vmatmul.mubr.f32.vlgmr.msra.gmra.mxu1 %v15409_v13  ;;  %10169 = vmatprep.mubr.msk.f32.mxu0 %vm4511_vm2, %v15396_v26 }
 0xa1d   : > { %9374 = vmatpush1.msra.mxu0 %v15724_v60  ;;  %10174 = vmatprep.mubr.msk.f32.mxu1 %vm4511_vm2, %v15429_v5  ;;  %v16235_v60 = vld [vmem:[%s16314_s7] sm:$0xff] }
 0xa1e   : > { %9375 = vmatprep.subr.mxu0 %v15733_v54 }
 0xa1f   : > { %9376 = vmatpush1.msra.mxu0 %v15745_v34 }
 0xa20   : > { %9355 = vmatmul.mubr.f32.gmra.mxu0 %v15409_v13  ;;  %9377 = vmatprep.subr.mxu0 %v15755_v58  ;;  %v8867_v58 = vrot.slane %v16235_v60, %v11400_v59 }
 0xa21   : > { %9450 = vmatmul.mubr.f32.gmra.mxu1 %v15450_v63  ;;  %10170 = vmatprep.mubr.msk.f32.mxu0 %vm4511_vm2, %v15429_v5 }
 0xa22   : > { %9378 = vmatpush1.msra.mxu0 %v15766_v42  ;;  %10175 = vmatprep.mubr.msk.f32.mxu1 %vm4511_vm2, %v15469_v23  ;;  %v8863_v42 = vrot.slane %v16235_v60, %v10498_v55 }
 0xa23   : > { %9379 = vmatprep.subr.mxu0 %v15775_v32  ;;  %v8871_v32 = vrot.slane %v16235_v60, %v11101_v1 }
 0xa24   : > { %9380 = vmatpush1.msra.mxu0 %v15787_v6 }
 0xa25   : > { %9361 = vmatmul.mubr.f32.gmra.mxu0 %v15450_v63  ;;  %9381 = vmatprep.subr.mxu0 %v15797_v36 }
 0xa26   : > { %9456 = vmatmul.mubr.f32.gmra.mxu1 %v15486_v3  ;;  %10171 = vmatprep.mubr.msk.f32.mxu0 %vm4511_vm2, %v15469_v23 }
 0xa27   : > { %9382 = vmatpush1.msra.mxu0 %v15808_v0 }
 0xa28   : > { %9383 = vmatprep.subr.mxu0 %v15817_v19 }
 0xa29   : > { %9384 = vmatpush1.msra.mxu0 %v15829_v28 }
 0xa2a   : > { %9367 = vmatmul.mubr.f32.gmra.mxu0 %v15486_v3  ;;  %9385 = vmatprep.subr.mxu0 %v15839_v61 }
 0xa2b   : > { %9386 = vmatpush1.msra.mxu0 %v15850_v27  ;;  %10172 = vmatprep.mubr.msk.f32.mxu0 %vm4511_vm2, %v15366_v2 }
 0xa2c   : > { %9387 = vmatprep.subr.mxu0 %v15859_v47 }
 0xa2d   : > { %9388 = vmatpush1.msra.mxu0 %v15869_v48 }
 0xa2e   : > { %9389 = vmatprep.subr.mxu0 %v15880_v14 }
 0xa2f   : > { %9390 = vmatpush1.msra.mxu0 %v15889_v41 }
 0xa30   : > { %9391 = vmatprep.subr.mxu0 %v15898_v50 }
 0xa31   : > { %9392 = vmatpush1.msra.mxu0 %v15907_v8 }
 0xa32   : > { %9393 = vmatprep.subr.mxu0 %v15916_v37 }
 0xa33   : > { %9394 = vmatpush1.msra.mxu0 %v15925_v10 }
 0xa34   : > { %9395 = vmatprep.subr.mxu0 %v15934_v11 }
 0xa35   : > { %9396 = vmatpush1.msra.mxu0 %v15943_v45 }
 0xa36   : > { %9397 = vmatprep.subr.mxu0 %v15952_v33 }
 0xa37   : > { %9398 = vmatpush1.msra.mxu0 %v15961_v43 }
 0xa38   : > { %9399 = vmatprep.subr.mxu0 %v15970_v30 }
 0xa39   : > { %9400 = vmatpush1.msra.mxu0 %v15979_v12 }
 0xa3a   : > { %9401 = vmatprep.subr.mxu0 %v15988_v4 }
 0xa3b   : > { %9402 = vmatpush1.msra.mxu0 %v15997_v20 }
 0xa3c   : > { %9403 = vmatprep.subr.mxu0 %v16006_v52 }
 0xa3d   : > { %9404 = vmatpush1.msra.mxu0 %v16015_v22 }
 0xa3e   : > { %9421 = vmatprep.subr.mxu0 %v16024_v17 }
 0xa3f   : > { %9422 = vmatpush2.msra.mxu0 %v16033_v40 }
 0xa40   : > { %9423 = vmatprep.subr.mxu0 %v16042_v38 }
 0xa41   : > { %9424 = vmatpush2.msra.mxu0 %v16051_v39 }
 0xa42   : > { %9425 = vmatprep.subr.mxu0 %v16060_v46 }
 0xa43   : > { %9426 = vmatpush2.msra.mxu0 %v16069_v24 }
 0xa44   : > { %9427 = vmatprep.subr.mxu0 %v16078_v16 }
 0xa45   : > { %9428 = vmatpush2.msra.mxu0 %v16087_v56 }
 0xa46   : > { %9429 = vmatprep.subr.mxu0 %v16096_v25 }
 0xa47   : > { %9430 = vmatpush2.msra.mxu0 %v16105_v29 }
 0xa48   : > { %9431 = vmatprep.subr.mxu0 %v16114_v18 }
 0xa49   : > { %9432 = vmatpush2.msra.mxu0 %v16123_v35 }
 0xa4a   : > { %9433 = vmatprep.subr.mxu0 %v16132_v21 }
 0xa4b   : > { %9434 = vmatpush2.msra.mxu0 %v16141_v44 }
 0xa4c   : > { %9435 = vmatprep.subr.mxu0 %v16150_v49 }
 0xa4d   : > { %9436 = vmatpush2.msra.mxu0 %v16159_v51 }
 0xa4e   : > { %9438 = vmatmul.mubr.f32.vlgmr.msra.gmra.mxu0 %v15370_v57  ;;  %v8859_v57 = vrot.slane %v16235_v60, %v10492_v53 }
 0xa6c   : > { %v8994_v7 = vpop.f32.mrf.mxu0  ;;  %v9083_v15 = vpop.f32.mrf.mxu1 }
 0xa6d   : > { %v8995_v28 = vadd.f32 %v8994_v7, %v8859_v57  ;;  %v9084_v61 = vadd.f32 %v9083_v15, %v8867_v58 }
 0xa6e   : > { %v8996_v62 = vpop.f32.mrf.mxu0  ;;  %v9085_v9 = vpop.f32.mrf.mxu1 }
 0xa6f   : > { %v8997_v8 = vadd.f32 %v8996_v62, %v8863_v42  ;;  %v9086_v37 = vadd.f32 %v9085_v9, %v8871_v32  ;;  %v9462_v12 = vmax.f32 %v8995_v28, 0.0  ;;  %v9464_v4 = vmax.f32 %v9084_v61, 0.0 }
 0xa71   : > { %v9463_v39 = vmax.f32 %v8997_v8, 0.0  ;;  %v9465_v46 = vmax.f32 %v9086_v37, 0.0  ;;  %v16331_v37 = vld [vmem:[#allocation5_spill] sm:$0xff] }
 0xa72   : > { %v9000_v2 = vpop.f32.mrf.mxu0  ;;  %v9089_v26 = vpop.f32.mrf.mxu1 }
 0xa73   : > { %v9001_v6 = vadd.f32 %v9000_v2, %v8859_v57  ;;  %v9090_v36 = vadd.f32 %v9089_v26, %v8867_v58 }
 0xa74   : > { %v9002_v13 = vpop.f32.mrf.mxu0  ;;  %v9091_v5 = vpop.f32.mrf.mxu1 }
 0xa75   : > { %v9003_v48 = vadd.f32 %v9002_v13, %v8863_v42  ;;  %v9092_v14 = vadd.f32 %v9091_v5, %v8871_v32  ;;  %v9474_v45 = vmax.f32 %v9001_v6, 0.0  ;;  %v9476_v33 = vmax.f32 %v9090_v36, 0.0 }
 0xa77   : > { %v9475_v22 = vmax.f32 %v9003_v48, 0.0  ;;  %v9477_v17 = vmax.f32 %v9092_v14, 0.0  ;;  %v9510_v56 = vadd.f32 %v9474_v45, %v9462_v12  ;;  %v9530_v25 = vadd.f32 %v9476_v33, %v9464_v4  ;;  %v16330_v14 = vld [vmem:[#allocation8_spill] sm:$0xff] }
 0xa78   : > { %v9006_v63 = vpop.f32.mrf.mxu0  ;;  %v9095_v23 = vpop.f32.mrf.mxu1  ;;  %v10267_v33 = vmov 1966171168  }
 0xa79   : > { %v9007_v41 = vadd.f32 %v9006_v63, %v8859_v57  ;;  %v9096_v50 = vadd.f32 %v9095_v23, %v8867_v58  ;;  %v9520_v44 = vadd.f32 %v9475_v22, %v9463_v39  ;;  %v9540_v49 = vadd.f32 %v9477_v17, %v9465_v46 }
 0xa7a   : > { %v9008_v3 = vpop.f32.mrf.mxu0  ;;  %v9097_v31 = vpop.f32.mrf.mxu1 }
 0xa7b   : > { %v9009_v43 = vadd.f32 %v9008_v3, %v8863_v42  ;;  %v9098_v30 = vadd.f32 %v9097_v31, %v8871_v32  ;;  %v9486_v40 = vmax.f32 %v9007_v41, 0.0  ;;  %v9488_v38 = vmax.f32 %v9096_v50, 0.0 }
 0xa7c   : > { %v8883_v41 = vrot.slane %v16235_v60, %v16330_v14 }
 0xa7d   : > { %v9487_v29 = vmax.f32 %v9009_v43, 0.0  ;;  %v9489_v18 = vmax.f32 %v9098_v30, 0.0  ;;  %v9511_v51 = vadd.f32 %v9510_v56, %v9486_v40  ;;  %v9531_v7 = vadd.f32 %v9530_v25, %v9488_v38 }
 0xa7e   : > { %v9012_v54 = vpop.f32.mrf.mxu0  ;;  %v9101_v34 = vpop.f32.mrf.mxu1  ;;  %v16257_v43 = vunpack.c.l.s4 %v10267_v33 }
 0xa7f   : > { %v9013_v27 = vadd.f32 %v9012_v54, %v8859_v57  ;;  %v9102_v47 = vadd.f32 %v9101_v34, %v8867_v58  ;;  %v9521_v9 = vadd.f32 %v9520_v44, %v9487_v29  ;;  %v9541_v2 = vadd.f32 %v9540_v49, %v9489_v18 }
 0xa80   : > { %v9014_v0 = vpop.f32.mrf.mxu0  ;;  %v9103_v19 = vpop.f32.mrf.mxu1 }
 0xa81   : > { %v9015_v10 = vadd.f32 %v9014_v0, %v8863_v42  ;;  %v9104_v11 = vadd.f32 %v9103_v19, %v8871_v32  ;;  %v9498_v20 = vmax.f32 %v9013_v27, 0.0  ;;  %v9500_v52 = vmax.f32 %v9102_v47, 0.0  ;;  %v16329_v47 = vld [vmem:[#allocation6_spill] sm:$0xff] }
 0xa82   : > { %v8875_v48 = vrot.slane %v16235_v60, %v16329_v47 }
 0xa83   : > { %v9499_v24 = vmax.f32 %v9015_v10, 0.0  ;;  %v9501_v16 = vmax.f32 %v9104_v11, 0.0  ;;  %v9512_v35 = vsel %vm6776_vm4, %v9498_v20, 0.0  ;;  %v9532_v21 = vsel %vm6776_vm4, %v9500_v52, 0.0  ;;  %v16332_v11 = vld [vmem:[#allocation7_spill] sm:$0xff] }
 0xa84   : > { %v9513_v26 = vadd.f32 %v9512_v35, %v9511_v51  ;;  %v9533_v13 = vadd.f32 %v9532_v21, %v9531_v7  ;;  %v8879_v10 = vrot.slane %v16235_v60, %v16331_v37  ;;  %v8887_v45 = vrot.slane %v16235_v60, %v16332_v11 }
 0xa85   : > { %v9522_v15 = vsel %vm6776_vm4, %v9499_v24, 0.0  ;;  %v9542_v62 = vsel %vm6776_vm4, %v9501_v16, 0.0 }
 0xa86   : > { %v9523_v23 = vadd.f32 %v9522_v15, %v9521_v9  ;;  %v9543_v3 = vadd.f32 %v9542_v62, %v9541_v2  ;;  %v9514_v34 = vrot.slane %v9513_v26, 4  ;;  %v9534_v57 = vrot.slane %v9533_v13, 4 }
 0xa88   : > { %v9524_v58 = vrot.slane %v9523_v23, 4  ;;  %v9544_v42 = vrot.slane %v9543_v3, 4  ;;  %v9515_v36 = vadd.f32 %v9514_v34, %v9513_v26  ;;  %v9535_v0 = vadd.f32 %v9534_v57, %v9533_v13 }
 0xa8a   : > { %v9525_v61 = vadd.f32 %v9524_v58, %v9523_v23  ;;  %v9545_v27 = vadd.f32 %v9544_v42, %v9543_v3  ;;  %v9516_v50 = vrot.slane %v9515_v36, 2  ;;  %v9536_v8 = vrot.slane %v9535_v0, 2 }
 0xa8c   : > { %v9526_v52 = vrot.slane %v9525_v61, 2  ;;  %v9546_v22 = vrot.slane %v9545_v27, 2  ;;  %v16259_v25 = vadd.f32 %v9516_v50, %v9515_v36  ;;  %v16261_v60 = vadd.f32 %v9536_v8, %v9535_v0 }
 0xa8e   : > { %v9527_v51 = vadd.f32 %v9526_v52, %v9525_v61  ;;  %v9547_v7 = vadd.f32 %v9546_v22, %v9545_v27 }
 0xaa3   : > { %v9172_v5 = vpop.f32.mrf.mxu0  ;;  %v9261_v63 = vpop.f32.mrf.mxu1 }
 0xaa4   : > { %v9173_v17 = vadd.f32 %v9172_v5, %v8875_v48  ;;  %v9262_v40 = vadd.f32 %v9261_v63, %v8883_v41 }
 0xaa5   : > { %v9174_v31 = vpop.f32.mrf.mxu0  ;;  %v9263_v54 = vpop.f32.mrf.mxu1 }
 0xaa6   : > { %v9175_v29 = vadd.f32 %v9174_v31, %v8879_v10  ;;  %v9264_v18 = vadd.f32 %v9263_v54, %v8887_v45  ;;  %v9466_v15 = vmax.f32 %v9173_v17, 0.0  ;;  %v9468_v62 = vmax.f32 %v9262_v40, 0.0 }
 0xaa7   : > { %v9518_v40 = vrot.slane %v16259_v25, 1 }
 0xaa8   : > { %v9467_v23 = vmax.f32 %v9175_v29, 0.0  ;;  %v9469_v3 = vmax.f32 %v9264_v18, 0.0  ;;  %v9648_v29 = vunpack.c.0.s8 %v16257_v43 }
 0xaa9   : > { %v9178_v32 = vpop.f32.mrf.mxu0  ;;  %v9267_v6 = vpop.f32.mrf.mxu1 }
 0xaaa   : > { %v9179_v30 = vadd.f32 %v9178_v32, %v8875_v48  ;;  %v9268_v12 = vadd.f32 %v9267_v6, %v8883_v41 }
 0xaab   : > { %v9180_v19 = vpop.f32.mrf.mxu0  ;;  %v9269_v28 = vpop.f32.mrf.mxu1 }
 0xaac   : > { %v9181_v38 = vadd.f32 %v9180_v19, %v8879_v10  ;;  %v9270_v39 = vadd.f32 %v9269_v28, %v8887_v45  ;;  %v9478_v35 = vmax.f32 %v9179_v30, 0.0  ;;  %v9480_v21 = vmax.f32 %v9268_v12, 0.0 }
 0xaad   : > { %v9528_v12 = vrot.slane %v9527_v51, 1 }
 0xaae   : > { %v9479_v9 = vmax.f32 %v9181_v38, 0.0  ;;  %v9481_v2 = vmax.f32 %v9270_v39, 0.0  ;;  %v9550_v31 = vadd.f32 %v9478_v35, %v9466_v15  ;;  %v9570_v54 = vadd.f32 %v9480_v21, %v9468_v62 }
 0xaaf   : > { %v9184_v4 = vpop.f32.mrf.mxu0  ;;  %v9273_v20 = vpop.f32.mrf.mxu1  ;;  %v9538_v38 = vrot.slane %v16261_v60, 1  ;;  %v9519_v15 = vadd.f32 %v9518_v40, %v16259_v25 }
 0xab0   : > { %v9185_v46 = vadd.f32 %v9184_v4, %v8875_v48  ;;  %v9274_v24 = vadd.f32 %v9273_v20, %v8883_v41  ;;  %v9560_v61 = vadd.f32 %v9479_v9, %v9467_v23  ;;  %v9580_v27 = vadd.f32 %v9481_v2, %v9469_v3 }
 0xab1   : > { %v9186_v16 = vpop.f32.mrf.mxu0  ;;  %v9275_v56 = vpop.f32.mrf.mxu1  ;;  %v9548_v4 = vrot.slane %v9547_v7, 1  ;;  %v9539_v62 = vadd.f32 %v9538_v38, %v16261_v60 }
 0xab2   : > { %v9187_v44 = vadd.f32 %v9186_v16, %v8879_v10  ;;  %v9276_v49 = vadd.f32 %v9275_v56, %v8887_v45  ;;  %v9490_v26 = vmax.f32 %v9185_v46, 0.0  ;;  %v9492_v13 = vmax.f32 %v9274_v24, 0.0 }
 0xab3   : > { %v9529_v56 = vadd.f32 %v9528_v12, %v9527_v51  ;;  %v9549_v18 = vadd.f32 %v9548_v4, %v9547_v7  ;;  %v8853_v12 = vld [vmem:[%s16314_s7 + $0x8] sm:$0xf] }
 0xab4   : > { %v9491_v58 = vmax.f32 %v9187_v44, 0.0  ;;  %v9493_v42 = vmax.f32 %v9276_v49, 0.0  ;;  %v9551_v47 = vadd.f32 %v9550_v31, %v9490_v26  ;;  %v9571_v14 = vadd.f32 %v9570_v54, %v9492_v13 }
 0xab5   : > { %v9190_v5 = vpop.f32.mrf.mxu0  ;;  %v9279_v63 = vpop.f32.mrf.mxu1  ;;  %v9643_v51 = vcombine.low %v9539_v62, %v9549_v18  ;;  %v8895_v4 = vrot.slane %v8853_v12, %v10498_v55 }
 0xab6   : > { %v9191_v34 = vadd.f32 %v9190_v5, %v8875_v48  ;;  %v9280_v57 = vadd.f32 %v9279_v63, %v8883_v41  ;;  %v9561_v37 = vadd.f32 %v9560_v61, %v9491_v58  ;;  %v9581_v11 = vadd.f32 %v9580_v27, %v9493_v42  ;;  %v16333_v63 = vld [vmem:[#allocation4_spill] sm:$0xff] }
 0xab7   : > { %v9192_v32 = vpop.f32.mrf.mxu0  ;;  %v9281_v6 = vpop.f32.mrf.mxu1  ;;  %v9642_v5 = vcombine.low %v9519_v15, %v9529_v56  ;;  %v16273_v23 = vsub.s32 %v9648_v29, %v16333_v63 }
 0xab8   : > { %v9502_v36 = vmax.f32 %v9191_v34, 0.0  ;;  %v9504_v0 = vmax.f32 %v9280_v57, 0.0  ;;  %v9193_v19 = vadd.f32 %v9192_v32, %v8879_v10  ;;  %v9282_v28 = vadd.f32 %v9281_v6, %v8887_v45 }
 0xab9   : > { %v9652_v25 = vrot.slane %v9642_v5, %v16273_v23  ;;  %v9659_v60 = vrot.slane %v9643_v51, %v16273_v23 }
 0xaba   : > { %v9552_v50 = vsel %vm6776_vm4, %v9502_v36, 0.0  ;;  %v9572_v8 = vsel %vm6776_vm4, %v9504_v0, 0.0  ;;  %v9503_v48 = vmax.f32 %v9193_v19, 0.0  ;;  %v9505_v41 = vmax.f32 %v9282_v28, 0.0 }
 0xabb   : > { %v9553_v33 = vadd.f32 %v9552_v50, %v9551_v47  ;;  %v9573_v30 = vadd.f32 %v9572_v8, %v9571_v14  ;;  %v9674_v0 = vcombine.low %v9652_v25, %v9659_v60 }
 0xabc   : > { %v9562_v20 = vsel %vm6776_vm4, %v9503_v48, 0.0  ;;  %v9582_v10 = vsel %vm6776_vm4, %v9505_v41, 0.0 }
 0xabd   : > { %v9554_v45 = vrot.slane %v9553_v33, 4  ;;  %v9574_v52 = vrot.slane %v9573_v30, 4  ;;  %v9563_v22 = vadd.f32 %v9562_v20, %v9561_v37  ;;  %v9583_v17 = vadd.f32 %v9582_v10, %v9581_v11 }
 0xabe   : > { %v9682_v27 = vrot.slane %v9674_v0, %v16273_v23  ;;  %v8891_v10 = vrot.slane %v8853_v12, %v10492_v53 }
 0xabf   : > { %v9555_v39 = vadd.f32 %v9554_v45, %v9553_v33  ;;  %v9575_v46 = vadd.f32 %v9574_v52, %v9573_v30  ;;  %v9564_v24 = vrot.slane %v9563_v22, 4  ;;  %v9584_v16 = vrot.slane %v9583_v17, 4 }
 0xac1   : > { %v9556_v35 = vrot.slane %v9555_v39, 2  ;;  %v9576_v21 = vrot.slane %v9575_v46, 2  ;;  %v9565_v44 = vadd.f32 %v9564_v24, %v9563_v22  ;;  %v9585_v49 = vadd.f32 %v9584_v16, %v9583_v17 }
 0xac3   : > { %v9557_v9 = vadd.f32 %v9556_v35, %v9555_v39  ;;  %v9577_v2 = vadd.f32 %v9576_v21, %v9575_v46  ;;  %v9566_v26 = vrot.slane %v9565_v44, 2  ;;  %v9586_v13 = vrot.slane %v9585_v49, 2 }
 0xac5   : > { %v9558_v3 = vrot.slane %v9557_v9, 1  ;;  %v9578_v43 = vrot.slane %v9577_v2, 1  ;;  %v9567_v7 = vadd.f32 %v9566_v26, %v9565_v44  ;;  %v9587_v34 = vadd.f32 %v9586_v13, %v9585_v49 }
 0xac6   : > { %v8899_v26 = vrot.slane %v8853_v12, %v11400_v59 }
 0xac7   : > { %v9568_v57 = vrot.slane %v9567_v7, 1  ;;  %v9588_v31 = vrot.slane %v9587_v34, 1  ;;  %v9559_v54 = vadd.f32 %v9558_v3, %v9557_v9  ;;  %v9579_v58 = vadd.f32 %v9578_v43, %v9577_v2 }
 0xac8   : > { %v8903_v3 = vrot.slane %v8853_v12, %v11101_v1 }
 0xac9   : > { %v9569_v42 = vadd.f32 %v9568_v57, %v9567_v7  ;;  %v9589_v32 = vadd.f32 %v9588_v31, %v9587_v34 }
 0xacb   : > { %v9644_v6 = vcombine.low %v9559_v54, %v9569_v42  ;;  %v9645_v36 = vcombine.low %v9579_v58, %v9589_v32 }
 0xacd   : > { %v9666_v19 = vrot.slane %v9644_v6, %v16273_v23  ;;  %v9673_v28 = vrot.slane %v9645_v36, %v16273_v23 }
 0xacf   : > { %v9675_v61 = vcombine.low %v9666_v19, %v9673_v28 }
 0xad1   : > { %v9689_v47 = vrot.slane %v9675_v61, %v16273_v23 }
 0xad3   : > { %v9690_v14 = vcombine.low %v9682_v27, %v9689_v47 }
 0xad5   : > { %9717 = vst [vmem:[%s16285_s13] sm:$0xff] %v9690_v14 }
 0xadb   : > { %v9350_v50 = vpop.f32.mrf.mxu0 }
 0xadc   : > { %v9445_v30 = vpop.f32.mrf.mxu1  ;;  %v9351_v46 = vadd.f32 %v9350_v50, %v8891_v10 }
 0xadd   : > { %v9352_v8 = vpop.f32.mrf.mxu0  ;;  %v9446_v7 = vadd.f32 %v9445_v30, %v8899_v26 }
 0xade   : > { %v9447_v45 = vpop.f32.mrf.mxu1  ;;  %v9353_v17 = vadd.f32 %v9352_v8, %v8895_v4  ;;  %v9470_v55 = vmax.f32 %v9351_v46, 0.0 }
 0xadf   : > { %v9448_v31 = vadd.f32 %v9447_v45, %v8903_v3  ;;  %v9484_v32 = vmax.f32 %v9446_v7, 0.0 }
 0xae0   : > { %v9356_v48 = vpop.f32.mrf.mxu0  ;;  %v9471_v18 = vmax.f32 %v9353_v17, 0.0 }
 0xae1   : > { %v9357_v40 = vadd.f32 %v9356_v48, %v8891_v10  ;;  %v9451_v24 = vpop.f32.mrf.mxu1  ;;  %v9485_v61 = vmax.f32 %v9448_v31, 0.0 }
 0xae2   : > { %v9358_v41 = vpop.f32.mrf.mxu0  ;;  %v9452_v54 = vadd.f32 %v9451_v24, %v8899_v26 }
 0xae3   : > { %v9359_v52 = vadd.f32 %v9358_v41, %v8895_v4  ;;  %v9482_v35 = vmax.f32 %v9357_v40, 0.0  ;;  %v9453_v15 = vpop.f32.mrf.mxu1 }
 0xae4   : > { %v9454_v36 = vadd.f32 %v9453_v15, %v8903_v3  ;;  %v9496_v1 = vmax.f32 %v9452_v54, 0.0 }
 0xae5   : > { %v9362_v37 = vpop.f32.mrf.mxu0  ;;  %v9483_v16 = vmax.f32 %v9359_v52, 0.0  ;;  %v9590_v9 = vadd.f32 %v9482_v35, %v9470_v55 }
 0xae6   : > { %v9363_v56 = vadd.f32 %v9362_v37, %v8891_v10  ;;  %v9457_v63 = vpop.f32.mrf.mxu1  ;;  %v9497_v48 = vmax.f32 %v9454_v36, 0.0 }
 0xae7   : > { %v9364_v11 = vpop.f32.mrf.mxu0  ;;  %v9600_v49 = vadd.f32 %v9483_v16, %v9471_v18  ;;  %v9458_v25 = vadd.f32 %v9457_v63, %v8899_v26 }
 0xae8   : > { %v9365_v38 = vadd.f32 %v9364_v11, %v8895_v4  ;;  %v9494_v53 = vmax.f32 %v9363_v56, 0.0  ;;  %v9459_v34 = vpop.f32.mrf.mxu1 }
 0xae9   : > { %v9460_v6 = vadd.f32 %v9459_v34, %v8903_v3  ;;  %v9508_v27 = vmax.f32 %v9458_v25, 0.0 }
 0xaea   : > { %v9368_v33 = vpop.f32.mrf.mxu0  ;;  %v9495_v21 = vmax.f32 %v9365_v38, 0.0  ;;  %v9591_v5 = vadd.f32 %v9590_v9, %v9494_v53 }
 0xaeb   : > { %v9369_v39 = vadd.f32 %v9368_v33, %v8891_v10  ;;  %v9509_v8 = vmax.f32 %v9460_v6, 0.0  ;;  %v9612_v33 = vsel %vm6776_vm4, %v9508_v27, 0.0 }
 0xaec   : > { %v9370_v20 = vpop.f32.mrf.mxu0  ;;  %v9601_v2 = vadd.f32 %v9600_v49, %v9495_v21 }
 0xaed   : > { %v9371_v22 = vadd.f32 %v9370_v20, %v8895_v4  ;;  %v9506_v44 = vmax.f32 %v9369_v39, 0.0  ;;  %v9622_v20 = vsel %vm6776_vm4, %v9509_v8, 0.0 }
 0xaef   : > { %v9507_v29 = vmax.f32 %v9371_v22, 0.0  ;;  %v9592_v13 = vsel %vm6776_vm4, %v9506_v44, 0.0 }
 0xaf0   : > { %v9593_v43 = vadd.f32 %v9592_v13, %v9591_v5 }
 0xaf1   : > { %v9602_v62 = vsel %vm6776_vm4, %v9507_v29, 0.0 }
 0xaf2   : > { %v9603_v51 = vadd.f32 %v9602_v62, %v9601_v2  ;;  %v9594_v58 = vrot.slane %v9593_v43, 4 }
 0xaf4   : > { %v9604_v57 = vrot.slane %v9603_v51, 4  ;;  %v9595_v47 = vadd.f32 %v9594_v58, %v9593_v43 }
 0xaf6   : > { %v9605_v0 = vadd.f32 %v9604_v57, %v9603_v51  ;;  %v9596_v30 = vrot.slane %v9595_v47, 2 }
 0xaf8   : > { %v9606_v41 = vrot.slane %v9605_v0, 2  ;;  %v9597_v22 = vadd.f32 %v9596_v30, %v9595_v47 }
 0xafa   : > { %v9607_v10 = vadd.f32 %v9606_v41, %v9605_v0  ;;  %v9598_v24 = vrot.slane %v9597_v22, 1 }
 0xafc   : > { %v9608_v38 = vrot.slane %v9607_v10, 1  ;;  %v9599_v21 = vadd.f32 %v9598_v24, %v9597_v22 }
 0xafe   : > { %v9609_v29 = vadd.f32 %v9608_v38, %v9607_v10 }
 0xb00   : > { %v9691_v55 = vcombine.low %v9599_v21, %v9609_v29 }
 0xb02   : > { %v9699_v62 = vrot.slane %v9691_v55, %v16273_v23 }
 0xb0e   : > { %v9439_v60 = vpop.f32.mrf.mxu0 }
 0xb0f   : > { %v9440_v42 = vadd.f32 %v9439_v60, %v8899_v26  ;;  %v16334_v26 = vlaneseq }
 0xb10   : > { %v9441_v59 = vpop.f32.mrf.mxu0 }
 0xb11   : > { %v9472_v19 = vmax.f32 %v9440_v42, 0.0  ;;  %v9442_v28 = vadd.f32 %v9441_v59, %v8903_v3  ;;  %vm9720_vm7 = vcmp.lt.s32.totalorder %v16334_v26, 512 }
 0xb13   : > { %v9610_v14 = vadd.f32 %v9484_v32, %v9472_v19  ;;  %v9473_v50 = vmax.f32 %v9442_v28, 0.0 }
 0xb15   : > { %v9611_v37 = vadd.f32 %v9610_v14, %v9496_v1  ;;  %v9620_v11 = vadd.f32 %v9485_v61, %v9473_v50 }
 0xb17   : > { %v9613_v12 = vadd.f32 %v9612_v33, %v9611_v37  ;;  %v9621_v4 = vadd.f32 %v9620_v11, %v9497_v48 }
 0xb19   : > { %v9614_v45 = vrot.slane %v9613_v12, 4  ;;  %v9623_v52 = vadd.f32 %v9622_v20, %v9621_v4 }
 0xb1b   : > { %v9615_v17 = vadd.f32 %v9614_v45, %v9613_v12  ;;  %v9624_v40 = vrot.slane %v9623_v52, 4 }
 0xb1d   : > { %v9616_v39 = vrot.slane %v9615_v17, 2  ;;  %v9625_v46 = vadd.f32 %v9624_v40, %v9623_v52 }
 0xb1f   : > { %v9617_v16 = vadd.f32 %v9616_v39, %v9615_v17  ;;  %v9626_v56 = vrot.slane %v9625_v46, 2 }
 0xb21   : > { %v9618_v18 = vrot.slane %v9617_v16, 1  ;;  %v9627_v35 = vadd.f32 %v9626_v56, %v9625_v46 }
 0xb23   : > { %v9628_v44 = vrot.slane %v9627_v35, 1  ;;  %v9619_v49 = vadd.f32 %v9618_v18, %v9617_v16 }
 0xb25   : > { %v9629_v15 = vadd.f32 %v9628_v44, %v9627_v35 }
 0xb27   : > { %v9692_v53 = vcombine.low %v9619_v49, %v9629_v15 }
 0xb29   : > { %v9706_v9 = vrot.slane %v9692_v53, %v16273_v23 }
 0xb2b   : > { %v9707_v2 = vcombine.low %v9699_v62, %v9706_v9 }
 0xb2d   : > { %v9714_v13 = vrot.slane %v9707_v2, %v16273_v23 }
 0xb2f   : > { %9722 = vst.msk [vmem:[%s16285_s13 + $0x8] sm:$0xf] %vm9720_vm7, %v9714_v13 }
 0xb30 PF: > { %s22_s15 = sadd.s32 1, %s10264_s15  }
 0xb31   : > { %p19_p4 = scmp.ge.s32.totalorder %s22_s15, 50  }
 0xb33   :  { %21 = sbr.rel (!%p19_p4) target bundleno = 2 (0x2), region = 98 }

</bundles_post_ra>
